<compile_context>
chip_gen: v6e
topology: v6e:2x2x1
jax: 0.10.0
libtpu: 0.0.40
codegen_flags: <defaults>
</compile_context>

<pallas_src>
import functools
import numpy as np
import jax
import jax.numpy as jnp
from jax.experimental import pallas as pl
from jax.experimental.pallas import tpu as pltpu


def _round_up(x, m):
    return (x + m - 1) // m * m


# ----------------------------- Pallas kernels ------------------------------

def _matmul_affine_kernel(x_ref, w_ref, s_ref, b_ref, m_ref, o_ref, acc_ref):
    """out = blend(relu_mask, relu(acc*scale+bias), acc*scale+bias); acc over K grid axis."""
    @pl.when(pl.program_id(1) == 0)
    def _():
        acc_ref[...] = jnp.zeros_like(acc_ref)

    acc_ref[...] += jnp.dot(x_ref[...], w_ref[...],
                            preferred_element_type=jnp.float32)

    @pl.when(pl.program_id(1) == pl.num_programs(1) - 1)
    def _():
        y = acc_ref[...] * s_ref[...] + b_ref[...]
        m = m_ref[...]                       # per-column 0/1 relu mask
        o_ref[...] = m * jnp.maximum(y, 0.0) + (1.0 - m) * y


def matmul_affine(x, w, scale, bias, relu, *, tm=256, tk=1024):
    """relu-masked (x @ w) * scale + bias, bf16 operands / f32 accumulation.

    Grid: (M tiles: parallel, K tiles: arbitrary reduction with VMEM f32 acc).
    `relu` is either a bool (all columns) or a per-column 0/1 mask of shape (N,).
    """
    M, K = x.shape
    N = w.shape[1]

    if isinstance(relu, (bool, int)):
        mask = jnp.full((1, N), 1.0 if relu else 0.0, jnp.float32)
    else:
        mask = jnp.asarray(relu, jnp.float32).reshape(1, N)

    xb = x.astype(jnp.bfloat16)
    wb = w.astype(jnp.bfloat16)

    # ---- M tiling (no padding needed when a single tile covers M) ----
    if M <= tm:
        nm, tm_eff, Mp = 1, M, M
    else:
        nm, tm_eff = pl.cdiv(M, tm), tm
        Mp = nm * tm
        xb = jnp.pad(xb, ((0, Mp - M), (0, 0)))

    # ---- K tiling (128-aligned lane blocks; zero padding is exact for the dot) ----
    if K <= tk:
        nk, tk_eff, Kp = 1, K, K
    else:
        nk = pl.cdiv(K, tk)
        tk_eff = _round_up(pl.cdiv(K, nk), 128)
        Kp = nk * tk_eff
        xb = jnp.pad(xb, ((0, 0), (0, Kp - K)))
        wb = jnp.pad(wb, ((0, Kp - K), (0, 0)))

    cost = pl.CostEstimate(flops=2 * Mp * Kp * N, transcendentals=0,
                           bytes_accessed=Mp * Kp * 2 + Kp * N * 2 + Mp * N * 4)

    out = pl.pallas_call(
        _matmul_affine_kernel,
        out_shape=jax.ShapeDtypeStruct((Mp, N), jnp.float32),
        grid=(nm, nk),
        in_specs=[
            pl.BlockSpec((tm_eff, tk_eff), lambda i, k: (i, k)),
            pl.BlockSpec((tk_eff, N), lambda i, k: (k, 0)),
            pl.BlockSpec((1, N), lambda i, k: (0, 0)),
            pl.BlockSpec((1, N), lambda i, k: (0, 0)),
            pl.BlockSpec((1, N), lambda i, k: (0, 0)),
        ],
        out_specs=pl.BlockSpec((tm_eff, N), lambda i, k: (i, 0)),
        scratch_shapes=[pltpu.VMEM((tm_eff, N), jnp.float32)],
        compiler_params=pltpu.CompilerParams(
            dimension_semantics=("parallel", "arbitrary")),
        cost_estimate=cost,
    )(xb, wb,
      scale.reshape(1, N).astype(jnp.float32),
      bias.reshape(1, N).astype(jnp.float32),
      mask)
    return out[:M] if Mp != M else out


def _maxpool_kernel(He, We, x_ref, o_ref):
    """3x3 / stride 2 / pad 1 max pool.

    x_ref: (B, He+2, We+2, 1, C) zero-padded input (post-ReLU, so 0-pad == -inf pad).
    o_ref: (B, He//2, We//2, 1, C).
    The dummy size-1 sublane dim keeps H and W on leading dims so all slicing /
    stride-2 subsampling is pure leading-dim re-indexing (no lane/sublane moves).
    """
    x = x_ref[...]
    B, C = x.shape[0], x.shape[-1]
    Ho, Wo = He // 2, We // 2
    # 3-wide max along W at every padded-W start 0..We-1
    cm = jnp.maximum(jnp.maximum(x[:, :, 0:We], x[:, :, 1:We + 1]), x[:, :, 2:We + 2])
    # stride-2 subsample along W (leading-dim reshape + index)
    cm = cm.reshape(B, He + 2, Wo, 2, 1, C)[:, :, :, 0]
    # 3-wide max along H at every padded-H start 0..He-1
    rm = jnp.maximum(jnp.maximum(cm[:, 0:He], cm[:, 1:He + 1]), cm[:, 2:He + 2])
    # stride-2 subsample along H
    o_ref[...] = rm.reshape(B, Ho, 2, Wo, 1, C)[:, :, 0]


def maxpool_3x3_s2_p1(x):
    B, H, W, C = x.shape
    He, We = H + (H % 2), W + (W % 2)     # extra trailing zero row/col for odd sizes (safe post-ReLU)
    Ho, Wo = He // 2, We // 2
    xp = jnp.pad(x, ((0, 0), (1, 1 + He - H), (1, 1 + We - W), (0, 0)))
    xp = xp.reshape(B, He + 2, We + 2, 1, C)
    vmem = pl.BlockSpec(memory_space=pltpu.MemorySpace.VMEM)
    y = pl.pallas_call(
        functools.partial(_maxpool_kernel, He, We),
        out_shape=jax.ShapeDtypeStruct((B, Ho, Wo, 1, C), jnp.float32),
        in_specs=[vmem],
        out_specs=vmem,
    )(xp)
    return y.reshape(B, Ho, Wo, C)


def _head_kernel(inv_hw, x_ref, w1_ref, s1_ref, b1_ref, w2_ref, s2_ref, b2_ref, o_ref):
    """Fused GAP + (Linear+BN1d+ReLU) x 2."""
    g = jnp.sum(x_ref[...], axis=1) * inv_hw                                 # (B, C)
    h = jnp.dot(g.astype(jnp.bfloat16), w1_ref[...],
                preferred_element_type=jnp.float32)
    h = jnp.maximum(h * s1_ref[...] + b1_ref[...], 0.0)
    h = jnp.dot(h.astype(jnp.bfloat16), w2_ref[...],
                preferred_element_type=jnp.float32)
    o_ref[...] = jnp.maximum(h * s2_ref[...] + b2_ref[...], 0.0)


def gap_fc_head(x, w1, s1, b1, w2, s2, b2):
    B, H, W, C = x.shape
    N1, N2 = w1.shape[1], w2.shape[1]
    xr = x.reshape(B, H * W, C)
    vmem = pl.BlockSpec(memory_space=pltpu.MemorySpace.VMEM)
    return pl.pallas_call(
        functools.partial(_head_kernel, 1.0 / (H * W)),
        out_shape=jax.ShapeDtypeStruct((B, N2), jnp.float32),
        in_specs=[vmem] * 7,
        out_specs=vmem,
    )(xr,
      w1.astype(jnp.bfloat16), s1.reshape(1, N1), b1.reshape(1, N1),
      w2.astype(jnp.bfloat16), s2.reshape(1, N2), b2.reshape(1, N2))


# ----------------------------- glue (plain JAX) ----------------------------

def im2col(x, k, stride, pad):
    """x: (B,H,W,C) NHWC -> (B*Ho*Wo, k*k*C) patches, (ky,kx,c) ordering."""
    B, H, W, C = x.shape
    if pad:
        x = jnp.pad(x, ((0, 0), (pad, pad), (pad, pad), (0, 0)))
    Ho = (H + 2 * pad - k) // stride + 1
    Wo = (W + 2 * pad - k) // stride + 1
    cols = []
    for ky in range(k):
        for kx in range(k):
            cols.append(x[:, ky:ky + (Ho - 1) * stride + 1:stride,
                          kx:kx + (Wo - 1) * stride + 1:stride, :])
    patches = jnp.stack(cols, axis=3)                  # (B, Ho, Wo, k*k, C)
    return patches.reshape(B * Ho * Wo, k * k * C), (B, Ho, Wo)


def conv_bn_relu(x, w, k, stride, pad, scale, bias, relu):
    patches, (B, Ho, Wo) = im2col(x, k, stride, pad)
    y = matmul_affine(patches, w, scale, bias, relu)
    return y.reshape(B, Ho, Wo, w.shape[1])


# ----------------------------- parameters ----------------------------------

def conv_weight4(key, cin, cout, k):
    # PyTorch weight (Cout,Cin,k,k) kept as (k,k,Cin,Cout) for embedding / reshape
    fan_in = cin * k * k
    return jax.random.normal(key, (k, k, cin, cout), jnp.float32) / np.sqrt(fan_in)


def linear_weight(key, cin, cout):
    return jax.random.normal(key, (cin, cout), jnp.float32) / np.sqrt(cin)


def bn_affine(key, c, eps=1e-5):
    # eval-mode BN folded to per-channel scale/bias
    k1, k2, k3, k4 = jax.random.split(key, 4)
    gamma = 1.0 + 0.1 * jax.random.normal(k1, (c,), jnp.float32)
    beta = 0.1 * jax.random.normal(k2, (c,), jnp.float32)
    mean = 0.1 * jax.random.normal(k3, (c,), jnp.float32)
    var = jax.random.uniform(k4, (c,), jnp.float32, minval=0.5, maxval=1.5)
    scale = gamma / jnp.sqrt(var + eps)
    bias = beta - mean * scale
    return scale, bias


def _embed_center_9x9(w):
    # zero-embed a (k,k,Cin,Cout) kernel at the center of a 9x9 kernel
    k = w.shape[0]
    off = (9 - k) // 2
    w9 = jnp.zeros((9, 9, w.shape[2], w.shape[3]), w.dtype)
    return w9.at[off:off + k, off:off + k, :, :].set(w)


def init_params(key, in_channel):
    keys = iter(jax.random.split(key, 32))
    p = {}
    # Inception_blockV1: 4 branch convs (k=3/5/7/9, 16 ch each) fused into one
    # 9x9 conv with pad 4 (small kernels zero-embedded, centered).
    branch = [conv_weight4(next(keys), in_channel, 16, k) for k in (3, 5, 7, 9)]
    w9 = jnp.concatenate([_embed_center_9x9(w) for w in branch], axis=-1)   # (9,9,Cin,64)
    p['v1_w'] = w9.reshape(81 * in_channel, 64)
    p['v1_bn'] = bn_affine(next(keys), 64)
    # Inception_blockV2(64, 32): 3 stride-2 1x1 convs fused into one (64,96) matmul
    p['v2_c1x1'] = jnp.concatenate(
        [conv_weight4(next(keys), 64, 32, 1).reshape(64, 32) for _ in range(3)], axis=1)
    p['v2_c2b'] = conv_weight4(next(keys), 32, 32, 3).reshape(9 * 32, 32)
    p['v2_c3b'] = conv_weight4(next(keys), 32, 32, 5).reshape(25 * 32, 32)
    p['v2_c4'] = conv_weight4(next(keys), 64, 32, 5).reshape(25 * 64, 32)
    p['v2_bn'] = bn_affine(next(keys), 128)
    # Basic blocks
    p['bb1_w'] = conv_weight4(next(keys), 128, 256, 3).reshape(9 * 128, 256)
    p['bb1_bn'] = bn_affine(next(keys), 256)
    p['bb2_w'] = conv_weight4(next(keys), 256, 512, 3).reshape(9 * 256, 512)
    p['bb2_bn'] = bn_affine(next(keys), 512)
    # Embedding layer
    p['fc1_w'] = linear_weight(next(keys), 512, 256)
    p['fc1_bn'] = bn_affine(next(keys), 256)
    p['fc2_w'] = linear_weight(next(keys), 256, 128)
    p['fc2_bn'] = bn_affine(next(keys), 128)
    return p


# ----------------------------- forward --------------------------------------

def inception_forward(x_nchw, p):
    x = jnp.transpose(x_nchw, (0, 2, 3, 1)).astype(jnp.float32)   # NCHW -> NHWC

    # ---- Inception_blockV1: fused 4-branch conv -> BN+ReLU (in epilogue) -> maxpool
    s64, b64 = p['v1_bn']
    x = conv_bn_relu(x, p['v1_w'], 9, 1, 4, s64, b64, True)       # (B,16,16,64)
    x = maxpool_3x3_s2_p1(x)                                      # (B, 8, 8,64)

    # ---- Inception_blockV2
    s128, b128 = p['v2_bn']
    one32 = jnp.ones((32,), jnp.float32)
    zero32 = jnp.zeros((32,), jnp.float32)
    # fused stride-2 1x1 convs: branch1 gets its BN slice + ReLU, the two
    # intermediate 1x1s (conv2[0], conv3[0]) get identity affine and no ReLU.
    scale96 = jnp.concatenate([s128[0:32], one32, one32])
    bias96 = jnp.concatenate([b128[0:32], zero32, zero32])
    mask96 = jnp.concatenate([one32, zero32, zero32])
    y = conv_bn_relu(x, p['v2_c1x1'], 1, 2, 0, scale96, bias96, mask96)   # (B,4,4,96)
    o1 = y[..., 0:32]
    o2 = conv_bn_relu(y[..., 32:64], p['v2_c2b'], 3, 1, 1,
                      s128[32:64], b128[32:64], True)
    o3 = conv_bn_relu(y[..., 64:96], p['v2_c3b'], 5, 1, 2,
                      s128[64:96], b128[64:96], True)
    t4 = maxpool_3x3_s2_p1(x)
    o4 = conv_bn_relu(t4, p['v2_c4'], 5, 1, 2, s128[96:128], b128[96:128], True)
    x = jnp.concatenate([o1, o2, o3, o4], axis=-1)                # (B,4,4,128)
    x = maxpool_3x3_s2_p1(x)                                      # (B,2,2,128)

    # ---- Basic blocks
    x = conv_bn_relu(x, p['bb1_w'], 3, 1, 1, p['bb1_bn'][0], p['bb1_bn'][1], True)
    x = maxpool_3x3_s2_p1(x)                                      # (B,1,1,256)
    x = conv_bn_relu(x, p['bb2_w'], 3, 1, 1, p['bb2_bn'][0], p['bb2_bn'][1], True)
    x = maxpool_3x3_s2_p1(x)                                      # (B,1,1,512)

    # ---- Fused GAP + Embedding layer (Linear+BN1d+ReLU twice); norm = Identity
    x = gap_fc_head(x, p['fc1_w'], p['fc1_bn'][0], p['fc1_bn'][1],
                    p['fc2_w'], p['fc2_bn'][0], p['fc2_bn'][1])   # (B,128)
    return x


if __name__ == "__main__":
    key = jax.random.PRNGKey(0)
    kx, kp = jax.random.split(key)
    in_channel = 4
    x = jax.random.normal(kx, (2, in_channel, 16, 16), jnp.float32)   # NCHW like PyTorch
    params = init_params(kp, in_channel)

    fwd = jax.jit(inception_forward)
    out = fwd(x, params)
    jax.block_until_ready(out)

    assert out.shape == (2, 128), out.shape
    assert out.dtype == jnp.float32
    print("KERNEL_OK")
</pallas_src>

<mosaic_0001>
module attributes {stable_mosaic.version = 11 : i64} {
  func.func @_matmul_affine_kernel(%arg0: i32, %arg1: i32, %arg2: memref<256x324xbf16, #tpu.memory_space<vmem>>, %arg3: memref<324x64xbf16, #tpu.memory_space<vmem>>, %arg4: memref<1x64xf32, #tpu.memory_space<vmem>>, %arg5: memref<1x64xf32, #tpu.memory_space<vmem>>, %arg6: memref<1x64xf32, #tpu.memory_space<vmem>>, %arg7: memref<256x64xf32, #tpu.memory_space<vmem>>, %arg8: memref<256x64xf32, #tpu.memory_space<vmem>>) attributes {dimension_semantics = [#tpu.dimension_semantics<parallel>, #tpu.dimension_semantics<arbitrary>], iteration_bounds = array<i64: 2, 1>, scalar_prefetch = 0 : i64, scratch_operands = 1 : i64, tpu.core_type = #tpu.core_type<tc>, window_params = [{transform_indices = @transform_0, window_bounds = array<i64: 256, 324>}, {transform_indices = @transform_1, window_bounds = array<i64: 324, 64>}, {pipeline_mode = #tpu.pipeline_mode<synchronous>, transform_indices = @transform_2, window_bounds = array<i64: 1, 64>}, {pipeline_mode = #tpu.pipeline_mode<synchronous>, transform_indices = @transform_3, window_bounds = array<i64: 1, 64>}, {pipeline_mode = #tpu.pipeline_mode<synchronous>, transform_indices = @transform_4, window_bounds = array<i64: 1, 64>}, {transform_indices = @transform_5, window_bounds = array<i64: 256, 64>}]} {
    %c0_i32 = arith.constant 0 : i32
    %0 = arith.cmpi eq, %arg1, %c0_i32 : i32
    %1 = arith.extui %0 : i1 to i32
    %c0_i32_0 = arith.constant 0 : i32
    %2 = arith.cmpi ne, %1, %c0_i32_0 : i32
    scf.if %2 {
      %cst_10 = arith.constant 0.000000e+00 : f32
      %12 = vector.broadcast %cst_10 : f32 to vector<256x64xf32>
      %c0_11 = arith.constant 0 : index
      %c0_12 = arith.constant 0 : index
      %13 = vector.load %arg8[%c0_11, %c0_12] : memref<256x64xf32, #tpu.memory_space<vmem>>, vector<256x64xf32>
      tpu.vector_store %arg8[%c0_11, %c0_12], %12 {strides = array<i32>} : memref<256x64xf32, #tpu.memory_space<vmem>>, vector<256x64xf32>,
    } else {
    }
    %c0 = arith.constant 0 : index
    %c0_1 = arith.constant 0 : index
    %3 = vector.load %arg8[%c0, %c0_1] : memref<256x64xf32, #tpu.memory_space<vmem>>, vector<256x64xf32>
    %c0_2 = arith.constant 0 : index
    %c0_3 = arith.constant 0 : index
    %4 = vector.load %arg2[%c0_2, %c0_3] : memref<256x324xbf16, #tpu.memory_space<vmem>>, vector<256x324xbf16>
    %c0_4 = arith.constant 0 : index
    %c0_5 = arith.constant 0 : index
    %5 = vector.load %arg3[%c0_4, %c0_5] : memref<324x64xbf16, #tpu.memory_space<vmem>>, vector<324x64xbf16>
    %cst = arith.constant dense<0.000000e+00> : vector<256x64xf32>
    %6 = tpu.matmul %4, %5, %cst {dimension_numbers = #tpu.dot_dimension_numbers<[1], [0], [0], [1], [0, 0, 1, 1], [], []>} : vector<256x324xbf16>, vector<324x64xbf16>, vector<256x64xf32> -> vector<256x64xf32>
    %7 = arith.addf %3, %6 : vector<256x64xf32>
    %c0_6 = arith.constant 0 : index
    %c0_7 = arith.constant 0 : index
    %8 = vector.load %arg8[%c0_6, %c0_7] : memref<256x64xf32, #tpu.memory_space<vmem>>, vector<256x64xf32>
    tpu.vector_store %arg8[%c0_6, %c0_7], %7 {strides = array<i32>} : memref<256x64xf32, #tpu.memory_space<vmem>>, vector<256x64xf32>,
    %c0_i32_8 = arith.constant 0 : i32
    %9 = arith.cmpi eq, %arg1, %c0_i32_8 : i32
    %10 = arith.extui %9 : i1 to i32
    %c0_i32_9 = arith.constant 0 : i32
    %11 = arith.cmpi ne, %10, %c0_i32_9 : i32
    scf.if %11 {
      %c0_10 = arith.constant 0 : index
      %c0_11 = arith.constant 0 : index
      %12 = vector.load %arg8[%c0_10, %c0_11] : memref<256x64xf32, #tpu.memory_space<vmem>>, vector<256x64xf32>
      %c0_12 = arith.constant 0 : index
      %c0_13 = arith.constant 0 : index
      %13 = vector.load %arg4[%c0_12, %c0_13] : memref<1x64xf32, #tpu.memory_space<vmem>>, vector<1x64xf32>
      %14 = vector.broadcast %13 : vector<1x64xf32> to vector<256x64xf32>
      %15 = arith.mulf %12, %14 : vector<256x64xf32>
      %c0_14 = arith.constant 0 : index
      %c0_15 = arith.constant 0 : index
      %16 = vector.load %arg5[%c0_14, %c0_15] : memref<1x64xf32, #tpu.memory_space<vmem>>, vector<1x64xf32>
      %17 = vector.broadcast %16 : vector<1x64xf32> to vector<256x64xf32>
      %18 = arith.addf %15, %17 : vector<256x64xf32>
      %c0_16 = arith.constant 0 : index
      %c0_17 = arith.constant 0 : index
      %19 = vector.load %arg6[%c0_16, %c0_17] : memref<1x64xf32, #tpu.memory_space<vmem>>, vector<1x64xf32>
      %cst_18 = arith.constant 0.000000e+00 : f32
      %20 = vector.broadcast %cst_18 : f32 to vector<256x64xf32>
      %21 = arith.maximumf %18, %20 : vector<256x64xf32>
      %22 = vector.broadcast %19 : vector<1x64xf32> to vector<256x64xf32>
      %23 = arith.mulf %22, %21 : vector<256x64xf32>
      %cst_19 = arith.constant 1.000000e+00 : f32
      %24 = vector.broadcast %cst_19 : f32 to vector<1x64xf32>
      %25 = arith.subf %24, %19 : vector<1x64xf32>
      %26 = vector.broadcast %25 : vector<1x64xf32> to vector<256x64xf32>
      %27 = arith.mulf %26, %18 : vector<256x64xf32>
      %28 = arith.addf %23, %27 : vector<256x64xf32>
      %c0_20 = arith.constant 0 : index
      %c0_21 = arith.constant 0 : index
      %29 = vector.load %arg7[%c0_20, %c0_21] : memref<256x64xf32, #tpu.memory_space<vmem>>, vector<256x64xf32>
      tpu.vector_store %arg7[%c0_20, %c0_21], %28 {strides = array<i32>} : memref<256x64xf32, #tpu.memory_space<vmem>>, vector<256x64xf32>,
    } else {
    }
    return
  }
  func.func @transform_0(%arg0: i32, %arg1: i32) -> (i32, i32) {
    %c0_i32 = arith.constant 0 : i32
    return %arg0, %arg1 : i32, i32
  }
  func.func @transform_1(%arg0: i32, %arg1: i32) -> (i32, i32) {
    %c0_i32 = arith.constant 0 : i32
    %c0_i32_0 = arith.constant 0 : i32
    return %arg1, %c0_i32 : i32, i32
  }
  func.func @transform_2(%arg0: i32, %arg1: i32) -> (i32, i32) {
    %c0_i32 = arith.constant 0 : i32
    %c0_i32_0 = arith.constant 0 : i32
    %c0_i32_1 = arith.constant 0 : i32
    return %c0_i32, %c0_i32_0 : i32, i32
  }
  func.func @transform_3(%arg0: i32, %arg1: i32) -> (i32, i32) {
    %c0_i32 = arith.constant 0 : i32
    %c0_i32_0 = arith.constant 0 : i32
    %c0_i32_1 = arith.constant 0 : i32
    return %c0_i32, %c0_i32_0 : i32, i32
  }
  func.func @transform_4(%arg0: i32, %arg1: i32) -> (i32, i32) {
    %c0_i32 = arith.constant 0 : i32
    %c0_i32_0 = arith.constant 0 : i32
    %c0_i32_1 = arith.constant 0 : i32
    return %c0_i32, %c0_i32_0 : i32, i32
  }
  func.func @transform_5(%arg0: i32, %arg1: i32) -> (i32, i32) {
    %c0_i32 = arith.constant 0 : i32
    %c0_i32_0 = arith.constant 0 : i32
    return %arg0, %c0_i32 : i32, i32
  }
}

module attributes {stable_mosaic.version = 11 : i64} {
  func.func @_maxpool_kernel(%arg0: memref<2x18x18x1x64xf32, #tpu.memory_space<vmem>>, %arg1: memref<2x8x8x1x64xf32, #tpu.memory_space<vmem>>) attributes {dimension_semantics = [], scalar_prefetch = 0 : i64, scratch_operands = 0 : i64, tpu.core_type = #tpu.core_type<tc>} {
    %c0 = arith.constant 0 : index
    %c0_0 = arith.constant 0 : index
    %c0_1 = arith.constant 0 : index
    %c0_2 = arith.constant 0 : index
    %c0_3 = arith.constant 0 : index
    %0 = vector.load %arg0[%c0, %c0_0, %c0_1, %c0_2, %c0_3] : memref<2x18x18x1x64xf32, #tpu.memory_space<vmem>>, vector<2x18x18x1x64xf32>
    %1 = vector.extract_strided_slice %0 {offsets = [0, 0, 0, 0, 0], sizes = [2, 18, 16, 1, 64], strides = [1, 1, 1, 1, 1]} : vector<2x18x18x1x64xf32> to vector<2x18x16x1x64xf32>
    %2 = vector.extract_strided_slice %0 {offsets = [0, 0, 1, 0, 0], sizes = [2, 18, 16, 1, 64], strides = [1, 1, 1, 1, 1]} : vector<2x18x18x1x64xf32> to vector<2x18x16x1x64xf32>
    %3 = arith.maximumf %1, %2 : vector<2x18x16x1x64xf32>
    %4 = vector.extract_strided_slice %0 {offsets = [0, 0, 2, 0, 0], sizes = [2, 18, 16, 1, 64], strides = [1, 1, 1, 1, 1]} : vector<2x18x18x1x64xf32> to vector<2x18x16x1x64xf32>
    %5 = arith.maximumf %3, %4 : vector<2x18x16x1x64xf32>
    %6 = vector.shape_cast %5 : vector<2x18x16x1x64xf32> to vector<2x18x8x2x1x64xf32>
    %7 = vector.extract_strided_slice %6 {offsets = [0, 0, 0, 0, 0, 0], sizes = [2, 18, 8, 1, 1, 64], strides = [1, 1, 1, 1, 1, 1]} : vector<2x18x8x2x1x64xf32> to vector<2x18x8x1x1x64xf32>
    %8 = vector.shape_cast %7 : vector<2x18x8x1x1x64xf32> to vector<2x18x8x1x64xf32>
    %9 = vector.extract_strided_slice %8 {offsets = [0, 0, 0, 0, 0], sizes = [2, 16, 8, 1, 64], strides = [1, 1, 1, 1, 1]} : vector<2x18x8x1x64xf32> to vector<2x16x8x1x64xf32>
    %10 = vector.extract_strided_slice %8 {offsets = [0, 1, 0, 0, 0], sizes = [2, 16, 8, 1, 64], strides = [1, 1, 1, 1, 1]} : vector<2x18x8x1x64xf32> to vector<2x16x8x1x64xf32>
    %11 = arith.maximumf %9, %10 : vector<2x16x8x1x64xf32>
    %12 = vector.extract_strided_slice %8 {offsets = [0, 2, 0, 0, 0], sizes = [2, 16, 8, 1, 64], strides = [1, 1, 1, 1, 1]} : vector<2x18x8x1x64xf32> to vector<2x16x8x1x64xf32>
    %13 = arith.maximumf %11, %12 : vector<2x16x8x1x64xf32>
    %14 = vector.shape_cast %13 : vector<2x16x8x1x64xf32> to vector<2x8x2x8x1x64xf32>
    %15 = vector.extract_strided_slice %14 {offsets = [0, 0, 0, 0, 0, 0], sizes = [2, 8, 1, 8, 1, 64], strides = [1, 1, 1, 1, 1, 1]} : vector<2x8x2x8x1x64xf32> to vector<2x8x1x8x1x64xf32>
    %16 = vector.shape_cast %15 : vector<2x8x1x8x1x64xf32> to vector<2x8x8x1x64xf32>
    %c0_4 = arith.constant 0 : index
    %c0_5 = arith.constant 0 : index
    %c0_6 = arith.constant 0 : index
    %c0_7 = arith.constant 0 : index
    %c0_8 = arith.constant 0 : index
    %17 = vector.load %arg1[%c0_4, %c0_5, %c0_6, %c0_7, %c0_8] : memref<2x8x8x1x64xf32, #tpu.memory_space<vmem>>, vector<2x8x8x1x64xf32>
    tpu.vector_store %arg1[%c0_4, %c0_5, %c0_6, %c0_7, %c0_8], %16 {strides = array<i32>} : memref<2x8x8x1x64xf32, #tpu.memory_space<vmem>>, vector<2x8x8x1x64xf32>,
    return
  }
}

module attributes {stable_mosaic.version = 11 : i64} {
  func.func @_matmul_affine_kernel(%arg0: i32, %arg1: i32, %arg2: memref<32x64xbf16, #tpu.memory_space<vmem>>, %arg3: memref<64x96xbf16, #tpu.memory_space<vmem>>, %arg4: memref<1x96xf32, #tpu.memory_space<vmem>>, %arg5: memref<1x96xf32, #tpu.memory_space<vmem>>, %arg6: memref<1x96xf32, #tpu.memory_space<vmem>>, %arg7: memref<32x96xf32, #tpu.memory_space<vmem>>, %arg8: memref<32x96xf32, #tpu.memory_space<vmem>>) attributes {dimension_semantics = [#tpu.dimension_semantics<parallel>, #tpu.dimension_semantics<arbitrary>], iteration_bounds = array<i64: 1, 1>, scalar_prefetch = 0 : i64, scratch_operands = 1 : i64, tpu.core_type = #tpu.core_type<tc>, window_params = [{transform_indices = @transform_0, window_bounds = array<i64: 32, 64>}, {transform_indices = @transform_1, window_bounds = array<i64: 64, 96>}, {pipeline_mode = #tpu.pipeline_mode<synchronous>, transform_indices = @transform_2, window_bounds = array<i64: 1, 96>}, {pipeline_mode = #tpu.pipeline_mode<synchronous>, transform_indices = @transform_3, window_bounds = array<i64: 1, 96>}, {pipeline_mode = #tpu.pipeline_mode<synchronous>, transform_indices = @transform_4, window_bounds = array<i64: 1, 96>}, {transform_indices = @transform_5, window_bounds = array<i64: 32, 96>}]} {
    %c0_i32 = arith.constant 0 : i32
    %0 = arith.cmpi eq, %arg1, %c0_i32 : i32
    %1 = arith.extui %0 : i1 to i32
    %c0_i32_0 = arith.constant 0 : i32
    %2 = arith.cmpi ne, %1, %c0_i32_0 : i32
    scf.if %2 {
      %cst_10 = arith.constant 0.000000e+00 : f32
      %12 = vector.broadcast %cst_10 : f32 to vector<32x96xf32>
      %c0_11 = arith.constant 0 : index
      %c0_12 = arith.constant 0 : index
      %13 = vector.load %arg8[%c0_11, %c0_12] : memref<32x96xf32, #tpu.memory_space<vmem>>, vector<32x96xf32>
      tpu.vector_store %arg8[%c0_11, %c0_12], %12 {strides = array<i32>} : memref<32x96xf32, #tpu.memory_space<vmem>>, vector<32x96xf32>,
    } else {
    }
    %c0 = arith.constant 0 : index
    %c0_1 = arith.constant 0 : index
    %3 = vector.load %arg8[%c0, %c0_1] : memref<32x96xf32, #tpu.memory_space<vmem>>, vector<32x96xf32>
    %c0_2 = arith.constant 0 : index
    %c0_3 = arith.constant 0 : index
    %4 = vector.load %arg2[%c0_2, %c0_3] : memref<32x64xbf16, #tpu.memory_space<vmem>>, vector<32x64xbf16>
    %c0_4 = arith.constant 0 : index
    %c0_5 = arith.constant 0 : index
    %5 = vector.load %arg3[%c0_4, %c0_5] : memref<64x96xbf16, #tpu.memory_space<vmem>>, vector<64x96xbf16>
    %cst = arith.constant dense<0.000000e+00> : vector<32x96xf32>
    %6 = tpu.matmul %4, %5, %cst {dimension_numbers = #tpu.dot_dimension_numbers<[1], [0], [0], [1], [0, 0, 1, 1], [], []>} : vector<32x64xbf16>, vector<64x96xbf16>, vector<32x96xf32> -> vector<32x96xf32>
    %7 = arith.addf %3, %6 : vector<32x96xf32>
    %c0_6 = arith.constant 0 : index
    %c0_7 = arith.constant 0 : index
    %8 = vector.load %arg8[%c0_6, %c0_7] : memref<32x96xf32, #tpu.memory_space<vmem>>, vector<32x96xf32>
    tpu.vector_store %arg8[%c0_6, %c0_7], %7 {strides = array<i32>} : memref<32x96xf32, #tpu.memory_space<vmem>>, vector<32x96xf32>,
    %c0_i32_8 = arith.constant 0 : i32
    %9 = arith.cmpi eq, %arg1, %c0_i32_8 : i32
    %10 = arith.extui %9 : i1 to i32
    %c0_i32_9 = arith.constant 0 : i32
    %11 = arith.cmpi ne, %10, %c0_i32_9 : i32
    scf.if %11 {
      %c0_10 = arith.constant 0 : index
      %c0_11 = arith.constant 0 : index
      %12 = vector.load %arg8[%c0_10, %c0_11] : memref<32x96xf32, #tpu.memory_space<vmem>>, vector<32x96xf32>
      %c0_12 = arith.constant 0 : index
      %c0_13 = arith.constant 0 : index
      %13 = vector.load %arg4[%c0_12, %c0_13] : memref<1x96xf32, #tpu.memory_space<vmem>>, vector<1x96xf32>
      %14 = vector.broadcast %13 : vector<1x96xf32> to vector<32x96xf32>
      %15 = arith.mulf %12, %14 : vector<32x96xf32>
      %c0_14 = arith.constant 0 : index
      %c0_15 = arith.constant 0 : index
      %16 = vector.load %arg5[%c0_14, %c0_15] : memref<1x96xf32, #tpu.memory_space<vmem>>, vector<1x96xf32>
      %17 = vector.broadcast %16 : vector<1x96xf32> to vector<32x96xf32>
      %18 = arith.addf %15, %17 : vector<32x96xf32>
      %c0_16 = arith.constant 0 : index
      %c0_17 = arith.constant 0 : index
      %19 = vector.load %arg6[%c0_16, %c0_17] : memref<1x96xf32, #tpu.memory_space<vmem>>, vector<1x96xf32>
      %cst_18 = arith.constant 0.000000e+00 : f32
      %20 = vector.broadcast %cst_18 : f32 to vector<32x96xf32>
      %21 = arith.maximumf %18, %20 : vector<32x96xf32>
      %22 = vector.broadcast %19 : vector<1x96xf32> to vector<32x96xf32>
      %23 = arith.mulf %22, %21 : vector<32x96xf32>
      %cst_19 = arith.constant 1.000000e+00 : f32
      %24 = vector.broadcast %cst_19 : f32 to vector<1x96xf32>
      %25 = arith.subf %24, %19 : vector<1x96xf32>
      %26 = vector.broadcast %25 : vector<1x96xf32> to vector<32x96xf32>
      %27 = arith.mulf %26, %18 : vector<32x96xf32>
      %28 = arith.addf %23, %27 : vector<32x96xf32>
      %c0_20 = arith.constant 0 : index
      %c0_21 = arith.constant 0 : index
      %29 = vector.load %arg7[%c0_20, %c0_21] : memref<32x96xf32, #tpu.memory_space<vmem>>, vector<32x96xf32>
      tpu.vector_store %arg7[%c0_20, %c0_21], %28 {strides = array<i32>} : memref<32x96xf32, #tpu.memory_space<vmem>>, vector<32x96xf32>,
    } else {
    }
    return
  }
  func.func @transform_0(%arg0: i32, %arg1: i32) -> (i32, i32) {
    %c0_i32 = arith.constant 0 : i32
    return %arg0, %arg1 : i32, i32
  }
  func.func @transform_1(%arg0: i32, %arg1: i32) -> (i32, i32) {
    %c0_i32 = arith.constant 0 : i32
    %c0_i32_0 = arith.constant 0 : i32
    return %arg1, %c0_i32 : i32, i32
  }
  func.func @transform_2(%arg0: i32, %arg1: i32) -> (i32, i32) {
    %c0_i32 = arith.constant 0 : i32
    %c0_i32_0 = arith.constant 0 : i32
    %c0_i32_1 = arith.constant 0 : i32
    return %c0_i32, %c0_i32_0 : i32, i32
  }
  func.func @transform_3(%arg0: i32, %arg1: i32) -> (i32, i32) {
    %c0_i32 = arith.constant 0 : i32
    %c0_i32_0 = arith.constant 0 : i32
    %c0_i32_1 = arith.constant 0 : i32
    return %c0_i32, %c0_i32_0 : i32, i32
  }
  func.func @transform_4(%arg0: i32, %arg1: i32) -> (i32, i32) {
    %c0_i32 = arith.constant 0 : i32
    %c0_i32_0 = arith.constant 0 : i32
    %c0_i32_1 = arith.constant 0 : i32
    return %c0_i32, %c0_i32_0 : i32, i32
  }
  func.func @transform_5(%arg0: i32, %arg1: i32) -> (i32, i32) {
    %c0_i32 = arith.constant 0 : i32
    %c0_i32_0 = arith.constant 0 : i32
    return %arg0, %c0_i32 : i32, i32
  }
}

module attributes {stable_mosaic.version = 11 : i64} {
  func.func @_matmul_affine_kernel(%arg0: i32, %arg1: i32, %arg2: memref<32x288xbf16, #tpu.memory_space<vmem>>, %arg3: memref<288x32xbf16, #tpu.memory_space<vmem>>, %arg4: memref<1x32xf32, #tpu.memory_space<vmem>>, %arg5: memref<1x32xf32, #tpu.memory_space<vmem>>, %arg6: memref<1x32xf32, #tpu.memory_space<vmem>>, %arg7: memref<32x32xf32, #tpu.memory_space<vmem>>, %arg8: memref<32x32xf32, #tpu.memory_space<vmem>>) attributes {dimension_semantics = [#tpu.dimension_semantics<parallel>, #tpu.dimension_semantics<arbitrary>], iteration_bounds = array<i64: 1, 1>, scalar_prefetch = 0 : i64, scratch_operands = 1 : i64, tpu.core_type = #tpu.core_type<tc>, window_params = [{transform_indices = @transform_0, window_bounds = array<i64: 32, 288>}, {transform_indices = @transform_1, window_bounds = array<i64: 288, 32>}, {pipeline_mode = #tpu.pipeline_mode<synchronous>, transform_indices = @transform_2, window_bounds = array<i64: 1, 32>}, {pipeline_mode = #tpu.pipeline_mode<synchronous>, transform_indices = @transform_3, window_bounds = array<i64: 1, 32>}, {pipeline_mode = #tpu.pipeline_mode<synchronous>, transform_indices = @transform_4, window_bounds = array<i64: 1, 32>}, {transform_indices = @transform_5, window_bounds = array<i64: 32, 32>}]} {
    %c0_i32 = arith.constant 0 : i32
    %0 = arith.cmpi eq, %arg1, %c0_i32 : i32
    %1 = arith.extui %0 : i1 to i32
    %c0_i32_0 = arith.constant 0 : i32
    %2 = arith.cmpi ne, %1, %c0_i32_0 : i32
    scf.if %2 {
      %cst_10 = arith.constant 0.000000e+00 : f32
      %12 = vector.broadcast %cst_10 : f32 to vector<32x32xf32>
      %c0_11 = arith.constant 0 : index
      %c0_12 = arith.constant 0 : index
      %13 = vector.load %arg8[%c0_11, %c0_12] : memref<32x32xf32, #tpu.memory_space<vmem>>, vector<32x32xf32>
      tpu.vector_store %arg8[%c0_11, %c0_12], %12 {strides = array<i32>} : memref<32x32xf32, #tpu.memory_space<vmem>>, vector<32x32xf32>,
    } else {
    }
    %c0 = arith.constant 0 : index
    %c0_1 = arith.constant 0 : index
    %3 = vector.load %arg8[%c0, %c0_1] : memref<32x32xf32, #tpu.memory_space<vmem>>, vector<32x32xf32>
    %c0_2 = arith.constant 0 : index
    %c0_3 = arith.constant 0 : index
    %4 = vector.load %arg2[%c0_2, %c0_3] : memref<32x288xbf16, #tpu.memory_space<vmem>>, vector<32x288xbf16>
    %c0_4 = arith.constant 0 : index
    %c0_5 = arith.constant 0 : index
    %5 = vector.load %arg3[%c0_4, %c0_5] : memref<288x32xbf16, #tpu.memory_space<vmem>>, vector<288x32xbf16>
    %cst = arith.constant dense<0.000000e+00> : vector<32x32xf32>
    %6 = tpu.matmul %4, %5, %cst {dimension_numbers = #tpu.dot_dimension_numbers<[1], [0], [0], [1], [0, 0, 1, 1], [], []>} : vector<32x288xbf16>, vector<288x32xbf16>, vector<32x32xf32> -> vector<32x32xf32>
    %7 = arith.addf %3, %6 : vector<32x32xf32>
    %c0_6 = arith.constant 0 : index
    %c0_7 = arith.constant 0 : index
    %8 = vector.load %arg8[%c0_6, %c0_7] : memref<32x32xf32, #tpu.memory_space<vmem>>, vector<32x32xf32>
    tpu.vector_store %arg8[%c0_6, %c0_7], %7 {strides = array<i32>} : memref<32x32xf32, #tpu.memory_space<vmem>>, vector<32x32xf32>,
    %c0_i32_8 = arith.constant 0 : i32
    %9 = arith.cmpi eq, %arg1, %c0_i32_8 : i32
    %10 = arith.extui %9 : i1 to i32
    %c0_i32_9 = arith.constant 0 : i32
    %11 = arith.cmpi ne, %10, %c0_i32_9 : i32
    scf.if %11 {
      %c0_10 = arith.constant 0 : index
      %c0_11 = arith.constant 0 : index
      %12 = vector.load %arg8[%c0_10, %c0_11] : memref<32x32xf32, #tpu.memory_space<vmem>>, vector<32x32xf32>
      %c0_12 = arith.constant 0 : index
      %c0_13 = arith.constant 0 : index
      %13 = vector.load %arg4[%c0_12, %c0_13] : memref<1x32xf32, #tpu.memory_space<vmem>>, vector<1x32xf32>
      %14 = vector.broadcast %13 : vector<1x32xf32> to vector<32x32xf32>
      %15 = arith.mulf %12, %14 : vector<32x32xf32>
      %c0_14 = arith.constant 0 : index
      %c0_15 = arith.constant 0 : index
      %16 = vector.load %arg5[%c0_14, %c0_15] : memref<1x32xf32, #tpu.memory_space<vmem>>, vector<1x32xf32>
      %17 = vector.broadcast %16 : vector<1x32xf32> to vector<32x32xf32>
      %18 = arith.addf %15, %17 : vector<32x32xf32>
      %c0_16 = arith.constant 0 : index
      %c0_17 = arith.constant 0 : index
      %19 = vector.load %arg6[%c0_16, %c0_17] : memref<1x32xf32, #tpu.memory_space<vmem>>, vector<1x32xf32>
      %cst_18 = arith.constant 0.000000e+00 : f32
      %20 = vector.broadcast %cst_18 : f32 to vector<32x32xf32>
      %21 = arith.maximumf %18, %20 : vector<32x32xf32>
      %22 = vector.broadcast %19 : vector<1x32xf32> to vector<32x32xf32>
      %23 = arith.mulf %22, %21 : vector<32x32xf32>
      %cst_19 = arith.constant 1.000000e+00 : f32
      %24 = vector.broadcast %cst_19 : f32 to vector<1x32xf32>
      %25 = arith.subf %24, %19 : vector<1x32xf32>
      %26 = vector.broadcast %25 : vector<1x32xf32> to vector<32x32xf32>
      %27 = arith.mulf %26, %18 : vector<32x32xf32>
      %28 = arith.addf %23, %27 : vector<32x32xf32>
      %c0_20 = arith.constant 0 : index
      %c0_21 = arith.constant 0 : index
      %29 = vector.load %arg7[%c0_20, %c0_21] : memref<32x32xf32, #tpu.memory_space<vmem>>, vector<32x32xf32>
      tpu.vector_store %arg7[%c0_20, %c0_21], %28 {strides = array<i32>} : memref<32x32xf32, #tpu.memory_space<vmem>>, vector<32x32xf32>,
    } else {
    }
    return
  }
  func.func @transform_0(%arg0: i32, %arg1: i32) -> (i32, i32) {
    %c0_i32 = arith.constant 0 : i32
    return %arg0, %arg1 : i32, i32
  }
  func.func @transform_1(%arg0: i32, %arg1: i32) -> (i32, i32) {
    %c0_i32 = arith.constant 0 : i32
    %c0_i32_0 = arith.constant 0 : i32
    return %arg1, %c0_i32 : i32, i32
  }
  func.func @transform_2(%arg0: i32, %arg1: i32) -> (i32, i32) {
    %c0_i32 = arith.constant 0 : i32
    %c0_i32_0 = arith.constant 0 : i32
    %c0_i32_1 = arith.constant 0 : i32
    return %c0_i32, %c0_i32_0 : i32, i32
  }
  func.func @transform_3(%arg0: i32, %arg1: i32) -> (i32, i32) {
    %c0_i32 = arith.constant 0 : i32
    %c0_i32_0 = arith.constant 0 : i32
    %c0_i32_1 = arith.constant 0 : i32
    return %c0_i32, %c0_i32_0 : i32, i32
  }
  func.func @transform_4(%arg0: i32, %arg1: i32) -> (i32, i32) {
    %c0_i32 = arith.constant 0 : i32
    %c0_i32_0 = arith.constant 0 : i32
    %c0_i32_1 = arith.constant 0 : i32
    return %c0_i32, %c0_i32_0 : i32, i32
  }
  func.func @transform_5(%arg0: i32, %arg1: i32) -> (i32, i32) {
    %c0_i32 = arith.constant 0 : i32
    %c0_i32_0 = arith.constant 0 : i32
    return %arg0, %c0_i32 : i32, i32
  }
}

module attributes {stable_mosaic.version = 11 : i64} {
  func.func @_matmul_affine_kernel(%arg0: i32, %arg1: i32, %arg2: memref<32x800xbf16, #tpu.memory_space<vmem>>, %arg3: memref<800x32xbf16, #tpu.memory_space<vmem>>, %arg4: memref<1x32xf32, #tpu.memory_space<vmem>>, %arg5: memref<1x32xf32, #tpu.memory_space<vmem>>, %arg6: memref<1x32xf32, #tpu.memory_space<vmem>>, %arg7: memref<32x32xf32, #tpu.memory_space<vmem>>, %arg8: memref<32x32xf32, #tpu.memory_space<vmem>>) attributes {dimension_semantics = [#tpu.dimension_semantics<parallel>, #tpu.dimension_semantics<arbitrary>], iteration_bounds = array<i64: 1, 1>, scalar_prefetch = 0 : i64, scratch_operands = 1 : i64, tpu.core_type = #tpu.core_type<tc>, window_params = [{transform_indices = @transform_0, window_bounds = array<i64: 32, 800>}, {transform_indices = @transform_1, window_bounds = array<i64: 800, 32>}, {pipeline_mode = #tpu.pipeline_mode<synchronous>, transform_indices = @transform_2, window_bounds = array<i64: 1, 32>}, {pipeline_mode = #tpu.pipeline_mode<synchronous>, transform_indices = @transform_3, window_bounds = array<i64: 1, 32>}, {pipeline_mode = #tpu.pipeline_mode<synchronous>, transform_indices = @transform_4, window_bounds = array<i64: 1, 32>}, {transform_indices = @transform_5, window_bounds = array<i64: 32, 32>}]} {
    %c0_i32 = arith.constant 0 : i32
    %0 = arith.cmpi eq, %arg1, %c0_i32 : i32
    %1 = arith.extui %0 : i1 to i32
    %c0_i32_0 = arith.constant 0 : i32
    %2 = arith.cmpi ne, %1, %c0_i32_0 : i32
    scf.if %2 {
      %cst_10 = arith.constant 0.000000e+00 : f32
      %12 = vector.broadcast %cst_10 : f32 to vector<32x32xf32>
      %c0_11 = arith.constant 0 : index
      %c0_12 = arith.constant 0 : index
      %13 = vector.load %arg8[%c0_11, %c0_12] : memref<32x32xf32, #tpu.memory_space<vmem>>, vector<32x32xf32>
      tpu.vector_store %arg8[%c0_11, %c0_12], %12 {strides = array<i32>} : memref<32x32xf32, #tpu.memory_space<vmem>>, vector<32x32xf32>,
    } else {
    }
    %c0 = arith.constant 0 : index
    %c0_1 = arith.constant 0 : index
    %3 = vector.load %arg8[%c0, %c0_1] : memref<32x32xf32, #tpu.memory_space<vmem>>, vector<32x32xf32>
    %c0_2 = arith.constant 0 : index
    %c0_3 = arith.constant 0 : index
    %4 = vector.load %arg2[%c0_2, %c0_3] : memref<32x800xbf16, #tpu.memory_space<vmem>>, vector<32x800xbf16>
    %c0_4 = arith.constant 0 : index
    %c0_5 = arith.constant 0 : index
    %5 = vector.load %arg3[%c0_4, %c0_5] : memref<800x32xbf16, #tpu.memory_space<vmem>>, vector<800x32xbf16>
    %cst = arith.constant dense<0.000000e+00> : vector<32x32xf32>
    %6 = tpu.matmul %4, %5, %cst {dimension_numbers = #tpu.dot_dimension_numbers<[1], [0], [0], [1], [0, 0, 1, 1], [], []>} : vector<32x800xbf16>, vector<800x32xbf16>, vector<32x32xf32> -> vector<32x32xf32>
    %7 = arith.addf %3, %6 : vector<32x32xf32>
    %c0_6 = arith.constant 0 : index
    %c0_7 = arith.constant 0 : index
    %8 = vector.load %arg8[%c0_6, %c0_7] : memref<32x32xf32, #tpu.memory_space<vmem>>, vector<32x32xf32>
    tpu.vector_store %arg8[%c0_6, %c0_7], %7 {strides = array<i32>} : memref<32x32xf32, #tpu.memory_space<vmem>>, vector<32x32xf32>,
    %c0_i32_8 = arith.constant 0 : i32
    %9 = arith.cmpi eq, %arg1, %c0_i32_8 : i32
    %10 = arith.extui %9 : i1 to i32
    %c0_i32_9 = arith.constant 0 : i32
    %11 = arith.cmpi ne, %10, %c0_i32_9 : i32
    scf.if %11 {
      %c0_10 = arith.constant 0 : index
      %c0_11 = arith.constant 0 : index
      %12 = vector.load %arg8[%c0_10, %c0_11] : memref<32x32xf32, #tpu.memory_space<vmem>>, vector<32x32xf32>
      %c0_12 = arith.constant 0 : index
      %c0_13 = arith.constant 0 : index
      %13 = vector.load %arg4[%c0_12, %c0_13] : memref<1x32xf32, #tpu.memory_space<vmem>>, vector<1x32xf32>
      %14 = vector.broadcast %13 : vector<1x32xf32> to vector<32x32xf32>
      %15 = arith.mulf %12, %14 : vector<32x32xf32>
      %c0_14 = arith.constant 0 : index
      %c0_15 = arith.constant 0 : index
      %16 = vector.load %arg5[%c0_14, %c0_15] : memref<1x32xf32, #tpu.memory_space<vmem>>, vector<1x32xf32>
      %17 = vector.broadcast %16 : vector<1x32xf32> to vector<32x32xf32>
      %18 = arith.addf %15, %17 : vector<32x32xf32>
      %c0_16 = arith.constant 0 : index
      %c0_17 = arith.constant 0 : index
      %19 = vector.load %arg6[%c0_16, %c0_17] : memref<1x32xf32, #tpu.memory_space<vmem>>, vector<1x32xf32>
      %cst_18 = arith.constant 0.000000e+00 : f32
      %20 = vector.broadcast %cst_18 : f32 to vector<32x32xf32>
      %21 = arith.maximumf %18, %20 : vector<32x32xf32>
      %22 = vector.broadcast %19 : vector<1x32xf32> to vector<32x32xf32>
      %23 = arith.mulf %22, %21 : vector<32x32xf32>
      %cst_19 = arith.constant 1.000000e+00 : f32
      %24 = vector.broadcast %cst_19 : f32 to vector<1x32xf32>
      %25 = arith.subf %24, %19 : vector<1x32xf32>
      %26 = vector.broadcast %25 : vector<1x32xf32> to vector<32x32xf32>
      %27 = arith.mulf %26, %18 : vector<32x32xf32>
      %28 = arith.addf %23, %27 : vector<32x32xf32>
      %c0_20 = arith.constant 0 : index
      %c0_21 = arith.constant 0 : index
      %29 = vector.load %arg7[%c0_20, %c0_21] : memref<32x32xf32, #tpu.memory_space<vmem>>, vector<32x32xf32>
      tpu.vector_store %arg7[%c0_20, %c0_21], %28 {strides = array<i32>} : memref<32x32xf32, #tpu.memory_space<vmem>>, vector<32x32xf32>,
    } else {
    }
    return
  }
  func.func @transform_0(%arg0: i32, %arg1: i32) -> (i32, i32) {
    %c0_i32 = arith.constant 0 : i32
    return %arg0, %arg1 : i32, i32
  }
  func.func @transform_1(%arg0: i32, %arg1: i32) -> (i32, i32) {
    %c0_i32 = arith.constant 0 : i32
    %c0_i32_0 = arith.constant 0 : i32
    return %arg1, %c0_i32 : i32, i32
  }
  func.func @transform_2(%arg0: i32, %arg1: i32) -> (i32, i32) {
    %c0_i32 = arith.constant 0 : i32
    %c0_i32_0 = arith.constant 0 : i32
    %c0_i32_1 = arith.constant 0 : i32
    return %c0_i32, %c0_i32_0 : i32, i32
  }
  func.func @transform_3(%arg0: i32, %arg1: i32) -> (i32, i32) {
    %c0_i32 = arith.constant 0 : i32
    %c0_i32_0 = arith.constant 0 : i32
    %c0_i32_1 = arith.constant 0 : i32
    return %c0_i32, %c0_i32_0 : i32, i32
  }
  func.func @transform_4(%arg0: i32, %arg1: i32) -> (i32, i32) {
    %c0_i32 = arith.constant 0 : i32
    %c0_i32_0 = arith.constant 0 : i32
    %c0_i32_1 = arith.constant 0 : i32
    return %c0_i32, %c0_i32_0 : i32, i32
  }
  func.func @transform_5(%arg0: i32, %arg1: i32) -> (i32, i32) {
    %c0_i32 = arith.constant 0 : i32
    %c0_i32_0 = arith.constant 0 : i32
    return %arg0, %c0_i32 : i32, i32
  }
}

module attributes {stable_mosaic.version = 11 : i64} {
  func.func @_maxpool_kernel(%arg0: memref<2x10x10x1x64xf32, #tpu.memory_space<vmem>>, %arg1: memref<2x4x4x1x64xf32, #tpu.memory_space<vmem>>) attributes {dimension_semantics = [], scalar_prefetch = 0 : i64, scratch_operands = 0 : i64, tpu.core_type = #tpu.core_type<tc>} {
    %c0 = arith.constant 0 : index
    %c0_0 = arith.constant 0 : index
    %c0_1 = arith.constant 0 : index
    %c0_2 = arith.constant 0 : index
    %c0_3 = arith.constant 0 : index
    %0 = vector.load %arg0[%c0, %c0_0, %c0_1, %c0_2, %c0_3] : memref<2x10x10x1x64xf32, #tpu.memory_space<vmem>>, vector<2x10x10x1x64xf32>
    %1 = vector.extract_strided_slice %0 {offsets = [0, 0, 0, 0, 0], sizes = [2, 10, 8, 1, 64], strides = [1, 1, 1, 1, 1]} : vector<2x10x10x1x64xf32> to vector<2x10x8x1x64xf32>
    %2 = vector.extract_strided_slice %0 {offsets = [0, 0, 1, 0, 0], sizes = [2, 10, 8, 1, 64], strides = [1, 1, 1, 1, 1]} : vector<2x10x10x1x64xf32> to vector<2x10x8x1x64xf32>
    %3 = arith.maximumf %1, %2 : vector<2x10x8x1x64xf32>
    %4 = vector.extract_strided_slice %0 {offsets = [0, 0, 2, 0, 0], sizes = [2, 10, 8, 1, 64], strides = [1, 1, 1, 1, 1]} : vector<2x10x10x1x64xf32> to vector<2x10x8x1x64xf32>
    %5 = arith.maximumf %3, %4 : vector<2x10x8x1x64xf32>
    %6 = vector.shape_cast %5 : vector<2x10x8x1x64xf32> to vector<2x10x4x2x1x64xf32>
    %7 = vector.extract_strided_slice %6 {offsets = [0, 0, 0, 0, 0, 0], sizes = [2, 10, 4, 1, 1, 64], strides = [1, 1, 1, 1, 1, 1]} : vector<2x10x4x2x1x64xf32> to vector<2x10x4x1x1x64xf32>
    %8 = vector.shape_cast %7 : vector<2x10x4x1x1x64xf32> to vector<2x10x4x1x64xf32>
    %9 = vector.extract_strided_slice %8 {offsets = [0, 0, 0, 0, 0], sizes = [2, 8, 4, 1, 64], strides = [1, 1, 1, 1, 1]} : vector<2x10x4x1x64xf32> to vector<2x8x4x1x64xf32>
    %10 = vector.extract_strided_slice %8 {offsets = [0, 1, 0, 0, 0], sizes = [2, 8, 4, 1, 64], strides = [1, 1, 1, 1, 1]} : vector<2x10x4x1x64xf32> to vector<2x8x4x1x64xf32>
    %11 = arith.maximumf %9, %10 : vector<2x8x4x1x64xf32>
    %12 = vector.extract_strided_slice %8 {offsets = [0, 2, 0, 0, 0], sizes = [2, 8, 4, 1, 64], strides = [1, 1, 1, 1, 1]} : vector<2x10x4x1x64xf32> to vector<2x8x4x1x64xf32>
    %13 = arith.maximumf %11, %12 : vector<2x8x4x1x64xf32>
    %14 = vector.shape_cast %13 : vector<2x8x4x1x64xf32> to vector<2x4x2x4x1x64xf32>
    %15 = vector.extract_strided_slice %14 {offsets = [0, 0, 0, 0, 0, 0], sizes = [2, 4, 1, 4, 1, 64], strides = [1, 1, 1, 1, 1, 1]} : vector<2x4x2x4x1x64xf32> to vector<2x4x1x4x1x64xf32>
    %16 = vector.shape_cast %15 : vector<2x4x1x4x1x64xf32> to vector<2x4x4x1x64xf32>
    %c0_4 = arith.constant 0 : index
    %c0_5 = arith.constant 0 : index
    %c0_6 = arith.constant 0 : index
    %c0_7 = arith.constant 0 : index
    %c0_8 = arith.constant 0 : index
    %17 = vector.load %arg1[%c0_4, %c0_5, %c0_6, %c0_7, %c0_8] : memref<2x4x4x1x64xf32, #tpu.memory_space<vmem>>, vector<2x4x4x1x64xf32>
    tpu.vector_store %arg1[%c0_4, %c0_5, %c0_6, %c0_7, %c0_8], %16 {strides = array<i32>} : memref<2x4x4x1x64xf32, #tpu.memory_space<vmem>>, vector<2x4x4x1x64xf32>,
    return
  }
}

module attributes {stable_mosaic.version = 11 : i64} {
  func.func @_matmul_affine_kernel(%arg0: i32, %arg1: i32, %arg2: memref<32x896xbf16, #tpu.memory_space<vmem>>, %arg3: memref<896x32xbf16, #tpu.memory_space<vmem>>, %arg4: memref<1x32xf32, #tpu.memory_space<vmem>>, %arg5: memref<1x32xf32, #tpu.memory_space<vmem>>, %arg6: memref<1x32xf32, #tpu.memory_space<vmem>>, %arg7: memref<32x32xf32, #tpu.memory_space<vmem>>, %arg8: memref<32x32xf32, #tpu.memory_space<vmem>>) attributes {dimension_semantics = [#tpu.dimension_semantics<parallel>, #tpu.dimension_semantics<arbitrary>], iteration_bounds = array<i64: 1, 2>, scalar_prefetch = 0 : i64, scratch_operands = 1 : i64, tpu.core_type = #tpu.core_type<tc>, window_params = [{transform_indices = @transform_0, window_bounds = array<i64: 32, 896>}, {transform_indices = @transform_1, window_bounds = array<i64: 896, 32>}, {pipeline_mode = #tpu.pipeline_mode<synchronous>, transform_indices = @transform_2, window_bounds = array<i64: 1, 32>}, {pipeline_mode = #tpu.pipeline_mode<synchronous>, transform_indices = @transform_3, window_bounds = array<i64: 1, 32>}, {pipeline_mode = #tpu.pipeline_mode<synchronous>, transform_indices = @transform_4, window_bounds = array<i64: 1, 32>}, {transform_indices = @transform_5, window_bounds = array<i64: 32, 32>}]} {
    %c0_i32 = arith.constant 0 : i32
    %0 = arith.cmpi eq, %arg1, %c0_i32 : i32
    %1 = arith.extui %0 : i1 to i32
    %c0_i32_0 = arith.constant 0 : i32
    %2 = arith.cmpi ne, %1, %c0_i32_0 : i32
    scf.if %2 {
      %cst_9 = arith.constant 0.000000e+00 : f32
      %12 = vector.broadcast %cst_9 : f32 to vector<32x32xf32>
      %c0_10 = arith.constant 0 : index
      %c0_11 = arith.constant 0 : index
      %13 = vector.load %arg8[%c0_10, %c0_11] : memref<32x32xf32, #tpu.memory_space<vmem>>, vector<32x32xf32>
      tpu.vector_store %arg8[%c0_10, %c0_11], %12 {strides = array<i32>} : memref<32x32xf32, #tpu.memory_space<vmem>>, vector<32x32xf32>,
    } else {
    }
    %c0 = arith.constant 0 : index
    %c0_1 = arith.constant 0 : index
    %3 = vector.load %arg8[%c0, %c0_1] : memref<32x32xf32, #tpu.memory_space<vmem>>, vector<32x32xf32>
    %c0_2 = arith.constant 0 : index
    %c0_3 = arith.constant 0 : index
    %4 = vector.load %arg2[%c0_2, %c0_3] : memref<32x896xbf16, #tpu.memory_space<vmem>>, vector<32x896xbf16>
    %c0_4 = arith.constant 0 : index
    %c0_5 = arith.constant 0 : index
    %5 = vector.load %arg3[%c0_4, %c0_5] : memref<896x32xbf16, #tpu.memory_space<vmem>>, vector<896x32xbf16>
    %cst = arith.constant dense<0.000000e+00> : vector<32x32xf32>
    %6 = tpu.matmul %4, %5, %cst {dimension_numbers = #tpu.dot_dimension_numbers<[1], [0], [0], [1], [0, 0, 1, 1], [], []>} : vector<32x896xbf16>, vector<896x32xbf16>, vector<32x32xf32> -> vector<32x32xf32>
    %7 = arith.addf %3, %6 : vector<32x32xf32>
    %c0_6 = arith.constant 0 : index
    %c0_7 = arith.constant 0 : index
    %8 = vector.load %arg8[%c0_6, %c0_7] : memref<32x32xf32, #tpu.memory_space<vmem>>, vector<32x32xf32>
    tpu.vector_store %arg8[%c0_6, %c0_7], %7 {strides = array<i32>} : memref<32x32xf32, #tpu.memory_space<vmem>>, vector<32x32xf32>,
    %c1_i32 = arith.constant 1 : i32
    %9 = arith.cmpi eq, %arg1, %c1_i32 : i32
    %10 = arith.extui %9 : i1 to i32
    %c0_i32_8 = arith.constant 0 : i32
    %11 = arith.cmpi ne, %10, %c0_i32_8 : i32
    scf.if %11 {
      %c0_9 = arith.constant 0 : index
      %c0_10 = arith.constant 0 : index
      %12 = vector.load %arg8[%c0_9, %c0_10] : memref<32x32xf32, #tpu.memory_space<vmem>>, vector<32x32xf32>
      %c0_11 = arith.constant 0 : index
      %c0_12 = arith.constant 0 : index
      %13 = vector.load %arg4[%c0_11, %c0_12] : memref<1x32xf32, #tpu.memory_space<vmem>>, vector<1x32xf32>
      %14 = vector.broadcast %13 : vector<1x32xf32> to vector<32x32xf32>
      %15 = arith.mulf %12, %14 : vector<32x32xf32>
      %c0_13 = arith.constant 0 : index
      %c0_14 = arith.constant 0 : index
      %16 = vector.load %arg5[%c0_13, %c0_14] : memref<1x32xf32, #tpu.memory_space<vmem>>, vector<1x32xf32>
      %17 = vector.broadcast %16 : vector<1x32xf32> to vector<32x32xf32>
      %18 = arith.addf %15, %17 : vector<32x32xf32>
      %c0_15 = arith.constant 0 : index
      %c0_16 = arith.constant 0 : index
      %19 = vector.load %arg6[%c0_15, %c0_16] : memref<1x32xf32, #tpu.memory_space<vmem>>, vector<1x32xf32>
      %cst_17 = arith.constant 0.000000e+00 : f32
      %20 = vector.broadcast %cst_17 : f32 to vector<32x32xf32>
      %21 = arith.maximumf %18, %20 : vector<32x32xf32>
      %22 = vector.broadcast %19 : vector<1x32xf32> to vector<32x32xf32>
      %23 = arith.mulf %22, %21 : vector<32x32xf32>
      %cst_18 = arith.constant 1.000000e+00 : f32
      %24 = vector.broadcast %cst_18 : f32 to vector<1x32xf32>
      %25 = arith.subf %24, %19 : vector<1x32xf32>
      %26 = vector.broadcast %25 : vector<1x32xf32> to vector<32x32xf32>
      %27 = arith.mulf %26, %18 : vector<32x32xf32>
      %28 = arith.addf %23, %27 : vector<32x32xf32>
      %c0_19 = arith.constant 0 : index
      %c0_20 = arith.constant 0 : index
      %29 = vector.load %arg7[%c0_19, %c0_20] : memref<32x32xf32, #tpu.memory_space<vmem>>, vector<32x32xf32>
      tpu.vector_store %arg7[%c0_19, %c0_20], %28 {strides = array<i32>} : memref<32x32xf32, #tpu.memory_space<vmem>>, vector<32x32xf32>,
    } else {
    }
    return
  }
  func.func @transform_0(%arg0: i32, %arg1: i32) -> (i32, i32) {
    %c0_i32 = arith.constant 0 : i32
    return %arg0, %arg1 : i32, i32
  }
  func.func @transform_1(%arg0: i32, %arg1: i32) -> (i32, i32) {
    %c0_i32 = arith.constant 0 : i32
    %c0_i32_0 = arith.constant 0 : i32
    return %arg1, %c0_i32 : i32, i32
  }
  func.func @transform_2(%arg0: i32, %arg1: i32) -> (i32, i32) {
    %c0_i32 = arith.constant 0 : i32
    %c0_i32_0 = arith.constant 0 : i32
    %c0_i32_1 = arith.constant 0 : i32
    return %c0_i32, %c0_i32_0 : i32, i32
  }
  func.func @transform_3(%arg0: i32, %arg1: i32) -> (i32, i32) {
    %c0_i32 = arith.constant 0 : i32
    %c0_i32_0 = arith.constant 0 : i32
    %c0_i32_1 = arith.constant 0 : i32
    return %c0_i32, %c0_i32_0 : i32, i32
  }
  func.func @transform_4(%arg0: i32, %arg1: i32) -> (i32, i32) {
    %c0_i32 = arith.constant 0 : i32
    %c0_i32_0 = arith.constant 0 : i32
    %c0_i32_1 = arith.constant 0 : i32
    return %c0_i32, %c0_i32_0 : i32, i32
  }
  func.func @transform_5(%arg0: i32, %arg1: i32) -> (i32, i32) {
    %c0_i32 = arith.constant 0 : i32
    %c0_i32_0 = arith.constant 0 : i32
    return %arg0, %c0_i32 : i32, i32
  }
}

module attributes {stable_mosaic.version = 11 : i64} {
  func.func @_maxpool_kernel(%arg0: memref<2x6x6x1x128xf32, #tpu.memory_space<vmem>>, %arg1: memref<2x2x2x1x128xf32, #tpu.memory_space<vmem>>) attributes {dimension_semantics = [], scalar_prefetch = 0 : i64, scratch_operands = 0 : i64, tpu.core_type = #tpu.core_type<tc>} {
    %c0 = arith.constant 0 : index
    %c0_0 = arith.constant 0 : index
    %c0_1 = arith.constant 0 : index
    %c0_2 = arith.constant 0 : index
    %c0_3 = arith.constant 0 : index
    %0 = vector.load %arg0[%c0, %c0_0, %c0_1, %c0_2, %c0_3] : memref<2x6x6x1x128xf32, #tpu.memory_space<vmem>>, vector<2x6x6x1x128xf32>
    %1 = vector.extract_strided_slice %0 {offsets = [0, 0, 0, 0, 0], sizes = [2, 6, 4, 1, 128], strides = [1, 1, 1, 1, 1]} : vector<2x6x6x1x128xf32> to vector<2x6x4x1x128xf32>
    %2 = vector.extract_strided_slice %0 {offsets = [0, 0, 1, 0, 0], sizes = [2, 6, 4, 1, 128], strides = [1, 1, 1, 1, 1]} : vector<2x6x6x1x128xf32> to vector<2x6x4x1x128xf32>
    %3 = arith.maximumf %1, %2 : vector<2x6x4x1x128xf32>
    %4 = vector.extract_strided_slice %0 {offsets = [0, 0, 2, 0, 0], sizes = [2, 6, 4, 1, 128], strides = [1, 1, 1, 1, 1]} : vector<2x6x6x1x128xf32> to vector<2x6x4x1x128xf32>
    %5 = arith.maximumf %3, %4 : vector<2x6x4x1x128xf32>
    %6 = vector.shape_cast %5 : vector<2x6x4x1x128xf32> to vector<2x6x2x2x1x128xf32>
    %7 = vector.extract_strided_slice %6 {offsets = [0, 0, 0, 0, 0, 0], sizes = [2, 6, 2, 1, 1, 128], strides = [1, 1, 1, 1, 1, 1]} : vector<2x6x2x2x1x128xf32> to vector<2x6x2x1x1x128xf32>
    %8 = vector.shape_cast %7 : vector<2x6x2x1x1x128xf32> to vector<2x6x2x1x128xf32>
    %9 = vector.extract_strided_slice %8 {offsets = [0, 0, 0, 0, 0], sizes = [2, 4, 2, 1, 128], strides = [1, 1, 1, 1, 1]} : vector<2x6x2x1x128xf32> to vector<2x4x2x1x128xf32>
    %10 = vector.extract_strided_slice %8 {offsets = [0, 1, 0, 0, 0], sizes = [2, 4, 2, 1, 128], strides = [1, 1, 1, 1, 1]} : vector<2x6x2x1x128xf32> to vector<2x4x2x1x128xf32>
    %11 = arith.maximumf %9, %10 : vector<2x4x2x1x128xf32>
    %12 = vector.extract_strided_slice %8 {offsets = [0, 2, 0, 0, 0], sizes = [2, 4, 2, 1, 128], strides = [1, 1, 1, 1, 1]} : vector<2x6x2x1x128xf32> to vector<2x4x2x1x128xf32>
    %13 = arith.maximumf %11, %12 : vector<2x4x2x1x128xf32>
    %14 = vector.shape_cast %13 : vector<2x4x2x1x128xf32> to vector<2x2x2x2x1x128xf32>
    %15 = vector.extract_strided_slice %14 {offsets = [0, 0, 0, 0, 0, 0], sizes = [2, 2, 1, 2, 1, 128], strides = [1, 1, 1, 1, 1, 1]} : vector<2x2x2x2x1x128xf32> to vector<2x2x1x2x1x128xf32>
    %16 = vector.shape_cast %15 : vector<2x2x1x2x1x128xf32> to vector<2x2x2x1x128xf32>
    %c0_4 = arith.constant 0 : index
    %c0_5 = arith.constant 0 : index
    %c0_6 = arith.constant 0 : index
    %c0_7 = arith.constant 0 : index
    %c0_8 = arith.constant 0 : index
    %17 = vector.load %arg1[%c0_4, %c0_5, %c0_6, %c0_7, %c0_8] : memref<2x2x2x1x128xf32, #tpu.memory_space<vmem>>, vector<2x2x2x1x128xf32>
    tpu.vector_store %arg1[%c0_4, %c0_5, %c0_6, %c0_7, %c0_8], %16 {strides = array<i32>} : memref<2x2x2x1x128xf32, #tpu.memory_space<vmem>>, vector<2x2x2x1x128xf32>,
    return
  }
}

module attributes {stable_mosaic.version = 11 : i64} {
  func.func @_matmul_affine_kernel(%arg0: i32, %arg1: i32, %arg2: memref<8x640xbf16, #tpu.memory_space<vmem>>, %arg3: memref<640x256xbf16, #tpu.memory_space<vmem>>, %arg4: memref<1x256xf32, #tpu.memory_space<vmem>>, %arg5: memref<1x256xf32, #tpu.memory_space<vmem>>, %arg6: memref<1x256xf32, #tpu.memory_space<vmem>>, %arg7: memref<8x256xf32, #tpu.memory_space<vmem>>, %arg8: memref<8x256xf32, #tpu.memory_space<vmem>>) attributes {dimension_semantics = [#tpu.dimension_semantics<parallel>, #tpu.dimension_semantics<arbitrary>], iteration_bounds = array<i64: 1, 2>, scalar_prefetch = 0 : i64, scratch_operands = 1 : i64, tpu.core_type = #tpu.core_type<tc>, window_params = [{transform_indices = @transform_0, window_bounds = array<i64: 8, 640>}, {transform_indices = @transform_1, window_bounds = array<i64: 640, 256>}, {pipeline_mode = #tpu.pipeline_mode<synchronous>, transform_indices = @transform_2, window_bounds = array<i64: 1, 256>}, {pipeline_mode = #tpu.pipeline_mode<synchronous>, transform_indices = @transform_3, window_bounds = array<i64: 1, 256>}, {pipeline_mode = #tpu.pipeline_mode<synchronous>, transform_indices = @transform_4, window_bounds = array<i64: 1, 256>}, {transform_indices = @transform_5, window_bounds = array<i64: 8, 256>}]} {
    %c0_i32 = arith.constant 0 : i32
    %0 = arith.cmpi eq, %arg1, %c0_i32 : i32
    %1 = arith.extui %0 : i1 to i32
    %c0_i32_0 = arith.constant 0 : i32
    %2 = arith.cmpi ne, %1, %c0_i32_0 : i32
    scf.if %2 {
      %cst_9 = arith.constant 0.000000e+00 : f32
      %12 = vector.broadcast %cst_9 : f32 to vector<8x256xf32>
      %c0_10 = arith.constant 0 : index
      %c0_11 = arith.constant 0 : index
      %13 = vector.load %arg8[%c0_10, %c0_11] : memref<8x256xf32, #tpu.memory_space<vmem>>, vector<8x256xf32>
      tpu.vector_store %arg8[%c0_10, %c0_11], %12 {strides = array<i32>} : memref<8x256xf32, #tpu.memory_space<vmem>>, vector<8x256xf32>,
    } else {
    }
    %c0 = arith.constant 0 : index
    %c0_1 = arith.constant 0 : index
    %3 = vector.load %arg8[%c0, %c0_1] : memref<8x256xf32, #tpu.memory_space<vmem>>, vector<8x256xf32>
    %c0_2 = arith.constant 0 : index
    %c0_3 = arith.constant 0 : index
    %4 = vector.load %arg2[%c0_2, %c0_3] : memref<8x640xbf16, #tpu.memory_space<vmem>>, vector<8x640xbf16>
    %c0_4 = arith.constant 0 : index
    %c0_5 = arith.constant 0 : index
    %5 = vector.load %arg3[%c0_4, %c0_5] : memref<640x256xbf16, #tpu.memory_space<vmem>>, vector<640x256xbf16>
    %cst = arith.constant dense<0.000000e+00> : vector<8x256xf32>
    %6 = tpu.matmul %4, %5, %cst {dimension_numbers = #tpu.dot_dimension_numbers<[1], [0], [0], [1], [0, 0, 1, 1], [], []>} : vector<8x640xbf16>, vector<640x256xbf16>, vector<8x256xf32> -> vector<8x256xf32>
    %7 = arith.addf %3, %6 : vector<8x256xf32>
    %c0_6 = arith.constant 0 : index
    %c0_7 = arith.constant 0 : index
    %8 = vector.load %arg8[%c0_6, %c0_7] : memref<8x256xf32, #tpu.memory_space<vmem>>, vector<8x256xf32>
    tpu.vector_store %arg8[%c0_6, %c0_7], %7 {strides = array<i32>} : memref<8x256xf32, #tpu.memory_space<vmem>>, vector<8x256xf32>,
    %c1_i32 = arith.constant 1 : i32
    %9 = arith.cmpi eq, %arg1, %c1_i32 : i32
    %10 = arith.extui %9 : i1 to i32
    %c0_i32_8 = arith.constant 0 : i32
    %11 = arith.cmpi ne, %10, %c0_i32_8 : i32
    scf.if %11 {
      %c0_9 = arith.constant 0 : index
      %c0_10 = arith.constant 0 : index
      %12 = vector.load %arg8[%c0_9, %c0_10] : memref<8x256xf32, #tpu.memory_space<vmem>>, vector<8x256xf32>
      %c0_11 = arith.constant 0 : index
      %c0_12 = arith.constant 0 : index
      %13 = vector.load %arg4[%c0_11, %c0_12] : memref<1x256xf32, #tpu.memory_space<vmem>>, vector<1x256xf32>
      %14 = vector.broadcast %13 : vector<1x256xf32> to vector<8x256xf32>
      %15 = arith.mulf %12, %14 : vector<8x256xf32>
      %c0_13 = arith.constant 0 : index
      %c0_14 = arith.constant 0 : index
      %16 = vector.load %arg5[%c0_13, %c0_14] : memref<1x256xf32, #tpu.memory_space<vmem>>, vector<1x256xf32>
      %17 = vector.broadcast %16 : vector<1x256xf32> to vector<8x256xf32>
      %18 = arith.addf %15, %17 : vector<8x256xf32>
      %c0_15 = arith.constant 0 : index
      %c0_16 = arith.constant 0 : index
      %19 = vector.load %arg6[%c0_15, %c0_16] : memref<1x256xf32, #tpu.memory_space<vmem>>, vector<1x256xf32>
      %cst_17 = arith.constant 0.000000e+00 : f32
      %20 = vector.broadcast %cst_17 : f32 to vector<8x256xf32>
      %21 = arith.maximumf %18, %20 : vector<8x256xf32>
      %22 = vector.broadcast %19 : vector<1x256xf32> to vector<8x256xf32>
      %23 = arith.mulf %22, %21 : vector<8x256xf32>
      %cst_18 = arith.constant 1.000000e+00 : f32
      %24 = vector.broadcast %cst_18 : f32 to vector<1x256xf32>
      %25 = arith.subf %24, %19 : vector<1x256xf32>
      %26 = vector.broadcast %25 : vector<1x256xf32> to vector<8x256xf32>
      %27 = arith.mulf %26, %18 : vector<8x256xf32>
      %28 = arith.addf %23, %27 : vector<8x256xf32>
      %c0_19 = arith.constant 0 : index
      %c0_20 = arith.constant 0 : index
      %29 = vector.load %arg7[%c0_19, %c0_20] : memref<8x256xf32, #tpu.memory_space<vmem>>, vector<8x256xf32>
      tpu.vector_store %arg7[%c0_19, %c0_20], %28 {strides = array<i32>} : memref<8x256xf32, #tpu.memory_space<vmem>>, vector<8x256xf32>,
    } else {
    }
    return
  }
  func.func @transform_0(%arg0: i32, %arg1: i32) -> (i32, i32) {
    %c0_i32 = arith.constant 0 : i32
    return %arg0, %arg1 : i32, i32
  }
  func.func @transform_1(%arg0: i32, %arg1: i32) -> (i32, i32) {
    %c0_i32 = arith.constant 0 : i32
    %c0_i32_0 = arith.constant 0 : i32
    return %arg1, %c0_i32 : i32, i32
  }
  func.func @transform_2(%arg0: i32, %arg1: i32) -> (i32, i32) {
    %c0_i32 = arith.constant 0 : i32
    %c0_i32_0 = arith.constant 0 : i32
    %c0_i32_1 = arith.constant 0 : i32
    return %c0_i32, %c0_i32_0 : i32, i32
  }
  func.func @transform_3(%arg0: i32, %arg1: i32) -> (i32, i32) {
    %c0_i32 = arith.constant 0 : i32
    %c0_i32_0 = arith.constant 0 : i32
    %c0_i32_1 = arith.constant 0 : i32
    return %c0_i32, %c0_i32_0 : i32, i32
  }
  func.func @transform_4(%arg0: i32, %arg1: i32) -> (i32, i32) {
    %c0_i32 = arith.constant 0 : i32
    %c0_i32_0 = arith.constant 0 : i32
    %c0_i32_1 = arith.constant 0 : i32
    return %c0_i32, %c0_i32_0 : i32, i32
  }
  func.func @transform_5(%arg0: i32, %arg1: i32) -> (i32, i32) {
    %c0_i32 = arith.constant 0 : i32
    %c0_i32_0 = arith.constant 0 : i32
    return %arg0, %c0_i32 : i32, i32
  }
}

module attributes {stable_mosaic.version = 11 : i64} {
  func.func @_maxpool_kernel(%arg0: memref<2x4x4x1x256xf32, #tpu.memory_space<vmem>>, %arg1: memref<2x1x1x1x256xf32, #tpu.memory_space<vmem>>) attributes {dimension_semantics = [], scalar_prefetch = 0 : i64, scratch_operands = 0 : i64, tpu.core_type = #tpu.core_type<tc>} {
    %c0 = arith.constant 0 : index
    %c0_0 = arith.constant 0 : index
    %c0_1 = arith.constant 0 : index
    %c0_2 = arith.constant 0 : index
    %c0_3 = arith.constant 0 : index
    %0 = vector.load %arg0[%c0, %c0_0, %c0_1, %c0_2, %c0_3] : memref<2x4x4x1x256xf32, #tpu.memory_space<vmem>>, vector<2x4x4x1x256xf32>
    %1 = vector.extract_strided_slice %0 {offsets = [0, 0, 0, 0, 0], sizes = [2, 4, 2, 1, 256], strides = [1, 1, 1, 1, 1]} : vector<2x4x4x1x256xf32> to vector<2x4x2x1x256xf32>
    %2 = vector.extract_strided_slice %0 {offsets = [0, 0, 1, 0, 0], sizes = [2, 4, 2, 1, 256], strides = [1, 1, 1, 1, 1]} : vector<2x4x4x1x256xf32> to vector<2x4x2x1x256xf32>
    %3 = arith.maximumf %1, %2 : vector<2x4x2x1x256xf32>
    %4 = vector.extract_strided_slice %0 {offsets = [0, 0, 2, 0, 0], sizes = [2, 4, 2, 1, 256], strides = [1, 1, 1, 1, 1]} : vector<2x4x4x1x256xf32> to vector<2x4x2x1x256xf32>
    %5 = arith.maximumf %3, %4 : vector<2x4x2x1x256xf32>
    %6 = vector.shape_cast %5 : vector<2x4x2x1x256xf32> to vector<2x4x1x2x1x256xf32>
    %7 = vector.extract_strided_slice %6 {offsets = [0, 0, 0, 0, 0, 0], sizes = [2, 4, 1, 1, 1, 256], strides = [1, 1, 1, 1, 1, 1]} : vector<2x4x1x2x1x256xf32> to vector<2x4x1x1x1x256xf32>
    %8 = vector.shape_cast %7 : vector<2x4x1x1x1x256xf32> to vector<2x4x1x1x256xf32>
    %9 = vector.extract_strided_slice %8 {offsets = [0, 0, 0, 0, 0], sizes = [2, 2, 1, 1, 256], strides = [1, 1, 1, 1, 1]} : vector<2x4x1x1x256xf32> to vector<2x2x1x1x256xf32>
    %10 = vector.extract_strided_slice %8 {offsets = [0, 1, 0, 0, 0], sizes = [2, 2, 1, 1, 256], strides = [1, 1, 1, 1, 1]} : vector<2x4x1x1x256xf32> to vector<2x2x1x1x256xf32>
    %11 = arith.maximumf %9, %10 : vector<2x2x1x1x256xf32>
    %12 = vector.extract_strided_slice %8 {offsets = [0, 2, 0, 0, 0], sizes = [2, 2, 1, 1, 256], strides = [1, 1, 1, 1, 1]} : vector<2x4x1x1x256xf32> to vector<2x2x1x1x256xf32>
    %13 = arith.maximumf %11, %12 : vector<2x2x1x1x256xf32>
    %14 = vector.shape_cast %13 : vector<2x2x1x1x256xf32> to vector<2x1x2x1x1x256xf32>
    %15 = vector.extract_strided_slice %14 {offsets = [0, 0, 0, 0, 0, 0], sizes = [2, 1, 1, 1, 1, 256], strides = [1, 1, 1, 1, 1, 1]} : vector<2x1x2x1x1x256xf32> to vector<2x1x1x1x1x256xf32>
    %16 = vector.shape_cast %15 : vector<2x1x1x1x1x256xf32> to vector<2x1x1x1x256xf32>
    %c0_4 = arith.constant 0 : index
    %c0_5 = arith.constant 0 : index
    %c0_6 = arith.constant 0 : index
    %c0_7 = arith.constant 0 : index
    %c0_8 = arith.constant 0 : index
    %17 = vector.load %arg1[%c0_4, %c0_5, %c0_6, %c0_7, %c0_8] : memref<2x1x1x1x256xf32, #tpu.memory_space<vmem>>, vector<2x1x1x1x256xf32>
    tpu.vector_store %arg1[%c0_4, %c0_5, %c0_6, %c0_7, %c0_8], %16 {strides = array<i32>} : memref<2x1x1x1x256xf32, #tpu.memory_space<vmem>>, vector<2x1x1x1x256xf32>,
    return
  }
}

module attributes {stable_mosaic.version = 11 : i64} {
  func.func @_matmul_affine_kernel(%arg0: i32, %arg1: i32, %arg2: memref<2x768xbf16, #tpu.memory_space<vmem>>, %arg3: memref<768x512xbf16, #tpu.memory_space<vmem>>, %arg4: memref<1x512xf32, #tpu.memory_space<vmem>>, %arg5: memref<1x512xf32, #tpu.memory_space<vmem>>, %arg6: memref<1x512xf32, #tpu.memory_space<vmem>>, %arg7: memref<2x512xf32, #tpu.memory_space<vmem>>, %arg8: memref<2x512xf32, #tpu.memory_space<vmem>>) attributes {dimension_semantics = [#tpu.dimension_semantics<parallel>, #tpu.dimension_semantics<arbitrary>], iteration_bounds = array<i64: 1, 3>, scalar_prefetch = 0 : i64, scratch_operands = 1 : i64, tpu.core_type = #tpu.core_type<tc>, window_params = [{transform_indices = @transform_0, window_bounds = array<i64: 2, 768>}, {transform_indices = @transform_1, window_bounds = array<i64: 768, 512>}, {pipeline_mode = #tpu.pipeline_mode<synchronous>, transform_indices = @transform_2, window_bounds = array<i64: 1, 512>}, {pipeline_mode = #tpu.pipeline_mode<synchronous>, transform_indices = @transform_3, window_bounds = array<i64: 1, 512>}, {pipeline_mode = #tpu.pipeline_mode<synchronous>, transform_indices = @transform_4, window_bounds = array<i64: 1, 512>}, {transform_indices = @transform_5, window_bounds = array<i64: 2, 512>}]} {
    %c0_i32 = arith.constant 0 : i32
    %0 = arith.cmpi eq, %arg1, %c0_i32 : i32
    %1 = arith.extui %0 : i1 to i32
    %c0_i32_0 = arith.constant 0 : i32
    %2 = arith.cmpi ne, %1, %c0_i32_0 : i32
    scf.if %2 {
      %cst_9 = arith.constant 0.000000e+00 : f32
      %12 = vector.broadcast %cst_9 : f32 to vector<2x512xf32>
      %c0_10 = arith.constant 0 : index
      %c0_11 = arith.constant 0 : index
      %13 = vector.load %arg8[%c0_10, %c0_11] : memref<2x512xf32, #tpu.memory_space<vmem>>, vector<2x512xf32>
      tpu.vector_store %arg8[%c0_10, %c0_11], %12 {strides = array<i32>} : memref<2x512xf32, #tpu.memory_space<vmem>>, vector<2x512xf32>,
    } else {
    }
    %c0 = arith.constant 0 : index
    %c0_1 = arith.constant 0 : index
    %3 = vector.load %arg8[%c0, %c0_1] : memref<2x512xf32, #tpu.memory_space<vmem>>, vector<2x512xf32>
    %c0_2 = arith.constant 0 : index
    %c0_3 = arith.constant 0 : index
    %4 = vector.load %arg2[%c0_2, %c0_3] : memref<2x768xbf16, #tpu.memory_space<vmem>>, vector<2x768xbf16>
    %c0_4 = arith.constant 0 : index
    %c0_5 = arith.constant 0 : index
    %5 = vector.load %arg3[%c0_4, %c0_5] : memref<768x512xbf16, #tpu.memory_space<vmem>>, vector<768x512xbf16>
    %cst = arith.constant dense<0.000000e+00> : vector<2x512xf32>
    %6 = tpu.matmul %4, %5, %cst {dimension_numbers = #tpu.dot_dimension_numbers<[1], [0], [0], [1], [0, 0, 1, 1], [], []>} : vector<2x768xbf16>, vector<768x512xbf16>, vector<2x512xf32> -> vector<2x512xf32>
    %7 = arith.addf %3, %6 : vector<2x512xf32>
    %c0_6 = arith.constant 0 : index
    %c0_7 = arith.constant 0 : index
    %8 = vector.load %arg8[%c0_6, %c0_7] : memref<2x512xf32, #tpu.memory_space<vmem>>, vector<2x512xf32>
    tpu.vector_store %arg8[%c0_6, %c0_7], %7 {strides = array<i32>} : memref<2x512xf32, #tpu.memory_space<vmem>>, vector<2x512xf32>,
    %c2_i32 = arith.constant 2 : i32
    %9 = arith.cmpi eq, %arg1, %c2_i32 : i32
    %10 = arith.extui %9 : i1 to i32
    %c0_i32_8 = arith.constant 0 : i32
    %11 = arith.cmpi ne, %10, %c0_i32_8 : i32
    scf.if %11 {
      %c0_9 = arith.constant 0 : index
      %c0_10 = arith.constant 0 : index
      %12 = vector.load %arg8[%c0_9, %c0_10] : memref<2x512xf32, #tpu.memory_space<vmem>>, vector<2x512xf32>
      %c0_11 = arith.constant 0 : index
      %c0_12 = arith.constant 0 : index
      %13 = vector.load %arg4[%c0_11, %c0_12] : memref<1x512xf32, #tpu.memory_space<vmem>>, vector<1x512xf32>
      %14 = vector.broadcast %13 : vector<1x512xf32> to vector<2x512xf32>
      %15 = arith.mulf %12, %14 : vector<2x512xf32>
      %c0_13 = arith.constant 0 : index
      %c0_14 = arith.constant 0 : index
      %16 = vector.load %arg5[%c0_13, %c0_14] : memref<1x512xf32, #tpu.memory_space<vmem>>, vector<1x512xf32>
      %17 = vector.broadcast %16 : vector<1x512xf32> to vector<2x512xf32>
      %18 = arith.addf %15, %17 : vector<2x512xf32>
      %c0_15 = arith.constant 0 : index
      %c0_16 = arith.constant 0 : index
      %19 = vector.load %arg6[%c0_15, %c0_16] : memref<1x512xf32, #tpu.memory_space<vmem>>, vector<1x512xf32>
      %cst_17 = arith.constant 0.000000e+00 : f32
      %20 = vector.broadcast %cst_17 : f32 to vector<2x512xf32>
      %21 = arith.maximumf %18, %20 : vector<2x512xf32>
      %22 = vector.broadcast %19 : vector<1x512xf32> to vector<2x512xf32>
      %23 = arith.mulf %22, %21 : vector<2x512xf32>
      %cst_18 = arith.constant 1.000000e+00 : f32
      %24 = vector.broadcast %cst_18 : f32 to vector<1x512xf32>
      %25 = arith.subf %24, %19 : vector<1x512xf32>
      %26 = vector.broadcast %25 : vector<1x512xf32> to vector<2x512xf32>
      %27 = arith.mulf %26, %18 : vector<2x512xf32>
      %28 = arith.addf %23, %27 : vector<2x512xf32>
      %c0_19 = arith.constant 0 : index
      %c0_20 = arith.constant 0 : index
      %29 = vector.load %arg7[%c0_19, %c0_20] : memref<2x512xf32, #tpu.memory_space<vmem>>, vector<2x512xf32>
      tpu.vector_store %arg7[%c0_19, %c0_20], %28 {strides = array<i32>} : memref<2x512xf32, #tpu.memory_space<vmem>>, vector<2x512xf32>,
    } else {
    }
    return
  }
  func.func @transform_0(%arg0: i32, %arg1: i32) -> (i32, i32) {
    %c0_i32 = arith.constant 0 : i32
    return %arg0, %arg1 : i32, i32
  }
  func.func @transform_1(%arg0: i32, %arg1: i32) -> (i32, i32) {
    %c0_i32 = arith.constant 0 : i32
    %c0_i32_0 = arith.constant 0 : i32
    return %arg1, %c0_i32 : i32, i32
  }
  func.func @transform_2(%arg0: i32, %arg1: i32) -> (i32, i32) {
    %c0_i32 = arith.constant 0 : i32
    %c0_i32_0 = arith.constant 0 : i32
    %c0_i32_1 = arith.constant 0 : i32
    return %c0_i32, %c0_i32_0 : i32, i32
  }
  func.func @transform_3(%arg0: i32, %arg1: i32) -> (i32, i32) {
    %c0_i32 = arith.constant 0 : i32
    %c0_i32_0 = arith.constant 0 : i32
    %c0_i32_1 = arith.constant 0 : i32
    return %c0_i32, %c0_i32_0 : i32, i32
  }
  func.func @transform_4(%arg0: i32, %arg1: i32) -> (i32, i32) {
    %c0_i32 = arith.constant 0 : i32
    %c0_i32_0 = arith.constant 0 : i32
    %c0_i32_1 = arith.constant 0 : i32
    return %c0_i32, %c0_i32_0 : i32, i32
  }
  func.func @transform_5(%arg0: i32, %arg1: i32) -> (i32, i32) {
    %c0_i32 = arith.constant 0 : i32
    %c0_i32_0 = arith.constant 0 : i32
    return %arg0, %c0_i32 : i32, i32
  }
}

module attributes {stable_mosaic.version = 11 : i64} {
  func.func @_maxpool_kernel(%arg0: memref<2x4x4x1x512xf32, #tpu.memory_space<vmem>>, %arg1: memref<2x1x1x1x512xf32, #tpu.memory_space<vmem>>) attributes {dimension_semantics = [], scalar_prefetch = 0 : i64, scratch_operands = 0 : i64, tpu.core_type = #tpu.core_type<tc>} {
    %c0 = arith.constant 0 : index
    %c0_0 = arith.constant 0 : index
    %c0_1 = arith.constant 0 : index
    %c0_2 = arith.constant 0 : index
    %c0_3 = arith.constant 0 : index
    %0 = vector.load %arg0[%c0, %c0_0, %c0_1, %c0_2, %c0_3] : memref<2x4x4x1x512xf32, #tpu.memory_space<vmem>>, vector<2x4x4x1x512xf32>
    %1 = vector.extract_strided_slice %0 {offsets = [0, 0, 0, 0, 0], sizes = [2, 4, 2, 1, 512], strides = [1, 1, 1, 1, 1]} : vector<2x4x4x1x512xf32> to vector<2x4x2x1x512xf32>
    %2 = vector.extract_strided_slice %0 {offsets = [0, 0, 1, 0, 0], sizes = [2, 4, 2, 1, 512], strides = [1, 1, 1, 1, 1]} : vector<2x4x4x1x512xf32> to vector<2x4x2x1x512xf32>
    %3 = arith.maximumf %1, %2 : vector<2x4x2x1x512xf32>
    %4 = vector.extract_strided_slice %0 {offsets = [0, 0, 2, 0, 0], sizes = [2, 4, 2, 1, 512], strides = [1, 1, 1, 1, 1]} : vector<2x4x4x1x512xf32> to vector<2x4x2x1x512xf32>
    %5 = arith.maximumf %3, %4 : vector<2x4x2x1x512xf32>
    %6 = vector.shape_cast %5 : vector<2x4x2x1x512xf32> to vector<2x4x1x2x1x512xf32>
    %7 = vector.extract_strided_slice %6 {offsets = [0, 0, 0, 0, 0, 0], sizes = [2, 4, 1, 1, 1, 512], strides = [1, 1, 1, 1, 1, 1]} : vector<2x4x1x2x1x512xf32> to vector<2x4x1x1x1x512xf32>
    %8 = vector.shape_cast %7 : vector<2x4x1x1x1x512xf32> to vector<2x4x1x1x512xf32>
    %9 = vector.extract_strided_slice %8 {offsets = [0, 0, 0, 0, 0], sizes = [2, 2, 1, 1, 512], strides = [1, 1, 1, 1, 1]} : vector<2x4x1x1x512xf32> to vector<2x2x1x1x512xf32>
    %10 = vector.extract_strided_slice %8 {offsets = [0, 1, 0, 0, 0], sizes = [2, 2, 1, 1, 512], strides = [1, 1, 1, 1, 1]} : vector<2x4x1x1x512xf32> to vector<2x2x1x1x512xf32>
    %11 = arith.maximumf %9, %10 : vector<2x2x1x1x512xf32>
    %12 = vector.extract_strided_slice %8 {offsets = [0, 2, 0, 0, 0], sizes = [2, 2, 1, 1, 512], strides = [1, 1, 1, 1, 1]} : vector<2x4x1x1x512xf32> to vector<2x2x1x1x512xf32>
    %13 = arith.maximumf %11, %12 : vector<2x2x1x1x512xf32>
    %14 = vector.shape_cast %13 : vector<2x2x1x1x512xf32> to vector<2x1x2x1x1x512xf32>
    %15 = vector.extract_strided_slice %14 {offsets = [0, 0, 0, 0, 0, 0], sizes = [2, 1, 1, 1, 1, 512], strides = [1, 1, 1, 1, 1, 1]} : vector<2x1x2x1x1x512xf32> to vector<2x1x1x1x1x512xf32>
    %16 = vector.shape_cast %15 : vector<2x1x1x1x1x512xf32> to vector<2x1x1x1x512xf32>
    %c0_4 = arith.constant 0 : index
    %c0_5 = arith.constant 0 : index
    %c0_6 = arith.constant 0 : index
    %c0_7 = arith.constant 0 : index
    %c0_8 = arith.constant 0 : index
    %17 = vector.load %arg1[%c0_4, %c0_5, %c0_6, %c0_7, %c0_8] : memref<2x1x1x1x512xf32, #tpu.memory_space<vmem>>, vector<2x1x1x1x512xf32>
    tpu.vector_store %arg1[%c0_4, %c0_5, %c0_6, %c0_7, %c0_8], %16 {strides = array<i32>} : memref<2x1x1x1x512xf32, #tpu.memory_space<vmem>>, vector<2x1x1x1x512xf32>,
    return
  }
}

module attributes {stable_mosaic.version = 11 : i64} {
  func.func @_head_kernel(%arg0: memref<2x1x512xf32, #tpu.memory_space<vmem>>, %arg1: memref<512x256xbf16, #tpu.memory_space<vmem>>, %arg2: memref<1x256xf32, #tpu.memory_space<vmem>>, %arg3: memref<1x256xf32, #tpu.memory_space<vmem>>, %arg4: memref<256x128xbf16, #tpu.memory_space<vmem>>, %arg5: memref<1x128xf32, #tpu.memory_space<vmem>>, %arg6: memref<1x128xf32, #tpu.memory_space<vmem>>, %arg7: memref<2x128xf32, #tpu.memory_space<vmem>>) attributes {dimension_semantics = [], scalar_prefetch = 0 : i64, scratch_operands = 0 : i64, tpu.core_type = #tpu.core_type<tc>} {
    %c0 = arith.constant 0 : index
    %c0_0 = arith.constant 0 : index
    %c0_1 = arith.constant 0 : index
    %0 = vector.load %arg0[%c0, %c0_0, %c0_1] : memref<2x1x512xf32, #tpu.memory_space<vmem>>, vector<2x1x512xf32>
    %cst = arith.constant dense<0.000000e+00> : vector<2x512xf32>
    %1 = vector.multi_reduction <add>, %0, %cst [1] : vector<2x1x512xf32> to vector<2x512xf32>
    %cst_2 = arith.constant 1.000000e+00 : f32
    %2 = vector.broadcast %cst_2 : f32 to vector<2x512xf32>
    %3 = arith.mulf %1, %2 : vector<2x512xf32>
    %4 = arith.truncf %3 : vector<2x512xf32> to vector<2x512xbf16>
    %c0_3 = arith.constant 0 : index
    %c0_4 = arith.constant 0 : index
    %5 = vector.load %arg1[%c0_3, %c0_4] : memref<512x256xbf16, #tpu.memory_space<vmem>>, vector<512x256xbf16>
    %cst_5 = arith.constant dense<0.000000e+00> : vector<2x256xf32>
    %6 = tpu.matmul %4, %5, %cst_5 {dimension_numbers = #tpu.dot_dimension_numbers<[1], [0], [0], [1], [0, 0, 1, 1], [], []>} : vector<2x512xbf16>, vector<512x256xbf16>, vector<2x256xf32> -> vector<2x256xf32>
    %c0_6 = arith.constant 0 : index
    %c0_7 = arith.constant 0 : index
    %7 = vector.load %arg2[%c0_6, %c0_7] : memref<1x256xf32, #tpu.memory_space<vmem>>, vector<1x256xf32>
    %8 = vector.broadcast %7 : vector<1x256xf32> to vector<2x256xf32>
    %9 = arith.mulf %6, %8 : vector<2x256xf32>
    %c0_8 = arith.constant 0 : index
    %c0_9 = arith.constant 0 : index
    %10 = vector.load %arg3[%c0_8, %c0_9] : memref<1x256xf32, #tpu.memory_space<vmem>>, vector<1x256xf32>
    %11 = vector.broadcast %10 : vector<1x256xf32> to vector<2x256xf32>
    %12 = arith.addf %9, %11 : vector<2x256xf32>
    %cst_10 = arith.constant 0.000000e+00 : f32
    %13 = vector.broadcast %cst_10 : f32 to vector<2x256xf32>
    %14 = arith.maximumf %12, %13 : vector<2x256xf32>
    %15 = arith.truncf %14 : vector<2x256xf32> to vector<2x256xbf16>
    %c0_11 = arith.constant 0 : index
    %c0_12 = arith.constant 0 : index
    %16 = vector.load %arg4[%c0_11, %c0_12] : memref<256x128xbf16, #tpu.memory_space<vmem>>, vector<256x128xbf16>
    %cst_13 = arith.constant dense<0.000000e+00> : vector<2x128xf32>
    %17 = tpu.matmul %15, %16, %cst_13 {dimension_numbers = #tpu.dot_dimension_numbers<[1], [0], [0], [1], [0, 0, 1, 1], [], []>} : vector<2x256xbf16>, vector<256x128xbf16>, vector<2x128xf32> -> vector<2x128xf32>
    %c0_14 = arith.constant 0 : index
    %c0_15 = arith.constant 0 : index
    %18 = vector.load %arg5[%c0_14, %c0_15] : memref<1x128xf32, #tpu.memory_space<vmem>>, vector<1x128xf32>
    %19 = vector.broadcast %18 : vector<1x128xf32> to vector<2x128xf32>
    %20 = arith.mulf %17, %19 : vector<2x128xf32>
    %c0_16 = arith.constant 0 : index
    %c0_17 = arith.constant 0 : index
    %21 = vector.load %arg6[%c0_16, %c0_17] : memref<1x128xf32, #tpu.memory_space<vmem>>, vector<1x128xf32>
    %22 = vector.broadcast %21 : vector<1x128xf32> to vector<2x128xf32>
    %23 = arith.addf %20, %22 : vector<2x128xf32>
    %cst_18 = arith.constant 0.000000e+00 : f32
    %24 = vector.broadcast %cst_18 : f32 to vector<2x128xf32>
    %25 = arith.maximumf %23, %24 : vector<2x128xf32>
    %c0_19 = arith.constant 0 : index
    %c0_20 = arith.constant 0 : index
    %26 = vector.load %arg7[%c0_19, %c0_20] : memref<2x128xf32, #tpu.memory_space<vmem>>, vector<2x128xf32>
    tpu.vector_store %arg7[%c0_19, %c0_20], %25 {strides = array<i32>} : memref<2x128xf32, #tpu.memory_space<vmem>>, vector<2x128xf32>,
    return
  }
}

</mosaic_0001>

<bundles_post_ra>
// kernel: inception_forward.13
= control target key start
LH: loop header
LB: loop body
LE: loop exit
PB: predicated region body
PF: predicated region fallthrough
CT: control target
= control target key end

     0   :  { %s2089_s18 = smov 0   ;;  %s2091_s19 = smov 0   ;;  %s2596_s0 = inlined_call_operand.vmem [shape: bf16[512,324], index: 0, kind: input, shape index: {}]   ;;  %s2597_s1 = inlined_call_operand.vmem [shape: bf16[324,64], index: 1, kind: input, shape index: {}]   ;;  %s2598_s2 = inlined_call_operand.vmem [shape: f32[1,64], index: 2, kind: input, shape index: {}]   ;;  %s2599_s3 = inlined_call_operand.vmem [shape: f32[1,64], index: 3, kind: input, shape index: {}]   ;;  %s2600_s4 = inlined_call_operand.vmem [shape: f32[1,64], index: 4, kind: input, shape index: {}]   ;;  %s2601_s5 = inlined_call_operand.vmem [shape: f32[512,64], index: 5, kind: output, shape index: {}]  }
   0x1   :  { %s2093_s20 = smov 0  }
   0x2 LB: > { %s27_s21 = sadd.s32 1, %s2052_s19  ;;  %p1637_p0 = scmp.ge.s32.totalorder %s2056_s20, 1  ;;  %s2056_s20 = sphi %s2093_s20, %s15_s20   ;;  %s2052_s19 = sphi %s2091_s19, %s2603_s19   ;;  %s2048_s18 = sphi %s2089_s18, %s2602_s18  }
   0x3   : > { %p29_p1 = scmp.ge.s32.totalorder %s27_s21, 2  ;;  %p219_p2 = scmp.lt.s32.totalorder %s2056_s20, 3 }
   0x5   : > { %s2605_s21 = smov (%p29_p1, %s27_s21), 0  ;;  %p220_p3 = pnand %p1637_p0, %p219_p2 }
   0x6   : > { %s1638_s24 = sshll.u32 (!%p220_p3), %s2048_s18, 5 }
   0x7   : > { %223 = sbr.rel (%p220_p3) target bundleno = 363 (0x16b), region = 40  ;;  %p259_p4 = scmp.lt.s32.totalorder (!%p220_p3), %s1638_s24, 63 }
   0xc   : > { %v1949_v0 = vld [vmem:[%s2597_s1 + $0x78] sm:$0xff]   ;;  %v1951_v2 = vld [vmem:[%s2597_s1 + $0x70] sm:$0xff]   ;;  %v1953_v4 = vld [vmem:[%s2597_s1 + $0x68] sm:$0xff]   ;;  %s2607_s24 = smov (!%p259_p4, %s1638_s24), 63  ;;  %vm868_vm0 = vcmask 1041408   ;;  %vm819_vm1 = vcmask 556032  }
   0xd   : > { %v1950_v1 = vld [vmem:[%s2597_s1 + $0x38] sm:$0xff]   ;;  %1731 = vmatprep.subr.bf16.mxu0 %v1949_v0  ;;  %1906 = vmatprep.subr.bf16.mxu1 %v1949_v0  ;;  %v1952_v3 = vld [vmem:[%s2597_s1 + $0x30] sm:$0xff]   ;;  %v1954_v5 = vld [vmem:[%s2597_s1 + $0x28] sm:$0xff]   ;;  %s1923_s12 = smul.u32 12, %s2607_s24  ;;  %vm286_vm2 = vcmask 523264   ;;  %s1641_s8 = sshll.u32 %s2607_s24, 3 }
   0xe   : > { %1732 = vmatpush3.bf16.msra.mxu0 %v1950_v1  ;;  %1914 = vmatpush3.bf16.msra.mxu1 %v1950_v1  ;;  %v1955_v6 = vld [vmem:[%s2597_s1 + $0x60] sm:$0xff]   ;;  %v1957_v8 = vld [vmem:[%s2597_s1 + $0x58] sm:$0xff]   ;;  %v1959_v10 = vld [vmem:[%s2597_s1 + $0x50] sm:$0xff]   ;;  %s2345_s10 = scalar_lea.vmem %s2601_s5, %s1641_s8 }
   0xf   : > { %1733 = vmatprep.subr.bf16.mxu0 %v1951_v2  ;;  %1907 = vmatprep.subr.bf16.mxu1 %v1951_v2  ;;  %v1956_v7 = vld [vmem:[%s2597_s1 + $0x20] sm:$0xff]   ;;  %s2140_s22 = scalar_lea.vmem %s2596_s0, %s1923_s12  ;;  %v1958_v9 = vld [vmem:[%s2597_s1 + $0x18] sm:$0xff]   ;;  %v1960_v13 = vld [vmem:[%s2597_s1 + $0x10] sm:$0xff]  }
  0x10   : > { %v1967_v11 = vld [vmem:[%s2140_s22 + $0x4] ss:$12 sps:$4 sm:$0xff]   ;;  %v1961_v14 = vld [vmem:[%s2597_s1 + $0x48] sm:$0xff]   ;;  %v1971_v18 = vld [vmem:[%s2597_s1 + $0xa0] ss:$0 sps:$4 sm:$0x33]  }
  0x11   : > { %v1970_v12 = vld [vmem:[%s2140_s22 + $0x124] ss:$12 sps:$4 sm:$0xff]   ;;  %904 = vmatprep.mubr.bf16.mxu0 %v1967_v11  ;;  %v1962_v15 = vld [vmem:[%s2597_s1 + $0x8] sm:$0xff]   ;;  %v870_v23 = vsel %vm868_vm0, %v1971_v18, 0  ;;  %v1978_v24 = vld [vmem:[%s2597_s1 + $0x98] sm:$0xff]  }
  0x12   : > { %1734 = vmatpush3.bf16.msra.mxu0 %v1952_v3  ;;  %1915 = vmatpush3.bf16.msra.mxu1 %v1952_v3  ;;  %v1963_v16 = vld [vmem:[%s2597_s1 + $0x40] sm:$0xff]   ;;  %v1972_v21 = vld [vmem:[%s2140_s22 + $0x1c] ss:$12 sps:$4 sm:$0xff]   ;;  %v1979_v26 = vld [vmem:[%s2597_s1 + $0x90] sm:$0xff]  }
  0x13   : > { %1735 = vmatprep.subr.bf16.mxu0 %v1953_v4  ;;  %1908 = vmatprep.subr.bf16.mxu1 %v1953_v4  ;;  %v1964_v17 = vld [vmem:[%s2597_s1] sm:$0xff]   ;;  %v1974_v22 = vld [vmem:[%s2140_s22 + $0x13c] ss:$12 sps:$4 sm:$0xff]   ;;  %v1987_v34 = vld [vmem:[%s2140_s22 + $0x4c] ss:$12 sps:$4 sm:$0xff]  }
  0x14   : > { %1000 = vmatprep.mubr.bf16.mxu1 %v1970_v12  ;;  %v1965_v19 = vld [vmem:[%s2140_s22] ss:$12 sps:$4 sm:$0xff]   ;;  %v1976_v25 = vld [vmem:[%s2140_s22 + $0x18] ss:$12 sps:$4 sm:$0xff]   ;;  %v1984_v31 = vld [vmem:[%s2140_s22 + $0x30] ss:$12 sps:$4 sm:$0xff]  }
  0x15   : > { %v1968_v20 = vld [vmem:[%s2140_s22 + $0x120] ss:$12 sps:$4 sm:$0xff]   ;;  %v1977_v27 = vld [vmem:[%s2140_s22 + $0x138] ss:$12 sps:$4 sm:$0xff]   ;;  %v1985_v33 = vld [vmem:[%s2140_s22 + $0x150] ss:$12 sps:$4 sm:$0xff]  }
  0x16   : > { %1736 = vmatpush3.bf16.msra.mxu0 %v1954_v5  ;;  %1916 = vmatpush3.bf16.msra.mxu1 %v1954_v5  ;;  %v1980_v28 = vld [vmem:[%s2140_s22 + $0x34] ss:$12 sps:$4 sm:$0xff]   ;;  %v1986_v30 = vld [vmem:[%s2597_s1 + $0x88] sm:$0xff]   ;;  %v1994_v38 = vld [vmem:[%s2140_s22 + $0x64] ss:$12 sps:$4 sm:$0xff]  }
  0x17   : > { %1737 = vmatprep.subr.bf16.mxu0 %v1955_v6  ;;  %1909 = vmatprep.subr.bf16.mxu1 %v1955_v6  ;;  %v1982_v29 = vld [vmem:[%s2140_s22 + $0x154] ss:$12 sps:$4 sm:$0xff]   ;;  %v1989_v35 = vld [vmem:[%s2140_s22 + $0x16c] ss:$12 sps:$4 sm:$0xff]   ;;  %v1999_v42 = vld [vmem:[%s2140_s22 + $0x7c] ss:$12 sps:$4 sm:$0xff]  }
  0x18   : > { %v1993_v32 = vld [vmem:[%s2597_s1 + $0x80] sm:$0xff]   ;;  %v1991_v36 = vld [vmem:[%s2140_s22 + $0x48] ss:$12 sps:$4 sm:$0xff]   ;;  %v2003_v45 = vld [vmem:[%s2140_s22 + $0x50] ss:$12 sps:$4 sm:$0xff]   ;;  %v2058_v6 = vmov 0.0  }
  0x19   : > { %v1992_v37 = vld [vmem:[%s2140_s22 + $0x168] ss:$12 sps:$4 sm:$0xff]   ;;  %v1997_v40 = vld [vmem:[%s2140_s22 + $0x60] ss:$12 sps:$4 sm:$0xff]   ;;  %v2001_v43 = vld [vmem:[%s2140_s22 + $0x38] ss:$12 sps:$4 sm:$0xff]  }
  0x1a   : > { %1738 = vmatpush3.bf16.msra.mxu0 %v1956_v7  ;;  %1917 = vmatpush3.bf16.msra.mxu1 %v1956_v7  ;;  %v1996_v39 = vld [vmem:[%s2140_s22 + $0x8] ss:$12 sps:$4 sm:$0xff]   ;;  %v1998_v41 = vld [vmem:[%s2140_s22 + $0x20] ss:$12 sps:$4 sm:$0xff]   ;;  %v2002_v44 = vld [vmem:[%s2140_s22 + $0x78] ss:$12 sps:$4 sm:$0xff]  }
  0x1b   : > { %1739 = vmatprep.subr.bf16.mxu0 %v1957_v8  ;;  %1910 = vmatprep.subr.bf16.mxu1 %v1957_v8  ;;  %v2004_v46 = vld [vmem:[%s2140_s22 + $0x94] ss:$12 sps:$4 sm:$0xff]   ;;  %v2007_v48 = vld [vmem:[%s2140_s22 + $0x90] ss:$12 sps:$4 sm:$0xff]   ;;  %v2009_v50 = vld [vmem:[%s2140_s22 + $0xac] ss:$12 sps:$4 sm:$0xff]  }
  0x1c   : > { %v2006_v47 = vld [vmem:[%s2140_s22 + $0x68] ss:$12 sps:$4 sm:$0xff]   ;;  %v2008_v49 = vld [vmem:[%s2140_s22 + $0x80] ss:$12 sps:$4 sm:$0xff]   ;;  %v2011_v51 = vld [vmem:[%s2140_s22 + $0x98] ss:$12 sps:$4 sm:$0xff]  }
  0x1d   : > { %v2012_v52 = vld [vmem:[%s2140_s22 + $0xa8] ss:$12 sps:$4 sm:$0xff]   ;;  %v2013_v53 = vld [vmem:[%s2140_s22 + $0xb0] ss:$12 sps:$4 sm:$0xff]   ;;  %v2017_v56 = vld [vmem:[%s2140_s22 + $0xc0] ss:$12 sps:$4 sm:$0xff]  }
  0x1e   : > { %1740 = vmatpush3.bf16.msra.mxu0 %v1958_v9  ;;  %1918 = vmatpush3.bf16.msra.mxu1 %v1958_v9  ;;  %v2014_v54 = vld [vmem:[%s2140_s22 + $0xc4] ss:$12 sps:$4 sm:$0xff]   ;;  %v2016_v55 = vld [vmem:[%s2140_s22 + $0xc8] ss:$12 sps:$4 sm:$0xff]   ;;  %v2018_v57 = vld [vmem:[%s2140_s22 + $0xe0] ss:$12 sps:$4 sm:$0xff]  }
  0x1f   : > { %1741 = vmatprep.subr.bf16.mxu0 %v1959_v10  ;;  %1911 = vmatprep.subr.bf16.mxu1 %v1959_v10  ;;  %v2019_v58 = vld [vmem:[%s2140_s22 + $0xdc] ss:$12 sps:$4 sm:$0xff]   ;;  %v2021_v59 = vld [vmem:[%s2140_s22 + $0xf8] ss:$12 sps:$4 sm:$0xff]   ;;  %v2024_v62 = vld [vmem:[%s2140_s22 + $0xf4] ss:$12 sps:$4 sm:$0xff]  }
  0x20   : > { %v2022_v60 = vld [vmem:[%s2140_s22 + $0xd8] ss:$12 sps:$4 sm:$0xff]   ;;  %v2023_v61 = vld [vmem:[%s2140_s22 + $0x110] ss:$12 sps:$4 sm:$0xff]   ;;  %v2026_v63 = vld [vmem:[%s2140_s22 + $0x128] ss:$12 sps:$4 sm:$0xff]  }
  0x21   : > { %v2027_v0 = vld [vmem:[%s2140_s22 + $0xf0] ss:$12 sps:$4 sm:$0xff]   ;;  %v2028_v1 = vld [vmem:[%s2140_s22 + $0x140] ss:$12 sps:$4 sm:$0xff]   ;;  %v2031_v3 = vld [vmem:[%s2140_s22 + $0x158] ss:$12 sps:$4 sm:$0xff]  }
  0x22   : > { %1742 = vmatpush3.bf16.msra.mxu0 %v1960_v13  ;;  %1919 = vmatpush3.bf16.msra.mxu1 %v1960_v13  ;;  %v2029_v2 = vld [vmem:[%s2140_s22 + $0x10c] ss:$12 sps:$4 sm:$0xff]   ;;  %v2032_v4 = vld [vmem:[%s2140_s22 + $0x108] ss:$12 sps:$4 sm:$0xff]   ;;  %v2033_v5 = vld [vmem:[%s2140_s22 + $0x170] ss:$12 sps:$4 sm:$0xff]  }
  0x23   : > { %1743 = vmatprep.subr.bf16.mxu0 %v1961_v14  ;;  %1912 = vmatprep.subr.bf16.mxu1 %v1961_v14  ;;  %289 = vst.msk [vmem:[#allocation2 + $0x10] sm:$0xff] %vm286_vm2, %v2058_v6  ;;  %287 = vst.msk [vmem:[#allocation2] sm:$0xff] %vm286_vm2, %v2058_v6 }
  0x24   : > { %288 = vst.msk [vmem:[#allocation2 + $0x8] sm:$0xff] %vm286_vm2, %v2058_v6  ;;  %290 = vst.msk [vmem:[#allocation2 + $0x18] sm:$0xff] %vm286_vm2, %v2058_v6 }
  0x25   : > { %291 = vst.msk [vmem:[#allocation2 + $0x20] sm:$0xff] %vm286_vm2, %v2058_v6  ;;  %292 = vst.msk [vmem:[#allocation2 + $0x28] sm:$0xff] %vm286_vm2, %v2058_v6 }
  0x26   : > { %1744 = vmatpush3.bf16.msra.mxu0 %v1962_v15  ;;  %1920 = vmatpush3.bf16.msra.mxu1 %v1962_v15  ;;  %293 = vst.msk [vmem:[#allocation2 + $0x30] sm:$0xff] %vm286_vm2, %v2058_v6  ;;  %294 = vst.msk [vmem:[#allocation2 + $0x38] sm:$0xff] %vm286_vm2, %v2058_v6 }
  0x27   : > { %1745 = vmatprep.subr.bf16.mxu0 %v1963_v16  ;;  %1913 = vmatprep.subr.bf16.mxu1 %v1963_v16  ;;  %295 = vst.msk [vmem:[#allocation2 + $0x40] sm:$0xff] %vm286_vm2, %v2058_v6  ;;  %296 = vst.msk [vmem:[#allocation2 + $0x48] sm:$0xff] %vm286_vm2, %v2058_v6 }
  0x28   : > { %297 = vst.msk [vmem:[#allocation2 + $0x50] sm:$0xff] %vm286_vm2, %v2058_v6  ;;  %298 = vst.msk [vmem:[#allocation2 + $0x58] sm:$0xff] %vm286_vm2, %v2058_v6 }
  0x29   : > { %299 = vst.msk [vmem:[#allocation2 + $0x60] sm:$0xff] %vm286_vm2, %v2058_v6  ;;  %300 = vst.msk [vmem:[#allocation2 + $0x68] sm:$0xff] %vm286_vm2, %v2058_v6 }
  0x2a   : > { %1746 = vmatpush3.bf16.msra.mxu0 %v1964_v17  ;;  %1921 = vmatpush3.bf16.msra.mxu1 %v1964_v17  ;;  %301 = vst.msk [vmem:[#allocation2 + $0x70] sm:$0xff] %vm286_vm2, %v2058_v6  ;;  %302 = vst.msk [vmem:[#allocation2 + $0x78] sm:$0xff] %vm286_vm2, %v2058_v6 }
  0x2b   : > { %1922 = vmatprep.subr.msk.bf16.mxu1 %vm868_vm0, %v1971_v18  ;;  %303 = vst.msk [vmem:[#allocation2 + $0x80] sm:$0xff] %vm286_vm2, %v2058_v6  ;;  %304 = vst.msk [vmem:[#allocation2 + $0x88] sm:$0xff] %vm286_vm2, %v2058_v6 }
  0x2c   : > { %305 = vst.msk [vmem:[#allocation2 + $0x90] sm:$0xff] %vm286_vm2, %v2058_v6  ;;  %306 = vst.msk [vmem:[#allocation2 + $0x98] sm:$0xff] %vm286_vm2, %v2058_v6 }
  0x2d   : > { %905 = vmatmul.mubr.bf16.vlgmr.msra.gmra.mxu0 %v1965_v19  ;;  %1001 = vmatmul.mubr.bf16.vlgmr.msra.gmra.mxu1 %v1968_v20  ;;  %307 = vst.msk [vmem:[#allocation2 + $0xa0] sm:$0xff] %vm286_vm2, %v2058_v6  ;;  %308 = vst.msk [vmem:[#allocation2 + $0xa8] sm:$0xff] %vm286_vm2, %v2058_v6 }
  0x2e   : > { %1865 = vmatpush3.bf16.msra.mxu1 %v870_v23  ;;  %912 = vmatprep.mubr.bf16.mxu0 %v1972_v21  ;;  %309 = vst.msk [vmem:[#allocation2 + $0xb0] sm:$0xff] %vm286_vm2, %v2058_v6  ;;  %310 = vst.msk [vmem:[#allocation2 + $0xb8] sm:$0xff] %vm286_vm2, %v2058_v6 }
  0x2f   : > { %1008 = vmatprep.mubr.bf16.mxu1 %v1974_v22  ;;  %1866 = vmatprep.subr.bf16.mxu1 %v1978_v24  ;;  %311 = vst.msk [vmem:[#allocation2 + $0xc0] sm:$0xff] %vm286_vm2, %v2058_v6  ;;  %312 = vst.msk [vmem:[#allocation2 + $0xc8] sm:$0xff] %vm286_vm2, %v2058_v6 }
  0x30   : > { %313 = vst.msk [vmem:[#allocation2 + $0xd0] sm:$0xff] %vm286_vm2, %v2058_v6  ;;  %314 = vst.msk [vmem:[#allocation2 + $0xd8] sm:$0xff] %vm286_vm2, %v2058_v6 }
  0x31   : > { %315 = vst.msk [vmem:[#allocation2 + $0xe0] sm:$0xff] %vm286_vm2, %v2058_v6  ;;  %316 = vst.msk [vmem:[#allocation2 + $0xe8] sm:$0xff] %vm286_vm2, %v2058_v6 }
  0x32   : > { %1867 = vmatpush3.bf16.msra.mxu1 %v1978_v24  ;;  %317 = vst.msk [vmem:[#allocation2 + $0xf0] sm:$0xff] %vm286_vm2, %v2058_v6  ;;  %318 = vst.msk [vmem:[#allocation2 + $0xf8] sm:$0xff] %vm286_vm2, %v2058_v6 }
  0x33   : > { %1868 = vmatprep.subr.bf16.mxu1 %v1979_v26 }
  0x35   : > { %913 = vmatmul.mubr.bf16.gmra.mxu0 %v1976_v25  ;;  %1009 = vmatmul.mubr.bf16.gmra.mxu1 %v1977_v27 }
  0x36   : > { %920 = vmatprep.mubr.bf16.mxu0 %v1980_v28  ;;  %1016 = vmatprep.mubr.bf16.mxu1 %v1982_v29 }
  0x37   : > { %1869 = vmatpush3.bf16.msra.mxu1 %v1979_v26 }
  0x38   : > { %1870 = vmatprep.subr.bf16.mxu1 %v1986_v30 }
  0x3b   : > { %1871 = vmatpush3.bf16.msra.mxu1 %v1986_v30 }
  0x3c   : > { %1872 = vmatprep.subr.bf16.mxu1 %v1993_v32 }
  0x3d   : > { %921 = vmatmul.mubr.bf16.gmra.mxu0 %v1984_v31  ;;  %1017 = vmatmul.mubr.bf16.gmra.mxu1 %v1985_v33 }
  0x3e   : > { %928 = vmatprep.mubr.bf16.mxu0 %v1987_v34  ;;  %1024 = vmatprep.mubr.bf16.mxu1 %v1989_v35 }
  0x3f   : > { %1873 = vmatpush3.bf16.msra.mxu1 %v1993_v32 }
  0x45   : > { %929 = vmatmul.mubr.bf16.gmra.mxu0 %v1991_v36  ;;  %1025 = vmatmul.mubr.bf16.gmra.mxu1 %v1992_v37 }
  0x46   : > { %936 = vmatprep.mubr.bf16.mxu0 %v1994_v38  ;;  %1874 = vmatprep.mubr.msk.bf16.mxu1 %vm819_vm1, %v1996_v39 }
  0x4d   : > { %937 = vmatmul.mubr.bf16.gmra.mxu0 %v1997_v40  ;;  %1875 = vmatmul.mubr.msk.bf16.vlgmr.msra.gmra.mxu1 %vm819_vm1, %v1998_v41 }
  0x4e   : > { %944 = vmatprep.mubr.bf16.mxu0 %v1999_v42  ;;  %1878 = vmatprep.mubr.msk.bf16.mxu1 %vm819_vm1, %v2001_v43 }
  0x55   : > { %945 = vmatmul.mubr.bf16.gmra.mxu0 %v2002_v44  ;;  %1879 = vmatmul.mubr.msk.bf16.gmra.mxu1 %vm819_vm1, %v2003_v45 }
  0x56   : > { %952 = vmatprep.mubr.bf16.mxu0 %v2004_v46  ;;  %1882 = vmatprep.mubr.msk.bf16.mxu1 %vm819_vm1, %v2006_v47  ;;  %v321_v47 = vld [vmem:[#allocation2 + $0x10] sm:$0xff] }
  0x5d   : > { %953 = vmatmul.mubr.bf16.gmra.mxu0 %v2007_v48  ;;  %1883 = vmatmul.mubr.msk.bf16.gmra.mxu1 %vm819_vm1, %v2008_v49 }
  0x5e   : > { %960 = vmatprep.mubr.bf16.mxu0 %v2009_v50  ;;  %1886 = vmatprep.mubr.msk.bf16.mxu1 %vm819_vm1, %v2011_v51  ;;  %v1406_v51 = vlaneseq }
  0x65   : > { %961 = vmatmul.mubr.bf16.gmra.mxu0 %v2012_v52  ;;  %1887 = vmatmul.mubr.msk.bf16.gmra.mxu1 %vm819_vm1, %v2013_v53  ;;  %v319_v53 = vld [vmem:[#allocation2] sm:$0xff] }
  0x66   : > { %968 = vmatprep.mubr.bf16.mxu0 %v2014_v54  ;;  %1890 = vmatprep.mubr.msk.bf16.mxu1 %vm819_vm1, %v2016_v55 }
  0x6d   : > { %969 = vmatmul.mubr.bf16.gmra.mxu0 %v2017_v56  ;;  %1891 = vmatmul.mubr.msk.bf16.gmra.mxu1 %vm819_vm1, %v2018_v57 }
  0x6e   : > { %976 = vmatprep.mubr.bf16.mxu0 %v2019_v58  ;;  %1894 = vmatprep.mubr.msk.bf16.mxu1 %vm819_vm1, %v2021_v59  ;;  %v322_v59 = vld [vmem:[#allocation2 + $0x18] sm:$0xff] }
  0x75   : > { %977 = vmatmul.mubr.bf16.gmra.mxu0 %v2022_v60  ;;  %1895 = vmatmul.mubr.msk.bf16.gmra.mxu1 %vm819_vm1, %v2023_v61 }
  0x76   : > { %984 = vmatprep.mubr.bf16.mxu0 %v2024_v62  ;;  %1898 = vmatprep.mubr.msk.bf16.mxu1 %vm819_vm1, %v2026_v63 }
  0x7d   : > { %985 = vmatmul.mubr.bf16.gmra.mxu0 %v2027_v0  ;;  %1899 = vmatmul.mubr.msk.bf16.gmra.mxu1 %vm819_vm1, %v2028_v1  ;;  %v1407_v0 = vshrl.u32 %v1406_v51, 7 }
  0x7e   : > { %992 = vmatprep.mubr.bf16.mxu0 %v2029_v2  ;;  %1902 = vmatprep.mubr.msk.bf16.mxu1 %vm819_vm1, %v2031_v3  ;;  %v320_v2 = vld [vmem:[#allocation2 + $0x8] sm:$0xff] }
  0x85   : > { %993 = vmatmul.mubr.bf16.gmra.mxu0 %v2032_v4  ;;  %1903 = vmatmul.mubr.msk.bf16.gmra.mxu1 %vm819_vm1, %v2033_v5  ;;  %v1372_v5 = vld [vmem:[%s2600_s4] sm:$0x1] }
  0xed   : > { %v1747_v7 = vpop.f32.mrf.mxu0  ;;  %v1819_v8 = vpop.f32.mrf.mxu1 }
  0xef   : > { %v1748_v9 = vpop.f32.mrf.mxu0  ;;  %v1820_v10 = vpop.f32.mrf.mxu1 }
  0xf0   : > { %v2274_v11 = vadd.f32 %v1820_v10, %v1819_v8  ;;  %v1749_v49 = vadd.f32 %v1748_v9, %v1747_v7  ;;  %v325_v9 = vld [vmem:[#allocation2 + $0x30] sm:$0xff] }
  0xf1   : > { %v1750_v12 = vpop.f32.mrf.mxu0  ;;  %v1822_v13 = vpop.f32.mrf.mxu1 }
  0xf3   : > { %v1751_v14 = vpop.f32.mrf.mxu0  ;;  %v1823_v15 = vpop.f32.mrf.mxu1 }
  0xf4   : > { %v2276_v16 = vadd.f32 %v1823_v15, %v1822_v13  ;;  %v1752_v61 = vadd.f32 %v1751_v14, %v1750_v12  ;;  %v2313_v15 = vld [vmem:[%s2598_s2] ss:$0 sm:$0xff] }
  0xf5   : > { %v1753_v17 = vpop.f32.mrf.mxu0  ;;  %v1825_v18 = vpop.f32.mrf.mxu1 }
  0xf7   : > { %v1754_v19 = vpop.f32.mrf.mxu0  ;;  %v1826_v20 = vpop.f32.mrf.mxu1 }
  0xf8   : > { %v2278_v21 = vadd.f32 %v1826_v20, %v1825_v18  ;;  %v1755_v45 = vadd.f32 %v1754_v19, %v1753_v17  ;;  %v1408_v17 = vsub.s32 0, %v1407_v0  ;;  %v1443_v18 = vsub.f32 1.0, %v1372_v5  ;;  %v323_v20 = vld [vmem:[#allocation2 + $0x20] sm:$0xff] }
  0xf9   : > { %v1756_v22 = vpop.f32.mrf.mxu0  ;;  %v1828_v23 = vpop.f32.mrf.mxu1 }
  0xfb   : > { %v1757_v24 = vpop.f32.mrf.mxu0  ;;  %v1829_v25 = vpop.f32.mrf.mxu1 }
  0xfc   : > { %v2280_v26 = vadd.f32 %v1829_v25, %v1828_v23  ;;  %v1758_v55 = vadd.f32 %v1757_v24, %v1756_v22 }
  0xfd   : > { %v1759_v27 = vpop.f32.mrf.mxu0  ;;  %v1831_v28 = vpop.f32.mrf.mxu1 }
  0xff   : > { %v1760_v29 = vpop.f32.mrf.mxu0  ;;  %v1832_v30 = vpop.f32.mrf.mxu1 }
 0x100   : > { %v2282_v31 = vadd.f32 %v1832_v30, %v1831_v28  ;;  %v1761_v12 = vadd.f32 %v1760_v29, %v1759_v27  ;;  %v2319_v28 = vld [vmem:[%s2599_s3] ss:$0 sm:$0xff]  ;;  %v326_v30 = vld [vmem:[#allocation2 + $0x38] sm:$0xff] }
 0x101   : > { %v2284_v32 = vpop.f32.mrf.mxu0  ;;  %v1834_v33 = vpop.f32.mrf.mxu1 }
 0x103   : > { %v2286_v34 = vpop.f32.mrf.mxu0  ;;  %v1835_v35 = vpop.f32.mrf.mxu1 }
 0x104   : > { %v2288_v36 = vadd.f32 %v1835_v35, %v1834_v33 }
 0x105   : > { %v1765_v37 = vpop.f32.mrf.mxu0  ;;  %v2290_v38 = vpop.f32.mrf.mxu1 }
 0x107   : > { %v1766_v39 = vpop.f32.mrf.mxu0  ;;  %v2292_v40 = vpop.f32.mrf.mxu1 }
 0x108   : > { %v1767_v4 = vadd.f32 %v1766_v39, %v1765_v37 }
 0x109   : > { %v1768_v41 = vpop.f32.mrf.mxu0  ;;  %v2294_v42 = vpop.f32.mrf.mxu1 }
 0x10b   : > { %v1769_v43 = vpop.f32.mrf.mxu0  ;;  %v2296_v44 = vpop.f32.mrf.mxu1 }
 0x10c   : > { %v1770_v23 = vadd.f32 %v1769_v43, %v1768_v41  ;;  %v1764_v41 = vadd.f32 %v2286_v34, %v2284_v32  ;;  %v2325_v43 = vrot.slane %v1443_v18, %v1408_v17 }
 0x10d   : > { %v2298_v46 = vpop.f32.mrf.mxu0  ;;  %v1876_v48 = vpop.f32.mrf.mxu1 }
 0x10e   : > { %v1076_v50 = vadd.f32 %v1876_v48, %v1755_v45 }
 0x10f   : > { %v2300_v52 = vpop.f32.mrf.mxu0  ;;  %v1067_v54 = vpop.f32.mrf.mxu1 }
 0x110   : > { %v1196_v56 = vadd.f32 %v1076_v50, %v321_v47  ;;  %v1068_v57 = vadd.f32 %v1749_v49, %v1067_v54  ;;  %v2328_v50 = vrot.slane %v1372_v5, %v1408_v17  ;;  %v324_v54 = vld [vmem:[#allocation2 + $0x28] sm:$0xff] }
 0x111   : > { %v2302_v58 = vpop.f32.mrf.mxu0  ;;  %v1877_v60 = vpop.f32.mrf.mxu1 }
 0x112   : > { %1229 = vst.msk [vmem:[#allocation2 + $0x10] sm:$0xff] %vm286_vm2, %v1196_v56  ;;  %v1194_v62 = vadd.f32 %v1068_v57, %v319_v53  ;;  %v1079_v63 = vadd.f32 %v1877_v60, %v1758_v55  ;;  %v1773_v60 = vadd.f32 %v2300_v52, %v2298_v46 }
 0x113   : > { %v1775_v1 = vpop.f32.mrf.mxu0  ;;  %v1070_v3 = vpop.f32.mrf.mxu1 }
 0x114   : > { %1227 = vst.msk [vmem:[#allocation2] sm:$0xff] %vm286_vm2, %v1194_v62  ;;  %v1197_v6 = vadd.f32 %v1079_v63, %v322_v59  ;;  %v1071_v7 = vadd.f32 %v1752_v61, %v1070_v3  ;;  %v329_v63 = vld [vmem:[#allocation2 + $0x50] sm:$0xff]  ;;  %v1776_v0 = vadd.f32 %v1775_v1, %v2302_v58 }
 0x115   : > { %v1777_v8 = vpop.f32.mrf.mxu0  ;;  %v1880_v10 = vpop.f32.mrf.mxu1 }
 0x116   : > { %1230 = vst.msk [vmem:[#allocation2 + $0x18] sm:$0xff] %vm286_vm2, %v1197_v6  ;;  %v1195_v13 = vadd.f32 %v1071_v7, %v320_v2  ;;  %v1092_v14 = vadd.f32 %v1880_v10, %v1767_v4  ;;  %v327_v10 = vld [vmem:[#allocation2 + $0x40] sm:$0xff] }
 0x117   : > { %v1778_v19 = vpop.f32.mrf.mxu0  ;;  %v1083_v22 = vpop.f32.mrf.mxu1 }
 0x118   : > { %1228 = vst.msk [vmem:[#allocation2 + $0x8] sm:$0xff] %vm286_vm2, %v1195_v13  ;;  %v1200_v24 = vadd.f32 %v1092_v14, %v325_v9  ;;  %v1084_v25 = vadd.f32 %v1761_v12, %v1083_v22  ;;  %v1779_v56 = vadd.f32 %v1778_v19, %v1777_v8 }
 0x119   : > { %v1264_v27 = vld [vmem:[#allocation2 + $0x10] sm:$0xff]  ;;  %v1780_v29 = vpop.f32.mrf.mxu0  ;;  %v1881_v33 = vpop.f32.mrf.mxu1 }
 0x11a   : > { %v1303_v35 = vmul.f32 %v2313_v15, %v1264_v27  ;;  %1233 = vst.msk [vmem:[#allocation2 + $0x30] sm:$0xff] %vm286_vm2, %v1200_v24  ;;  %v1198_v37 = vadd.f32 %v1084_v25, %v323_v20  ;;  %v1095_v39 = vadd.f32 %v1881_v33, %v1770_v23  ;;  %v330_v24 = vld [vmem:[#allocation2 + $0x58] sm:$0xff] }
 0x11b   : > { %v1262_v45 = vld [vmem:[#allocation2] sm:$0xff]  ;;  %v1781_v47 = vpop.f32.mrf.mxu0  ;;  %v1086_v48 = vpop.f32.mrf.mxu1 }
 0x11c   : > { %v1342_v49 = vadd.f32 %v2319_v28, %v1303_v35  ;;  %v1301_v51 = vmul.f32 %v2313_v15, %v1262_v45  ;;  %1231 = vst.msk [vmem:[#allocation2 + $0x20] sm:$0xff] %vm286_vm2, %v1198_v37  ;;  %v1201_v53 = vadd.f32 %v1095_v39, %v326_v30  ;;  %v1087_v57 = vadd.f32 %v1764_v41, %v1086_v48 }
 0x11d   : > { %v1265_v55 = vld [vmem:[#allocation2 + $0x18] sm:$0xff]  ;;  %v1783_v32 = vpop.f32.mrf.mxu0  ;;  %v1884_v34 = vpop.f32.mrf.mxu1  ;;  %v1782_v3 = vadd.f32 %v1781_v47, %v1780_v29 }
 0x11e   : > { %v1375_v59 = vmax.f32 %v1342_v49, 0.0  ;;  %v1340_v61 = vadd.f32 %v2319_v28, %v1301_v51  ;;  %v1304_v62 = vmul.f32 %v2313_v15, %v1265_v55  ;;  %1234 = vst.msk [vmem:[#allocation2 + $0x38] sm:$0xff] %vm286_vm2, %v1201_v53  ;;  %v1199_v4 = vadd.f32 %v1087_v57, %v324_v54  ;;  %v328_v55 = vld [vmem:[#allocation2 + $0x48] sm:$0xff] }
 0x11f   : > { %v1263_v2 = vld [vmem:[#allocation2 + $0x8] sm:$0xff]  ;;  %v1108_v5 = vadd.f32 %v1884_v34, %v1779_v56  ;;  %v1784_v6 = vpop.f32.mrf.mxu0  ;;  %v1099_v7 = vpop.f32.mrf.mxu1  ;;  %v1452_v9 = vmul.f32 %v2325_v43, %v1342_v49 }
 0x120   : > { %v1413_v8 = vmul.f32 %v2328_v50, %v1375_v59  ;;  %v1373_v46 = vmax.f32 %v1340_v61, 0.0  ;;  %v1343_v52 = vadd.f32 %v2319_v28, %v1304_v62  ;;  %v1450_v58 = vmul.f32 %v2325_v43, %v1340_v61  ;;  %1232 = vst.msk [vmem:[#allocation2 + $0x28] sm:$0xff] %vm286_vm2, %v1199_v4 }
 0x121   : > { %v1302_v1 = vmul.f32 %v2313_v15, %v1263_v2  ;;  %v1268_v12 = vld [vmem:[#allocation2 + $0x30] sm:$0xff]  ;;  %v1204_v13 = vadd.f32 %v1108_v5, %v329_v63  ;;  %v1100_v14 = vadd.f32 %v1773_v60, %v1099_v7  ;;  %v1786_v17 = vpop.f32.mrf.mxu0  ;;  %v1885_v18 = vpop.f32.mrf.mxu1  ;;  %v1785_v23 = vadd.f32 %v1784_v6, %v1783_v32 }
 0x122   : > { %v1484_v19 = vadd.f32 %v1452_v9, %v1413_v8  ;;  %v1411_v20 = vmul.f32 %v2328_v50, %v1373_v46  ;;  %v1376_v22 = vmax.f32 %v1343_v52, 0.0  ;;  %v1307_v27 = vmul.f32 %v2313_v15, %v1268_v12 }
 0x123   : > { %v1341_v25 = vadd.f32 %v2319_v28, %v1302_v1  ;;  %v1266_v29 = vld [vmem:[#allocation2 + $0x20] sm:$0xff]  ;;  %1237 = vst.msk [vmem:[#allocation2 + $0x50] sm:$0xff] %vm286_vm2, %v1204_v13  ;;  %v1202_v30 = vadd.f32 %v1100_v14, %v327_v10  ;;  %v1111_v33 = vadd.f32 %v1885_v18, %v1782_v3  ;;  %v1787_v35 = vpop.f32.mrf.mxu0  ;;  %v1102_v37 = vpop.f32.mrf.mxu1  ;;  %v1453_v45 = vmul.f32 %v2325_v43, %v1343_v52 }
 0x124   : > { %1516 = vst.msk [vmem:[%s2345_s10 + $0x10] sm:$0xff] %vm286_vm2, %v1484_v19  ;;  %v1482_v39 = vadd.f32 %v1450_v58, %v1411_v20  ;;  %v1414_v41 = vmul.f32 %v2328_v50, %v1376_v22  ;;  %v1305_v47 = vmul.f32 %v2313_v15, %v1266_v29  ;;  %v1346_v49 = vadd.f32 %v2319_v28, %v1307_v27  ;;  %v331_v58 = vld [vmem:[#allocation2 + $0x60] sm:$0xff] }
 0x125   : > { %v1374_v48 = vmax.f32 %v1341_v25, 0.0  ;;  %v1269_v51 = vld [vmem:[#allocation2 + $0x38] sm:$0xff]  ;;  %1235 = vst.msk [vmem:[#allocation2 + $0x40] sm:$0xff] %vm286_vm2, %v1202_v30  ;;  %v1205_v53 = vadd.f32 %v1111_v33, %v330_v24  ;;  %v1788_v54 = vadd.f32 %v1787_v35, %v1786_v17  ;;  %v1789_v56 = vpop.f32.mrf.mxu0  ;;  %v1888_v57 = vpop.f32.mrf.mxu1  ;;  %v1103_v60 = vadd.f32 %v1776_v0, %v1102_v37 }
 0x126   : > { %1514 = vst.msk [vmem:[%s2345_s10] sm:$0xff] %vm286_vm2, %v1482_v39  ;;  %v1485_v32 = vadd.f32 %v1453_v45, %v1414_v41  ;;  %v1344_v34 = vadd.f32 %v2319_v28, %v1305_v47  ;;  %v1308_v59 = vmul.f32 %v2313_v15, %v1269_v51  ;;  %v1451_v62 = vmul.f32 %v2325_v43, %v1341_v25  ;;  %v333_v25 = vld [vmem:[#allocation2 + $0x70] sm:$0xff] }
 0x127   : > { %v1412_v61 = vmul.f32 %v2328_v50, %v1374_v48  ;;  %v1379_v63 = vmax.f32 %v1346_v49, 0.0  ;;  %v1456_v2 = vmul.f32 %v2325_v43, %v1346_v49  ;;  %1238 = vst.msk [vmem:[#allocation2 + $0x58] sm:$0xff] %vm286_vm2, %v1205_v53  ;;  %v1790_v3 = vpop.f32.mrf.mxu0  ;;  %v1115_v4 = vpop.f32.mrf.mxu1  ;;  %v1267_v0 = vld [vmem:[#allocation2 + $0x28] sm:$0xff]  ;;  %v1203_v8 = vadd.f32 %v1103_v60, %v328_v55  ;;  %v334_v48 = vld [vmem:[#allocation2 + $0x78] sm:$0xff] }
 0x128   : > { %1517 = vst.msk [vmem:[%s2345_s10 + $0x18] sm:$0xff] %vm286_vm2, %v1485_v32  ;;  %v1377_v5 = vmax.f32 %v1344_v34, 0.0  ;;  %v1454_v6 = vmul.f32 %v2325_v43, %v1344_v34  ;;  %v1347_v7 = vadd.f32 %v2319_v28, %v1308_v59  ;;  %v1306_v52 = vmul.f32 %v2313_v15, %v1267_v0  ;;  %v332_v49 = vld [vmem:[#allocation2 + $0x68] sm:$0xff] }
 0x129   : > { %v1483_v9 = vadd.f32 %v1451_v62, %v1412_v61  ;;  %v1417_v46 = vmul.f32 %v2328_v50, %v1379_v63  ;;  %v1791_v10 = vadd.f32 %v1790_v3, %v1789_v56  ;;  %v1792_v1 = vpop.f32.mrf.mxu0  ;;  %v1889_v12 = vpop.f32.mrf.mxu1  ;;  %1236 = vst.msk [vmem:[#allocation2 + $0x48] sm:$0xff] %vm286_vm2, %v1203_v8  ;;  %v1116_v19 = vadd.f32 %v1785_v23, %v1115_v4 }
 0x12a   : > { %v1415_v13 = vmul.f32 %v2328_v50, %v1377_v5  ;;  %v1380_v14 = vmax.f32 %v1347_v7, 0.0  ;;  %v1457_v17 = vmul.f32 %v2325_v43, %v1347_v7  ;;  %v1272_v18 = vld [vmem:[#allocation2 + $0x50] sm:$0xff]  ;;  %v1345_v22 = vadd.f32 %v2319_v28, %v1306_v52 }
 0x12b   : > { %1515 = vst.msk [vmem:[%s2345_s10 + $0x8] sm:$0xff] %vm286_vm2, %v1483_v9  ;;  %v1488_v20 = vadd.f32 %v1456_v2, %v1417_v46  ;;  %v1311_v24 = vmul.f32 %v2313_v15, %v1272_v18  ;;  %v1124_v27 = vadd.f32 %v1888_v57, %v1791_v10  ;;  %v1793_v29 = vpop.f32.mrf.mxu0  ;;  %v1118_v30 = vpop.f32.mrf.mxu1  ;;  %v1206_v39 = vadd.f32 %v1116_v19, %v331_v58  ;;  %v335_v46 = vld [vmem:[#allocation2 + $0x80] sm:$0xff] }
 0x12c   : > { %v1486_v33 = vadd.f32 %v1454_v6, %v1415_v13  ;;  %v1418_v35 = vmul.f32 %v2328_v50, %v1380_v14  ;;  %v1270_v37 = vld [vmem:[#allocation2 + $0x40] sm:$0xff]  ;;  %v1794_v41 = vadd.f32 %v1793_v29, %v1792_v1  ;;  %v1378_v23 = vmax.f32 %v1345_v22, 0.0 }
 0x12d   : > { %1520 = vst.msk [vmem:[%s2345_s10 + $0x30] sm:$0xff] %vm286_vm2, %v1488_v20  ;;  %v1350_v45 = vadd.f32 %v2319_v28, %v1311_v24  ;;  %v1309_v47 = vmul.f32 %v2313_v15, %v1270_v37  ;;  %v1795_v51 = vpop.f32.mrf.mxu0  ;;  %v2387_v53 = vpop.f32.mrf.mxu1  ;;  %v1208_v57 = vadd.f32 %v1124_v27, %v333_v25  ;;  %1239 = vst.msk [vmem:[#allocation2 + $0x60] sm:$0xff] %vm286_vm2, %v1206_v39 }
 0x12e   : > { %1518 = vst.msk [vmem:[%s2345_s10 + $0x20] sm:$0xff] %vm286_vm2, %v1486_v33  ;;  %v1489_v55 = vadd.f32 %v1457_v17, %v1418_v35  ;;  %v1273_v56 = vld [vmem:[#allocation2 + $0x58] sm:$0xff]  ;;  %v1127_v32 = vadd.f32 %v1889_v12, %v1794_v41  ;;  %v1119_v34 = vadd.f32 %v1788_v54, %v1118_v30  ;;  %v1416_v59 = vmul.f32 %v2328_v50, %v1378_v23  ;;  %v336_v23 = vld [vmem:[#allocation2 + $0x88] sm:$0xff] }
 0x12f   : > { %v1455_v60 = vmul.f32 %v2325_v43, %v1345_v22  ;;  %v1383_v61 = vmax.f32 %v1350_v45, 0.0  ;;  %v1348_v62 = vadd.f32 %v2319_v28, %v1309_v47  ;;  %v1796_v63 = vpop.f32.mrf.mxu0  ;;  %v1131_v2 = vpop.f32.mrf.mxu1  ;;  %v1312_v3 = vmul.f32 %v2313_v15, %v1273_v56  ;;  %1241 = vst.msk [vmem:[#allocation2 + $0x70] sm:$0xff] %vm286_vm2, %v1208_v57 }
 0x130   : > { %1521 = vst.msk [vmem:[%s2345_s10 + $0x38] sm:$0xff] %vm286_vm2, %v1489_v55  ;;  %v1209_v4 = vadd.f32 %v1127_v32, %v334_v48  ;;  %v1207_v5 = vadd.f32 %v1119_v34, %v332_v49  ;;  %v1797_v6 = vadd.f32 %v1796_v63, %v1795_v51  ;;  %v1460_v0 = vmul.f32 %v2325_v43, %v1350_v45  ;;  %v1271_v9 = vld [vmem:[#allocation2 + $0x48] sm:$0xff] }
 0x131   : > { %v1487_v54 = vadd.f32 %v1455_v60, %v1416_v59  ;;  %v1421_v7 = vmul.f32 %v2328_v50, %v1383_v61  ;;  %v1381_v8 = vmax.f32 %v1348_v62, 0.0  ;;  %v1798_v52 = vpop.f32.mrf.mxu0  ;;  %v2401_v10 = vpop.f32.mrf.mxu1  ;;  %v1351_v58 = vadd.f32 %v2319_v28, %v1312_v3 }
 0x132   : > { %v1310_v1 = vmul.f32 %v2313_v15, %v1271_v9  ;;  %1242 = vst.msk [vmem:[#allocation2 + $0x78] sm:$0xff] %vm286_vm2, %v1209_v4  ;;  %1240 = vst.msk [vmem:[#allocation2 + $0x68] sm:$0xff] %vm286_vm2, %v1207_v5  ;;  %v1132_v12 = vadd.f32 %v1797_v6, %v1131_v2  ;;  %v1458_v17 = vmul.f32 %v2325_v43, %v1348_v62  ;;  %v337_v5 = vld [vmem:[#allocation2 + $0x90] sm:$0xff] }
 0x133   : > { %1519 = vst.msk [vmem:[%s2345_s10 + $0x28] sm:$0xff] %vm286_vm2, %v1487_v54  ;;  %v1492_v13 = vadd.f32 %v1460_v0, %v1421_v7  ;;  %v1419_v14 = vmul.f32 %v2328_v50, %v1381_v8  ;;  %v1799_v18 = vpop.f32.mrf.mxu0  ;;  %v1134_v19 = vpop.f32.mrf.mxu1  ;;  %v1384_v20 = vmax.f32 %v1351_v58, 0.0  ;;  %v1461_v37 = vmul.f32 %v2325_v43, %v1351_v58 }
 0x134   : > { %v1349_v22 = vadd.f32 %v2319_v28, %v1310_v1  ;;  %v1210_v24 = vadd.f32 %v1132_v12, %v335_v46  ;;  %v1274_v27 = vld [vmem:[#allocation2 + $0x60] sm:$0xff]  ;;  %v1800_v29 = vadd.f32 %v1799_v18, %v1798_v52  ;;  %v2435_v6 = vadd.f32 %v2292_v40, %v2290_v38 }
 0x135   : > { %1524 = vst.msk [vmem:[%s2345_s10 + $0x50] sm:$0xff] %vm286_vm2, %v1492_v13  ;;  %v1490_v25 = vadd.f32 %v1458_v17, %v1419_v14  ;;  %v1801_v30 = vpop.f32.mrf.mxu0  ;;  %v2414_v33 = vpop.f32.mrf.mxu1  ;;  %v1422_v35 = vmul.f32 %v2328_v50, %v1384_v20  ;;  %v1313_v41 = vmul.f32 %v2313_v15, %v1274_v27 }
 0x136   : > { %v1382_v39 = vmax.f32 %v1349_v22, 0.0  ;;  %1243 = vst.msk [vmem:[#allocation2 + $0x80] sm:$0xff] %vm286_vm2, %v1210_v24  ;;  %v1459_v45 = vmul.f32 %v2325_v43, %v1349_v22  ;;  %v1276_v47 = vld [vmem:[#allocation2 + $0x70] sm:$0xff]  ;;  %v1135_v48 = vadd.f32 %v1800_v29, %v1134_v19 }
 0x137   : > { %1522 = vst.msk [vmem:[%s2345_s10 + $0x40] sm:$0xff] %vm286_vm2, %v1490_v25  ;;  %v1802_v49 = vpop.f32.mrf.mxu0  ;;  %v2423_v51 = vpop.f32.mrf.mxu1  ;;  %v1493_v55 = vadd.f32 %v1461_v37, %v1422_v35  ;;  %v1315_v57 = vmul.f32 %v2313_v15, %v1276_v47  ;;  %v1352_v32 = vadd.f32 %v2319_v28, %v1313_v41  ;;  %v345_v35 = vld [vmem:[#allocation2 + $0xd0] sm:$0xff] }
 0x138   : > { %v1420_v56 = vmul.f32 %v2328_v50, %v1382_v39  ;;  %v1211_v60 = vadd.f32 %v1135_v48, %v336_v23  ;;  %v1803_v61 = vadd.f32 %v1802_v49, %v1801_v30 }
 0x139   : > { %v1277_v34 = vld [vmem:[#allocation2 + $0x78] sm:$0xff]  ;;  %v1275_v59 = vld [vmem:[#allocation2 + $0x68] sm:$0xff]  ;;  %v1804_v62 = vpop.f32.mrf.mxu0  ;;  %v2428_v63 = vpop.f32.mrf.mxu1  ;;  %1525 = vst.msk [vmem:[%s2345_s10 + $0x58] sm:$0xff] %vm286_vm2, %v1493_v55  ;;  %v1354_v3 = vadd.f32 %v2319_v28, %v1315_v57  ;;  %v1385_v4 = vmax.f32 %v1352_v32, 0.0  ;;  %v1462_v58 = vmul.f32 %v2325_v43, %v1352_v32  ;;  %v343_v55 = vld [vmem:[#allocation2 + $0xc0] sm:$0xff] }
 0x13a   : > { %v1491_v2 = vadd.f32 %v1459_v45, %v1420_v56  ;;  %v1316_v54 = vmul.f32 %v2313_v15, %v1277_v34  ;;  %v1314_v7 = vmul.f32 %v2313_v15, %v1275_v59  ;;  %1244 = vst.msk [vmem:[#allocation2 + $0x88] sm:$0xff] %vm286_vm2, %v1211_v60  ;;  %v1140_v0 = vadd.f32 %v2387_v53, %v1803_v61  ;;  %v338_v53 = vld [vmem:[#allocation2 + $0x98] sm:$0xff] }
 0x13b   : > { %v1805_v8 = vpop.f32.mrf.mxu0  ;;  %v2441_v9 = vpop.f32.mrf.mxu1  ;;  %v1387_v46 = vmax.f32 %v1354_v3, 0.0  ;;  %v1423_v52 = vmul.f32 %v2328_v50, %v1385_v4  ;;  %v1464_v40 = vmul.f32 %v2325_v43, %v1354_v3  ;;  %v346_v32 = vld [vmem:[#allocation2 + $0xd8] sm:$0xff] }
 0x13c   : > { %1523 = vst.msk [vmem:[%s2345_s10 + $0x48] sm:$0xff] %vm286_vm2, %v1491_v2  ;;  %v1806_v38 = vadd.f32 %v1805_v8, %v1804_v62  ;;  %v1355_v1 = vadd.f32 %v2319_v28, %v1316_v54  ;;  %v1353_v12 = vadd.f32 %v2319_v28, %v1314_v7  ;;  %v1212_v14 = vadd.f32 %v1140_v0, %v337_v5  ;;  %v339_v62 = vld [vmem:[#allocation2 + $0xa0] sm:$0xff] }
 0x13d   : > { %v1278_v13 = vld [vmem:[#allocation2 + $0x80] sm:$0xff]  ;;  %v1807_v17 = vpop.f32.mrf.mxu0  ;;  %v1900_v18 = vpop.f32.mrf.mxu1  ;;  %v1425_v19 = vmul.f32 %v2328_v50, %v1387_v46  ;;  %v1494_v20 = vadd.f32 %v1462_v58, %v1423_v52  ;;  %v344_v58 = vld [vmem:[#allocation2 + $0xc8] sm:$0xff] }
 0x13e   : > { %v1317_v22 = vmul.f32 %v2313_v15, %v1278_v13  ;;  %v1143_v24 = vadd.f32 %v2401_v10, %v1806_v38  ;;  %v1388_v25 = vmax.f32 %v1355_v1, 0.0  ;;  %v1465_v27 = vmul.f32 %v2325_v43, %v1355_v1  ;;  %1245 = vst.msk [vmem:[#allocation2 + $0x90] sm:$0xff] %vm286_vm2, %v1212_v14 }
 0x13f   : > { %v1386_v29 = vmax.f32 %v1353_v12, 0.0  ;;  %v1463_v30 = vmul.f32 %v2325_v43, %v1353_v12  ;;  %v1808_v37 = vpop.f32.mrf.mxu0  ;;  %v1163_v39 = vpop.f32.mrf.mxu1  ;;  %v1496_v41 = vadd.f32 %v1464_v40, %v1425_v19  ;;  %1526 = vst.msk [vmem:[%s2345_s10 + $0x60] sm:$0xff] %vm286_vm2, %v1494_v20  ;;  %v1172_v10 = vadd.f32 %v1900_v18, %v2278_v21  ;;  %v340_v40 = vld [vmem:[#allocation2 + $0xa8] sm:$0xff]  ;;  %v349_v12 = vld [vmem:[#allocation2 + $0xf0] sm:$0xff] }
 0x140   : > { %v1356_v23 = vadd.f32 %v2319_v28, %v1317_v22  ;;  %v1213_v45 = vadd.f32 %v1143_v24, %v338_v53  ;;  %v1426_v47 = vmul.f32 %v2328_v50, %v1388_v25  ;;  %v1809_v49 = vadd.f32 %v1808_v37, %v1807_v17  ;;  %v347_v25 = vld [vmem:[#allocation2 + $0xe0] sm:$0xff] }
 0x141   : > { %v1424_v48 = vmul.f32 %v2328_v50, %v1386_v29  ;;  %v1164_v56 = vadd.f32 %v2274_v11, %v1163_v39  ;;  %v1810_v57 = vpop.f32.mrf.mxu0  ;;  %v1901_v34 = vpop.f32.mrf.mxu1  ;;  %1528 = vst.msk [vmem:[%s2345_s10 + $0x70] sm:$0xff] %vm286_vm2, %v1496_v41  ;;  %v1279_v61 = vld [vmem:[#allocation2 + $0x88] sm:$0xff]  ;;  %v1220_v21 = vadd.f32 %v1172_v10, %v345_v35  ;;  %v1842_v19 = vadd.f32 %v2296_v44, %v2294_v42  ;;  %v341_v39 = vld [vmem:[#allocation2 + $0xb0] sm:$0xff] }
 0x142   : > { %v1389_v59 = vmax.f32 %v1356_v23, 0.0  ;;  %v1466_v60 = vmul.f32 %v2325_v43, %v1356_v23  ;;  %1246 = vst.msk [vmem:[#allocation2 + $0x98] sm:$0xff] %vm286_vm2, %v1213_v45  ;;  %v1175_v2 = vadd.f32 %v1901_v34, %v2280_v26  ;;  %v1497_v3 = vadd.f32 %v1465_v27, %v1426_v47  ;;  %v350_v23 = vld [vmem:[#allocation2 + $0xf8] sm:$0xff] }
 0x143   : > { %v1495_v4 = vadd.f32 %v1463_v30, %v1424_v48  ;;  %v1318_v11 = vmul.f32 %v2313_v15, %v1279_v61  ;;  %v1148_v5 = vadd.f32 %v1809_v49, %v2423_v51  ;;  %v1811_v54 = vpop.f32.mrf.mxu0  ;;  %v1166_v7 = vpop.f32.mrf.mxu1  ;;  %1253 = vst.msk [vmem:[#allocation2 + $0xd0] sm:$0xff] %vm286_vm2, %v1220_v21  ;;  %v1218_v8 = vadd.f32 %v1164_v56, %v343_v55 }
 0x144   : > { %v1427_v0 = vmul.f32 %v2328_v50, %v1389_v59  ;;  %v1221_v46 = vadd.f32 %v1175_v2, %v346_v32  ;;  %v1812_v52 = vadd.f32 %v1811_v54, %v1810_v57  ;;  %1529 = vst.msk [vmem:[%s2345_s10 + $0x78] sm:$0xff] %vm286_vm2, %v1497_v3  ;;  %v1167_v51 = vadd.f32 %v2276_v16, %v1166_v7  ;;  %v342_v7 = vld [vmem:[#allocation2 + $0xb8] sm:$0xff] }
 0x145   : > { %1527 = vst.msk [vmem:[%s2345_s10 + $0x68] sm:$0xff] %vm286_vm2, %v1495_v4  ;;  %v1357_v26 = vadd.f32 %v2319_v28, %v1318_v11  ;;  %v1214_v38 = vadd.f32 %v1148_v5, %v339_v62  ;;  %v1813_v1 = vpop.f32.mrf.mxu0  ;;  %v1904_v13 = vpop.f32.mrf.mxu1  ;;  %v1280_v53 = vld [vmem:[#allocation2 + $0x90] sm:$0xff]  ;;  %1251 = vst.msk [vmem:[#allocation2 + $0xc0] sm:$0xff] %vm286_vm2, %v1218_v8 }
 0x146   : > { %v1498_v14 = vadd.f32 %v1466_v60, %v1427_v0  ;;  %1254 = vst.msk [vmem:[#allocation2 + $0xd8] sm:$0xff] %vm286_vm2, %v1221_v46  ;;  %v1151_v17 = vadd.f32 %v1812_v52, %v2441_v9  ;;  %v1188_v18 = vadd.f32 %v1904_v13, %v2435_v6  ;;  %v1319_v16 = vmul.f32 %v2313_v15, %v1280_v53 }
 0x147   : > { %v1390_v20 = vmax.f32 %v1357_v26, 0.0  ;;  %1247 = vst.msk [vmem:[#allocation2 + $0xa0] sm:$0xff] %vm286_vm2, %v1214_v38  ;;  %v1219_v22 = vadd.f32 %v1167_v51, %v344_v58  ;;  %v1814_v24 = vpop.f32.mrf.mxu0  ;;  %v1179_v27 = vpop.f32.mrf.mxu1  ;;  %v1467_v42 = vmul.f32 %v2325_v43, %v1357_v26 }
 0x148   : > { %1530 = vst.msk [vmem:[%s2345_s10 + $0x80] sm:$0xff] %vm286_vm2, %v1498_v14  ;;  %v1215_v29 = vadd.f32 %v1151_v17, %v340_v40  ;;  %v1224_v30 = vadd.f32 %v1188_v18, %v349_v12  ;;  %v1815_v35 = vadd.f32 %v1814_v24, %v1813_v1  ;;  %v1180_v9 = vadd.f32 %v2282_v31, %v1179_v27 }
 0x149   : > { %v1428_v6 = vmul.f32 %v2328_v50, %v1390_v20  ;;  %v1358_v44 = vadd.f32 %v2319_v28, %v1319_v16  ;;  %v1281_v37 = vld [vmem:[#allocation2 + $0x98] sm:$0xff]  ;;  %1252 = vst.msk [vmem:[#allocation2 + $0xc8] sm:$0xff] %vm286_vm2, %v1219_v22  ;;  %v1816_v41 = vpop.f32.mrf.mxu0  ;;  %v1905_v45 = vpop.f32.mrf.mxu1 }
 0x14a   : > { %v1320_v10 = vmul.f32 %v2313_v15, %v1281_v37  ;;  %1248 = vst.msk [vmem:[#allocation2 + $0xa8] sm:$0xff] %vm286_vm2, %v1215_v29  ;;  %1257 = vst.msk [vmem:[#allocation2 + $0xf0] sm:$0xff] %vm286_vm2, %v1224_v30  ;;  %v1156_v31 = vadd.f32 %v2414_v33, %v1815_v35  ;;  %v1222_v47 = vadd.f32 %v1180_v9, %v347_v25  ;;  %v1288_v56 = vld [vmem:[#allocation2 + $0xd0] sm:$0xff] }
 0x14b   : > { %v1191_v48 = vadd.f32 %v1905_v45, %v1842_v19  ;;  %v1499_v49 = vadd.f32 %v1467_v42, %v1428_v6  ;;  %v1391_v55 = vmax.f32 %v1358_v44, 0.0  ;;  %v1817_v57 = vpop.f32.mrf.mxu0  ;;  %v1327_v34 = vmul.f32 %v2313_v15, %v1288_v56  ;;  %v1182_v29 = vpop.f32.mrf.mxu1 }
 0x14c   : > { %v1359_v32 = vadd.f32 %v2319_v28, %v1320_v10  ;;  %v1216_v59 = vadd.f32 %v1156_v31, %v341_v39  ;;  %1255 = vst.msk [vmem:[#allocation2 + $0xe0] sm:$0xff] %vm286_vm2, %v1222_v47  ;;  %v1468_v33 = vmul.f32 %v2325_v43, %v1358_v44  ;;  %v1286_v21 = vld [vmem:[#allocation2 + $0xc0] sm:$0xff]  ;;  %v1818_v2 = vadd.f32 %v1817_v57, %v1816_v41 }
 0x14d   : > { %v1225_v60 = vadd.f32 %v1191_v48, %v350_v23  ;;  %1531 = vst.msk [vmem:[%s2345_s10 + $0x88] sm:$0xff] %vm286_vm2, %v1499_v49  ;;  %v1429_v61 = vmul.f32 %v2328_v50, %v1391_v55  ;;  %v1289_v62 = vld [vmem:[#allocation2 + $0xd8] sm:$0xff]  ;;  %v1366_v11 = vadd.f32 %v2319_v28, %v1327_v34  ;;  %v1325_v54 = vmul.f32 %v2313_v15, %v1286_v21  ;;  %v348_v21 = vld [vmem:[#allocation2 + $0xe8] sm:$0xff] }
 0x14e   : > { %v1392_v3 = vmax.f32 %v1359_v32, 0.0  ;;  %v1469_v4 = vmul.f32 %v2325_v43, %v1359_v32  ;;  %v1282_v5 = vld [vmem:[#allocation2 + $0xa0] sm:$0xff]  ;;  %1249 = vst.msk [vmem:[#allocation2 + $0xb0] sm:$0xff] %vm286_vm2, %v1216_v59  ;;  %v1328_v46 = vmul.f32 %v2313_v15, %v1289_v62  ;;  %v1159_v52 = vadd.f32 %v2428_v63, %v1818_v2 }
 0x14f   : > { %1258 = vst.msk [vmem:[#allocation2 + $0xf8] sm:$0xff] %vm286_vm2, %v1225_v60  ;;  %v1500_v0 = vadd.f32 %v1468_v33, %v1429_v61  ;;  %v1321_v8 = vmul.f32 %v2313_v15, %v1282_v5  ;;  %v1399_v26 = vmax.f32 %v1366_v11, 0.0  ;;  %v1476_v38 = vmul.f32 %v2325_v43, %v1366_v11 }
 0x150   : > { %v1430_v58 = vmul.f32 %v2328_v50, %v1392_v3  ;;  %v1364_v40 = vadd.f32 %v2319_v28, %v1325_v54  ;;  %v1287_v51 = vld [vmem:[#allocation2 + $0xc8] sm:$0xff]  ;;  %v1367_v12 = vadd.f32 %v2319_v28, %v1328_v46  ;;  %v1217_v53 = vadd.f32 %v1159_v52, %v342_v7 }
 0x151   : > { %1532 = vst.msk [vmem:[%s2345_s10 + $0x90] sm:$0xff] %vm286_vm2, %v1500_v0  ;;  %v1360_v1 = vadd.f32 %v2319_v28, %v1321_v8  ;;  %v1283_v13 = vld [vmem:[#allocation2 + $0xa8] sm:$0xff]  ;;  %v1326_v14 = vmul.f32 %v2313_v15, %v1287_v51  ;;  %v1437_v17 = vmul.f32 %v2328_v50, %v1399_v26  ;;  %v1292_v20 = vld [vmem:[#allocation2 + $0xf0] sm:$0xff]  ;;  %v1183_v47 = vadd.f32 %v2288_v36, %v1182_v29 }
 0x152   : > { %v1501_v63 = vadd.f32 %v1469_v4, %v1430_v58  ;;  %v1397_v18 = vmax.f32 %v1364_v40, 0.0  ;;  %v1474_v19 = vmul.f32 %v2325_v43, %v1364_v40  ;;  %v1400_v24 = vmax.f32 %v1367_v12, 0.0  ;;  %1250 = vst.msk [vmem:[#allocation2 + $0xb8] sm:$0xff] %vm286_vm2, %v1217_v53 }
 0x153   : > { %v1393_v16 = vmax.f32 %v1360_v1, 0.0  ;;  %v1470_v22 = vmul.f32 %v2325_v43, %v1360_v1  ;;  %v1477_v25 = vmul.f32 %v2325_v43, %v1367_v12  ;;  %v1290_v27 = vld [vmem:[#allocation2 + $0xe0] sm:$0xff]  ;;  %v1508_v30 = vadd.f32 %v1476_v38, %v1437_v17 }
 0x154   : > { %1533 = vst.msk [vmem:[%s2345_s10 + $0x98] sm:$0xff] %vm286_vm2, %v1501_v63  ;;  %v1435_v35 = vmul.f32 %v2328_v50, %v1397_v18  ;;  %v1322_v9 = vmul.f32 %v2313_v15, %v1283_v13  ;;  %v1365_v6 = vadd.f32 %v2319_v28, %v1326_v14  ;;  %v1438_v44 = vmul.f32 %v2328_v50, %v1400_v24 }
 0x155   : > { %v1431_v42 = vmul.f32 %v2328_v50, %v1393_v16  ;;  %v1331_v37 = vmul.f32 %v2313_v15, %v1292_v20  ;;  %v1284_v39 = vld [vmem:[#allocation2 + $0xb0] sm:$0xff]  ;;  %v1329_v41 = vmul.f32 %v2313_v15, %v1290_v27  ;;  %1540 = vst.msk [vmem:[%s2345_s10 + $0xd0] sm:$0xff] %vm286_vm2, %v1508_v30  ;;  %v1223_v58 = vadd.f32 %v1183_v47, %v348_v21 }
 0x156   : > { %v1506_v23 = vadd.f32 %v1474_v19, %v1435_v35  ;;  %v1361_v45 = vadd.f32 %v2319_v28, %v1322_v9  ;;  %v1398_v10 = vmax.f32 %v1365_v6, 0.0  ;;  %v1293_v31 = vld [vmem:[#allocation2 + $0xf8] sm:$0xff]  ;;  %v1509_v49 = vadd.f32 %v1477_v25, %v1438_v44 }
 0x157   : > { %v1502_v48 = vadd.f32 %v1470_v22, %v1431_v42  ;;  %v1370_v55 = vadd.f32 %v2319_v28, %v1331_v37  ;;  %v1323_v56 = vmul.f32 %v2313_v15, %v1284_v39  ;;  %v1475_v34 = vmul.f32 %v2325_v43, %v1365_v6  ;;  %1256 = vst.msk [vmem:[#allocation2 + $0xe8] sm:$0xff] %vm286_vm2, %v1223_v58 }
 0x158   : > { %1538 = vst.msk [vmem:[%s2345_s10 + $0xc0] sm:$0xff] %vm286_vm2, %v1506_v23  ;;  %v1394_v57 = vmax.f32 %v1361_v45, 0.0  ;;  %v1436_v32 = vmul.f32 %v2328_v50, %v1398_v10  ;;  %v1368_v59 = vadd.f32 %v2319_v28, %v1329_v41  ;;  %1541 = vst.msk [vmem:[%s2345_s10 + $0xd8] sm:$0xff] %vm286_vm2, %v1509_v49  ;;  %v1471_v36 = vmul.f32 %v2325_v43, %v1361_v45 }
 0x159   : > { %1534 = vst.msk [vmem:[%s2345_s10 + $0xa0] sm:$0xff] %vm286_vm2, %v1502_v48  ;;  %v1403_v60 = vmax.f32 %v1370_v55, 0.0  ;;  %v1362_v61 = vadd.f32 %v2319_v28, %v1323_v56  ;;  %v1332_v33 = vmul.f32 %v2313_v15, %v1293_v31  ;;  %v1480_v3 = vmul.f32 %v2325_v43, %v1370_v55  ;;  %v1285_v11 = vld [vmem:[#allocation2 + $0xb8] sm:$0xff] }
 0x15a   : > { %v1432_v62 = vmul.f32 %v2328_v50, %v1394_v57  ;;  %v1507_v2 = vadd.f32 %v1475_v34, %v1436_v32  ;;  %v1401_v4 = vmax.f32 %v1368_v59, 0.0  ;;  %v1478_v7 = vmul.f32 %v2325_v43, %v1368_v59 }
 0x15b   : > { %v1441_v5 = vmul.f32 %v2328_v50, %v1403_v60  ;;  %v1395_v54 = vmax.f32 %v1362_v61, 0.0  ;;  %v1371_v0 = vadd.f32 %v2319_v28, %v1332_v33  ;;  %v1324_v52 = vmul.f32 %v2313_v15, %v1285_v11 }
 0x15c   : > { %v1503_v8 = vadd.f32 %v1471_v36, %v1432_v62  ;;  %1539 = vst.msk [vmem:[%s2345_s10 + $0xc8] sm:$0xff] %vm286_vm2, %v1507_v2  ;;  %v1439_v46 = vmul.f32 %v2328_v50, %v1401_v4  ;;  %v1472_v40 = vmul.f32 %v2325_v43, %v1362_v61 }
 0x15d   : > { %v1512_v26 = vadd.f32 %v1480_v3, %v1441_v5  ;;  %v1433_v38 = vmul.f32 %v2328_v50, %v1395_v54  ;;  %v1404_v51 = vmax.f32 %v1371_v0, 0.0  ;;  %v1363_v12 = vadd.f32 %v2319_v28, %v1324_v52 }
 0x15e   : > { %1535 = vst.msk [vmem:[%s2345_s10 + $0xa8] sm:$0xff] %vm286_vm2, %v1503_v8  ;;  %v1510_v1 = vadd.f32 %v1478_v7, %v1439_v46  ;;  %v1481_v53 = vmul.f32 %v2325_v43, %v1371_v0  ;;  %v1291_v16 = vld [vmem:[#allocation2 + $0xe8] sm:$0xff] }
 0x15f   : > { %1544 = vst.msk [vmem:[%s2345_s10 + $0xf0] sm:$0xff] %vm286_vm2, %v1512_v26  ;;  %v1504_v13 = vadd.f32 %v1472_v40, %v1433_v38  ;;  %v1442_v14 = vmul.f32 %v2328_v50, %v1404_v51  ;;  %v1396_v63 = vmax.f32 %v1363_v12, 0.0  ;;  %v1473_v19 = vmul.f32 %v2325_v43, %v1363_v12 }
 0x160   : > { %1542 = vst.msk [vmem:[%s2345_s10 + $0xe0] sm:$0xff] %vm286_vm2, %v1510_v1  ;;  %v1330_v22 = vmul.f32 %v2313_v15, %v1291_v16 }
 0x161   : > { %1536 = vst.msk [vmem:[%s2345_s10 + $0xb0] sm:$0xff] %vm286_vm2, %v1504_v13  ;;  %v1513_v17 = vadd.f32 %v1481_v53, %v1442_v14  ;;  %v1434_v18 = vmul.f32 %v2328_v50, %v1396_v63 }
 0x162   : > { %v1369_v24 = vadd.f32 %v2319_v28, %v1330_v22 }
 0x163   : > { %1545 = vst.msk [vmem:[%s2345_s10 + $0xf8] sm:$0xff] %vm286_vm2, %v1513_v17  ;;  %v1505_v20 = vadd.f32 %v1473_v19, %v1434_v18 }
 0x164   : > { %v1402_v25 = vmax.f32 %v1369_v24, 0.0  ;;  %v1479_v29 = vmul.f32 %v2325_v43, %v1369_v24 }
 0x165   : > { %1537 = vst.msk [vmem:[%s2345_s10 + $0xb8] sm:$0xff] %vm286_vm2, %v1505_v20 }
 0x166   : > { %v1440_v27 = vmul.f32 %v2328_v50, %v1402_v25 }
 0x168   : > { %v1511_v30 = vadd.f32 %v1479_v29, %v1440_v27 }
 0x16a   : > { %1543 = vst.msk [vmem:[%s2345_s10 + $0xe8] sm:$0xff] %vm286_vm2, %v1511_v30 }
 0x16b PF: > { %s15_s20 = sadd.s32 1, %s2056_s20   ;;  %s2602_s18 = smov %s2052_s19 }
 0x16c   : > { %p12_p5 = scmp.ge.s32.totalorder %s15_s20, 4   ;;  %s2603_s19 = smov %s2605_s21 }
 0x16e   :  { %14 = sbr.rel (!%p12_p5) target bundleno = 2 (0x2), region = 81 }

// kernel: inception_forward.15
= control target key start
LH: loop header
LB: loop body
LE: loop exit
PB: predicated region body
PF: predicated region fallthrough
CT: control target
= control target key end

     0   :  { %vm25_vm0 = vcmask 785408   ;;  %v247_v1 = vmov 0.0   ;;  %vm80_vm1 = vcmask 523264   ;;  %v180_v11 = vlaneseq  ;;  %s329_s1 = inlined_call_operand.vmem [shape: bf16[64,96], index: 1, kind: input, shape index: {}]   ;;  %s330_s0 = inlined_call_operand.vmem [shape: bf16[32,64], index: 0, kind: input, shape index: {}]   ;;  %s331_s4 = inlined_call_operand.vmem [shape: f32[1,96], index: 4, kind: input, shape index: {}]   ;;  %s332_s2 = inlined_call_operand.vmem [shape: f32[1,96], index: 2, kind: input, shape index: {}]   ;;  %s333_s3 = inlined_call_operand.vmem [shape: f32[1,96], index: 3, kind: input, shape index: {}]   ;;  %s334_s5 = inlined_call_operand.vmem [shape: f32[32,96], index: 5, kind: output, shape index: {}]  }
   0x1   :  { %v241_v0 = vld [vmem:[%s329_s1 + $0x18] sm:$0xff]   ;;  %28 = vst.msk [vmem:[#allocation2 + $0x10] sm:$0xff] %vm25_vm0, %v247_v1  ;;  %26 = vst.msk [vmem:[#allocation2] sm:$0xff] %vm25_vm0, %v247_v1  ;;  %v242_v2 = vld [vmem:[%s329_s1 + $0x10] sm:$0xff]  }
   0x2   :  { %27 = vst.msk [vmem:[#allocation2 + $0x8] sm:$0xff] %vm25_vm0, %v247_v1  ;;  %29 = vst.msk [vmem:[#allocation2 + $0x18] sm:$0xff] %vm25_vm0, %v247_v1  ;;  %228 = vmatprep.subr.bf16.mxu0 %v241_v0  ;;  %v243_v3 = vld [vmem:[%s329_s1 + $0x8] sm:$0xff]   ;;  %v245_v4 = vld [vmem:[%s330_s0] sm:$0xff]   ;;  %v181_v17 = vshrl.u32 %v180_v11, 7 }
   0x3   :  { %229 = vmatpush3.bf16.msra.mxu0 %v241_v0  ;;  %236 = vmatprep.mubr.msk.bf16.mxu0 %vm80_vm1, %v245_v4  ;;  %v244_v5 = vld [vmem:[%s329_s1] sm:$0xff]   ;;  %v246_v6 = vld [vmem:[%s330_s0 + $0x8] sm:$0xff]  }
   0x4   :  { %230 = vmatprep.subr.bf16.mxu0 %v242_v2  ;;  %v174_v19 = vld [vmem:[%s331_s4] sm:$0x1]  ;;  %v182_v23 = vsub.s32 0, %v181_v17 }
   0x5   :  { %v220_v22 = vld [vmem:[%s332_s2] ss:$0 sm:$0xff]  ;;  %v189_v24 = vsub.f32 1.0, %v174_v19 }
   0x6   :  { %v221_v26 = vld [vmem:[%s333_s3] ss:$0 sm:$0xff]  ;;  %v183_v30 = vrot.slane %v174_v19, %v182_v23 }
   0x7   :  { %231 = vmatpush3.bf16.msra.mxu0 %v242_v2  ;;  %v194_v31 = vrot.slane %v189_v24, %v182_v23 }
   0x8   :  { %232 = vmatprep.subr.bf16.mxu0 %v243_v3  ;;  %v32_v7 = vld [vmem:[#allocation2 + $0x10] sm:$0xff]  ;;  %v30_v9 = vld [vmem:[#allocation2] sm:$0xff] }
   0x9   :  { %v33_v13 = vld [vmem:[#allocation2 + $0x18] sm:$0xff]  ;;  %v31_v16 = vld [vmem:[#allocation2 + $0x8] sm:$0xff] }
   0xb   :  { %233 = vmatpush3.bf16.msra.mxu0 %v243_v3 }
   0xc   :  { %234 = vmatprep.subr.bf16.mxu0 %v244_v5 }
   0xf   :  { %235 = vmatpush3.bf16.msra.mxu0 %v244_v5 }
  0x12   :  { %237 = vmatmul.mubr.msk.bf16.vlgmr.msra.gmra.mxu0 %vm80_vm1, %v246_v6 }
  0xd2   :  { %v238_v8 = vpop.f32.mrf.mxu0 }
  0xd3   :  { %v138_v10 = vadd.f32 %v238_v8, %v32_v7 }
  0xd4   :  { %v121_v12 = vpop.f32.mrf.mxu0 }
  0xd5   :  { %143 = vst.msk [vmem:[#allocation2 + $0x10] sm:$0xff] %vm25_vm0, %v138_v10  ;;  %v136_v14 = vadd.f32 %v121_v12, %v30_v9 }
  0xd6   :  { %v239_v15 = vpop.f32.mrf.mxu0 }
  0xd7   :  { %141 = vst.msk [vmem:[#allocation2] sm:$0xff] %vm25_vm0, %v136_v14  ;;  %v139_v18 = vadd.f32 %v239_v15, %v33_v13 }
  0xd8   :  { %v124_v20 = vpop.f32.mrf.mxu0 }
  0xd9   :  { %144 = vst.msk [vmem:[#allocation2 + $0x18] sm:$0xff] %vm25_vm0, %v139_v18  ;;  %v137_v21 = vadd.f32 %v124_v20, %v31_v16 }
  0xdb   :  { %142 = vst.msk [vmem:[#allocation2 + $0x8] sm:$0xff] %vm25_vm0, %v137_v21 }
  0xdc   :  { %v150_v25 = vld [vmem:[#allocation2 + $0x10] sm:$0xff] }
  0xdd   :  { %v161_v27 = vmul.f32 %v220_v22, %v150_v25 }
  0xde   :  { %v148_v28 = vld [vmem:[#allocation2] sm:$0xff] }
  0xdf   :  { %v172_v29 = vadd.f32 %v221_v26, %v161_v27  ;;  %v159_v32 = vmul.f32 %v220_v22, %v148_v28 }
  0xe0   :  { %v151_v33 = vld [vmem:[#allocation2 + $0x18] sm:$0xff] }
  0xe1   :  { %v177_v34 = vmax.f32 %v172_v29, 0.0  ;;  %v170_v35 = vadd.f32 %v221_v26, %v159_v32  ;;  %v162_v36 = vmul.f32 %v220_v22, %v151_v33  ;;  %v198_v39 = vmul.f32 %v194_v31, %v172_v29 }
  0xe2   :  { %v149_v37 = vld [vmem:[#allocation2 + $0x8] sm:$0xff] }
  0xe3   :  { %v187_v38 = vmul.f32 %v183_v30, %v177_v34  ;;  %v175_v40 = vmax.f32 %v170_v35, 0.0  ;;  %v173_v41 = vadd.f32 %v221_v26, %v162_v36  ;;  %v160_v42 = vmul.f32 %v220_v22, %v149_v37 }
  0xe4   :  { %v196_v45 = vmul.f32 %v194_v31, %v170_v35 }
  0xe5   :  { %v202_v43 = vadd.f32 %v198_v39, %v187_v38  ;;  %v185_v44 = vmul.f32 %v183_v30, %v175_v40  ;;  %v178_v46 = vmax.f32 %v173_v41, 0.0  ;;  %v171_v47 = vadd.f32 %v221_v26, %v160_v42 }
  0xe6   :  { %v199_v50 = vmul.f32 %v194_v31, %v173_v41 }
  0xe7   :  { %206 = vst.msk [vmem:[%s334_s5 + $0x10] sm:$0xff] %vm25_vm0, %v202_v43  ;;  %v200_v48 = vadd.f32 %v196_v45, %v185_v44  ;;  %v188_v49 = vmul.f32 %v183_v30, %v178_v46  ;;  %v176_v51 = vmax.f32 %v171_v47, 0.0  ;;  %v197_v54 = vmul.f32 %v194_v31, %v171_v47 }
  0xe9   :  { %204 = vst.msk [vmem:[%s334_s5] sm:$0xff] %vm25_vm0, %v200_v48  ;;  %v203_v52 = vadd.f32 %v199_v50, %v188_v49  ;;  %v186_v53 = vmul.f32 %v183_v30, %v176_v51 }
  0xeb   :  { %207 = vst.msk [vmem:[%s334_s5 + $0x18] sm:$0xff] %vm25_vm0, %v203_v52  ;;  %v201_v55 = vadd.f32 %v197_v54, %v186_v53 }
  0xed   :  { %205 = vst.msk [vmem:[%s334_s5 + $0x8] sm:$0xff] %vm25_vm0, %v201_v55 }

// kernel: inception_forward.14
= control target key start
LH: loop header
LB: loop body
LE: loop exit
PB: predicated region body
PF: predicated region fallthrough
CT: control target
= control target key end

     0   :  { %vm1386_vm0 = vcmask 516096   ;;  %s4223_s0 = inlined_call_operand.vmem [shape: f32[2,18,18,1,64], index: 0, kind: input, shape index: {}]   ;;  %s4224_s1 = inlined_call_operand.vmem [shape: f32[2,8,8,1,64], index: 1, kind: output, shape index: {}]  }
   0x1   :  { %v8_v0 = vld [vmem:[%s4223_s0] sm:$0x1]  ;;  %v9_v1 = vld [vmem:[%s4223_s0 + $0x1] sm:$0x1]  ;;  %v10_v2 = vld [vmem:[%s4223_s0 + $0x2] sm:$0x1] }
   0x2   :  { %v25_v3 = vld [vmem:[%s4223_s0 + $0x12] sm:$0x1]  ;;  %v26_v4 = vld [vmem:[%s4223_s0 + $0x13] sm:$0x1]  ;;  %v27_v5 = vld [vmem:[%s4223_s0 + $0x14] sm:$0x1]  ;;  %v586_v6 = vmax.f32 %v8_v0, %v9_v1 }
   0x3   :  { %v42_v7 = vld [vmem:[%s4223_s0 + $0x24] sm:$0x1]  ;;  %v43_v8 = vld [vmem:[%s4223_s0 + $0x25] sm:$0x1]  ;;  %v44_v9 = vld [vmem:[%s4223_s0 + $0x26] sm:$0x1]  ;;  %v594_v10 = vmax.f32 %v25_v3, %v26_v4 }
   0x4   :  { %v602_v11 = vmax.f32 %v42_v7, %v43_v8  ;;  %v858_v12 = vmax.f32 %v586_v6, %v10_v2  ;;  %v11_v13 = vld [vmem:[%s4223_s0 + $0x3] sm:$0x1]  ;;  %v12_v14 = vld [vmem:[%s4223_s0 + $0x4] sm:$0x1]  ;;  %v28_v15 = vld [vmem:[%s4223_s0 + $0x15] sm:$0x1] }
   0x5   :  { %v866_v16 = vmax.f32 %v594_v10, %v27_v5  ;;  %v29_v17 = vld [vmem:[%s4223_s0 + $0x16] sm:$0x1]  ;;  %v45_v18 = vld [vmem:[%s4223_s0 + $0x27] sm:$0x1]  ;;  %v46_v19 = vld [vmem:[%s4223_s0 + $0x28] sm:$0x1]  ;;  %v587_v20 = vmax.f32 %v10_v2, %v11_v13  ;;  %v595_v21 = vmax.f32 %v27_v5, %v28_v15 }
   0x6   :  { %v1574_v22 = vmax.f32 %v602_v11, %v44_v9  ;;  %v603_v23 = vmax.f32 %v44_v9, %v45_v18  ;;  %v13_v24 = vld [vmem:[%s4223_s0 + $0x5] sm:$0x1]  ;;  %v14_v25 = vld [vmem:[%s4223_s0 + $0x6] sm:$0x1]  ;;  %v30_v26 = vld [vmem:[%s4223_s0 + $0x17] sm:$0x1] }
   0x7   :  { %v1130_v27 = vmax.f32 %v858_v12, %v866_v16  ;;  %v859_v28 = vmax.f32 %v587_v20, %v12_v14  ;;  %v867_v29 = vmax.f32 %v595_v21, %v29_v17  ;;  %v31_v30 = vld [vmem:[%s4223_s0 + $0x18] sm:$0x1]  ;;  %v47_v31 = vld [vmem:[%s4223_s0 + $0x29] sm:$0x1]  ;;  %v48_v32 = vld [vmem:[%s4223_s0 + $0x2a] sm:$0x1]  ;;  %v588_v33 = vmax.f32 %v12_v14, %v13_v24 }
   0x8   :  { %v1594_v34 = vmax.f32 %v603_v23, %v46_v19  ;;  %v596_v35 = vmax.f32 %v29_v17, %v30_v26  ;;  %v604_v36 = vmax.f32 %v46_v19, %v47_v31  ;;  %v15_v37 = vld [vmem:[%s4223_s0 + $0x7] sm:$0x1]  ;;  %v16_v38 = vld [vmem:[%s4223_s0 + $0x8] sm:$0x1]  ;;  %v32_v39 = vld [vmem:[%s4223_s0 + $0x19] sm:$0x1] }
   0x9   :  { %v1258_v40 = vmax.f32 %v1130_v27, %v1574_v22  ;;  %v1131_v41 = vmax.f32 %v859_v28, %v867_v29  ;;  %v860_v42 = vmax.f32 %v588_v33, %v14_v25  ;;  %v33_v43 = vld [vmem:[%s4223_s0 + $0x1a] sm:$0x1]  ;;  %v49_v44 = vld [vmem:[%s4223_s0 + $0x2b] sm:$0x1]  ;;  %v50_v45 = vld [vmem:[%s4223_s0 + $0x2c] sm:$0x1]  ;;  %v589_v46 = vmax.f32 %v14_v25, %v15_v37 }
   0xa   :  { %v868_v47 = vmax.f32 %v596_v35, %v31_v30  ;;  %v1615_v48 = vmax.f32 %v604_v36, %v48_v32  ;;  %v597_v49 = vmax.f32 %v31_v30, %v32_v39  ;;  %v605_v50 = vmax.f32 %v48_v32, %v49_v44  ;;  %v17_v51 = vld [vmem:[%s4223_s0 + $0x9] sm:$0x1]  ;;  %v18_v52 = vld [vmem:[%s4223_s0 + $0xa] sm:$0x1]  ;;  %v34_v53 = vld [vmem:[%s4223_s0 + $0x1b] sm:$0x1] }
   0xb   :  { %1387 = vst.msk [vmem:[%s4224_s1] sm:$0x1] %vm1386_vm0, %v1258_v40  ;;  %v1259_v54 = vmax.f32 %v1131_v41, %v1594_v34  ;;  %v861_v55 = vmax.f32 %v589_v46, %v16_v38  ;;  %v35_v56 = vld [vmem:[%s4223_s0 + $0x1c] sm:$0x1]  ;;  %v51_v57 = vld [vmem:[%s4223_s0 + $0x2d] sm:$0x1]  ;;  %v590_v59 = vmax.f32 %v16_v38, %v17_v51  ;;  %v598_v60 = vmax.f32 %v33_v43, %v34_v53 }
   0xc   :  { %v52_v58 = vld [vmem:[%s4223_s0 + $0x2e] sm:$0x1]  ;;  %v1132_v61 = vmax.f32 %v860_v42, %v868_v47  ;;  %v869_v62 = vmax.f32 %v597_v49, %v33_v43  ;;  %v1640_v63 = vmax.f32 %v605_v50, %v50_v45  ;;  %v606_v0 = vmax.f32 %v50_v45, %v51_v57  ;;  %v19_v1 = vld [vmem:[%s4223_s0 + $0xb] sm:$0x1]  ;;  %v20_v2 = vld [vmem:[%s4223_s0 + $0xc] sm:$0x1] }
   0xd   :  { %v36_v3 = vld [vmem:[%s4223_s0 + $0x1d] sm:$0x1]  ;;  %1388 = vst.msk [vmem:[%s4224_s1 + $0x1] sm:$0x1] %vm1386_vm0, %v1259_v54  ;;  %v862_v4 = vmax.f32 %v590_v59, %v18_v52  ;;  %v870_v5 = vmax.f32 %v598_v60, %v35_v56  ;;  %v37_v6 = vld [vmem:[%s4223_s0 + $0x1e] sm:$0x1]  ;;  %v591_v9 = vmax.f32 %v18_v52, %v19_v1 }
   0xe   :  { %v53_v7 = vld [vmem:[%s4223_s0 + $0x2f] sm:$0x1]  ;;  %v54_v8 = vld [vmem:[%s4223_s0 + $0x30] sm:$0x1]  ;;  %v599_v10 = vmax.f32 %v35_v56, %v36_v3  ;;  %v1260_v11 = vmax.f32 %v1132_v61, %v1615_v48  ;;  %v1133_v12 = vmax.f32 %v861_v55, %v869_v62  ;;  %v1665_v13 = vmax.f32 %v606_v0, %v52_v58  ;;  %v21_v15 = vld [vmem:[%s4223_s0 + $0xd] sm:$0x1] }
   0xf   :  { %v607_v14 = vmax.f32 %v52_v58, %v53_v7  ;;  %v22_v16 = vld [vmem:[%s4223_s0 + $0xe] sm:$0x1]  ;;  %v38_v17 = vld [vmem:[%s4223_s0 + $0x1f] sm:$0x1]  ;;  %v1134_v18 = vmax.f32 %v862_v4, %v870_v5  ;;  %v863_v19 = vmax.f32 %v591_v9, %v20_v2  ;;  %v39_v21 = vld [vmem:[%s4223_s0 + $0x20] sm:$0x1]  ;;  %v592_v25 = vmax.f32 %v20_v2, %v21_v15 }
  0x10   :  { %v871_v20 = vmax.f32 %v599_v10, %v37_v6  ;;  %v55_v23 = vld [vmem:[%s4223_s0 + $0x31] sm:$0x1]  ;;  %v56_v24 = vld [vmem:[%s4223_s0 + $0x32] sm:$0x1]  ;;  %1389 = vst.msk [vmem:[%s4224_s1 + $0x2] sm:$0x1] %vm1386_vm0, %v1260_v11  ;;  %v1261_v26 = vmax.f32 %v1133_v12, %v1640_v63  ;;  %v600_v28 = vmax.f32 %v37_v6, %v38_v17 }
  0x11   :  { %v1690_v27 = vmax.f32 %v607_v14, %v54_v8  ;;  %v608_v29 = vmax.f32 %v54_v8, %v55_v23  ;;  %v23_v30 = vld [vmem:[%s4223_s0 + $0xf] sm:$0x1]  ;;  %v24_v31 = vld [vmem:[%s4223_s0 + $0x10] sm:$0x1]  ;;  %v40_v32 = vld [vmem:[%s4223_s0 + $0x21] sm:$0x1]  ;;  %v1262_v33 = vmax.f32 %v1134_v18, %v1665_v13  ;;  %v864_v36 = vmax.f32 %v592_v25, %v22_v16 }
  0x12   :  { %v1135_v35 = vmax.f32 %v863_v19, %v871_v20  ;;  %v41_v37 = vld [vmem:[%s4223_s0 + $0x22] sm:$0x1]  ;;  %v57_v38 = vld [vmem:[%s4223_s0 + $0x33] sm:$0x1]  ;;  %v58_v39 = vld [vmem:[%s4223_s0 + $0x34] sm:$0x1]  ;;  %v593_v40 = vmax.f32 %v22_v16, %v23_v30  ;;  %v872_v41 = vmax.f32 %v600_v28, %v39_v21  ;;  %v601_v42 = vmax.f32 %v39_v21, %v40_v32 }
  0x13   :  { %1390 = vst.msk [vmem:[%s4224_s1 + $0x3] sm:$0x1] %vm1386_vm0, %v1261_v26  ;;  %v609_v43 = vmax.f32 %v56_v24, %v57_v38  ;;  %v59_v44 = vld [vmem:[%s4223_s0 + $0x36] sm:$0x1]  ;;  %v60_v45 = vld [vmem:[%s4223_s0 + $0x37] sm:$0x1]  ;;  %v1738_v54 = vmax.f32 %v608_v29, %v56_v24 }
  0x14   :  { %v61_v46 = vld [vmem:[%s4223_s0 + $0x38] sm:$0x1]  ;;  %1391 = vst.msk [vmem:[%s4224_s1 + $0x4] sm:$0x1] %vm1386_vm0, %v1262_v33  ;;  %v1263_v47 = vmax.f32 %v1135_v35, %v1690_v27  ;;  %v865_v49 = vmax.f32 %v593_v40, %v24_v31  ;;  %v76_v50 = vld [vmem:[%s4223_s0 + $0x48] sm:$0x1]  ;;  %v610_v53 = vmax.f32 %v59_v44, %v60_v45  ;;  %v1136_v55 = vmax.f32 %v864_v36, %v872_v41 }
  0x15   :  { %v77_v51 = vld [vmem:[%s4223_s0 + $0x49] sm:$0x1]  ;;  %v78_v52 = vld [vmem:[%s4223_s0 + $0x4a] sm:$0x1]  ;;  %v873_v56 = vmax.f32 %v601_v42, %v41_v37  ;;  %v62_v58 = vld [vmem:[%s4223_s0 + $0x39] sm:$0x1]  ;;  %v1753_v61 = vmax.f32 %v609_v43, %v58_v39 }
  0x16   :  { %v618_v57 = vmax.f32 %v76_v50, %v77_v51  ;;  %v63_v59 = vld [vmem:[%s4223_s0 + $0x3a] sm:$0x1]  ;;  %v79_v60 = vld [vmem:[%s4223_s0 + $0x4b] sm:$0x1]  ;;  %1392 = vst.msk [vmem:[%s4224_s1 + $0x5] sm:$0x1] %vm1386_vm0, %v1263_v47  ;;  %v882_v62 = vmax.f32 %v610_v53, %v61_v46  ;;  %v611_v1 = vmax.f32 %v61_v46, %v62_v58  ;;  %v1264_v5 = vmax.f32 %v1136_v55, %v1738_v54 }
  0x17   :  { %v80_v0 = vld [vmem:[%s4223_s0 + $0x4c] sm:$0x1]  ;;  %v619_v2 = vmax.f32 %v78_v52, %v79_v60  ;;  %v64_v3 = vld [vmem:[%s4223_s0 + $0x3b] sm:$0x1]  ;;  %v65_v4 = vld [vmem:[%s4223_s0 + $0x3c] sm:$0x1]  ;;  %v1137_v6 = vmax.f32 %v865_v49, %v873_v56 }
  0x18   :  { %v1765_v7 = vmax.f32 %v618_v57, %v78_v52  ;;  %v81_v8 = vld [vmem:[%s4223_s0 + $0x4d] sm:$0x1]  ;;  %v82_v9 = vld [vmem:[%s4223_s0 + $0x4e] sm:$0x1]  ;;  %v612_v10 = vmax.f32 %v63_v59, %v64_v3  ;;  %v66_v11 = vld [vmem:[%s4223_s0 + $0x3d] sm:$0x1]  ;;  %v1138_v12 = vmax.f32 %v1574_v22, %v882_v62  ;;  %v883_v14 = vmax.f32 %v611_v1, %v63_v59 }
  0x19   :  { %v1777_v15 = vmax.f32 %v619_v2, %v80_v0  ;;  %v620_v16 = vmax.f32 %v80_v0, %v81_v8  ;;  %v67_v17 = vld [vmem:[%s4223_s0 + $0x3e] sm:$0x1]  ;;  %v83_v18 = vld [vmem:[%s4223_s0 + $0x4f] sm:$0x1]  ;;  %v84_v19 = vld [vmem:[%s4223_s0 + $0x50] sm:$0x1]  ;;  %v1265_v22 = vmax.f32 %v1137_v6, %v1753_v61  ;;  %v613_v21 = vmax.f32 %v65_v4, %v66_v11 }
  0x1a   :  { %1393 = vst.msk [vmem:[%s4224_s1 + $0x6] sm:$0x1] %vm1386_vm0, %v1264_v5  ;;  %v884_v20 = vmax.f32 %v612_v10, %v65_v4  ;;  %v621_v23 = vmax.f32 %v82_v9, %v83_v18  ;;  %v68_v24 = vld [vmem:[%s4223_s0 + $0x3f] sm:$0x1]  ;;  %v69_v25 = vld [vmem:[%s4223_s0 + $0x40] sm:$0x1]  ;;  %v1266_v28 = vmax.f32 %v1138_v12, %v1765_v7  ;;  %v1139_v29 = vmax.f32 %v1594_v34, %v883_v14 }
  0x1b   :  { %v85_v26 = vld [vmem:[%s4223_s0 + $0x51] sm:$0x1]  ;;  %v1804_v30 = vmax.f32 %v620_v16, %v82_v9  ;;  %v86_v31 = vld [vmem:[%s4223_s0 + $0x52] sm:$0x1]  ;;  %v614_v32 = vmax.f32 %v67_v17, %v68_v24  ;;  %v70_v33 = vld [vmem:[%s4223_s0 + $0x41] sm:$0x1]  ;;  %v885_v36 = vmax.f32 %v613_v21, %v67_v17 }
  0x1c   :  { %v71_v35 = vld [vmem:[%s4223_s0 + $0x42] sm:$0x1]  ;;  %1394 = vst.msk [vmem:[%s4224_s1 + $0x7] sm:$0x1] %vm1386_vm0, %v1265_v22  ;;  %v1140_v34 = vmax.f32 %v1615_v48, %v884_v20  ;;  %v1820_v37 = vmax.f32 %v621_v23, %v84_v19  ;;  %v622_v38 = vmax.f32 %v84_v19, %v85_v26  ;;  %v87_v39 = vld [vmem:[%s4223_s0 + $0x53] sm:$0x1]  ;;  %v1267_v48 = vmax.f32 %v1139_v29, %v1777_v15 }
  0x1d   :  { %v88_v40 = vld [vmem:[%s4223_s0 + $0x54] sm:$0x1]  ;;  %v72_v41 = vld [vmem:[%s4223_s0 + $0x43] sm:$0x1]  ;;  %1395 = vst.msk [vmem:[%s4224_s1 + $0x8] sm:$0x1] %vm1386_vm0, %v1266_v28  ;;  %v886_v42 = vmax.f32 %v614_v32, %v69_v25  ;;  %v615_v43 = vmax.f32 %v69_v25, %v70_v33  ;;  %v623_v44 = vmax.f32 %v86_v31, %v87_v39  ;;  %v1141_v50 = vmax.f32 %v1640_v63, %v885_v36 }
  0x1e   :  { %v73_v45 = vld [vmem:[%s4223_s0 + $0x44] sm:$0x1]  ;;  %v89_v46 = vld [vmem:[%s4223_s0 + $0x55] sm:$0x1]  ;;  %v90_v47 = vld [vmem:[%s4223_s0 + $0x56] sm:$0x1]  ;;  %v1268_v49 = vmax.f32 %v1140_v34, %v1804_v30  ;;  %v1847_v51 = vmax.f32 %v622_v38, %v86_v31  ;;  %v616_v52 = vmax.f32 %v71_v35, %v72_v41 }
  0x1f   :  { %v74_v53 = vld [vmem:[%s4223_s0 + $0x45] sm:$0x1]  ;;  %v75_v55 = vld [vmem:[%s4223_s0 + $0x46] sm:$0x1]  ;;  %v91_v56 = vld [vmem:[%s4223_s0 + $0x57] sm:$0x1]  ;;  %v1142_v63 = vmax.f32 %v1665_v13, %v886_v42  ;;  %v887_v57 = vmax.f32 %v615_v43, %v71_v35  ;;  %v1863_v58 = vmax.f32 %v623_v44, %v88_v40  ;;  %v624_v59 = vmax.f32 %v88_v40, %v89_v46 }
  0x20   :  { %1396 = vst.msk [vmem:[%s4224_s1 + $0x9] sm:$0x1] %vm1386_vm0, %v1267_v48  ;;  %v92_v60 = vld [vmem:[%s4223_s0 + $0x58] sm:$0x1]  ;;  %v93_v62 = vld [vmem:[%s4223_s0 + $0x5a] sm:$0x1]  ;;  %v1269_v13 = vmax.f32 %v1141_v50, %v1820_v37  ;;  %v888_v1 = vmax.f32 %v616_v52, %v73_v45  ;;  %v617_v2 = vmax.f32 %v73_v45, %v74_v53  ;;  %v625_v3 = vmax.f32 %v90_v47, %v91_v56 }
  0x21   :  { %v94_v0 = vld [vmem:[%s4223_s0 + $0x5b] sm:$0x1]  ;;  %1397 = vst.msk [vmem:[%s4224_s1 + $0xa] sm:$0x1] %vm1386_vm0, %v1268_v49  ;;  %v95_v4 = vld [vmem:[%s4223_s0 + $0x5c] sm:$0x1]  ;;  %v1270_v8 = vmax.f32 %v1142_v63, %v1847_v51  ;;  %v1143_v9 = vmax.f32 %v1690_v27, %v887_v57  ;;  %v1890_v10 = vmax.f32 %v624_v59, %v90_v47 }
  0x22   :  { %v110_v5 = vld [vmem:[%s4223_s0 + $0x6c] sm:$0x1]  ;;  %v111_v6 = vld [vmem:[%s4223_s0 + $0x6d] sm:$0x1]  ;;  %v112_v11 = vld [vmem:[%s4223_s0 + $0x6e] sm:$0x1]  ;;  %v626_v12 = vmax.f32 %v93_v62, %v94_v0  ;;  %v1144_v27 = vmax.f32 %v1738_v54, %v888_v1  ;;  %v889_v17 = vmax.f32 %v617_v2, %v75_v55  ;;  %v1906_v18 = vmax.f32 %v625_v3, %v92_v60 }
  0x23   :  { %v96_v14 = vld [vmem:[%s4223_s0 + $0x5d] sm:$0x1]  ;;  %v97_v16 = vld [vmem:[%s4223_s0 + $0x5e] sm:$0x1]  ;;  %1398 = vst.msk [vmem:[%s4224_s1 + $0xb] sm:$0x1] %vm1386_vm0, %v1269_v13  ;;  %v634_v19 = vmax.f32 %v110_v5, %v111_v6  ;;  %v1271_v54 = vmax.f32 %v1143_v9, %v1863_v58 }
  0x24   :  { %v113_v22 = vld [vmem:[%s4223_s0 + $0x6f] sm:$0x1]  ;;  %v114_v20 = vld [vmem:[%s4223_s0 + $0x70] sm:$0x1]  ;;  %v98_v21 = vld [vmem:[%s4223_s0 + $0x5f] sm:$0x1]  ;;  %v898_v23 = vmax.f32 %v626_v12, %v95_v4  ;;  %v627_v24 = vmax.f32 %v95_v4, %v96_v14  ;;  %v1272_v31 = vmax.f32 %v1144_v27, %v1890_v10  ;;  %v1145_v32 = vmax.f32 %v1753_v61, %v889_v17 }
  0x25   :  { %1399 = vst.msk [vmem:[%s4224_s1 + $0xc] sm:$0x1] %vm1386_vm0, %v1270_v8  ;;  %v635_v25 = vmax.f32 %v112_v11, %v113_v22  ;;  %v99_v26 = vld [vmem:[%s4223_s0 + $0x60] sm:$0x1]  ;;  %v115_v28 = vld [vmem:[%s4223_s0 + $0x71] sm:$0x1]  ;;  %v1933_v33 = vmax.f32 %v634_v19, %v112_v11  ;;  %v628_v35 = vmax.f32 %v97_v16, %v98_v21 }
  0x26   :  { %v116_v29 = vld [vmem:[%s4223_s0 + $0x72] sm:$0x1]  ;;  %v100_v34 = vld [vmem:[%s4223_s0 + $0x61] sm:$0x1]  ;;  %v101_v36 = vld [vmem:[%s4223_s0 + $0x62] sm:$0x1]  ;;  %v1146_v61 = vmax.f32 %v1765_v7, %v898_v23  ;;  %v899_v39 = vmax.f32 %v627_v24, %v97_v16  ;;  %v636_v41 = vmax.f32 %v114_v20, %v115_v28  ;;  %v1273_v7 = vmax.f32 %v1145_v32, %v1906_v18 }
  0x27   :  { %v117_v38 = vld [vmem:[%s4223_s0 + $0x73] sm:$0x1]  ;;  %1400 = vst.msk [vmem:[%s4224_s1 + $0xd] sm:$0x1] %vm1386_vm0, %v1271_v54  ;;  %v1949_v40 = vmax.f32 %v635_v25, %v114_v20  ;;  %v118_v48 = vld [vmem:[%s4223_s0 + $0x74] sm:$0x1]  ;;  %v900_v44 = vmax.f32 %v628_v35, %v99_v26  ;;  %v629_v45 = vmax.f32 %v99_v26, %v100_v34 }
  0x28   :  { %v102_v42 = vld [vmem:[%s4223_s0 + $0x63] sm:$0x1]  ;;  %v103_v43 = vld [vmem:[%s4223_s0 + $0x64] sm:$0x1]  ;;  %1401 = vst.msk [vmem:[%s4224_s1 + $0xe] sm:$0x1] %vm1386_vm0, %v1272_v31  ;;  %v637_v46 = vmax.f32 %v116_v29, %v117_v38  ;;  %v1274_v52 = vmax.f32 %v1146_v61, %v1933_v33  ;;  %v1147_v53 = vmax.f32 %v1777_v15, %v899_v39  ;;  %v1976_v55 = vmax.f32 %v636_v41, %v116_v29 }
  0x29   :  { %v119_v47 = vld [vmem:[%s4223_s0 + $0x75] sm:$0x1]  ;;  %v120_v49 = vld [vmem:[%s4223_s0 + $0x76] sm:$0x1]  ;;  %v104_v50 = vld [vmem:[%s4223_s0 + $0x65] sm:$0x1]  ;;  %v630_v56 = vmax.f32 %v101_v36, %v102_v42  ;;  %v1148_v15 = vmax.f32 %v1804_v30, %v900_v44  ;;  %v901_v60 = vmax.f32 %v629_v45, %v101_v36 }
  0x2a   :  { %v105_v63 = vld [vmem:[%s4223_s0 + $0x66] sm:$0x1]  ;;  %v121_v57 = vld [vmem:[%s4223_s0 + $0x77] sm:$0x1]  ;;  %v122_v59 = vld [vmem:[%s4223_s0 + $0x78] sm:$0x1]  ;;  %v1992_v62 = vmax.f32 %v637_v46, %v118_v48  ;;  %v638_v0 = vmax.f32 %v118_v48, %v119_v47  ;;  %v1275_v30 = vmax.f32 %v1147_v53, %v1949_v40  ;;  %v631_v4 = vmax.f32 %v103_v43, %v104_v50 }
  0x2b   :  { %1402 = vst.msk [vmem:[%s4224_s1 + $0xf] sm:$0x1] %vm1386_vm0, %v1273_v7  ;;  %v106_v13 = vld [vmem:[%s4223_s0 + $0x67] sm:$0x1]  ;;  %v107_v1 = vld [vmem:[%s4223_s0 + $0x68] sm:$0x1]  ;;  %v902_v3 = vmax.f32 %v630_v56, %v103_v43  ;;  %v639_v5 = vmax.f32 %v120_v49, %v121_v57  ;;  %v1276_v11 = vmax.f32 %v1148_v15, %v1976_v55  ;;  %v1149_v12 = vmax.f32 %v1820_v37, %v901_v60 }
  0x2c   :  { %v123_v2 = vld [vmem:[%s4223_s0 + $0x79] sm:$0x1]  ;;  %1403 = vst.msk [vmem:[%s4224_s1 + $0x10] sm:$0x1] %vm1386_vm0, %v1274_v52  ;;  %v124_v6 = vld [vmem:[%s4223_s0 + $0x7a] sm:$0x1]  ;;  %v2019_v14 = vmax.f32 %v638_v0, %v120_v49  ;;  %v632_v16 = vmax.f32 %v105_v63, %v106_v13  ;;  %v903_v22 = vmax.f32 %v631_v4, %v105_v63 }
  0x2d   :  { %v108_v8 = vld [vmem:[%s4223_s0 + $0x69] sm:$0x1]  ;;  %v109_v9 = vld [vmem:[%s4223_s0 + $0x6a] sm:$0x1]  ;;  %v125_v27 = vld [vmem:[%s4223_s0 + $0x7b] sm:$0x1]  ;;  %v1150_v37 = vmax.f32 %v1847_v51, %v902_v3  ;;  %v2035_v20 = vmax.f32 %v639_v5, %v122_v59  ;;  %v640_v21 = vmax.f32 %v122_v59, %v123_v2  ;;  %v1277_v51 = vmax.f32 %v1149_v12, %v1992_v62 }
  0x2e   :  { %v126_v17 = vld [vmem:[%s4223_s0 + $0x7c] sm:$0x1]  ;;  %v127_v19 = vld [vmem:[%s4223_s0 + $0x7e] sm:$0x1]  ;;  %1404 = vst.msk [vmem:[%s4224_s1 + $0x11] sm:$0x1] %vm1386_vm0, %v1275_v30  ;;  %v904_v25 = vmax.f32 %v632_v16, %v107_v1  ;;  %v633_v26 = vmax.f32 %v107_v1, %v108_v8  ;;  %v641_v28 = vmax.f32 %v124_v6, %v125_v27  ;;  %v1151_v34 = vmax.f32 %v1863_v58, %v903_v22 }
  0x2f   :  { %v128_v54 = vld [vmem:[%s4223_s0 + $0x7f] sm:$0x1]  ;;  %v129_v23 = vld [vmem:[%s4223_s0 + $0x80] sm:$0x1]  ;;  %v144_v24 = vld [vmem:[%s4223_s0 + $0x90] sm:$0x1]  ;;  %v1278_v35 = vmax.f32 %v1150_v37, %v2019_v14  ;;  %v2062_v36 = vmax.f32 %v640_v21, %v124_v6 }
  0x30   :  { %1405 = vst.msk [vmem:[%s4224_s1 + $0x12] sm:$0x1] %vm1386_vm0, %v1276_v11  ;;  %v145_v29 = vld [vmem:[%s4223_s0 + $0x91] sm:$0x1]  ;;  %v146_v31 = vld [vmem:[%s4223_s0 + $0x92] sm:$0x1]  ;;  %v642_v38 = vmax.f32 %v127_v19, %v128_v54  ;;  %v1152_v41 = vmax.f32 %v1890_v10, %v904_v25  ;;  %v905_v48 = vmax.f32 %v633_v26, %v109_v9  ;;  %v2075_v58 = vmax.f32 %v641_v28, %v126_v17 }
  0x31   :  { %v130_v32 = vld [vmem:[%s4223_s0 + $0x81] sm:$0x1]  ;;  %v131_v61 = vld [vmem:[%s4223_s0 + $0x82] sm:$0x1]  ;;  %v147_v39 = vld [vmem:[%s4223_s0 + $0x93] sm:$0x1]  ;;  %v650_v42 = vmax.f32 %v144_v24, %v145_v29  ;;  %v1279_v10 = vmax.f32 %v1151_v34, %v2035_v20 }
  0x32   :  { %1406 = vst.msk [vmem:[%s4224_s1 + $0x13] sm:$0x1] %vm1386_vm0, %v1277_v51  ;;  %v148_v43 = vld [vmem:[%s4223_s0 + $0x94] sm:$0x1]  ;;  %v132_v7 = vld [vmem:[%s4223_s0 + $0x83] sm:$0x1]  ;;  %v914_v45 = vmax.f32 %v642_v38, %v129_v23  ;;  %v643_v46 = vmax.f32 %v129_v23, %v130_v32  ;;  %v651_v47 = vmax.f32 %v146_v31, %v147_v39  ;;  %v1280_v53 = vmax.f32 %v1152_v41, %v2062_v36 }
  0x33   :  { %v149_v44 = vld [vmem:[%s4223_s0 + $0x95] sm:$0x1]  ;;  %1407 = vst.msk [vmem:[%s4224_s1 + $0x14] sm:$0x1] %vm1386_vm0, %v1278_v35  ;;  %v133_v49 = vld [vmem:[%s4223_s0 + $0x84] sm:$0x1]  ;;  %v1153_v56 = vmax.f32 %v1906_v18, %v905_v48  ;;  %v2102_v63 = vmax.f32 %v650_v42, %v146_v31  ;;  %v644_v57 = vmax.f32 %v131_v61, %v132_v7 }
  0x34   :  { %v150_v50 = vld [vmem:[%s4223_s0 + $0x96] sm:$0x1]  ;;  %v134_v52 = vld [vmem:[%s4223_s0 + $0x85] sm:$0x1]  ;;  %v135_v59 = vld [vmem:[%s4223_s0 + $0x86] sm:$0x1]  ;;  %v1154_v18 = vmax.f32 %v1933_v33, %v914_v45  ;;  %v915_v0 = vmax.f32 %v643_v46, %v131_v61  ;;  %v2118_v13 = vmax.f32 %v651_v47, %v148_v43  ;;  %v652_v1 = vmax.f32 %v148_v43, %v149_v44 }
  0x35   :  { %v151_v15 = vld [vmem:[%s4223_s0 + $0x97] sm:$0x1]  ;;  %v136_v60 = vld [vmem:[%s4223_s0 + $0x87] sm:$0x1]  ;;  %1408 = vst.msk [vmem:[%s4224_s1 + $0x15] sm:$0x1] %vm1386_vm0, %v1279_v10  ;;  %v1281_v33 = vmax.f32 %v1153_v56, %v2075_v58  ;;  %v916_v4 = vmax.f32 %v644_v57, %v133_v49  ;;  %v645_v5 = vmax.f32 %v133_v49, %v134_v52 }
  0x36   :  { %v152_v2 = vld [vmem:[%s4223_s0 + $0x98] sm:$0x1]  ;;  %v137_v30 = vld [vmem:[%s4223_s0 + $0x88] sm:$0x1]  ;;  %v153_v3 = vld [vmem:[%s4223_s0 + $0x99] sm:$0x1]  ;;  %v653_v6 = vmax.f32 %v150_v50, %v151_v15  ;;  %v1282_v12 = vmax.f32 %v1154_v18, %v2102_v63  ;;  %v1155_v16 = vmax.f32 %v1949_v40, %v915_v0  ;;  %v2145_v27 = vmax.f32 %v652_v1, %v150_v50 }
  0x37   :  { %1409 = vst.msk [vmem:[%s4224_s1 + $0x16] sm:$0x1] %vm1386_vm0, %v1280_v53  ;;  %v154_v8 = vld [vmem:[%s4223_s0 + $0x9a] sm:$0x1]  ;;  %v138_v9 = vld [vmem:[%s4223_s0 + $0x89] sm:$0x1]  ;;  %v646_v17 = vmax.f32 %v135_v59, %v136_v60  ;;  %v1156_v40 = vmax.f32 %v1976_v55, %v916_v4  ;;  %v917_v21 = vmax.f32 %v645_v5, %v135_v59  ;;  %v654_v23 = vmax.f32 %v152_v2, %v153_v3 }
  0x38   :  { %v155_v11 = vld [vmem:[%s4223_s0 + $0x9b] sm:$0x1]  ;;  %v139_v19 = vld [vmem:[%s4223_s0 + $0x8a] sm:$0x1]  ;;  %v156_v37 = vld [vmem:[%s4223_s0 + $0x9c] sm:$0x1]  ;;  %v2161_v54 = vmax.f32 %v653_v6, %v152_v2  ;;  %v1283_v55 = vmax.f32 %v1155_v16, %v2118_v13  ;;  %v647_v28 = vmax.f32 %v137_v30, %v138_v9 }
  0x39   :  { %v140_v22 = vld [vmem:[%s4223_s0 + $0x8b] sm:$0x1]  ;;  %1410 = vst.msk [vmem:[%s4224_s1 + $0x17] sm:$0x1] %vm1386_vm0, %v1281_v33  ;;  %v141_v24 = vld [vmem:[%s4223_s0 + $0x8c] sm:$0x1]  ;;  %v918_v26 = vmax.f32 %v646_v17, %v137_v30  ;;  %v655_v29 = vmax.f32 %v154_v8, %v155_v11  ;;  %v1284_v34 = vmax.f32 %v1156_v40, %v2145_v27  ;;  %v1157_v38 = vmax.f32 %v1992_v62, %v917_v21 }
  0x3a   :  { %v157_v51 = vld [vmem:[%s4223_s0 + $0x9d] sm:$0x1]  ;;  %v158_v25 = vld [vmem:[%s4223_s0 + $0x9e] sm:$0x1]  ;;  %1411 = vst.msk [vmem:[%s4224_s1 + $0x18] sm:$0x1] %vm1386_vm0, %v1282_v12  ;;  %v2188_v61 = vmax.f32 %v654_v23, %v154_v8  ;;  %v648_v39 = vmax.f32 %v139_v19, %v140_v22  ;;  %v919_v43 = vmax.f32 %v647_v28, %v139_v19 }
  0x3b   :  { %v142_v31 = vld [vmem:[%s4223_s0 + $0x8d] sm:$0x1]  ;;  %v143_v32 = vld [vmem:[%s4223_s0 + $0x8e] sm:$0x1]  ;;  %v159_v35 = vld [vmem:[%s4223_s0 + $0x9f] sm:$0x1]  ;;  %v1158_v62 = vmax.f32 %v2019_v14, %v918_v26  ;;  %v2204_v7 = vmax.f32 %v655_v29, %v156_v37  ;;  %v656_v44 = vmax.f32 %v156_v37, %v157_v51  ;;  %v1285_v14 = vmax.f32 %v1157_v38, %v2161_v54 }
  0x3c   :  { %v160_v41 = vld [vmem:[%s4223_s0 + $0xa0] sm:$0x1]  ;;  %v161_v48 = vld [vmem:[%s4223_s0 + $0xa2] sm:$0x1]  ;;  %v162_v42 = vld [vmem:[%s4223_s0 + $0xa3] sm:$0x1]  ;;  %v920_v47 = vmax.f32 %v648_v39, %v141_v24  ;;  %v649_v49 = vmax.f32 %v141_v24, %v142_v31  ;;  %v657_v50 = vmax.f32 %v158_v25, %v159_v35  ;;  %v1159_v59 = vmax.f32 %v2035_v20, %v919_v43 }
  0x3d   :  { %1412 = vst.msk [vmem:[%s4224_s1 + $0x19] sm:$0x1] %vm1386_vm0, %v1283_v55  ;;  %v163_v10 = vld [vmem:[%s4223_s0 + $0xa4] sm:$0x1]  ;;  %v178_v45 = vld [vmem:[%s4223_s0 + $0xb4] sm:$0x1]  ;;  %v1286_v57 = vmax.f32 %v1158_v62, %v2188_v61  ;;  %v2231_v15 = vmax.f32 %v656_v44, %v158_v25  ;;  %v658_v60 = vmax.f32 %v161_v48, %v162_v42 }
  0x3e   :  { %v179_v46 = vld [vmem:[%s4223_s0 + $0xb5] sm:$0x1]  ;;  %1413 = vst.msk [vmem:[%s4224_s1 + $0x1a] sm:$0x1] %vm1386_vm0, %v1284_v34  ;;  %v180_v52 = vld [vmem:[%s4223_s0 + $0xb6] sm:$0x1]  ;;  %v1160_v1 = vmax.f32 %v2062_v36, %v920_v47  ;;  %v921_v2 = vmax.f32 %v649_v49, %v143_v32  ;;  %v2244_v20 = vmax.f32 %v657_v50, %v160_v41  ;;  %v1287_v36 = vmax.f32 %v1159_v59, %v2204_v7 }
  0x3f   :  { %v164_v53 = vld [vmem:[%s4223_s0 + $0xa5] sm:$0x1]  ;;  %v181_v56 = vld [vmem:[%s4223_s0 + $0xb7] sm:$0x1]  ;;  %v165_v18 = vld [vmem:[%s4223_s0 + $0xa6] sm:$0x1]  ;;  %v666_v30 = vmax.f32 %v178_v45, %v179_v46  ;;  %v930_v5 = vmax.f32 %v658_v60, %v163_v10 }
  0x40   :  { %v166_v0 = vld [vmem:[%s4223_s0 + $0xa7] sm:$0x1]  ;;  %1414 = vst.msk [vmem:[%s4224_s1 + $0x1b] sm:$0x1] %vm1386_vm0, %v1285_v14  ;;  %v182_v3 = vld [vmem:[%s4223_s0 + $0xb8] sm:$0x1]  ;;  %v659_v6 = vmax.f32 %v163_v10, %v164_v53  ;;  %v667_v8 = vmax.f32 %v180_v52, %v181_v56  ;;  %v1288_v16 = vmax.f32 %v1160_v1, %v2231_v15  ;;  %v1161_v17 = vmax.f32 %v2075_v58, %v921_v2 }
  0x41   :  { %v167_v33 = vld [vmem:[%s4223_s0 + $0xa8] sm:$0x1]  ;;  %v183_v4 = vld [vmem:[%s4223_s0 + $0xb9] sm:$0x1]  ;;  %1415 = vst.msk [vmem:[%s4224_s1 + $0x1c] sm:$0x1] %vm1386_vm0, %v1286_v57  ;;  %v2271_v19 = vmax.f32 %v666_v30, %v180_v52  ;;  %v660_v37 = vmax.f32 %v165_v18, %v166_v0  ;;  %v1162_v21 = vmax.f32 %v2102_v63, %v930_v5 }
  0x42   :  { %v184_v9 = vld [vmem:[%s4223_s0 + $0xba] sm:$0x1]  ;;  %v168_v11 = vld [vmem:[%s4223_s0 + $0xa9] sm:$0x1]  ;;  %v185_v12 = vld [vmem:[%s4223_s0 + $0xbb] sm:$0x1]  ;;  %v931_v23 = vmax.f32 %v659_v6, %v165_v18  ;;  %v2284_v58 = vmax.f32 %v667_v8, %v182_v3  ;;  %v668_v24 = vmax.f32 %v182_v3, %v183_v4  ;;  %v1289_v63 = vmax.f32 %v1161_v17, %v2244_v20 }
  0x43   :  { %v169_v22 = vld [vmem:[%s4223_s0 + $0xaa] sm:$0x1]  ;;  %v170_v40 = vld [vmem:[%s4223_s0 + $0xab] sm:$0x1]  ;;  %1416 = vst.msk [vmem:[%s4224_s1 + $0x1d] sm:$0x1] %vm1386_vm0, %v1287_v36  ;;  %v932_v26 = vmax.f32 %v660_v37, %v167_v33  ;;  %v661_v28 = vmax.f32 %v167_v33, %v168_v11  ;;  %v669_v29 = vmax.f32 %v184_v9, %v185_v12  ;;  %v1290_v34 = vmax.f32 %v1162_v21, %v2271_v19 }
  0x44   :  { %v186_v51 = vld [vmem:[%s4223_s0 + $0xbc] sm:$0x1]  ;;  %v171_v25 = vld [vmem:[%s4223_s0 + $0xac] sm:$0x1]  ;;  %v187_v55 = vld [vmem:[%s4223_s0 + $0xbd] sm:$0x1]  ;;  %v1163_v38 = vmax.f32 %v2118_v13, %v931_v23  ;;  %v2311_v39 = vmax.f32 %v668_v24, %v184_v9  ;;  %v662_v41 = vmax.f32 %v169_v22, %v170_v40 }
  0x45   :  { %1417 = vst.msk [vmem:[%s4224_s1 + $0x1e] sm:$0x1] %vm1386_vm0, %v1288_v16  ;;  %v188_v31 = vld [vmem:[%s4223_s0 + $0xbe] sm:$0x1]  ;;  %v172_v32 = vld [vmem:[%s4223_s0 + $0xad] sm:$0x1]  ;;  %v1164_v13 = vmax.f32 %v2145_v27, %v932_v26  ;;  %v933_v43 = vmax.f32 %v661_v28, %v169_v22  ;;  %v2327_v44 = vmax.f32 %v669_v29, %v186_v51  ;;  %v670_v10 = vmax.f32 %v186_v51, %v187_v55 }
  0x46   :  { %v189_v35 = vld [vmem:[%s4223_s0 + $0xbf] sm:$0x1]  ;;  %v173_v48 = vld [vmem:[%s4223_s0 + $0xae] sm:$0x1]  ;;  %v190_v42 = vld [vmem:[%s4223_s0 + $0xc0] sm:$0x1]  ;;  %v1291_v27 = vmax.f32 %v1163_v38, %v2284_v58  ;;  %v934_v47 = vmax.f32 %v662_v41, %v171_v25  ;;  %v663_v49 = vmax.f32 %v171_v25, %v172_v32 }
  0x47   :  { %v174_v62 = vld [vmem:[%s4223_s0 + $0xaf] sm:$0x1]  ;;  %1418 = vst.msk [vmem:[%s4224_s1 + $0x1f] sm:$0x1] %vm1386_vm0, %v1289_v63  ;;  %v175_v45 = vld [vmem:[%s4223_s0 + $0xb0] sm:$0x1]  ;;  %v671_v50 = vmax.f32 %v188_v31, %v189_v35  ;;  %v1292_v57 = vmax.f32 %v1164_v13, %v2311_v39  ;;  %v1165_v59 = vmax.f32 %v2161_v54, %v933_v43  ;;  %v2354_v60 = vmax.f32 %v670_v10, %v188_v31 }
  0x48   :  { %v191_v46 = vld [vmem:[%s4223_s0 + $0xc1] sm:$0x1]  ;;  %v192_v14 = vld [vmem:[%s4223_s0 + $0xc2] sm:$0x1]  ;;  %1419 = vst.msk [vmem:[%s4224_s1 + $0x20] sm:$0x1] %vm1386_vm0, %v1290_v34  ;;  %v664_v18 = vmax.f32 %v173_v48, %v174_v62  ;;  %v1166_v54 = vmax.f32 %v2188_v61, %v934_v47  ;;  %v935_v30 = vmax.f32 %v663_v49, %v173_v48 }
  0x49   :  { %v176_v52 = vld [vmem:[%s4223_s0 + $0xb1] sm:$0x1]  ;;  %v177_v53 = vld [vmem:[%s4223_s0 + $0xb2] sm:$0x1]  ;;  %v193_v56 = vld [vmem:[%s4223_s0 + $0xc3] sm:$0x1]  ;;  %v2370_v3 = vmax.f32 %v671_v50, %v190_v42  ;;  %v672_v33 = vmax.f32 %v190_v42, %v191_v46  ;;  %v1293_v61 = vmax.f32 %v1165_v59, %v2327_v44 }
  0x4a   :  { %v194_v0 = vld [vmem:[%s4223_s0 + $0xc4] sm:$0x1]  ;;  %v195_v1 = vld [vmem:[%s4223_s0 + $0xc6] sm:$0x1]  ;;  %v196_v2 = vld [vmem:[%s4223_s0 + $0xc7] sm:$0x1]  ;;  %v936_v6 = vmax.f32 %v664_v18, %v175_v45  ;;  %v665_v8 = vmax.f32 %v175_v45, %v176_v52  ;;  %v673_v9 = vmax.f32 %v192_v14, %v193_v56  ;;  %v1294_v17 = vmax.f32 %v1166_v54, %v2354_v60 }
  0x4b   :  { %1420 = vst.msk [vmem:[%s4224_s1 + $0x21] sm:$0x1] %vm1386_vm0, %v1291_v27  ;;  %v197_v4 = vld [vmem:[%s4223_s0 + $0xc8] sm:$0x1]  ;;  %v212_v36 = vld [vmem:[%s4223_s0 + $0xd8] sm:$0x1]  ;;  %v1167_v37 = vmax.f32 %v2204_v7, %v935_v30  ;;  %v2397_v22 = vmax.f32 %v672_v33, %v192_v14  ;;  %v674_v40 = vmax.f32 %v195_v1, %v196_v2 }
  0x4c   :  { %v213_v5 = vld [vmem:[%s4223_s0 + $0xd9] sm:$0x1]  ;;  %1421 = vst.msk [vmem:[%s4224_s1 + $0x22] sm:$0x1] %vm1386_vm0, %v1292_v57  ;;  %v214_v11 = vld [vmem:[%s4223_s0 + $0xda] sm:$0x1]  ;;  %v1168_v24 = vmax.f32 %v2231_v15, %v936_v6  ;;  %v937_v51 = vmax.f32 %v665_v8, %v177_v53  ;;  %v2410_v7 = vmax.f32 %v673_v9, %v194_v0 }
  0x4d   :  { %v198_v12 = vld [vmem:[%s4223_s0 + $0xc9] sm:$0x1]  ;;  %v215_v16 = vld [vmem:[%s4223_s0 + $0xdb] sm:$0x1]  ;;  %v199_v21 = vld [vmem:[%s4223_s0 + $0xca] sm:$0x1]  ;;  %v682_v25 = vmax.f32 %v212_v36, %v213_v5  ;;  %v1295_v15 = vmax.f32 %v1167_v37, %v2370_v3  ;;  %v946_v28 = vmax.f32 %v674_v40, %v197_v4 }
  0x4e   :  { %v200_v23 = vld [vmem:[%s4223_s0 + $0xcb] sm:$0x1]  ;;  %1422 = vst.msk [vmem:[%s4224_s1 + $0x23] sm:$0x1] %vm1386_vm0, %v1293_v61  ;;  %v216_v55 = vld [vmem:[%s4223_s0 + $0xdc] sm:$0x1]  ;;  %v675_v29 = vmax.f32 %v197_v4, %v198_v12  ;;  %v683_v31 = vmax.f32 %v214_v11, %v215_v16  ;;  %v1296_v38 = vmax.f32 %v1168_v24, %v2397_v22  ;;  %v1169_v41 = vmax.f32 %v2244_v20, %v937_v51 }
  0x4f   :  { %v201_v63 = vld [vmem:[%s4223_s0 + $0xcc] sm:$0x1]  ;;  %v217_v26 = vld [vmem:[%s4223_s0 + $0xdd] sm:$0x1]  ;;  %1423 = vst.msk [vmem:[%s4224_s1 + $0x24] sm:$0x1] %vm1386_vm0, %v1294_v17  ;;  %v2437_v48 = vmax.f32 %v682_v25, %v214_v11  ;;  %v676_v42 = vmax.f32 %v199_v21, %v200_v23  ;;  %v1170_v43 = vmax.f32 %v2271_v19, %v946_v28 }
  0x50   :  { %v218_v32 = vld [vmem:[%s4223_s0 + $0xde] sm:$0x1]  ;;  %v202_v35 = vld [vmem:[%s4223_s0 + $0xcd] sm:$0x1]  ;;  %v219_v34 = vld [vmem:[%s4223_s0 + $0xdf] sm:$0x1]  ;;  %v947_v10 = vmax.f32 %v675_v29, %v199_v21  ;;  %v2450_v20 = vmax.f32 %v683_v31, %v216_v55  ;;  %v684_v45 = vmax.f32 %v216_v55, %v217_v26  ;;  %v1297_v19 = vmax.f32 %v1169_v41, %v2410_v7 }
  0x51   :  { %v203_v62 = vld [vmem:[%s4223_s0 + $0xce] sm:$0x1]  ;;  %v204_v13 = vld [vmem:[%s4223_s0 + $0xcf] sm:$0x1]  ;;  %1424 = vst.msk [vmem:[%s4224_s1 + $0x25] sm:$0x1] %vm1386_vm0, %v1295_v15  ;;  %v948_v47 = vmax.f32 %v676_v42, %v201_v63  ;;  %v677_v49 = vmax.f32 %v201_v63, %v202_v35  ;;  %v685_v50 = vmax.f32 %v218_v32, %v219_v34  ;;  %v1298_v57 = vmax.f32 %v1170_v43, %v2437_v48 }
  0x52   :  { %v220_v46 = vld [vmem:[%s4223_s0 + $0xe0] sm:$0x1]  ;;  %v205_v14 = vld [vmem:[%s4223_s0 + $0xd0] sm:$0x1]  ;;  %v221_v27 = vld [vmem:[%s4223_s0 + $0xe1] sm:$0x1]  ;;  %v1171_v59 = vmax.f32 %v2284_v58, %v947_v10  ;;  %v2477_v18 = vmax.f32 %v684_v45, %v218_v32  ;;  %v678_v0 = vmax.f32 %v203_v62, %v204_v13 }
  0x53   :  { %1425 = vst.msk [vmem:[%s4224_s1 + $0x26] sm:$0x1] %vm1386_vm0, %v1296_v38  ;;  %v222_v52 = vld [vmem:[%s4223_s0 + $0xe2] sm:$0x1]  ;;  %v206_v53 = vld [vmem:[%s4223_s0 + $0xd1] sm:$0x1]  ;;  %v1172_v58 = vmax.f32 %v2311_v39, %v948_v47  ;;  %v949_v30 = vmax.f32 %v677_v49, %v203_v62  ;;  %v2493_v33 = vmax.f32 %v685_v50, %v220_v46  ;;  %v686_v4 = vmax.f32 %v220_v46, %v221_v27 }
  0x54   :  { %v223_v56 = vld [vmem:[%s4223_s0 + $0xe3] sm:$0x1]  ;;  %v207_v1 = vld [vmem:[%s4223_s0 + $0xd2] sm:$0x1]  ;;  %v224_v2 = vld [vmem:[%s4223_s0 + $0xe4] sm:$0x1]  ;;  %v1299_v39 = vmax.f32 %v1171_v59, %v2450_v20  ;;  %v950_v6 = vmax.f32 %v678_v0, %v205_v14  ;;  %v679_v8 = vmax.f32 %v205_v14, %v206_v53 }
  0x55   :  { %v208_v54 = vld [vmem:[%s4223_s0 + $0xd3] sm:$0x1]  ;;  %1426 = vst.msk [vmem:[%s4224_s1 + $0x27] sm:$0x1] %vm1386_vm0, %v1297_v19  ;;  %v209_v36 = vld [vmem:[%s4223_s0 + $0xd4] sm:$0x1]  ;;  %v687_v9 = vmax.f32 %v222_v52, %v223_v56  ;;  %v1300_v17 = vmax.f32 %v1172_v58, %v2477_v18  ;;  %v1173_v37 = vmax.f32 %v2327_v44, %v949_v30  ;;  %v2520_v40 = vmax.f32 %v686_v4, %v222_v52 }
  0x56   :  { %v225_v5 = vld [vmem:[%s4223_s0 + $0xe5] sm:$0x1]  ;;  %v226_v61 = vld [vmem:[%s4223_s0 + $0xe6] sm:$0x1]  ;;  %1427 = vst.msk [vmem:[%s4224_s1 + $0x28] sm:$0x1] %vm1386_vm0, %v1298_v57  ;;  %v680_v21 = vmax.f32 %v207_v1, %v208_v54  ;;  %v1174_v44 = vmax.f32 %v2354_v60, %v950_v6  ;;  %v951_v25 = vmax.f32 %v679_v8, %v207_v1 }
  0x57   :  { %v210_v11 = vld [vmem:[%s4223_s0 + $0xd5] sm:$0x1]  ;;  %v211_v12 = vld [vmem:[%s4223_s0 + $0xd6] sm:$0x1]  ;;  %v227_v16 = vld [vmem:[%s4223_s0 + $0xe7] sm:$0x1]  ;;  %v2536_v55 = vmax.f32 %v687_v9, %v224_v2  ;;  %v688_v63 = vmax.f32 %v224_v2, %v225_v5  ;;  %v1301_v60 = vmax.f32 %v1173_v37, %v2493_v33 }
  0x58   :  { %v228_v23 = vld [vmem:[%s4223_s0 + $0xe8] sm:$0x1]  ;;  %v229_v24 = vld [vmem:[%s4223_s0 + $0xea] sm:$0x1]  ;;  %v230_v51 = vld [vmem:[%s4223_s0 + $0xeb] sm:$0x1]  ;;  %v952_v29 = vmax.f32 %v680_v21, %v209_v36  ;;  %v681_v31 = vmax.f32 %v209_v36, %v210_v11  ;;  %v689_v32 = vmax.f32 %v226_v61, %v227_v16  ;;  %v1302_v41 = vmax.f32 %v1174_v44, %v2520_v40 }
  0x59   :  { %1428 = vst.msk [vmem:[%s4224_s1 + $0x29] sm:$0x1] %vm1386_vm0, %v1299_v39  ;;  %v231_v26 = vld [vmem:[%s4223_s0 + $0xec] sm:$0x1]  ;;  %v246_v15 = vld [vmem:[%s4223_s0 + $0xfc] sm:$0x1]  ;;  %v1175_v42 = vmax.f32 %v2370_v3, %v951_v25  ;;  %v2563_v62 = vmax.f32 %v688_v63, %v226_v61  ;;  %v690_v13 = vmax.f32 %v229_v24, %v230_v51 }
  0x5a   :  { %v247_v28 = vld [vmem:[%s4223_s0 + $0xfd] sm:$0x1]  ;;  %1429 = vst.msk [vmem:[%s4224_s1 + $0x2a] sm:$0x1] %vm1386_vm0, %v1300_v17  ;;  %v248_v35 = vld [vmem:[%s4223_s0 + $0xfe] sm:$0x1]  ;;  %v1176_v45 = vmax.f32 %v2397_v22, %v952_v29  ;;  %v953_v46 = vmax.f32 %v681_v31, %v211_v12  ;;  %v2576_v3 = vmax.f32 %v689_v32, %v228_v23 }
  0x5b   :  { %v232_v34 = vld [vmem:[%s4223_s0 + $0xed] sm:$0x1]  ;;  %v249_v38 = vld [vmem:[%s4223_s0 + $0xff] sm:$0x1]  ;;  %v233_v43 = vld [vmem:[%s4223_s0 + $0xee] sm:$0x1]  ;;  %v698_v14 = vmax.f32 %v246_v15, %v247_v28  ;;  %v1303_v22 = vmax.f32 %v1175_v42, %v2536_v55  ;;  %v962_v49 = vmax.f32 %v690_v13, %v231_v26 }
  0x5c   :  { %v234_v10 = vld [vmem:[%s4223_s0 + $0xef] sm:$0x1]  ;;  %1430 = vst.msk [vmem:[%s4224_s1 + $0x2b] sm:$0x1] %vm1386_vm0, %v1301_v60  ;;  %v250_v27 = vld [vmem:[%s4223_s0 + $0x100] sm:$0x1]  ;;  %v691_v50 = vmax.f32 %v231_v26, %v232_v34  ;;  %v699_v52 = vmax.f32 %v248_v35, %v249_v38  ;;  %v1304_v59 = vmax.f32 %v1176_v45, %v2563_v62  ;;  %v1177_v0 = vmax.f32 %v2410_v7, %v953_v46 }
  0x5d   :  { %v235_v19 = vld [vmem:[%s4223_s0 + $0xf0] sm:$0x1]  ;;  %v251_v47 = vld [vmem:[%s4223_s0 + $0x101] sm:$0x1]  ;;  %1431 = vst.msk [vmem:[%s4224_s1 + $0x2c] sm:$0x1] %vm1386_vm0, %v1302_v41  ;;  %v2603_v1 = vmax.f32 %v698_v14, %v248_v35  ;;  %v692_v2 = vmax.f32 %v233_v43, %v234_v10  ;;  %v1178_v30 = vmax.f32 %v2437_v48, %v962_v49 }
  0x5e   :  { %v252_v53 = vld [vmem:[%s4223_s0 + $0x102] sm:$0x1]  ;;  %v236_v56 = vld [vmem:[%s4223_s0 + $0xf1] sm:$0x1]  ;;  %v253_v57 = vld [vmem:[%s4223_s0 + $0x103] sm:$0x1]  ;;  %v963_v4 = vmax.f32 %v691_v50, %v233_v43  ;;  %v2616_v7 = vmax.f32 %v699_v52, %v250_v27  ;;  %v700_v36 = vmax.f32 %v250_v27, %v251_v47  ;;  %v1305_v48 = vmax.f32 %v1177_v0, %v2576_v3 }
  0x5f   :  { %v237_v54 = vld [vmem:[%s4223_s0 + $0xf2] sm:$0x1]  ;;  %v238_v58 = vld [vmem:[%s4223_s0 + $0xf3] sm:$0x1]  ;;  %1432 = vst.msk [vmem:[%s4224_s1 + $0x2d] sm:$0x1] %vm1386_vm0, %v1303_v22  ;;  %v964_v6 = vmax.f32 %v692_v2, %v235_v19  ;;  %v693_v8 = vmax.f32 %v235_v19, %v236_v56  ;;  %v701_v9 = vmax.f32 %v252_v53, %v253_v57  ;;  %v1306_v17 = vmax.f32 %v1178_v30, %v2603_v1 }
  0x60   :  { %v254_v5 = vld [vmem:[%s4223_s0 + $0x104] sm:$0x1]  ;;  %v239_v61 = vld [vmem:[%s4223_s0 + $0xf4] sm:$0x1]  ;;  %v255_v39 = vld [vmem:[%s4223_s0 + $0x105] sm:$0x1]  ;;  %v1179_v37 = vmax.f32 %v2450_v20, %v963_v4  ;;  %v2643_v21 = vmax.f32 %v700_v36, %v252_v53  ;;  %v694_v23 = vmax.f32 %v237_v54, %v238_v58 }
  0x61   :  { %1433 = vst.msk [vmem:[%s4224_s1 + $0x2e] sm:$0x1] %vm1386_vm0, %v1304_v59  ;;  %v256_v11 = vld [vmem:[%s4223_s0 + $0x106] sm:$0x1]  ;;  %v240_v12 = vld [vmem:[%s4223_s0 + $0xf5] sm:$0x1]  ;;  %v1180_v20 = vmax.f32 %v2477_v18, %v964_v6  ;;  %v965_v25 = vmax.f32 %v693_v8, %v237_v54  ;;  %v2659_v63 = vmax.f32 %v701_v9, %v254_v5  ;;  %v702_v26 = vmax.f32 %v254_v5, %v255_v39 }
  0x62   :  { %v257_v16 = vld [vmem:[%s4223_s0 + $0x107] sm:$0x1]  ;;  %v241_v24 = vld [vmem:[%s4223_s0 + $0xf6] sm:$0x1]  ;;  %v258_v51 = vld [vmem:[%s4223_s0 + $0x108] sm:$0x1]  ;;  %v1307_v18 = vmax.f32 %v1179_v37, %v2616_v7  ;;  %v966_v29 = vmax.f32 %v694_v23, %v239_v61  ;;  %v695_v31 = vmax.f32 %v239_v61, %v240_v12 }
  0x63   :  { %v242_v44 = vld [vmem:[%s4223_s0 + $0xf7] sm:$0x1]  ;;  %1434 = vst.msk [vmem:[%s4224_s1 + $0x2f] sm:$0x1] %vm1386_vm0, %v1305_v48  ;;  %v243_v15 = vld [vmem:[%s4223_s0 + $0xf8] sm:$0x1]  ;;  %v703_v32 = vmax.f32 %v256_v11, %v257_v16  ;;  %v1308_v41 = vmax.f32 %v1180_v20, %v2643_v21  ;;  %v1181_v42 = vmax.f32 %v2493_v33, %v965_v25  ;;  %v2686_v13 = vmax.f32 %v702_v26, %v256_v11 }
  0x64   :  { %v259_v28 = vld [vmem:[%s4223_s0 + $0x109] sm:$0x1]  ;;  %v260_v60 = vld [vmem:[%s4223_s0 + $0x10a] sm:$0x1]  ;;  %1435 = vst.msk [vmem:[%s4224_s1 + $0x30] sm:$0x1] %vm1386_vm0, %v1306_v17  ;;  %v696_v43 = vmax.f32 %v241_v24, %v242_v44  ;;  %v1182_v33 = vmax.f32 %v2520_v40, %v966_v29  ;;  %v967_v14 = vmax.f32 %v695_v31, %v241_v24 }
  0x65   :  { %v244_v35 = vld [vmem:[%s4223_s0 + $0xf9] sm:$0x1]  ;;  %v245_v34 = vld [vmem:[%s4223_s0 + $0xfa] sm:$0x1]  ;;  %v261_v38 = vld [vmem:[%s4223_s0 + $0x10b] sm:$0x1]  ;;  %v2702_v27 = vmax.f32 %v703_v32, %v258_v51  ;;  %v704_v19 = vmax.f32 %v258_v51, %v259_v28  ;;  %v1309_v40 = vmax.f32 %v1181_v42, %v2659_v63 }
  0x66   :  { %v262_v10 = vld [vmem:[%s4223_s0 + $0x10c] sm:$0x1]  ;;  %v263_v45 = vld [vmem:[%s4223_s0 + $0x10e] sm:$0x1]  ;;  %v264_v46 = vld [vmem:[%s4223_s0 + $0x10f] sm:$0x1]  ;;  %v968_v50 = vmax.f32 %v696_v43, %v243_v15  ;;  %v697_v52 = vmax.f32 %v243_v15, %v244_v35  ;;  %v705_v53 = vmax.f32 %v260_v60, %v261_v38  ;;  %v1310_v0 = vmax.f32 %v1182_v33, %v2686_v13 }
  0x67   :  { %1436 = vst.msk [vmem:[%s4224_s1 + $0x31] sm:$0x1] %vm1386_vm0, %v1307_v18  ;;  %v265_v47 = vld [vmem:[%s4223_s0 + $0x110] sm:$0x1]  ;;  %v280_v22 = vld [vmem:[%s4223_s0 + $0x120] sm:$0x1]  ;;  %v1183_v2 = vmax.f32 %v2536_v55, %v967_v14  ;;  %v2729_v54 = vmax.f32 %v704_v19, %v260_v60  ;;  %v706_v58 = vmax.f32 %v263_v45, %v264_v46 }
  0x68   :  { %v281_v49 = vld [vmem:[%s4223_s0 + $0x121] sm:$0x1]  ;;  %1437 = vst.msk [vmem:[%s4224_s1 + $0x32] sm:$0x1] %vm1386_vm0, %v1308_v41  ;;  %v282_v56 = vld [vmem:[%s4223_s0 + $0x122] sm:$0x1]  ;;  %v1184_v55 = vmax.f32 %v2563_v62, %v968_v50  ;;  %v969_v5 = vmax.f32 %v697_v52, %v245_v34  ;;  %v2745_v61 = vmax.f32 %v705_v53, %v262_v10 }
  0x69   :  { %v266_v57 = vld [vmem:[%s4223_s0 + $0x111] sm:$0x1]  ;;  %v283_v59 = vld [vmem:[%s4223_s0 + $0x123] sm:$0x1]  ;;  %v267_v30 = vld [vmem:[%s4223_s0 + $0x112] sm:$0x1]  ;;  %v714_v39 = vmax.f32 %v280_v22, %v281_v49  ;;  %v1311_v62 = vmax.f32 %v1183_v2, %v2702_v27  ;;  %v978_v9 = vmax.f32 %v706_v58, %v265_v47 }
  0x6a   :  { %v284_v4 = vld [vmem:[%s4223_s0 + $0x124] sm:$0x1]  ;;  %v268_v36 = vld [vmem:[%s4223_s0 + $0x113] sm:$0x1]  ;;  %1438 = vst.msk [vmem:[%s4224_s1 + $0x33] sm:$0x1] %vm1386_vm0, %v1309_v40  ;;  %v707_v11 = vmax.f32 %v265_v47, %v266_v57  ;;  %v715_v12 = vmax.f32 %v282_v56, %v283_v59  ;;  %v1312_v23 = vmax.f32 %v1184_v55, %v2729_v54  ;;  %v1185_v24 = vmax.f32 %v2576_v3, %v969_v5 }
  0x6b   :  { %v269_v48 = vld [vmem:[%s4223_s0 + $0x114] sm:$0x1]  ;;  %v285_v6 = vld [vmem:[%s4223_s0 + $0x125] sm:$0x1]  ;;  %v286_v8 = vld [vmem:[%s4223_s0 + $0x126] sm:$0x1]  ;;  %v986_v51 = vmax.f32 %v714_v39, %v282_v56  ;;  %v708_v44 = vmax.f32 %v267_v30, %v268_v36  ;;  %v1186_v3 = vmax.f32 %v2603_v1, %v978_v9 }
  0x6c   :  { %1439 = vst.msk [vmem:[%s4224_s1 + $0x34] sm:$0x1] %vm1386_vm0, %v1310_v0  ;;  %v270_v16 = vld [vmem:[%s4223_s0 + $0x115] sm:$0x1]  ;;  %v271_v17 = vld [vmem:[%s4223_s0 + $0x116] sm:$0x1]  ;;  %v979_v15 = vmax.f32 %v707_v11, %v267_v30  ;;  %v987_v28 = vmax.f32 %v715_v12, %v284_v4  ;;  %v716_v60 = vmax.f32 %v284_v4, %v285_v6  ;;  %v1313_v1 = vmax.f32 %v1185_v24, %v2745_v61 }
  0x6d   :  { %v287_v37 = vld [vmem:[%s4223_s0 + $0x127] sm:$0x1]  ;;  %v288_v20 = vld [vmem:[%s4223_s0 + $0x128] sm:$0x1]  ;;  %v272_v25 = vld [vmem:[%s4223_s0 + $0x117] sm:$0x1]  ;;  %v980_v32 = vmax.f32 %v708_v44, %v269_v48  ;;  %v709_v35 = vmax.f32 %v269_v48, %v270_v16  ;;  %v1314_v43 = vmax.f32 %v1186_v3, %v986_v51 }
  0x6e   :  { %v273_v26 = vld [vmem:[%s4223_s0 + $0x118] sm:$0x1]  ;;  %1440 = vst.msk [vmem:[%s4224_s1 + $0x35] sm:$0x1] %vm1386_vm0, %v1311_v62  ;;  %v289_v18 = vld [vmem:[%s4223_s0 + $0x129] sm:$0x1]  ;;  %v717_v34 = vmax.f32 %v286_v8, %v287_v37  ;;  %v1187_v10 = vmax.f32 %v2616_v7, %v979_v15  ;;  %v988_v45 = vmax.f32 %v716_v60, %v286_v8  ;;  %v710_v46 = vmax.f32 %v271_v17, %v272_v25 }
  0x6f   :  { %v290_v29 = vld [vmem:[%s4223_s0 + $0x12a] sm:$0x1]  ;;  %v274_v31 = vld [vmem:[%s4223_s0 + $0x119] sm:$0x1]  ;;  %1441 = vst.msk [vmem:[%s4224_s1 + $0x36] sm:$0x1] %vm1386_vm0, %v1312_v23  ;;  %v1188_v7 = vmax.f32 %v2643_v21, %v980_v32  ;;  %v981_v47 = vmax.f32 %v709_v35, %v271_v17  ;;  %v718_v49 = vmax.f32 %v288_v20, %v289_v18 }
  0x70   :  { %v275_v38 = vld [vmem:[%s4223_s0 + $0x11a] sm:$0x1]  ;;  %v291_v41 = vld [vmem:[%s4223_s0 + $0x12b] sm:$0x1]  ;;  %v292_v42 = vld [vmem:[%s4223_s0 + $0x12c] sm:$0x1]  ;;  %v989_v22 = vmax.f32 %v717_v34, %v288_v20  ;;  %v1315_v21 = vmax.f32 %v1187_v10, %v987_v28  ;;  %v982_v53 = vmax.f32 %v710_v46, %v273_v26  ;;  %v711_v56 = vmax.f32 %v273_v26, %v274_v31 }
  0x71   :  { %v276_v33 = vld [vmem:[%s4223_s0 + $0x11b] sm:$0x1]  ;;  %v277_v14 = vld [vmem:[%s4223_s0 + $0x11c] sm:$0x1]  ;;  %v293_v19 = vld [vmem:[%s4223_s0 + $0x12d] sm:$0x1]  ;;  %v719_v57 = vmax.f32 %v290_v29, %v291_v41  ;;  %v1316_v30 = vmax.f32 %v1188_v7, %v988_v45  ;;  %v1189_v4 = vmax.f32 %v2659_v63, %v981_v47  ;;  %v990_v36 = vmax.f32 %v718_v49, %v290_v29 }
  0x72   :  { %1442 = vst.msk [vmem:[%s4224_s1 + $0x37] sm:$0x1] %vm1386_vm0, %v1313_v1  ;;  %v294_v40 = vld [vmem:[%s4223_s0 + $0x12e] sm:$0x1]  ;;  %v278_v50 = vld [vmem:[%s4223_s0 + $0x11d] sm:$0x1]  ;;  %v712_v55 = vmax.f32 %v275_v38, %v276_v33  ;;  %v1190_v63 = vmax.f32 %v2686_v13, %v982_v53  ;;  %v983_v6 = vmax.f32 %v711_v56, %v275_v38  ;;  %v720_v62 = vmax.f32 %v292_v42, %v293_v19 }
  0x73   :  { %v295_v52 = vld [vmem:[%s4223_s0 + $0x12f] sm:$0x1]  ;;  %1443 = vst.msk [vmem:[%s4224_s1 + $0x38] sm:$0x1] %vm1386_vm0, %v1314_v43  ;;  %v279_v59 = vld [vmem:[%s4223_s0 + $0x11e] sm:$0x1]  ;;  %v991_v8 = vmax.f32 %v719_v57, %v292_v42  ;;  %v1317_v13 = vmax.f32 %v1189_v4, %v989_v22  ;;  %v713_v17 = vmax.f32 %v277_v14, %v278_v50 }
  0x74   :  { %v296_v0 = vld [vmem:[%s4223_s0 + $0x130] sm:$0x1]  ;;  %v297_v2 = vld [vmem:[%s4223_s0 + $0x144] sm:$0x1]  ;;  %v298_v58 = vld [vmem:[%s4223_s0 + $0x145] sm:$0x1]  ;;  %v984_v16 = vmax.f32 %v712_v55, %v277_v14  ;;  %v721_v37 = vmax.f32 %v294_v40, %v295_v52  ;;  %v1318_v44 = vmax.f32 %v1190_v63, %v990_v36  ;;  %v1191_v20 = vmax.f32 %v2702_v27, %v983_v6 }
  0x75   :  { %v299_v5 = vld [vmem:[%s4223_s0 + $0x146] sm:$0x1]  ;;  %v314_v39 = vld [vmem:[%s4223_s0 + $0x156] sm:$0x1]  ;;  %v315_v48 = vld [vmem:[%s4223_s0 + $0x157] sm:$0x1]  ;;  %v992_v25 = vmax.f32 %v720_v62, %v294_v40  ;;  %v722_v26 = vmax.f32 %v297_v2, %v298_v58  ;;  %v985_v60 = vmax.f32 %v713_v17, %v279_v59 }
  0x76   :  { %1444 = vst.msk [vmem:[%s4224_s1 + $0x39] sm:$0x1] %vm1386_vm0, %v1315_v21  ;;  %v316_v9 = vld [vmem:[%s4223_s0 + $0x158] sm:$0x1]  ;;  %v331_v11 = vld [vmem:[%s4223_s0 + $0x168] sm:$0x1]  ;;  %v1192_v27 = vmax.f32 %v2729_v54, %v984_v16  ;;  %v993_v18 = vmax.f32 %v721_v37, %v296_v0  ;;  %v730_v29 = vmax.f32 %v314_v39, %v315_v48  ;;  %v1319_v54 = vmax.f32 %v1191_v20, %v991_v8 }
  0x77   :  { %v332_v12 = vld [vmem:[%s4223_s0 + $0x169] sm:$0x1]  ;;  %1445 = vst.msk [vmem:[%s4224_s1 + $0x3a] sm:$0x1] %vm1386_vm0, %v1316_v30  ;;  %v333_v23 = vld [vmem:[%s4223_s0 + $0x16a] sm:$0x1]  ;;  %v994_v34 = vmax.f32 %v722_v26, %v299_v5  ;;  %v1193_v45 = vmax.f32 %v2745_v61, %v985_v60 }
  0x78   :  { %v300_v24 = vld [vmem:[%s4223_s0 + $0x147] sm:$0x1]  ;;  %v301_v51 = vld [vmem:[%s4223_s0 + $0x148] sm:$0x1]  ;;  %v317_v3 = vld [vmem:[%s4223_s0 + $0x159] sm:$0x1]  ;;  %v738_v35 = vmax.f32 %v331_v11, %v332_v12  ;;  %v1320_v10 = vmax.f32 %v1192_v27, %v992_v25  ;;  %v1002_v46 = vmax.f32 %v730_v29, %v316_v9 }
  0x79   :  { %v318_v15 = vld [vmem:[%s4223_s0 + $0x15a] sm:$0x1]  ;;  %v334_v28 = vld [vmem:[%s4223_s0 + $0x16b] sm:$0x1]  ;;  %1446 = vst.msk [vmem:[%s4224_s1 + $0x3b] sm:$0x1] %vm1386_vm0, %v1317_v13  ;;  %v723_v38 = vmax.f32 %v299_v5, %v300_v24  ;;  %v731_v33 = vmax.f32 %v316_v9, %v317_v3  ;;  %v1321_v21 = vmax.f32 %v1193_v45, %v993_v18 }
  0x7a   :  { %v335_v31 = vld [vmem:[%s4223_s0 + $0x16c] sm:$0x1]  ;;  %v302_v1 = vld [vmem:[%s4223_s0 + $0x149] sm:$0x1]  ;;  %v303_v32 = vld [vmem:[%s4223_s0 + $0x14a] sm:$0x1]  ;;  %v2937_v61 = vmax.f32 %v738_v35, %v333_v23  ;;  %v739_v47 = vmax.f32 %v333_v23, %v334_v28  ;;  %v1194_v53 = vmax.f32 %v994_v34, %v1002_v46 }
  0x7b   :  { %1447 = vst.msk [vmem:[%s4224_s1 + $0x3c] sm:$0x1] %vm1386_vm0, %v1318_v44  ;;  %v319_v41 = vld [vmem:[%s4223_s0 + $0x15b] sm:$0x1]  ;;  %v320_v42 = vld [vmem:[%s4223_s0 + $0x15c] sm:$0x1]  ;;  %v995_v22 = vmax.f32 %v723_v38, %v301_v51  ;;  %v724_v49 = vmax.f32 %v301_v51, %v302_v1  ;;  %v1003_v56 = vmax.f32 %v731_v33, %v318_v15 }
  0x7c   :  { %v336_v43 = vld [vmem:[%s4223_s0 + $0x16d] sm:$0x1]  ;;  %v337_v14 = vld [vmem:[%s4223_s0 + $0x16e] sm:$0x1]  ;;  %v304_v19 = vld [vmem:[%s4223_s0 + $0x14b] sm:$0x1]  ;;  %v732_v57 = vmax.f32 %v318_v15, %v319_v41  ;;  %v2961_v58 = vmax.f32 %v739_v47, %v335_v31  ;;  %v1322_v48 = vmax.f32 %v1194_v53, %v2937_v61 }
  0x7d   :  { %v305_v7 = vld [vmem:[%s4223_s0 + $0x14c] sm:$0x1]  ;;  %1448 = vst.msk [vmem:[%s4224_s1 + $0x3d] sm:$0x1] %vm1386_vm0, %v1319_v54  ;;  %v321_v40 = vld [vmem:[%s4223_s0 + $0x15d] sm:$0x1]  ;;  %v740_v30 = vmax.f32 %v335_v31, %v336_v43  ;;  %v996_v4 = vmax.f32 %v724_v49, %v303_v32  ;;  %v725_v36 = vmax.f32 %v303_v32, %v304_v19  ;;  %v1195_v63 = vmax.f32 %v995_v22, %v1003_v56 }
  0x7e   :  { %v322_v50 = vld [vmem:[%s4223_s0 + $0x15e] sm:$0x1]  ;;  %v338_v52 = vld [vmem:[%s4223_s0 + $0x16f] sm:$0x1]  ;;  %1449 = vst.msk [vmem:[%s4224_s1 + $0x3e] sm:$0x1] %vm1386_vm0, %v1320_v10  ;;  %v1004_v6 = vmax.f32 %v732_v57, %v320_v42  ;;  %v733_v8 = vmax.f32 %v320_v42, %v321_v40 }
  0x7f   :  { %v339_v59 = vld [vmem:[%s4223_s0 + $0x170] sm:$0x1]  ;;  %v306_v0 = vld [vmem:[%s4223_s0 + $0x14d] sm:$0x1]  ;;  %v307_v2 = vld [vmem:[%s4223_s0 + $0x14e] sm:$0x1]  ;;  %v2986_v12 = vmax.f32 %v740_v30, %v337_v14  ;;  %v741_v13 = vmax.f32 %v337_v14, %v338_v52  ;;  %v997_v16 = vmax.f32 %v725_v36, %v305_v7  ;;  %v1323_v51 = vmax.f32 %v1195_v63, %v2961_v58 }
  0x80   :  { %v323_v55 = vld [vmem:[%s4223_s0 + $0x15f] sm:$0x1]  ;;  %v324_v5 = vld [vmem:[%s4223_s0 + $0x160] sm:$0x1]  ;;  %v340_v39 = vld [vmem:[%s4223_s0 + $0x171] sm:$0x1]  ;;  %v726_v17 = vmax.f32 %v305_v7, %v306_v0  ;;  %v1196_v44 = vmax.f32 %v996_v4, %v1004_v6  ;;  %v1005_v20 = vmax.f32 %v733_v8, %v322_v50 }
  0x81   :  { %1450 = vst.msk [vmem:[%s4224_s1 + $0x3f] sm:$0x1] %vm1386_vm0, %v1321_v21  ;;  %v341_v62 = vld [vmem:[%s4223_s0 + $0x172] sm:$0x1]  ;;  %v308_v9 = vld [vmem:[%s4223_s0 + $0x14f] sm:$0x1]  ;;  %v734_v25 = vmax.f32 %v322_v50, %v323_v55  ;;  %v3011_v28 = vmax.f32 %v741_v13, %v339_v59  ;;  %v742_v27 = vmax.f32 %v339_v59, %v340_v39 }
  0x82   :  { %v309_v11 = vld [vmem:[%s4223_s0 + $0x150] sm:$0x1]  ;;  %v325_v37 = vld [vmem:[%s4223_s0 + $0x161] sm:$0x1]  ;;  %v326_v23 = vld [vmem:[%s4223_s0 + $0x162] sm:$0x1]  ;;  %v998_v60 = vmax.f32 %v726_v17, %v307_v2  ;;  %v727_v18 = vmax.f32 %v307_v2, %v308_v9  ;;  %v1324_v32 = vmax.f32 %v1196_v44, %v2986_v12  ;;  %v1197_v54 = vmax.f32 %v997_v16, %v1005_v20 }
  0x83   :  { %v342_v24 = vld [vmem:[%s4223_s0 + $0x173] sm:$0x1]  ;;  %1451 = vst.msk [vmem:[%s4224_s1 + $0x40] sm:$0x1] %vm1386_vm0, %v1322_v48  ;;  %v343_v26 = vld [vmem:[%s4223_s0 + $0x174] sm:$0x1]  ;;  %v1006_v35 = vmax.f32 %v734_v25, %v324_v5  ;;  %v735_v34 = vmax.f32 %v324_v5, %v325_v37  ;;  %v3036_v43 = vmax.f32 %v742_v27, %v341_v62 }
  0x84   :  { %v310_v3 = vld [vmem:[%s4223_s0 + $0x151] sm:$0x1]  ;;  %v311_v15 = vld [vmem:[%s4223_s0 + $0x152] sm:$0x1]  ;;  %v327_v29 = vld [vmem:[%s4223_s0 + $0x163] sm:$0x1]  ;;  %v743_v10 = vmax.f32 %v341_v62, %v342_v24  ;;  %v999_v45 = vmax.f32 %v727_v18, %v309_v11  ;;  %v1325_v7 = vmax.f32 %v1197_v54, %v3011_v28 }
  0x85   :  { %v328_v31 = vld [vmem:[%s4223_s0 + $0x164] sm:$0x1]  ;;  %v344_v1 = vld [vmem:[%s4223_s0 + $0x175] sm:$0x1]  ;;  %1452 = vst.msk [vmem:[%s4224_s1 + $0x41] sm:$0x1] %vm1386_vm0, %v1323_v51  ;;  %v728_v46 = vmax.f32 %v309_v11, %v310_v3  ;;  %v1198_v47 = vmax.f32 %v998_v60, %v1006_v35  ;;  %v1007_v22 = vmax.f32 %v735_v34, %v326_v23  ;;  %v736_v49 = vmax.f32 %v326_v23, %v327_v29 }
  0x86   :  { %v345_v38 = vld [vmem:[%s4223_s0 + $0x176] sm:$0x1]  ;;  %v312_v41 = vld [vmem:[%s4223_s0 + $0x153] sm:$0x1]  ;;  %v313_v42 = vld [vmem:[%s4223_s0 + $0x154] sm:$0x1]  ;;  %v3061_v21 = vmax.f32 %v743_v10, %v343_v26  ;;  %v744_v53 = vmax.f32 %v343_v26, %v344_v1 }
  0x87   :  { %v329_v33 = vld [vmem:[%s4223_s0 + $0x165] sm:$0x1]  ;;  %v330_v14 = vld [vmem:[%s4223_s0 + $0x166] sm:$0x1]  ;;  %v346_v19 = vld [vmem:[%s4223_s0 + $0x177] sm:$0x1]  ;;  %v1000_v56 = vmax.f32 %v728_v46, %v311_v15  ;;  %v729_v57 = vmax.f32 %v311_v15, %v312_v41  ;;  %v1326_v30 = vmax.f32 %v1198_v47, %v3036_v43  ;;  %v1199_v4 = vmax.f32 %v999_v45, %v1007_v22 }
  0x88   :  { %1453 = vst.msk [vmem:[%s4224_s1 + $0x42] sm:$0x1] %vm1386_vm0, %v1324_v32  ;;  %v347_v40 = vld [vmem:[%s4223_s0 + $0x178] sm:$0x1]  ;;  %v348_v50 = vld [vmem:[%s4223_s0 + $0x17a] sm:$0x1]  ;;  %v1008_v36 = vmax.f32 %v736_v49, %v328_v31  ;;  %v737_v55 = vmax.f32 %v328_v31, %v329_v33  ;;  %v3086_v63 = vmax.f32 %v744_v53, %v345_v38  ;;  %v745_v6 = vmax.f32 %v345_v38, %v346_v19 }
  0x89   :  { %v349_v52 = vld [vmem:[%s4223_s0 + $0x17b] sm:$0x1]  ;;  %v350_v59 = vld [vmem:[%s4223_s0 + $0x17c] sm:$0x1]  ;;  %v365_v0 = vld [vmem:[%s4223_s0 + $0x18c] sm:$0x1]  ;;  %v1001_v8 = vmax.f32 %v729_v57, %v313_v42  ;;  %v1327_v13 = vmax.f32 %v1199_v4, %v3061_v21 }
  0x8a   :  { %v366_v2 = vld [vmem:[%s4223_s0 + $0x18d] sm:$0x1]  ;;  %1454 = vst.msk [vmem:[%s4224_s1 + $0x43] sm:$0x1] %vm1386_vm0, %v1325_v7  ;;  %v367_v5 = vld [vmem:[%s4223_s0 + $0x18e] sm:$0x1]  ;;  %v746_v62 = vmax.f32 %v348_v50, %v349_v52  ;;  %v1200_v16 = vmax.f32 %v1000_v56, %v1008_v36  ;;  %v1009_v17 = vmax.f32 %v737_v55, %v330_v14  ;;  %v3108_v44 = vmax.f32 %v745_v6, %v347_v40 }
  0x8b   :  { %v351_v39 = vld [vmem:[%s4223_s0 + $0x17d] sm:$0x1]  ;;  %v368_v48 = vld [vmem:[%s4223_s0 + $0x18f] sm:$0x1]  ;;  %v352_v9 = vld [vmem:[%s4223_s0 + $0x17e] sm:$0x1]  ;;  %v754_v37 = vmax.f32 %v365_v0, %v366_v2 }
  0x8c   :  { %v353_v11 = vld [vmem:[%s4223_s0 + $0x17f] sm:$0x1]  ;;  %1455 = vst.msk [vmem:[%s4224_s1 + $0x44] sm:$0x1] %vm1386_vm0, %v1326_v30  ;;  %v369_v23 = vld [vmem:[%s4223_s0 + $0x190] sm:$0x1]  ;;  %v1018_v20 = vmax.f32 %v746_v62, %v350_v59  ;;  %v747_v25 = vmax.f32 %v350_v59, %v351_v39  ;;  %v755_v26 = vmax.f32 %v367_v5, %v368_v48  ;;  %v1328_v60 = vmax.f32 %v1200_v16, %v3086_v63 }
  0x8d   :  { %v354_v24 = vld [vmem:[%s4223_s0 + $0x180] sm:$0x1]  ;;  %v370_v51 = vld [vmem:[%s4223_s0 + $0x191] sm:$0x1]  ;;  %v371_v3 = vld [vmem:[%s4223_s0 + $0x192] sm:$0x1]  ;;  %v1201_v18 = vmax.f32 %v1001_v8, %v1009_v17  ;;  %v3124_v29 = vmax.f32 %v754_v37, %v367_v5  ;;  %v748_v31 = vmax.f32 %v352_v9, %v353_v11 }
  0x8e   :  { %v355_v15 = vld [vmem:[%s4223_s0 + $0x181] sm:$0x1]  ;;  %v372_v27 = vld [vmem:[%s4223_s0 + $0x193] sm:$0x1]  ;;  %1456 = vst.msk [vmem:[%s4224_s1 + $0x45] sm:$0x1] %vm1386_vm0, %v1327_v13  ;;  %v1202_v54 = vmax.f32 %v2937_v61, %v1018_v20  ;;  %v1019_v35 = vmax.f32 %v747_v25, %v352_v9  ;;  %v3133_v34 = vmax.f32 %v755_v26, %v369_v23  ;;  %v756_v38 = vmax.f32 %v369_v23, %v370_v51 }
  0x8f   :  { %v356_v1 = vld [vmem:[%s4223_s0 + $0x182] sm:$0x1]  ;;  %v357_v32 = vld [vmem:[%s4223_s0 + $0x183] sm:$0x1]  ;;  %v373_v41 = vld [vmem:[%s4223_s0 + $0x194] sm:$0x1]  ;;  %v1329_v61 = vmax.f32 %v1201_v18, %v3108_v44  ;;  %v1020_v45 = vmax.f32 %v748_v31, %v354_v24  ;;  %v749_v46 = vmax.f32 %v354_v24, %v355_v15  ;;  %v757_v33 = vmax.f32 %v371_v3, %v372_v27 }
  0x90   :  { %v358_v42 = vld [vmem:[%s4223_s0 + $0x184] sm:$0x1]  ;;  %v374_v10 = vld [vmem:[%s4223_s0 + $0x195] sm:$0x1]  ;;  %1457 = vst.msk [vmem:[%s4224_s1 + $0x46] sm:$0x1] %vm1386_vm0, %v1328_v60  ;;  %v1330_v47 = vmax.f32 %v1202_v54, %v3124_v29  ;;  %v1203_v22 = vmax.f32 %v2961_v58, %v1019_v35  ;;  %v3160_v49 = vmax.f32 %v756_v38, %v371_v3  ;;  %v750_v40 = vmax.f32 %v356_v1, %v357_v32 }
  0x91   :  { %v375_v14 = vld [vmem:[%s4223_s0 + $0x196] sm:$0x1]  ;;  %v359_v19 = vld [vmem:[%s4223_s0 + $0x185] sm:$0x1]  ;;  %v376_v7 = vld [vmem:[%s4223_s0 + $0x197] sm:$0x1]  ;;  %v1204_v58 = vmax.f32 %v2986_v12, %v1020_v45  ;;  %v1021_v56 = vmax.f32 %v749_v46, %v356_v1  ;;  %v3176_v57 = vmax.f32 %v757_v33, %v373_v41  ;;  %v758_v59 = vmax.f32 %v373_v41, %v374_v10 }
  0x92   :  { %v360_v50 = vld [vmem:[%s4223_s0 + $0x186] sm:$0x1]  ;;  %v377_v52 = vld [vmem:[%s4223_s0 + $0x198] sm:$0x1]  ;;  %v361_v53 = vld [vmem:[%s4223_s0 + $0x187] sm:$0x1]  ;;  %v1331_v12 = vmax.f32 %v1203_v22, %v3133_v34  ;;  %v1022_v4 = vmax.f32 %v750_v40, %v358_v42  ;;  %v751_v36 = vmax.f32 %v358_v42, %v359_v19  ;;  %v759_v55 = vmax.f32 %v375_v14, %v376_v7 }
  0x93   :  { %1458 = vst.msk [vmem:[%s4224_s1 + $0x47] sm:$0x1] %vm1386_vm0, %v1329_v61  ;;  %v362_v0 = vld [vmem:[%s4223_s0 + $0x188] sm:$0x1]  ;;  %v378_v2 = vld [vmem:[%s4223_s0 + $0x199] sm:$0x1]  ;;  %v1332_v6 = vmax.f32 %v1204_v58, %v3160_v49  ;;  %v1205_v8 = vmax.f32 %v3011_v28, %v1021_v56  ;;  %v3203_v62 = vmax.f32 %v758_v59, %v375_v14  ;;  %v752_v9 = vmax.f32 %v360_v50, %v361_v53 }
  0x94   :  { %v379_v30 = vld [vmem:[%s4223_s0 + $0x19a] sm:$0x1]  ;;  %1459 = vst.msk [vmem:[%s4224_s1 + $0x48] sm:$0x1] %vm1386_vm0, %v1330_v47  ;;  %v363_v5 = vld [vmem:[%s4223_s0 + $0x189] sm:$0x1]  ;;  %v1206_v28 = vmax.f32 %v3036_v43, %v1022_v4  ;;  %v1023_v17 = vmax.f32 %v751_v36, %v360_v50  ;;  %v3219_v37 = vmax.f32 %v759_v55, %v377_v52  ;;  %v760_v23 = vmax.f32 %v377_v52, %v378_v2 }
  0x95   :  { %v364_v39 = vld [vmem:[%s4223_s0 + $0x18a] sm:$0x1]  ;;  %v380_v48 = vld [vmem:[%s4223_s0 + $0x19b] sm:$0x1]  ;;  %v381_v11 = vld [vmem:[%s4223_s0 + $0x19c] sm:$0x1]  ;;  %v1333_v43 = vmax.f32 %v1205_v8, %v3176_v57  ;;  %v1024_v25 = vmax.f32 %v752_v9, %v362_v0  ;;  %v753_v26 = vmax.f32 %v362_v0, %v363_v5 }
  0x96   :  { %v382_v13 = vld [vmem:[%s4223_s0 + $0x19e] sm:$0x1]  ;;  %v383_v16 = vld [vmem:[%s4223_s0 + $0x19f] sm:$0x1]  ;;  %1460 = vst.msk [vmem:[%s4224_s1 + $0x49] sm:$0x1] %vm1386_vm0, %v1331_v12  ;;  %v761_v3 = vmax.f32 %v379_v30, %v380_v48  ;;  %v1334_v18 = vmax.f32 %v1206_v28, %v3203_v62  ;;  %v1207_v31 = vmax.f32 %v3061_v21, %v1023_v17  ;;  %v3246_v1 = vmax.f32 %v760_v23, %v379_v30 }
  0x97   :  { %v384_v24 = vld [vmem:[%s4223_s0 + $0x1a0] sm:$0x1]  ;;  %v399_v51 = vld [vmem:[%s4223_s0 + $0x1b0] sm:$0x1]  ;;  %v400_v20 = vld [vmem:[%s4223_s0 + $0x1b1] sm:$0x1]  ;;  %v762_v32 = vmax.f32 %v382_v13, %v383_v16  ;;  %v1208_v38 = vmax.f32 %v3086_v63, %v1024_v25  ;;  %v1025_v41 = vmax.f32 %v753_v26, %v364_v39 }
  0x98   :  { %1461 = vst.msk [vmem:[%s4224_s1 + $0x4a] sm:$0x1] %vm1386_vm0, %v1332_v6  ;;  %v401_v15 = vld [vmem:[%s4223_s0 + $0x1b2] sm:$0x1]  ;;  %v385_v27 = vld [vmem:[%s4223_s0 + $0x1a1] sm:$0x1]  ;;  %v3259_v21 = vmax.f32 %v761_v3, %v381_v11  ;;  %v770_v42 = vmax.f32 %v399_v51, %v400_v20  ;;  %v1335_v63 = vmax.f32 %v1207_v31, %v3219_v37 }
  0x99   :  { %v402_v60 = vld [vmem:[%s4223_s0 + $0x1b3] sm:$0x1]  ;;  %v386_v54 = vld [vmem:[%s4223_s0 + $0x1a2] sm:$0x1]  ;;  %v387_v35 = vld [vmem:[%s4223_s0 + $0x1a3] sm:$0x1]  ;;  %v1034_v46 = vmax.f32 %v762_v32, %v384_v24  ;;  %v763_v33 = vmax.f32 %v384_v24, %v385_v27  ;;  %v1336_v22 = vmax.f32 %v1208_v38, %v3246_v1  ;;  %v1209_v40 = vmax.f32 %v3108_v44, %v1025_v41 }
  0x9a   :  { %1462 = vst.msk [vmem:[%s4224_s1 + $0x4b] sm:$0x1] %vm1386_vm0, %v1333_v43  ;;  %v403_v10 = vld [vmem:[%s4223_s0 + $0x1b4] sm:$0x1]  ;;  %v388_v61 = vld [vmem:[%s4223_s0 + $0x1a4] sm:$0x1]  ;;  %v771_v14 = vmax.f32 %v401_v15, %v402_v60  ;;  %v3286_v50 = vmax.f32 %v770_v42, %v401_v15  ;;  %v764_v52 = vmax.f32 %v386_v54, %v387_v35 }
  0x9b   :  { %v404_v45 = vld [vmem:[%s4223_s0 + $0x1b5] sm:$0x1]  ;;  %1463 = vst.msk [vmem:[%s4224_s1 + $0x4c] sm:$0x1] %vm1386_vm0, %v1334_v18  ;;  %v405_v19 = vld [vmem:[%s4223_s0 + $0x1b6] sm:$0x1]  ;;  %v1210_v56 = vmax.f32 %v3124_v29, %v1034_v46  ;;  %v1035_v59 = vmax.f32 %v763_v33, %v386_v54  ;;  %v1337_v29 = vmax.f32 %v1209_v40, %v3259_v21 }
  0x9c   :  { %v389_v7 = vld [vmem:[%s4223_s0 + $0x1a5] sm:$0x1]  ;;  %v406_v47 = vld [vmem:[%s4223_s0 + $0x1b7] sm:$0x1]  ;;  %v390_v53 = vld [vmem:[%s4223_s0 + $0x1a6] sm:$0x1]  ;;  %v3299_v44 = vmax.f32 %v771_v14, %v403_v10  ;;  %v772_v0 = vmax.f32 %v403_v10, %v404_v45  ;;  %v1036_v4 = vmax.f32 %v764_v52, %v388_v61 }
  0x9d   :  { %v391_v58 = vld [vmem:[%s4223_s0 + $0x1a7] sm:$0x1]  ;;  %1464 = vst.msk [vmem:[%s4224_s1 + $0x4d] sm:$0x1] %vm1386_vm0, %v1335_v63  ;;  %v407_v2 = vld [vmem:[%s4223_s0 + $0x1b8] sm:$0x1]  ;;  %v765_v36 = vmax.f32 %v388_v61, %v389_v7  ;;  %v773_v55 = vmax.f32 %v405_v19, %v406_v47  ;;  %v1338_v6 = vmax.f32 %v1210_v56, %v3286_v50  ;;  %v1211_v8 = vmax.f32 %v3133_v34, %v1035_v59 }
  0x9e   :  { %v392_v30 = vld [vmem:[%s4223_s0 + $0x1a8] sm:$0x1]  ;;  %v408_v12 = vld [vmem:[%s4223_s0 + $0x1b9] sm:$0x1]  ;;  %1465 = vst.msk [vmem:[%s4224_s1 + $0x4e] sm:$0x1] %vm1386_vm0, %v1336_v22  ;;  %v3326_v9 = vmax.f32 %v772_v0, %v405_v19  ;;  %v766_v11 = vmax.f32 %v390_v53, %v391_v58  ;;  %v1212_v34 = vmax.f32 %v3160_v49, %v1036_v4 }
  0x9f   :  { %v409_v5 = vld [vmem:[%s4223_s0 + $0x1ba] sm:$0x1]  ;;  %v393_v39 = vld [vmem:[%s4223_s0 + $0x1a9] sm:$0x1]  ;;  %v410_v48 = vld [vmem:[%s4223_s0 + $0x1bb] sm:$0x1]  ;;  %v1037_v17 = vmax.f32 %v765_v36, %v390_v53  ;;  %v3342_v23 = vmax.f32 %v773_v55, %v407_v2  ;;  %v774_v24 = vmax.f32 %v407_v2, %v408_v12  ;;  %v1339_v49 = vmax.f32 %v1211_v8, %v3299_v44 }
  0xa0   :  { %v394_v13 = vld [vmem:[%s4223_s0 + $0x1aa] sm:$0x1]  ;;  %v411_v16 = vld [vmem:[%s4223_s0 + $0x1bc] sm:$0x1]  ;;  %v395_v28 = vld [vmem:[%s4223_s0 + $0x1ab] sm:$0x1]  ;;  %v1038_v25 = vmax.f32 %v766_v11, %v392_v30  ;;  %v767_v26 = vmax.f32 %v392_v30, %v393_v39  ;;  %v775_v3 = vmax.f32 %v409_v5, %v410_v48  ;;  %v1340_v18 = vmax.f32 %v1212_v34, %v3326_v9 }
  0xa1   :  { %1466 = vst.msk [vmem:[%s4224_s1 + $0x4f] sm:$0x1] %vm1386_vm0, %v1337_v29  ;;  %v396_v51 = vld [vmem:[%s4223_s0 + $0x1ac] sm:$0x1]  ;;  %v412_v20 = vld [vmem:[%s4223_s0 + $0x1bd] sm:$0x1]  ;;  %v1213_v31 = vmax.f32 %v3176_v57, %v1037_v17  ;;  %v3369_v32 = vmax.f32 %v774_v24, %v409_v5  ;;  %v768_v54 = vmax.f32 %v394_v13, %v395_v28 }
  0xa2   :  { %v413_v43 = vld [vmem:[%s4223_s0 + $0x1be] sm:$0x1]  ;;  %1467 = vst.msk [vmem:[%s4224_s1 + $0x50] sm:$0x1] %vm1386_vm0, %v1338_v6  ;;  %v397_v15 = vld [vmem:[%s4223_s0 + $0x1ad] sm:$0x1]  ;;  %v1214_v57 = vmax.f32 %v3203_v62, %v1038_v25  ;;  %v1039_v42 = vmax.f32 %v767_v26, %v394_v13  ;;  %v3385_v10 = vmax.f32 %v775_v3, %v411_v16  ;;  %v776_v61 = vmax.f32 %v411_v16, %v412_v20 }
  0xa3   :  { %v398_v27 = vld [vmem:[%s4223_s0 + $0x1ae] sm:$0x1]  ;;  %v414_v60 = vld [vmem:[%s4223_s0 + $0x1bf] sm:$0x1]  ;;  %v415_v35 = vld [vmem:[%s4223_s0 + $0x1c0] sm:$0x1]  ;;  %v1341_v62 = vmax.f32 %v1213_v31, %v3342_v23  ;;  %v1040_v33 = vmax.f32 %v768_v54, %v396_v51  ;;  %v769_v14 = vmax.f32 %v396_v51, %v397_v15 }
  0xa4   :  { %v416_v38 = vld [vmem:[%s4223_s0 + $0x1c2] sm:$0x1]  ;;  %v417_v41 = vld [vmem:[%s4223_s0 + $0x1c3] sm:$0x1]  ;;  %1468 = vst.msk [vmem:[%s4224_s1 + $0x51] sm:$0x1] %vm1386_vm0, %v1339_v49  ;;  %v777_v19 = vmax.f32 %v413_v43, %v414_v60  ;;  %v1342_v40 = vmax.f32 %v1214_v57, %v3369_v32  ;;  %v1215_v52 = vmax.f32 %v3219_v37, %v1039_v42  ;;  %v3412_v53 = vmax.f32 %v776_v61, %v413_v43 }
  0xa5   :  { %v418_v45 = vld [vmem:[%s4223_s0 + $0x1c4] sm:$0x1]  ;;  %v433_v63 = vld [vmem:[%s4223_s0 + $0x1d4] sm:$0x1]  ;;  %v434_v46 = vld [vmem:[%s4223_s0 + $0x1d5] sm:$0x1]  ;;  %v778_v58 = vmax.f32 %v416_v38, %v417_v41  ;;  %v1216_v0 = vmax.f32 %v3246_v1, %v1040_v33  ;;  %v1041_v2 = vmax.f32 %v769_v14, %v398_v27 }
  0xa6   :  { %1469 = vst.msk [vmem:[%s4224_s1 + $0x52] sm:$0x1] %vm1386_vm0, %v1340_v18  ;;  %v435_v7 = vld [vmem:[%s4223_s0 + $0x1d6] sm:$0x1]  ;;  %v419_v47 = vld [vmem:[%s4223_s0 + $0x1c5] sm:$0x1]  ;;  %v3425_v37 = vmax.f32 %v777_v19, %v415_v35  ;;  %v786_v30 = vmax.f32 %v433_v63, %v434_v46  ;;  %v1343_v1 = vmax.f32 %v1215_v52, %v3385_v10 }
  0xa7   :  { %v436_v22 = vld [vmem:[%s4223_s0 + $0x1d7] sm:$0x1]  ;;  %v420_v56 = vld [vmem:[%s4223_s0 + $0x1c6] sm:$0x1]  ;;  %v421_v59 = vld [vmem:[%s4223_s0 + $0x1c7] sm:$0x1]  ;;  %v1050_v36 = vmax.f32 %v778_v58, %v418_v45  ;;  %v779_v55 = vmax.f32 %v418_v45, %v419_v47  ;;  %v1344_v8 = vmax.f32 %v1216_v0, %v3412_v53  ;;  %v1217_v11 = vmax.f32 %v3259_v21, %v1041_v2 }
  0xa8   :  { %1470 = vst.msk [vmem:[%s4224_s1 + $0x53] sm:$0x1] %vm1386_vm0, %v1341_v62  ;;  %v437_v12 = vld [vmem:[%s4223_s0 + $0x1d8] sm:$0x1]  ;;  %v422_v29 = vld [vmem:[%s4223_s0 + $0x1c8] sm:$0x1]  ;;  %v787_v5 = vmax.f32 %v435_v7, %v436_v22  ;;  %v3452_v13 = vmax.f32 %v786_v30, %v435_v7  ;;  %v780_v16 = vmax.f32 %v420_v56, %v421_v59 }
  0xa9   :  { %v438_v4 = vld [vmem:[%s4223_s0 + $0x1d9] sm:$0x1]  ;;  %1471 = vst.msk [vmem:[%s4224_s1 + $0x54] sm:$0x1] %vm1386_vm0, %v1342_v40  ;;  %v439_v39 = vld [vmem:[%s4223_s0 + $0x1da] sm:$0x1]  ;;  %v1218_v17 = vmax.f32 %v3286_v50, %v1050_v36  ;;  %v1051_v24 = vmax.f32 %v779_v55, %v420_v56  ;;  %v1345_v50 = vmax.f32 %v1217_v11, %v3425_v37 }
  0xaa   :  { %v423_v48 = vld [vmem:[%s4223_s0 + $0x1c9] sm:$0x1]  ;;  %v440_v6 = vld [vmem:[%s4223_s0 + $0x1db] sm:$0x1]  ;;  %v424_v28 = vld [vmem:[%s4223_s0 + $0x1ca] sm:$0x1]  ;;  %v3465_v21 = vmax.f32 %v787_v5, %v437_v12  ;;  %v788_v51 = vmax.f32 %v437_v12, %v438_v4  ;;  %v1052_v25 = vmax.f32 %v780_v16, %v422_v29 }
  0xab   :  { %v425_v34 = vld [vmem:[%s4223_s0 + $0x1cb] sm:$0x1]  ;;  %1472 = vst.msk [vmem:[%s4224_s1 + $0x55] sm:$0x1] %vm1386_vm0, %v1343_v1  ;;  %v441_v20 = vld [vmem:[%s4223_s0 + $0x1dc] sm:$0x1]  ;;  %v781_v26 = vmax.f32 %v422_v29, %v423_v48  ;;  %v789_v3 = vmax.f32 %v439_v39, %v440_v6  ;;  %v1346_v18 = vmax.f32 %v1218_v17, %v3452_v13  ;;  %v1219_v31 = vmax.f32 %v3299_v44, %v1051_v24 }
  0xac   :  { %v426_v43 = vld [vmem:[%s4223_s0 + $0x1cc] sm:$0x1]  ;;  %v442_v49 = vld [vmem:[%s4223_s0 + $0x1dd] sm:$0x1]  ;;  %1473 = vst.msk [vmem:[%s4224_s1 + $0x56] sm:$0x1] %vm1386_vm0, %v1344_v8  ;;  %v3492_v54 = vmax.f32 %v788_v51, %v439_v39  ;;  %v782_v35 = vmax.f32 %v424_v28, %v425_v34  ;;  %v1220_v44 = vmax.f32 %v3326_v9, %v1052_v25 }
  0xad   :  { %v443_v15 = vld [vmem:[%s4223_s0 + $0x1de] sm:$0x1]  ;;  %v427_v27 = vld [vmem:[%s4223_s0 + $0x1cd] sm:$0x1]  ;;  %v444_v60 = vld [vmem:[%s4223_s0 + $0x1df] sm:$0x1]  ;;  %v1053_v42 = vmax.f32 %v781_v26, %v424_v28  ;;  %v3508_v61 = vmax.f32 %v789_v3, %v441_v20  ;;  %v790_v45 = vmax.f32 %v441_v20, %v442_v49  ;;  %v1347_v9 = vmax.f32 %v1219_v31, %v3465_v21 }
  0xae   :  { %v428_v38 = vld [vmem:[%s4223_s0 + $0x1ce] sm:$0x1]  ;;  %v445_v41 = vld [vmem:[%s4223_s0 + $0x1e0] sm:$0x1]  ;;  %v429_v57 = vld [vmem:[%s4223_s0 + $0x1cf] sm:$0x1]  ;;  %v1054_v33 = vmax.f32 %v782_v35, %v426_v43  ;;  %v783_v14 = vmax.f32 %v426_v43, %v427_v27  ;;  %v791_v19 = vmax.f32 %v443_v15, %v444_v60  ;;  %v1348_v40 = vmax.f32 %v1220_v44, %v3492_v54 }
  0xaf   :  { %1474 = vst.msk [vmem:[%s4224_s1 + $0x57] sm:$0x1] %vm1386_vm0, %v1345_v50  ;;  %v430_v63 = vld [vmem:[%s4223_s0 + $0x1d0] sm:$0x1]  ;;  %v446_v46 = vld [vmem:[%s4223_s0 + $0x1e1] sm:$0x1]  ;;  %v1221_v52 = vmax.f32 %v3342_v23, %v1053_v42  ;;  %v3535_v58 = vmax.f32 %v790_v45, %v443_v15  ;;  %v784_v56 = vmax.f32 %v428_v38, %v429_v57 }
  0xb0   :  { %v447_v62 = vld [vmem:[%s4223_s0 + $0x1e2] sm:$0x1]  ;;  %1475 = vst.msk [vmem:[%s4224_s1 + $0x58] sm:$0x1] %vm1386_vm0, %v1346_v18  ;;  %v431_v7 = vld [vmem:[%s4223_s0 + $0x1d1] sm:$0x1]  ;;  %v1222_v23 = vmax.f32 %v3369_v32, %v1054_v33  ;;  %v1055_v30 = vmax.f32 %v783_v14, %v428_v38  ;;  %v3551_v12 = vmax.f32 %v791_v19, %v445_v41  ;;  %v792_v29 = vmax.f32 %v445_v41, %v446_v46 }
  0xb1   :  { %v432_v47 = vld [vmem:[%s4223_s0 + $0x1d2] sm:$0x1]  ;;  %v448_v22 = vld [vmem:[%s4223_s0 + $0x1e3] sm:$0x1]  ;;  %v449_v59 = vld [vmem:[%s4223_s0 + $0x1e4] sm:$0x1]  ;;  %v1349_v32 = vmax.f32 %v1221_v52, %v3508_v61  ;;  %v1056_v55 = vmax.f32 %v784_v56, %v430_v63  ;;  %v785_v5 = vmax.f32 %v430_v63, %v431_v7 }
  0xb2   :  { %v450_v0 = vld [vmem:[%s4223_s0 + $0x1e6] sm:$0x1]  ;;  %v451_v2 = vld [vmem:[%s4223_s0 + $0x1e7] sm:$0x1]  ;;  %1476 = vst.msk [vmem:[%s4224_s1 + $0x59] sm:$0x1] %vm1386_vm0, %v1347_v9  ;;  %v793_v39 = vmax.f32 %v447_v62, %v448_v22  ;;  %v1350_v11 = vmax.f32 %v1222_v23, %v3535_v58  ;;  %v1223_v16 = vmax.f32 %v3385_v10, %v1055_v30  ;;  %v3578_v28 = vmax.f32 %v792_v29, %v447_v62 }
  0xb3   :  { %v452_v4 = vld [vmem:[%s4223_s0 + $0x1e8] sm:$0x1]  ;;  %v467_v1 = vld [vmem:[%s4223_s0 + $0x1f8] sm:$0x1]  ;;  %v468_v36 = vld [vmem:[%s4223_s0 + $0x1f9] sm:$0x1]  ;;  %v794_v34 = vmax.f32 %v450_v0, %v451_v2  ;;  %v1224_v51 = vmax.f32 %v3412_v53, %v1056_v55  ;;  %v1057_v20 = vmax.f32 %v785_v5, %v432_v47 }
  0xb4   :  { %1477 = vst.msk [vmem:[%s4224_s1 + $0x5a] sm:$0x1] %vm1386_vm0, %v1348_v40  ;;  %v469_v48 = vld [vmem:[%s4223_s0 + $0x1fa] sm:$0x1]  ;;  %v453_v6 = vld [vmem:[%s4223_s0 + $0x1e9] sm:$0x1]  ;;  %v3591_v10 = vmax.f32 %v793_v39, %v449_v59  ;;  %v802_v43 = vmax.f32 %v467_v1, %v468_v36  ;;  %v1351_v53 = vmax.f32 %v1223_v16, %v3551_v12 }
  0xb5   :  { %v470_v8 = vld [vmem:[%s4223_s0 + $0x1fb] sm:$0x1]  ;;  %v454_v17 = vld [vmem:[%s4223_s0 + $0x1ea] sm:$0x1]  ;;  %v455_v24 = vld [vmem:[%s4223_s0 + $0x1eb] sm:$0x1]  ;;  %v1066_v26 = vmax.f32 %v794_v34, %v452_v4  ;;  %v795_v3 = vmax.f32 %v452_v4, %v453_v6  ;;  %v1352_v31 = vmax.f32 %v1224_v51, %v3578_v28  ;;  %v1225_v35 = vmax.f32 %v3425_v37, %v1057_v20 }
  0xb6   :  { %1478 = vst.msk [vmem:[%s4224_s1 + $0x5b] sm:$0x1] %vm1386_vm0, %v1349_v32  ;;  %v471_v49 = vld [vmem:[%s4223_s0 + $0x1fc] sm:$0x1]  ;;  %v456_v50 = vld [vmem:[%s4223_s0 + $0x1ec] sm:$0x1]  ;;  %v803_v15 = vmax.f32 %v469_v48, %v470_v8  ;;  %v3618_v38 = vmax.f32 %v802_v43, %v469_v48  ;;  %v796_v41 = vmax.f32 %v454_v17, %v455_v24 }
  0xb7   :  { %v472_v25 = vld [vmem:[%s4223_s0 + $0x1fd] sm:$0x1]  ;;  %1479 = vst.msk [vmem:[%s4224_s1 + $0x5c] sm:$0x1] %vm1386_vm0, %v1350_v11  ;;  %v473_v27 = vld [vmem:[%s4223_s0 + $0x1fe] sm:$0x1]  ;;  %v1226_v42 = vmax.f32 %v3452_v13, %v1066_v26  ;;  %v1067_v45 = vmax.f32 %v795_v3, %v454_v17  ;;  %v1353_v13 = vmax.f32 %v1225_v35, %v3591_v10 }
  0xb8   :  { %v457_v60 = vld [vmem:[%s4223_s0 + $0x1ed] sm:$0x1]  ;;  %v474_v18 = vld [vmem:[%s4223_s0 + $0x1ff] sm:$0x1]  ;;  %v458_v57 = vld [vmem:[%s4223_s0 + $0x1ee] sm:$0x1]  ;;  %v3631_v37 = vmax.f32 %v803_v15, %v471_v49  ;;  %v804_v63 = vmax.f32 %v471_v49, %v472_v25  ;;  %v1068_v33 = vmax.f32 %v796_v41, %v456_v50 }
  0xb9   :  { %v459_v44 = vld [vmem:[%s4223_s0 + $0x1ef] sm:$0x1]  ;;  %1480 = vst.msk [vmem:[%s4224_s1 + $0x5d] sm:$0x1] %vm1386_vm0, %v1351_v53  ;;  %v475_v46 = vld [vmem:[%s4223_s0 + $0x200] sm:$0x1]  ;;  %v797_v14 = vmax.f32 %v456_v50, %v457_v60  ;;  %v805_v19 = vmax.f32 %v473_v27, %v474_v18  ;;  %v1354_v40 = vmax.f32 %v1226_v42, %v3618_v38  ;;  %v1227_v52 = vmax.f32 %v3465_v21, %v1067_v45 }
  0xba   :  { %v460_v62 = vld [vmem:[%s4223_s0 + $0x1f0] sm:$0x1]  ;;  %v476_v9 = vld [vmem:[%s4223_s0 + $0x201] sm:$0x1]  ;;  %1481 = vst.msk [vmem:[%s4224_s1 + $0x5e] sm:$0x1] %vm1386_vm0, %v1352_v31  ;;  %v3658_v56 = vmax.f32 %v804_v63, %v473_v27  ;;  %v798_v59 = vmax.f32 %v458_v57, %v459_v44  ;;  %v1228_v21 = vmax.f32 %v3492_v54, %v1068_v33 }
  0xbb   :  { %v477_v7 = vld [vmem:[%s4223_s0 + $0x202] sm:$0x1]  ;;  %v461_v47 = vld [vmem:[%s4223_s0 + $0x1f1] sm:$0x1]  ;;  %v478_v22 = vld [vmem:[%s4223_s0 + $0x203] sm:$0x1]  ;;  %v1069_v30 = vmax.f32 %v797_v14, %v458_v57  ;;  %v3674_v29 = vmax.f32 %v805_v19, %v475_v46  ;;  %v806_v4 = vmax.f32 %v475_v46, %v476_v9  ;;  %v1355_v54 = vmax.f32 %v1227_v52, %v3631_v37 }
  0xbc   :  { %v462_v0 = vld [vmem:[%s4223_s0 + $0x1f2] sm:$0x1]  ;;  %v479_v2 = vld [vmem:[%s4223_s0 + $0x204] sm:$0x1]  ;;  %v463_v23 = vld [vmem:[%s4223_s0 + $0x1f3] sm:$0x1]  ;;  %v1070_v55 = vmax.f32 %v798_v59, %v460_v62  ;;  %v799_v5 = vmax.f32 %v460_v62, %v461_v47  ;;  %v807_v39 = vmax.f32 %v477_v7, %v478_v22  ;;  %v1356_v11 = vmax.f32 %v1228_v21, %v3658_v56 }
  0xbd   :  { %1482 = vst.msk [vmem:[%s4224_s1 + $0x5f] sm:$0x1] %vm1386_vm0, %v1353_v13  ;;  %v464_v1 = vld [vmem:[%s4223_s0 + $0x1f4] sm:$0x1]  ;;  %v480_v36 = vld [vmem:[%s4223_s0 + $0x205] sm:$0x1]  ;;  %v1229_v16 = vmax.f32 %v3508_v61, %v1069_v30  ;;  %v3701_v34 = vmax.f32 %v806_v4, %v477_v7  ;;  %v800_v17 = vmax.f32 %v462_v0, %v463_v23 }
  0xbe   :  { %v481_v32 = vld [vmem:[%s4223_s0 + $0x206] sm:$0x1]  ;;  %1483 = vst.msk [vmem:[%s4224_s1 + $0x60] sm:$0x1] %vm1386_vm0, %v1354_v40  ;;  %v465_v48 = vld [vmem:[%s4223_s0 + $0x1f5] sm:$0x1]  ;;  %v1230_v61 = vmax.f32 %v3535_v58, %v1070_v55  ;;  %v1071_v43 = vmax.f32 %v799_v5, %v462_v0  ;;  %v3717_v49 = vmax.f32 %v807_v39, %v479_v2  ;;  %v808_v50 = vmax.f32 %v479_v2, %v480_v36 }
  0xbf   :  { %v466_v6 = vld [vmem:[%s4223_s0 + $0x1f6] sm:$0x1]  ;;  %v482_v8 = vld [vmem:[%s4223_s0 + $0x207] sm:$0x1]  ;;  %v483_v24 = vld [vmem:[%s4223_s0 + $0x208] sm:$0x1]  ;;  %v1357_v58 = vmax.f32 %v1229_v16, %v3674_v29  ;;  %v1072_v3 = vmax.f32 %v800_v17, %v464_v1  ;;  %v801_v15 = vmax.f32 %v464_v1, %v465_v48 }
  0xc0   :  { %v484_v51 = vld [vmem:[%s4223_s0 + $0x20a] sm:$0x1]  ;;  %v485_v20 = vld [vmem:[%s4223_s0 + $0x20b] sm:$0x1]  ;;  %1484 = vst.msk [vmem:[%s4224_s1 + $0x61] sm:$0x1] %vm1386_vm0, %v1355_v54  ;;  %v809_v27 = vmax.f32 %v481_v32, %v482_v8  ;;  %v1358_v35 = vmax.f32 %v1230_v61, %v3701_v34  ;;  %v1231_v41 = vmax.f32 %v3551_v12, %v1071_v43  ;;  %v3744_v57 = vmax.f32 %v808_v50, %v481_v32 }
  0xc1   :  { %v486_v25 = vld [vmem:[%s4223_s0 + $0x20c] sm:$0x1]  ;;  %v501_v53 = vld [vmem:[%s4223_s0 + $0x21c] sm:$0x1]  ;;  %v502_v26 = vld [vmem:[%s4223_s0 + $0x21d] sm:$0x1]  ;;  %v810_v44 = vmax.f32 %v484_v51, %v485_v20  ;;  %v1232_v63 = vmax.f32 %v3578_v28, %v1072_v3  ;;  %v1073_v46 = vmax.f32 %v801_v15, %v466_v6 }
  0xc2   :  { %1485 = vst.msk [vmem:[%s4224_s1 + $0x62] sm:$0x1] %vm1386_vm0, %v1356_v11  ;;  %v503_v60 = vld [vmem:[%s4223_s0 + $0x21e] sm:$0x1]  ;;  %v487_v18 = vld [vmem:[%s4223_s0 + $0x20d] sm:$0x1]  ;;  %v3757_v12 = vmax.f32 %v809_v27, %v483_v24  ;;  %v818_v62 = vmax.f32 %v501_v53, %v502_v26  ;;  %v1359_v28 = vmax.f32 %v1231_v41, %v3717_v49 }
  0xc3   :  { %v504_v31 = vld [vmem:[%s4223_s0 + $0x21f] sm:$0x1]  ;;  %v488_v42 = vld [vmem:[%s4223_s0 + $0x20e] sm:$0x1]  ;;  %v489_v45 = vld [vmem:[%s4223_s0 + $0x20f] sm:$0x1]  ;;  %v1082_v14 = vmax.f32 %v810_v44, %v486_v25  ;;  %v811_v19 = vmax.f32 %v486_v25, %v487_v18  ;;  %v1360_v52 = vmax.f32 %v1232_v63, %v3744_v57  ;;  %v1233_v59 = vmax.f32 %v3591_v10, %v1073_v46 }
  0xc4   :  { %1486 = vst.msk [vmem:[%s4224_s1 + $0x63] sm:$0x1] %vm1386_vm0, %v1357_v58  ;;  %v505_v9 = vld [vmem:[%s4223_s0 + $0x220] sm:$0x1]  ;;  %v490_v13 = vld [vmem:[%s4223_s0 + $0x210] sm:$0x1]  ;;  %v819_v7 = vmax.f32 %v503_v60, %v504_v31  ;;  %v3784_v0 = vmax.f32 %v818_v62, %v503_v60  ;;  %v812_v2 = vmax.f32 %v488_v42, %v489_v45 }
  0xc5   :  { %v506_v33 = vld [vmem:[%s4223_s0 + $0x221] sm:$0x1]  ;;  %1487 = vst.msk [vmem:[%s4224_s1 + $0x64] sm:$0x1] %vm1386_vm0, %v1358_v35  ;;  %v507_v47 = vld [vmem:[%s4223_s0 + $0x222] sm:$0x1]  ;;  %v1234_v30 = vmax.f32 %v3618_v38, %v1082_v14  ;;  %v1083_v4 = vmax.f32 %v811_v19, %v488_v42  ;;  %v1361_v38 = vmax.f32 %v1233_v59, %v3757_v12 }
  0xc6   :  { %v491_v22 = vld [vmem:[%s4223_s0 + $0x211] sm:$0x1]  ;;  %v508_v40 = vld [vmem:[%s4223_s0 + $0x223] sm:$0x1]  ;;  %v492_v23 = vld [vmem:[%s4223_s0 + $0x212] sm:$0x1]  ;;  %v3797_v10 = vmax.f32 %v819_v7, %v505_v9  ;;  %v820_v1 = vmax.f32 %v505_v9, %v506_v33  ;;  %v1084_v55 = vmax.f32 %v812_v2, %v490_v13 }
  0xc7   :  { %v493_v21 = vld [vmem:[%s4223_s0 + $0x213] sm:$0x1]  ;;  %1488 = vst.msk [vmem:[%s4224_s1 + $0x65] sm:$0x1] %vm1386_vm0, %v1359_v28  ;;  %v509_v36 = vld [vmem:[%s4223_s0 + $0x224] sm:$0x1]  ;;  %v813_v5 = vmax.f32 %v490_v13, %v491_v22  ;;  %v821_v39 = vmax.f32 %v507_v47, %v508_v40  ;;  %v1362_v11 = vmax.f32 %v1234_v30, %v3784_v0  ;;  %v1235_v16 = vmax.f32 %v3631_v37, %v1083_v4 }
  0xc8   :  { %v494_v32 = vld [vmem:[%s4223_s0 + $0x214] sm:$0x1]  ;;  %v510_v54 = vld [vmem:[%s4223_s0 + $0x225] sm:$0x1]  ;;  %1489 = vst.msk [vmem:[%s4224_s1 + $0x66] sm:$0x1] %vm1386_vm0, %v1360_v52  ;;  %v3824_v17 = vmax.f32 %v820_v1, %v507_v47  ;;  %v814_v24 = vmax.f32 %v492_v23, %v493_v21  ;;  %v1236_v37 = vmax.f32 %v3658_v56, %v1084_v55 }
  0xc9   :  { %v511_v48 = vld [vmem:[%s4223_s0 + $0x226] sm:$0x1]  ;;  %v495_v6 = vld [vmem:[%s4223_s0 + $0x215] sm:$0x1]  ;;  %v512_v8 = vld [vmem:[%s4223_s0 + $0x227] sm:$0x1]  ;;  %v1085_v43 = vmax.f32 %v813_v5, %v492_v23  ;;  %v3840_v50 = vmax.f32 %v821_v39, %v509_v36  ;;  %v822_v25 = vmax.f32 %v509_v36, %v510_v54  ;;  %v1363_v56 = vmax.f32 %v1235_v16, %v3797_v10 }
  0xca   :  { %v496_v51 = vld [vmem:[%s4223_s0 + $0x216] sm:$0x1]  ;;  %v513_v20 = vld [vmem:[%s4223_s0 + $0x228] sm:$0x1]  ;;  %v497_v61 = vld [vmem:[%s4223_s0 + $0x217] sm:$0x1]  ;;  %v1086_v3 = vmax.f32 %v814_v24, %v494_v32  ;;  %v815_v15 = vmax.f32 %v494_v32, %v495_v6  ;;  %v823_v27 = vmax.f32 %v511_v48, %v512_v8  ;;  %v1364_v35 = vmax.f32 %v1236_v37, %v3824_v17 }
  0xcb   :  { %1490 = vst.msk [vmem:[%s4224_s1 + $0x67] sm:$0x1] %vm1386_vm0, %v1361_v38  ;;  %v498_v53 = vld [vmem:[%s4223_s0 + $0x218] sm:$0x1]  ;;  %v514_v26 = vld [vmem:[%s4223_s0 + $0x229] sm:$0x1]  ;;  %v1237_v41 = vmax.f32 %v3674_v29, %v1085_v43  ;;  %v3867_v44 = vmax.f32 %v822_v25, %v511_v48  ;;  %v816_v42 = vmax.f32 %v496_v51, %v497_v61 }
  0xcc   :  { %v515_v58 = vld [vmem:[%s4223_s0 + $0x22a] sm:$0x1]  ;;  %1491 = vst.msk [vmem:[%s4224_s1 + $0x68] sm:$0x1] %vm1386_vm0, %v1362_v11  ;;  %v499_v60 = vld [vmem:[%s4223_s0 + $0x219] sm:$0x1]  ;;  %v1238_v29 = vmax.f32 %v3701_v34, %v1086_v3  ;;  %v1087_v62 = vmax.f32 %v815_v15, %v496_v51  ;;  %v3883_v9 = vmax.f32 %v823_v27, %v513_v20  ;;  %v824_v13 = vmax.f32 %v513_v20, %v514_v26 }
  0xcd   :  { %v500_v18 = vld [vmem:[%s4223_s0 + $0x21a] sm:$0x1]  ;;  %v516_v31 = vld [vmem:[%s4223_s0 + $0x22b] sm:$0x1]  ;;  %v517_v45 = vld [vmem:[%s4223_s0 + $0x22c] sm:$0x1]  ;;  %v1365_v34 = vmax.f32 %v1237_v41, %v3840_v50  ;;  %v1088_v19 = vmax.f32 %v816_v42, %v498_v53  ;;  %v817_v7 = vmax.f32 %v498_v53, %v499_v60 }
  0xce   :  { %v518_v63 = vld [vmem:[%s4223_s0 + $0x22e] sm:$0x1]  ;;  %v519_v46 = vld [vmem:[%s4223_s0 + $0x22f] sm:$0x1]  ;;  %1492 = vst.msk [vmem:[%s4224_s1 + $0x69] sm:$0x1] %vm1386_vm0, %v1363_v56  ;;  %v825_v47 = vmax.f32 %v515_v58, %v516_v31  ;;  %v1366_v59 = vmax.f32 %v1238_v29, %v3867_v44  ;;  %v1239_v2 = vmax.f32 %v3717_v49, %v1087_v62  ;;  %v3910_v23 = vmax.f32 %v824_v13, %v515_v58 }
  0xcf   :  { %v520_v33 = vld [vmem:[%s4223_s0 + $0x230] sm:$0x1]  ;;  %v535_v28 = vld [vmem:[%s4223_s0 + $0x240] sm:$0x1]  ;;  %v536_v14 = vld [vmem:[%s4223_s0 + $0x241] sm:$0x1]  ;;  %v826_v21 = vmax.f32 %v518_v63, %v519_v46  ;;  %v1240_v1 = vmax.f32 %v3744_v57, %v1088_v19  ;;  %v1089_v36 = vmax.f32 %v817_v7, %v500_v18 }
  0xd0   :  { %1493 = vst.msk [vmem:[%s4224_s1 + $0x6a] sm:$0x1] %vm1386_vm0, %v1364_v35  ;;  %v537_v22 = vld [vmem:[%s4223_s0 + $0x242] sm:$0x1]  ;;  %v521_v40 = vld [vmem:[%s4223_s0 + $0x231] sm:$0x1]  ;;  %v3923_v49 = vmax.f32 %v825_v47, %v517_v45  ;;  %v834_v32 = vmax.f32 %v535_v28, %v536_v14  ;;  %v1367_v57 = vmax.f32 %v1239_v2, %v3883_v9 }
  0xd1   :  { %v538_v52 = vld [vmem:[%s4223_s0 + $0x243] sm:$0x1]  ;;  %v522_v30 = vld [vmem:[%s4223_s0 + $0x232] sm:$0x1]  ;;  %v523_v4 = vld [vmem:[%s4223_s0 + $0x233] sm:$0x1]  ;;  %v1098_v5 = vmax.f32 %v826_v21, %v520_v33  ;;  %v827_v39 = vmax.f32 %v520_v33, %v521_v40  ;;  %v1368_v16 = vmax.f32 %v1240_v1, %v3910_v23  ;;  %v1241_v24 = vmax.f32 %v3757_v12, %v1089_v36 }
  0xd2   :  { %1494 = vst.msk [vmem:[%s4224_s1 + $0x6b] sm:$0x1] %vm1386_vm0, %v1365_v34  ;;  %v539_v54 = vld [vmem:[%s4223_s0 + $0x244] sm:$0x1]  ;;  %v524_v38 = vld [vmem:[%s4223_s0 + $0x234] sm:$0x1]  ;;  %v835_v48 = vmax.f32 %v537_v22, %v538_v52  ;;  %v3950_v51 = vmax.f32 %v834_v32, %v537_v22  ;;  %v828_v20 = vmax.f32 %v522_v30, %v523_v4 }
  0xd3   :  { %v540_v55 = vld [vmem:[%s4223_s0 + $0x245] sm:$0x1]  ;;  %1495 = vst.msk [vmem:[%s4224_s1 + $0x6c] sm:$0x1] %vm1386_vm0, %v1366_v59  ;;  %v541_v6 = vld [vmem:[%s4223_s0 + $0x246] sm:$0x1]  ;;  %v1242_v43 = vmax.f32 %v3784_v0, %v1098_v5  ;;  %v1099_v25 = vmax.f32 %v827_v39, %v522_v30  ;;  %v1369_v0 = vmax.f32 %v1241_v24, %v3923_v49 }
  0xd4   :  { %v525_v8 = vld [vmem:[%s4223_s0 + $0x235] sm:$0x1]  ;;  %v542_v11 = vld [vmem:[%s4223_s0 + $0x247] sm:$0x1]  ;;  %v526_v61 = vld [vmem:[%s4223_s0 + $0x236] sm:$0x1]  ;;  %v3963_v12 = vmax.f32 %v835_v48, %v539_v54  ;;  %v836_v53 = vmax.f32 %v539_v54, %v540_v55  ;;  %v1100_v3 = vmax.f32 %v828_v20, %v524_v38 }
  0xd5   :  { %v527_v37 = vld [vmem:[%s4223_s0 + $0x237] sm:$0x1]  ;;  %1496 = vst.msk [vmem:[%s4224_s1 + $0x6d] sm:$0x1] %vm1386_vm0, %v1367_v57  ;;  %v543_v26 = vld [vmem:[%s4223_s0 + $0x248] sm:$0x1]  ;;  %v829_v15 = vmax.f32 %v524_v38, %v525_v8  ;;  %v837_v27 = vmax.f32 %v541_v6, %v542_v11  ;;  %v1370_v35 = vmax.f32 %v1242_v43, %v3950_v51  ;;  %v1243_v41 = vmax.f32 %v3797_v10, %v1099_v25 }
  0xd6   :  { %v528_v58 = vld [vmem:[%s4223_s0 + $0x238] sm:$0x1]  ;;  %v544_v56 = vld [vmem:[%s4223_s0 + $0x249] sm:$0x1]  ;;  %1497 = vst.msk [vmem:[%s4224_s1 + $0x6e] sm:$0x1] %vm1386_vm0, %v1368_v16  ;;  %v3990_v42 = vmax.f32 %v836_v53, %v541_v6  ;;  %v830_v45 = vmax.f32 %v526_v61, %v527_v37  ;;  %v1244_v10 = vmax.f32 %v3824_v17, %v1100_v3 }
  0xd7   :  { %v545_v60 = vld [vmem:[%s4223_s0 + $0x24a] sm:$0x1]  ;;  %v529_v18 = vld [vmem:[%s4223_s0 + $0x239] sm:$0x1]  ;;  %v546_v31 = vld [vmem:[%s4223_s0 + $0x24b] sm:$0x1]  ;;  %v1101_v62 = vmax.f32 %v829_v15, %v526_v61  ;;  %v4006_v13 = vmax.f32 %v837_v27, %v543_v26  ;;  %v838_v33 = vmax.f32 %v543_v26, %v544_v56  ;;  %v1371_v17 = vmax.f32 %v1243_v41, %v3963_v12 }
  0xd8   :  { %v530_v63 = vld [vmem:[%s4223_s0 + $0x23a] sm:$0x1]  ;;  %v547_v46 = vld [vmem:[%s4223_s0 + $0x24c] sm:$0x1]  ;;  %v531_v29 = vld [vmem:[%s4223_s0 + $0x23b] sm:$0x1]  ;;  %v1102_v19 = vmax.f32 %v830_v45, %v528_v58  ;;  %v831_v7 = vmax.f32 %v528_v58, %v529_v18  ;;  %v839_v47 = vmax.f32 %v545_v60, %v546_v31  ;;  %v1372_v59 = vmax.f32 %v1244_v10, %v3990_v42 }
  0xd9   :  { %1498 = vst.msk [vmem:[%s4224_s1 + $0x6f] sm:$0x1] %vm1386_vm0, %v1369_v0  ;;  %v532_v28 = vld [vmem:[%s4223_s0 + $0x23c] sm:$0x1]  ;;  %v548_v14 = vld [vmem:[%s4223_s0 + $0x24d] sm:$0x1]  ;;  %v1245_v2 = vmax.f32 %v3840_v50, %v1101_v62  ;;  %v4033_v21 = vmax.f32 %v838_v33, %v545_v60  ;;  %v832_v30 = vmax.f32 %v530_v63, %v531_v29 }
  0xda   :  { %v549_v34 = vld [vmem:[%s4223_s0 + $0x24e] sm:$0x1]  ;;  %1499 = vst.msk [vmem:[%s4224_s1 + $0x70] sm:$0x1] %vm1386_vm0, %v1370_v35  ;;  %v533_v22 = vld [vmem:[%s4223_s0 + $0x23d] sm:$0x1]  ;;  %v1246_v50 = vmax.f32 %v3867_v44, %v1102_v19  ;;  %v1103_v32 = vmax.f32 %v831_v7, %v530_v63  ;;  %v4049_v54 = vmax.f32 %v839_v47, %v547_v46  ;;  %v840_v38 = vmax.f32 %v547_v46, %v548_v14 }
  0xdb   :  { %v534_v40 = vld [vmem:[%s4223_s0 + $0x23e] sm:$0x1]  ;;  %v550_v52 = vld [vmem:[%s4223_s0 + $0x24f] sm:$0x1]  ;;  %v551_v4 = vld [vmem:[%s4223_s0 + $0x250] sm:$0x1]  ;;  %v1373_v44 = vmax.f32 %v1245_v2, %v4006_v13  ;;  %v1104_v39 = vmax.f32 %v832_v30, %v532_v28  ;;  %v833_v48 = vmax.f32 %v532_v28, %v533_v22 }
  0xdc   :  { %v552_v1 = vld [vmem:[%s4223_s0 + $0x252] sm:$0x1]  ;;  %v553_v36 = vld [vmem:[%s4223_s0 + $0x253] sm:$0x1]  ;;  %1500 = vst.msk [vmem:[%s4224_s1 + $0x71] sm:$0x1] %vm1386_vm0, %v1371_v17  ;;  %v841_v6 = vmax.f32 %v549_v34, %v550_v52  ;;  %v1374_v24 = vmax.f32 %v1246_v50, %v4033_v21  ;;  %v1247_v20 = vmax.f32 %v3883_v9, %v1103_v32  ;;  %v4076_v61 = vmax.f32 %v840_v38, %v549_v34 }
  0xdd   :  { %v554_v55 = vld [vmem:[%s4223_s0 + $0x254] sm:$0x1]  ;;  %v569_v57 = vld [vmem:[%s4223_s0 + $0x264] sm:$0x1]  ;;  %v570_v5 = vld [vmem:[%s4223_s0 + $0x265] sm:$0x1]  ;;  %v842_v37 = vmax.f32 %v552_v1, %v553_v36  ;;  %v1248_v53 = vmax.f32 %v3910_v23, %v1104_v39  ;;  %v1105_v26 = vmax.f32 %v833_v48, %v534_v40 }
  0xde   :  { %1501 = vst.msk [vmem:[%s4224_s1 + $0x72] sm:$0x1] %vm1386_vm0, %v1372_v59  ;;  %v571_v8 = vld [vmem:[%s4223_s0 + $0x266] sm:$0x1]  ;;  %v555_v11 = vld [vmem:[%s4223_s0 + $0x255] sm:$0x1]  ;;  %v4089_v9 = vmax.f32 %v841_v6, %v551_v4  ;;  %v850_v58 = vmax.f32 %v569_v57, %v570_v5  ;;  %v1375_v23 = vmax.f32 %v1247_v20, %v4049_v54 }
  0xdf   :  { %v572_v16 = vld [vmem:[%s4223_s0 + $0x267] sm:$0x1]  ;;  %v556_v43 = vld [vmem:[%s4223_s0 + $0x256] sm:$0x1]  ;;  %v557_v25 = vld [vmem:[%s4223_s0 + $0x257] sm:$0x1]  ;;  %v1114_v15 = vmax.f32 %v842_v37, %v554_v55  ;;  %v843_v27 = vmax.f32 %v554_v55, %v555_v11  ;;  %v1376_v41 = vmax.f32 %v1248_v53, %v4076_v61  ;;  %v1249_v45 = vmax.f32 %v3923_v49, %v1105_v26 }
  0xe0   :  { %1502 = vst.msk [vmem:[%s4224_s1 + $0x73] sm:$0x1] %vm1386_vm0, %v1373_v44  ;;  %v573_v56 = vld [vmem:[%s4223_s0 + $0x268] sm:$0x1]  ;;  %v558_v0 = vld [vmem:[%s4223_s0 + $0x258] sm:$0x1]  ;;  %v851_v60 = vmax.f32 %v571_v8, %v572_v16  ;;  %v1122_v63 = vmax.f32 %v850_v58, %v571_v8  ;;  %v844_v46 = vmax.f32 %v556_v43, %v557_v25 }
  0xe1   :  { %v574_v3 = vld [vmem:[%s4223_s0 + $0x269] sm:$0x1]  ;;  %1503 = vst.msk [vmem:[%s4224_s1 + $0x74] sm:$0x1] %vm1386_vm0, %v1374_v24  ;;  %v575_v18 = vld [vmem:[%s4223_s0 + $0x26a] sm:$0x1]  ;;  %v1250_v62 = vmax.f32 %v3950_v51, %v1114_v15  ;;  %v1115_v33 = vmax.f32 %v843_v27, %v556_v43  ;;  %v1377_v51 = vmax.f32 %v1249_v45, %v4089_v9 }
  0xe2   :  { %v559_v31 = vld [vmem:[%s4223_s0 + $0x259] sm:$0x1]  ;;  %v576_v35 = vld [vmem:[%s4223_s0 + $0x26b] sm:$0x1]  ;;  %v560_v29 = vld [vmem:[%s4223_s0 + $0x25a] sm:$0x1]  ;;  %v1123_v28 = vmax.f32 %v851_v60, %v573_v56  ;;  %v852_v49 = vmax.f32 %v573_v56, %v574_v3  ;;  %v1116_v19 = vmax.f32 %v844_v46, %v558_v0 }
  0xe3   :  { %v561_v10 = vld [vmem:[%s4223_s0 + $0x25b] sm:$0x1]  ;;  %1504 = vst.msk [vmem:[%s4224_s1 + $0x75] sm:$0x1] %vm1386_vm0, %v1375_v23  ;;  %v577_v14 = vld [vmem:[%s4223_s0 + $0x26c] sm:$0x1]  ;;  %v845_v7 = vmax.f32 %v558_v0, %v559_v31  ;;  %v853_v47 = vmax.f32 %v575_v18, %v576_v35  ;;  %v1378_v59 = vmax.f32 %v1250_v62, %v1122_v63  ;;  %v1251_v2 = vmax.f32 %v3963_v12, %v1115_v33 }
  0xe4   :  { %v562_v34 = vld [vmem:[%s4223_s0 + $0x25c] sm:$0x1]  ;;  %v578_v17 = vld [vmem:[%s4223_s0 + $0x26d] sm:$0x1]  ;;  %1505 = vst.msk [vmem:[%s4224_s1 + $0x76] sm:$0x1] %vm1386_vm0, %v1376_v41  ;;  %v1124_v30 = vmax.f32 %v852_v49, %v575_v18  ;;  %v846_v4 = vmax.f32 %v560_v29, %v561_v10  ;;  %v1252_v50 = vmax.f32 %v3990_v42, %v1116_v19 }
  0xe5   :  { %v579_v22 = vld [vmem:[%s4223_s0 + $0x26e] sm:$0x1]  ;;  %v563_v40 = vld [vmem:[%s4223_s0 + $0x25d] sm:$0x1]  ;;  %v580_v52 = vld [vmem:[%s4223_s0 + $0x26f] sm:$0x1]  ;;  %v1117_v32 = vmax.f32 %v845_v7, %v560_v29  ;;  %v1125_v38 = vmax.f32 %v853_v47, %v577_v14  ;;  %v854_v12 = vmax.f32 %v577_v14, %v578_v17  ;;  %v1379_v42 = vmax.f32 %v1251_v2, %v1123_v28 }
  0xe6   :  { %v564_v1 = vld [vmem:[%s4223_s0 + $0x25e] sm:$0x1]  ;;  %v565_v36 = vld [vmem:[%s4223_s0 + $0x25f] sm:$0x1]  ;;  %1506 = vst.msk [vmem:[%s4224_s1 + $0x77] sm:$0x1] %vm1386_vm0, %v1377_v51  ;;  %v1118_v44 = vmax.f32 %v846_v4, %v562_v34  ;;  %v847_v39 = vmax.f32 %v562_v34, %v563_v40  ;;  %v855_v48 = vmax.f32 %v579_v22, %v580_v52  ;;  %v1380_v16 = vmax.f32 %v1252_v50, %v1124_v30 }
  0xe7   :  { %v581_v55 = vld [vmem:[%s4223_s0 + $0x270] sm:$0x1]  ;;  %v566_v57 = vld [vmem:[%s4223_s0 + $0x260] sm:$0x1]  ;;  %v582_v5 = vld [vmem:[%s4223_s0 + $0x271] sm:$0x1]  ;;  %v1253_v24 = vmax.f32 %v4006_v13, %v1117_v32  ;;  %v1126_v20 = vmax.f32 %v854_v12, %v579_v22  ;;  %v848_v37 = vmax.f32 %v564_v1, %v565_v36 }
  0xe8   :  { %1507 = vst.msk [vmem:[%s4224_s1 + $0x78] sm:$0x1] %vm1386_vm0, %v1378_v59  ;;  %v583_v6 = vld [vmem:[%s4223_s0 + $0x272] sm:$0x1]  ;;  %v567_v8 = vld [vmem:[%s4223_s0 + $0x261] sm:$0x1]  ;;  %v1254_v43 = vmax.f32 %v4033_v21, %v1118_v44  ;;  %v1119_v25 = vmax.f32 %v847_v39, %v564_v1  ;;  %v1127_v53 = vmax.f32 %v855_v48, %v581_v55  ;;  %v856_v26 = vmax.f32 %v581_v55, %v582_v5 }
  0xe9   :  { %v584_v11 = vld [vmem:[%s4223_s0 + $0x273] sm:$0x1]  ;;  %1508 = vst.msk [vmem:[%s4224_s1 + $0x79] sm:$0x1] %vm1386_vm0, %v1379_v42  ;;  %v568_v58 = vld [vmem:[%s4223_s0 + $0x262] sm:$0x1]  ;;  %v1381_v56 = vmax.f32 %v1253_v24, %v1125_v38  ;;  %v1120_v0 = vmax.f32 %v848_v37, %v566_v57  ;;  %v849_v3 = vmax.f32 %v566_v57, %v567_v8 }
  0xea   :  { %v585_v13 = vld [vmem:[%s4223_s0 + $0x274] sm:$0x1]  ;;  %1509 = vst.msk [vmem:[%s4224_s1 + $0x7a] sm:$0x1] %vm1386_vm0, %v1380_v16  ;;  %v857_v21 = vmax.f32 %v583_v6, %v584_v11  ;;  %v1382_v23 = vmax.f32 %v1254_v43, %v1126_v20  ;;  %v1255_v15 = vmax.f32 %v4049_v54, %v1119_v25  ;;  %v1128_v27 = vmax.f32 %v856_v26, %v583_v6 }
  0xeb   :  { %1510 = vst.msk [vmem:[%s4224_s1 + $0x7b] sm:$0x1] %vm1386_vm0, %v1381_v56  ;;  %v1256_v60 = vmax.f32 %v4076_v61, %v1120_v0  ;;  %v1121_v18 = vmax.f32 %v849_v3, %v568_v58 }
  0xec   :  { %v1129_v31 = vmax.f32 %v857_v21, %v585_v13  ;;  %1511 = vst.msk [vmem:[%s4224_s1 + $0x7c] sm:$0x1] %vm1386_vm0, %v1382_v23  ;;  %v1383_v35 = vmax.f32 %v1255_v15, %v1127_v53 }
  0xed   :  { %v1384_v41 = vmax.f32 %v1256_v60, %v1128_v27  ;;  %v1257_v45 = vmax.f32 %v4089_v9, %v1121_v18 }
  0xee   :  { %1512 = vst.msk [vmem:[%s4224_s1 + $0x7d] sm:$0x1] %vm1386_vm0, %v1383_v35 }
  0xef   :  { %1513 = vst.msk [vmem:[%s4224_s1 + $0x7e] sm:$0x1] %vm1386_vm0, %v1384_v41  ;;  %v1385_v54 = vmax.f32 %v1257_v45, %v1129_v31 }
  0xf1   :  { %1514 = vst.msk [vmem:[%s4224_s1 + $0x7f] sm:$0x1] %vm1386_vm0, %v1385_v54 }

// kernel: inception_forward.16
= control target key start
LH: loop header
LB: loop body
LE: loop exit
PB: predicated region body
PF: predicated region fallthrough
CT: control target
= control target key end

     0   :  { %vm25_vm0 = vcmask 261120   ;;  %v491_v24 = vmov 0.0   ;;  %v364_v37 = vlaneseq  ;;  %s629_s1 = inlined_call_operand.vmem [shape: bf16[288,32], index: 1, kind: input, shape index: {}]   ;;  %s630_s0 = inlined_call_operand.vmem [shape: bf16[32,288], index: 0, kind: input, shape index: {}]   ;;  %s631_s4 = inlined_call_operand.vmem [shape: f32[1,32], index: 4, kind: input, shape index: {}]   ;;  %s632_s2 = inlined_call_operand.vmem [shape: f32[1,32], index: 2, kind: input, shape index: {}]   ;;  %s633_s3 = inlined_call_operand.vmem [shape: f32[1,32], index: 3, kind: input, shape index: {}]   ;;  %s634_s5 = inlined_call_operand.vmem [shape: f32[32,32], index: 5, kind: output, shape index: {}]  }
   0x1   :  { %v465_v0 = vld [vmem:[%s629_s1 + $0x78] sm:$0xff]   ;;  %v467_v2 = vld [vmem:[%s629_s1 + $0x70] sm:$0xff]   ;;  %v469_v4 = vld [vmem:[%s629_s1 + $0x68] sm:$0xff]   ;;  %26 = vst.msk [vmem:[#allocation2] sm:$0xff] %vm25_vm0, %v491_v24 }
   0x2   :  { %v466_v1 = vld [vmem:[%s629_s1 + $0x38] sm:$0xff]   ;;  %424 = vmatprep.subr.bf16.mxu0 %v465_v0  ;;  %v468_v3 = vld [vmem:[%s629_s1 + $0x30] sm:$0xff]   ;;  %v470_v5 = vld [vmem:[%s629_s1 + $0x28] sm:$0xff]   ;;  %27 = vst.msk [vmem:[#allocation2 + $0x8] sm:$0xff] %vm25_vm0, %v491_v24  ;;  %v365_v43 = vshrl.u32 %v364_v37, 7 }
   0x3   :  { %425 = vmatpush3.bf16.msra.mxu0 %v466_v1  ;;  %v471_v6 = vld [vmem:[%s629_s1 + $0x60] sm:$0xff]   ;;  %v473_v8 = vld [vmem:[%s629_s1 + $0x58] sm:$0xff]   ;;  %v479_v9 = vld [vmem:[%s629_s1 + $0x88] sm:$0xff]   ;;  %28 = vst.msk [vmem:[#allocation2 + $0x10] sm:$0xff] %vm25_vm0, %v491_v24 }
   0x4   :  { %426 = vmatprep.subr.bf16.mxu0 %v467_v2  ;;  %v472_v7 = vld [vmem:[%s629_s1 + $0x20] sm:$0xff]   ;;  %v474_v10 = vld [vmem:[%s629_s1 + $0x18] sm:$0xff]   ;;  %v475_v11 = vld [vmem:[%s629_s1 + $0x50] sm:$0xff]   ;;  %456 = vmatprep.subr.bf16.mxu1 %v479_v9  ;;  %29 = vst.msk [vmem:[#allocation2 + $0x18] sm:$0xff] %vm25_vm0, %v491_v24  ;;  %v366_v52 = vsub.s32 0, %v365_v43 }
   0x5   :  { %v476_v12 = vld [vmem:[%s629_s1 + $0x10] sm:$0xff]   ;;  %457 = vmatpush3.bf16.msra.mxu1 %v479_v9  ;;  %v482_v13 = vld [vmem:[%s629_s1 + $0x80] sm:$0xff]   ;;  %v477_v14 = vld [vmem:[%s629_s1 + $0x48] sm:$0xff]  }
   0x6   :  { %458 = vmatprep.subr.bf16.mxu1 %v482_v13  ;;  %v485_v15 = vld [vmem:[%s630_s0 + $0x4] ss:$12 sps:$4 sm:$0xff]   ;;  %v486_v16 = vld [vmem:[%s630_s0 + $0x8] ss:$12 sps:$4 sm:$0xff]   ;;  %v487_v17 = vld [vmem:[%s630_s0 + $0x20] ss:$12 sps:$4 sm:$0xff]  }
   0x7   :  { %427 = vmatpush3.bf16.msra.mxu0 %v468_v3  ;;  %255 = vmatprep.mubr.bf16.mxu0 %v485_v15  ;;  %v478_v18 = vld [vmem:[%s629_s1 + $0x8] sm:$0xff]   ;;  %v480_v19 = vld [vmem:[%s629_s1 + $0x40] sm:$0xff]  }
   0x8   :  { %428 = vmatprep.subr.bf16.mxu0 %v469_v4  ;;  %460 = vmatprep.mubr.msk.bf16.mxu1 %vm25_vm0, %v486_v16  ;;  %v481_v20 = vld [vmem:[%s629_s1] sm:$0xff]   ;;  %v488_v22 = vld [vmem:[%s630_s0 + $0x1c] ss:$12 sps:$4 sm:$0xff]  }
   0x9   :  { %459 = vmatpush3.bf16.msra.mxu1 %v482_v13  ;;  %v483_v21 = vld [vmem:[%s630_s0] ss:$12 sps:$4 sm:$0xff]   ;;  %v490_v23 = vld [vmem:[%s630_s0 + $0x18] ss:$12 sps:$4 sm:$0xff]  }
   0xa   :  { %v30_v32 = vld [vmem:[#allocation2] sm:$0xff]  ;;  %v31_v40 = vld [vmem:[#allocation2 + $0x8] sm:$0xff]  ;;  %v32_v47 = vld [vmem:[#allocation2 + $0x10] sm:$0xff] }
   0xb   :  { %429 = vmatpush3.bf16.msra.mxu0 %v470_v5  ;;  %v358_v46 = vld [vmem:[%s631_s4] sm:$0x1]  ;;  %v33_v58 = vld [vmem:[#allocation2 + $0x18] sm:$0xff] }
   0xc   :  { %430 = vmatprep.subr.bf16.mxu0 %v471_v6  ;;  %461 = vmatmul.mubr.msk.bf16.vlgmr.msra.gmra.mxu1 %vm25_vm0, %v487_v17  ;;  %v422_v50 = vld [vmem:[%s632_s2] ss:$0 sm:$0xff]  ;;  %v373_v53 = vsub.f32 1.0, %v358_v46  ;;  %v367_v62 = vrot.slane %v358_v46, %v366_v52 }
   0xd   :  { %v423_v57 = vld [vmem:[%s633_s3] ss:$0 sm:$0xff] }
   0xe   :  { %v378_v63 = vrot.slane %v373_v53, %v366_v52 }
   0xf   :  { %431 = vmatpush3.bf16.msra.mxu0 %v472_v7 }
  0x10   :  { %432 = vmatprep.subr.bf16.mxu0 %v473_v8 }
  0x13   :  { %433 = vmatpush3.bf16.msra.mxu0 %v474_v10 }
  0x14   :  { %434 = vmatprep.subr.bf16.mxu0 %v475_v11 }
  0x17   :  { %435 = vmatpush3.bf16.msra.mxu0 %v476_v12 }
  0x18   :  { %436 = vmatprep.subr.bf16.mxu0 %v477_v14 }
  0x1b   :  { %437 = vmatpush3.bf16.msra.mxu0 %v478_v18 }
  0x1c   :  { %438 = vmatprep.subr.bf16.mxu0 %v480_v19 }
  0x1f   :  { %439 = vmatpush3.bf16.msra.mxu0 %v481_v20 }
  0x22   :  { %256 = vmatmul.mubr.bf16.vlgmr.msra.gmra.mxu0 %v483_v21 }
  0x23   :  { %263 = vmatprep.mubr.bf16.mxu0 %v488_v22 }
  0x2a   :  { %264 = vmatmul.mubr.bf16.gmra.mxu0 %v490_v23 }
  0xcc   :  { %v462_v25 = vpop.f32.mrf.mxu1 }
  0xce   :  { %v306_v26 = vpop.f32.mrf.mxu1 }
  0xd0   :  { %v463_v29 = vpop.f32.mrf.mxu1 }
  0xd2   :  { %v309_v35 = vpop.f32.mrf.mxu1 }
  0xe2   :  { %v440_v27 = vpop.f32.mrf.mxu0 }
  0xe4   :  { %v441_v28 = vpop.f32.mrf.mxu0 }
  0xe5   :  { %v442_v30 = vadd.f32 %v441_v28, %v440_v27 }
  0xe6   :  { %v443_v31 = vpop.f32.mrf.mxu0 }
  0xe7   :  { %v307_v33 = vadd.f32 %v442_v30, %v306_v26 }
  0xe8   :  { %v444_v34 = vpop.f32.mrf.mxu0 }
  0xe9   :  { %v321_v36 = vadd.f32 %v307_v33, %v30_v32  ;;  %v445_v38 = vadd.f32 %v444_v34, %v443_v31 }
  0xea   :  { %v446_v39 = vpop.f32.mrf.mxu0 }
  0xeb   :  { %325 = vst.msk [vmem:[#allocation2] sm:$0xff] %vm25_vm0, %v321_v36  ;;  %v310_v41 = vadd.f32 %v445_v38, %v309_v35 }
  0xec   :  { %v447_v42 = vpop.f32.mrf.mxu0 }
  0xed   :  { %v322_v44 = vadd.f32 %v310_v41, %v31_v40  ;;  %v448_v45 = vadd.f32 %v447_v42, %v446_v39 }
  0xee   :  { %v449_v48 = vpop.f32.mrf.mxu0 }
  0xef   :  { %326 = vst.msk [vmem:[#allocation2 + $0x8] sm:$0xff] %vm25_vm0, %v322_v44  ;;  %v315_v49 = vadd.f32 %v462_v25, %v448_v45 }
  0xf0   :  { %v450_v51 = vpop.f32.mrf.mxu0 }
  0xf1   :  { %v323_v54 = vadd.f32 %v315_v49, %v32_v47  ;;  %v451_v55 = vadd.f32 %v450_v51, %v449_v48 }
  0xf2   :  { %v332_v56 = vld [vmem:[#allocation2] sm:$0xff] }
  0xf3   :  { %v343_v59 = vmul.f32 %v422_v50, %v332_v56  ;;  %327 = vst.msk [vmem:[#allocation2 + $0x10] sm:$0xff] %vm25_vm0, %v323_v54  ;;  %v318_v60 = vadd.f32 %v463_v29, %v451_v55 }
  0xf5   :  { %v354_v61 = vadd.f32 %v423_v57, %v343_v59  ;;  %v324_v0 = vadd.f32 %v318_v60, %v33_v58 }
  0xf6   :  { %v333_v1 = vld [vmem:[#allocation2 + $0x8] sm:$0xff] }
  0xf7   :  { %v359_v2 = vmax.f32 %v354_v61, 0.0  ;;  %v344_v3 = vmul.f32 %v422_v50, %v333_v1  ;;  %328 = vst.msk [vmem:[#allocation2 + $0x18] sm:$0xff] %vm25_vm0, %v324_v0  ;;  %v380_v5 = vmul.f32 %v378_v63, %v354_v61 }
  0xf9   :  { %v369_v4 = vmul.f32 %v367_v62, %v359_v2  ;;  %v355_v6 = vadd.f32 %v423_v57, %v344_v3 }
  0xfa   :  { %v334_v7 = vld [vmem:[#allocation2 + $0x10] sm:$0xff] }
  0xfb   :  { %v384_v8 = vadd.f32 %v380_v5, %v369_v4  ;;  %v360_v9 = vmax.f32 %v355_v6, 0.0  ;;  %v345_v10 = vmul.f32 %v422_v50, %v334_v7  ;;  %v381_v12 = vmul.f32 %v378_v63, %v355_v6 }
  0xfd   :  { %388 = vst.msk [vmem:[%s634_s5] sm:$0xff] %vm25_vm0, %v384_v8  ;;  %v370_v11 = vmul.f32 %v367_v62, %v360_v9  ;;  %v356_v13 = vadd.f32 %v423_v57, %v345_v10 }
  0xfe   :  { %v335_v14 = vld [vmem:[#allocation2 + $0x18] sm:$0xff] }
  0xff   :  { %v385_v15 = vadd.f32 %v381_v12, %v370_v11  ;;  %v361_v16 = vmax.f32 %v356_v13, 0.0  ;;  %v346_v17 = vmul.f32 %v422_v50, %v335_v14  ;;  %v382_v19 = vmul.f32 %v378_v63, %v356_v13 }
 0x101   :  { %389 = vst.msk [vmem:[%s634_s5 + $0x8] sm:$0xff] %vm25_vm0, %v385_v15  ;;  %v371_v18 = vmul.f32 %v367_v62, %v361_v16  ;;  %v357_v20 = vadd.f32 %v423_v57, %v346_v17 }
 0x103   :  { %v386_v21 = vadd.f32 %v382_v19, %v371_v18  ;;  %v362_v22 = vmax.f32 %v357_v20, 0.0  ;;  %v383_v24 = vmul.f32 %v378_v63, %v357_v20 }
 0x105   :  { %390 = vst.msk [vmem:[%s634_s5 + $0x10] sm:$0xff] %vm25_vm0, %v386_v21  ;;  %v372_v23 = vmul.f32 %v367_v62, %v362_v22 }
 0x107   :  { %v387_v25 = vadd.f32 %v383_v24, %v372_v23 }
 0x109   :  { %391 = vst.msk [vmem:[%s634_s5 + $0x18] sm:$0xff] %vm25_vm0, %v387_v25 }

// kernel: inception_forward.17
= control target key start
LH: loop header
LB: loop body
LE: loop exit
PB: predicated region body
PF: predicated region fallthrough
CT: control target
= control target key end

     0   :  { %vm25_vm0 = vcmask 261120   ;;  %s1291_s1 = inlined_call_operand.vmem [shape: bf16[800,32], index: 1, kind: input, shape index: {}]   ;;  %s1292_s0 = inlined_call_operand.vmem [shape: bf16[32,800], index: 0, kind: input, shape index: {}]   ;;  %s1293_s4 = inlined_call_operand.vmem [shape: f32[1,32], index: 4, kind: input, shape index: {}]   ;;  %s1294_s2 = inlined_call_operand.vmem [shape: f32[1,32], index: 2, kind: input, shape index: {}]   ;;  %s1295_s3 = inlined_call_operand.vmem [shape: f32[1,32], index: 3, kind: input, shape index: {}]   ;;  %s1296_s5 = inlined_call_operand.vmem [shape: f32[32,32], index: 5, kind: output, shape index: {}]  }
   0x1   :  { %v963_v0 = vld [vmem:[%s1291_s1 + $0x78] sm:$0xff]   ;;  %v967_v4 = vld [vmem:[%s1291_s1 + $0x70] sm:$0xff]   ;;  %v971_v8 = vld [vmem:[%s1291_s1 + $0x68] sm:$0xff]  }
   0x2   :  { %v964_v1 = vld [vmem:[%s1291_s1 + $0xf8] sm:$0xff]   ;;  %866 = vmatprep.subr.bf16.mxu0 %v963_v0  ;;  %v968_v5 = vld [vmem:[%s1291_s1 + $0xf0] sm:$0xff]   ;;  %v972_v9 = vld [vmem:[%s1291_s1 + $0xe8] sm:$0xff]   ;;  %v1033_v0 = vmov 0.0  }
   0x3   :  { %v965_v2 = vld [vmem:[%s1291_s1 + $0x38] sm:$0xff]   ;;  %894 = vmatprep.subr.bf16.mxu1 %v964_v1  ;;  %v969_v6 = vld [vmem:[%s1291_s1 + $0x30] sm:$0xff]   ;;  %v973_v10 = vld [vmem:[%s1291_s1 + $0x28] sm:$0xff]   ;;  %26 = vst.msk [vmem:[#allocation2] sm:$0xff] %vm25_vm0, %v1033_v0 }
   0x4   :  { %v966_v3 = vld [vmem:[%s1291_s1 + $0xb8] sm:$0xff]   ;;  %867 = vmatpush3.bf16.msra.mxu0 %v965_v2  ;;  %v970_v7 = vld [vmem:[%s1291_s1 + $0xb0] sm:$0xff]   ;;  %v974_v11 = vld [vmem:[%s1291_s1 + $0xa8] sm:$0xff]   ;;  %27 = vst.msk [vmem:[#allocation2 + $0x8] sm:$0xff] %vm25_vm0, %v1033_v0 }
   0x5   :  { %895 = vmatpush3.bf16.msra.mxu1 %v966_v3  ;;  %868 = vmatprep.subr.bf16.mxu0 %v967_v4  ;;  %v975_v12 = vld [vmem:[%s1291_s1 + $0x60] sm:$0xff]   ;;  %v979_v16 = vld [vmem:[%s1291_s1 + $0x58] sm:$0xff]   ;;  %v983_v20 = vld [vmem:[%s1291_s1 + $0x50] sm:$0xff]   ;;  %28 = vst.msk [vmem:[#allocation2 + $0x10] sm:$0xff] %vm25_vm0, %v1033_v0 }
   0x6   :  { %896 = vmatprep.subr.bf16.mxu1 %v968_v5  ;;  %v976_v13 = vld [vmem:[%s1291_s1 + $0xe0] sm:$0xff]   ;;  %v980_v17 = vld [vmem:[%s1291_s1 + $0xd8] sm:$0xff]   ;;  %v984_v21 = vld [vmem:[%s1291_s1 + $0xd0] sm:$0xff]   ;;  %29 = vst.msk [vmem:[#allocation2 + $0x18] sm:$0xff] %vm25_vm0, %v1033_v0 }
   0x7   :  { %v977_v14 = vld [vmem:[%s1291_s1 + $0x20] sm:$0xff]   ;;  %v981_v18 = vld [vmem:[%s1291_s1 + $0x18] sm:$0xff]   ;;  %v985_v22 = vld [vmem:[%s1291_s1 + $0x10] sm:$0xff]  }
   0x8   :  { %869 = vmatpush3.bf16.msra.mxu0 %v969_v6  ;;  %v978_v15 = vld [vmem:[%s1291_s1 + $0xa0] sm:$0xff]   ;;  %v982_v19 = vld [vmem:[%s1291_s1 + $0x98] sm:$0xff]   ;;  %v986_v23 = vld [vmem:[%s1291_s1 + $0x90] sm:$0xff]  }
   0x9   :  { %897 = vmatpush3.bf16.msra.mxu1 %v970_v7  ;;  %870 = vmatprep.subr.bf16.mxu0 %v971_v8  ;;  %v987_v24 = vld [vmem:[%s1291_s1 + $0x48] sm:$0xff]   ;;  %v991_v28 = vld [vmem:[%s1291_s1 + $0x40] sm:$0xff]   ;;  %v1001_v36 = vld [vmem:[%s1291_s1 + $0x178] sm:$0xff]  }
   0xa   :  { %898 = vmatprep.subr.bf16.mxu1 %v972_v9  ;;  %v988_v25 = vld [vmem:[%s1291_s1 + $0xc8] sm:$0xff]   ;;  %v992_v29 = vld [vmem:[%s1291_s1 + $0xc0] sm:$0xff]   ;;  %v1002_v37 = vld [vmem:[%s1291_s1 + $0x138] sm:$0xff]  }
   0xb   :  { %v989_v26 = vld [vmem:[%s1291_s1 + $0x8] sm:$0xff]   ;;  %v993_v30 = vld [vmem:[%s1291_s1] sm:$0xff]   ;;  %v1003_v38 = vld [vmem:[%s1291_s1 + $0x170] sm:$0xff]  }
   0xc   :  { %871 = vmatpush3.bf16.msra.mxu0 %v973_v10  ;;  %v990_v27 = vld [vmem:[%s1291_s1 + $0x88] sm:$0xff]   ;;  %v994_v31 = vld [vmem:[%s1291_s1 + $0x80] sm:$0xff]   ;;  %v1004_v39 = vld [vmem:[%s1291_s1 + $0x130] sm:$0xff]  }
   0xd   :  { %899 = vmatpush3.bf16.msra.mxu1 %v974_v11  ;;  %872 = vmatprep.subr.bf16.mxu0 %v975_v12  ;;  %v995_v32 = vld [vmem:[%s1292_s0] ss:$28 sps:$4 sm:$0xff]   ;;  %v998_v34 = vld [vmem:[%s1292_s0 + $0x8] ss:$28 sps:$4 sm:$0xff]   ;;  %v1015_v47 = vld [vmem:[%s1292_s0 + $0x38] ss:$28 sps:$4 sm:$0xff]  }
   0xe   :  { %900 = vmatprep.subr.bf16.mxu1 %v976_v13  ;;  %v997_v33 = vld [vmem:[%s1292_s0 + $0x4] ss:$28 sps:$4 sm:$0xff]   ;;  %v1000_v35 = vld [vmem:[%s1292_s0 + $0xc] ss:$28 sps:$4 sm:$0xff]   ;;  %v1010_v44 = vld [vmem:[%s1292_s0 + $0x3c] ss:$28 sps:$4 sm:$0xff]  }
   0xf   :  { %559 = vmatprep.mubr.bf16.mxu0 %v997_v33  ;;  %608 = vmatprep.mubr.bf16.mxu1 %v1000_v35  ;;  %v1005_v40 = vld [vmem:[%s1291_s1 + $0x168] sm:$0xff]   ;;  %v1007_v42 = vld [vmem:[%s1291_s1 + $0x160] sm:$0xff]   ;;  %v1009_v46 = vld [vmem:[%s1291_s1 + $0x158] sm:$0xff]  }
  0x10   :  { %873 = vmatpush3.bf16.msra.mxu0 %v977_v14  ;;  %v1006_v41 = vld [vmem:[%s1291_s1 + $0x128] sm:$0xff]   ;;  %v1008_v43 = vld [vmem:[%s1291_s1 + $0x120] sm:$0xff]   ;;  %v1014_v49 = vld [vmem:[%s1291_s1 + $0x118] sm:$0xff]  }
  0x11   :  { %901 = vmatpush3.bf16.msra.mxu1 %v978_v15  ;;  %874 = vmatprep.subr.bf16.mxu0 %v979_v16  ;;  %v1012_v45 = vld [vmem:[%s1292_s0 + $0x44] ss:$28 sps:$4 sm:$0xff]   ;;  %v1017_v50 = vld [vmem:[%s1291_s1 + $0x150] sm:$0xff]   ;;  %v1021_v51 = vld [vmem:[%s1291_s1 + $0x188] sm:$0xff]  }
  0x12   :  { %902 = vmatprep.subr.bf16.mxu1 %v980_v17  ;;  %v1016_v48 = vld [vmem:[%s1292_s0 + $0x40] ss:$28 sps:$4 sm:$0xff]   ;;  %v1018_v52 = vld [vmem:[%s1291_s1 + $0x110] sm:$0xff]   ;;  %v1019_v53 = vld [vmem:[%s1291_s1 + $0x148] sm:$0xff]  }
  0x13   :  { %v1026_v54 = vld [vmem:[%s1292_s0 + $0x14] ss:$28 sps:$4 sm:$0xff]   ;;  %v1020_v55 = vld [vmem:[%s1291_s1 + $0x108] sm:$0xff]   ;;  %v1027_v56 = vld [vmem:[%s1291_s1 + $0x180] sm:$0xff]  }
  0x14   :  { %875 = vmatpush3.bf16.msra.mxu0 %v981_v18  ;;  %v1028_v57 = vld [vmem:[%s1292_s0 + $0x18] ss:$28 sps:$4 sm:$0xff]   ;;  %v1029_v58 = vld [vmem:[%s1292_s0 + $0x50] ss:$28 sps:$4 sm:$0xff]   ;;  %v1022_v59 = vld [vmem:[%s1291_s1 + $0x140] sm:$0xff]  }
  0x15   :  { %903 = vmatpush3.bf16.msra.mxu1 %v982_v19  ;;  %876 = vmatprep.subr.bf16.mxu0 %v983_v20  ;;  %v1023_v60 = vld [vmem:[%s1291_s1 + $0x100] sm:$0xff]   ;;  %v1024_v61 = vld [vmem:[%s1292_s0 + $0x10] ss:$28 sps:$4 sm:$0xff]  }
  0x16   :  { %904 = vmatprep.subr.bf16.mxu1 %v984_v21  ;;  %v1030_v62 = vld [vmem:[%s1292_s0 + $0x4c] ss:$28 sps:$4 sm:$0xff]   ;;  %v30_v33 = vld [vmem:[#allocation2] sm:$0xff] }
  0x17   :  { %v1032_v63 = vld [vmem:[%s1292_s0 + $0x48] ss:$28 sps:$4 sm:$0xff]  }
  0x18   :  { %877 = vmatpush3.bf16.msra.mxu0 %v985_v22 }
  0x19   :  { %905 = vmatpush3.bf16.msra.mxu1 %v986_v23  ;;  %878 = vmatprep.subr.bf16.mxu0 %v987_v24 }
  0x1a   :  { %906 = vmatprep.subr.bf16.mxu1 %v988_v25 }
  0x1c   :  { %879 = vmatpush3.bf16.msra.mxu0 %v989_v26 }
  0x1d   :  { %907 = vmatpush3.bf16.msra.mxu1 %v990_v27  ;;  %880 = vmatprep.subr.bf16.mxu0 %v991_v28 }
  0x1e   :  { %908 = vmatprep.subr.bf16.mxu1 %v992_v29 }
  0x20   :  { %881 = vmatpush3.bf16.msra.mxu0 %v993_v30 }
  0x21   :  { %909 = vmatpush3.bf16.msra.mxu1 %v994_v31  ;;  %922 = vmatprep.subr.bf16.mxu0 %v1001_v36 }
  0x22   :  { %954 = vmatprep.subr.bf16.mxu1 %v1021_v51 }
  0x23   :  { %560 = vmatmul.mubr.bf16.vlgmr.msra.gmra.mxu0 %v995_v32 }
  0x24   :  { %609 = vmatmul.mubr.bf16.vlgmr.msra.gmra.mxu1 %v998_v34  ;;  %923 = vmatpush3.bf16.msra.mxu0 %v1002_v37 }
  0x25   :  { %924 = vmatprep.subr.bf16.mxu0 %v1003_v38  ;;  %567 = vmatprep.mubr.bf16.mxu0 %v1010_v44  ;;  %v31_v44 = vld [vmem:[#allocation2 + $0x8] sm:$0xff] }
  0x26   :  { %616 = vmatprep.mubr.bf16.mxu1 %v1012_v45  ;;  %955 = vmatpush3.bf16.msra.mxu1 %v1021_v51 }
  0x27   :  { %956 = vmatprep.subr.bf16.mxu1 %v1027_v56 }
  0x28   :  { %925 = vmatpush3.bf16.msra.mxu0 %v1004_v39 }
  0x29   :  { %926 = vmatprep.subr.bf16.mxu0 %v1005_v40  ;;  %v766_v40 = vlaneseq }
  0x2a   :  { %957 = vmatpush3.bf16.msra.mxu1 %v1027_v56 }
  0x2b   :  { %568 = vmatmul.mubr.bf16.gmra.mxu0 %v1015_v47 }
  0x2c   :  { %927 = vmatpush3.bf16.msra.mxu0 %v1006_v41  ;;  %617 = vmatmul.mubr.bf16.gmra.mxu1 %v1016_v48 }
  0x2d   :  { %928 = vmatprep.subr.bf16.mxu0 %v1007_v42  ;;  %657 = vmatprep.mubr.bf16.mxu0 %v1026_v54  ;;  %v32_v54 = vld [vmem:[#allocation2 + $0x10] sm:$0xff] }
  0x2e   :  { %958 = vmatprep.mubr.msk.bf16.mxu1 %vm25_vm0, %v1028_v57 }
  0x30   :  { %929 = vmatpush3.bf16.msra.mxu0 %v1008_v43 }
  0x31   :  { %930 = vmatprep.subr.bf16.mxu0 %v1009_v46 }
  0x34   :  { %931 = vmatpush3.bf16.msra.mxu0 %v1014_v49  ;;  %959 = vmatmul.mubr.msk.bf16.vlgmr.msra.gmra.mxu1 %vm25_vm0, %v1029_v58 }
  0x35   :  { %932 = vmatprep.subr.bf16.mxu0 %v1017_v50  ;;  %v767_v50 = vshrl.u32 %v766_v40, 7 }
  0x38   :  { %933 = vmatpush3.bf16.msra.mxu0 %v1018_v52 }
  0x39   :  { %934 = vmatprep.subr.bf16.mxu0 %v1019_v53  ;;  %v760_v53 = vld [vmem:[%s1293_s4] sm:$0x1] }
  0x3c   :  { %935 = vmatpush3.bf16.msra.mxu0 %v1020_v55 }
  0x3d   :  { %936 = vmatprep.subr.bf16.mxu0 %v1022_v59  ;;  %v864_v59 = vld [vmem:[%s1294_s2] ss:$0 sm:$0xff] }
  0x40   :  { %937 = vmatpush3.bf16.msra.mxu0 %v1023_v60  ;;  %v768_v60 = vsub.s32 0, %v767_v50 }
  0x43   :  { %658 = vmatmul.mubr.bf16.vlgmr.msra.gmra.mxu0 %v1024_v61  ;;  %v775_v61 = vsub.f32 1.0, %v760_v53 }
  0x44   :  { %665 = vmatprep.mubr.bf16.mxu0 %v1030_v62 }
  0x4b   :  { %666 = vmatmul.mubr.bf16.gmra.mxu0 %v1032_v63 }
  0xe3   :  { %v882_v2 = vpop.f32.mrf.mxu0 }
  0xe4   :  { %v910_v1 = vpop.f32.mrf.mxu1 }
  0xe5   :  { %v883_v4 = vpop.f32.mrf.mxu0 }
  0xe6   :  { %v911_v3 = vpop.f32.mrf.mxu1  ;;  %v884_v18 = vadd.f32 %v883_v4, %v882_v2  ;;  %v33_v2 = vld [vmem:[#allocation2 + $0x18] sm:$0xff] }
  0xe7   :  { %v885_v6 = vpop.f32.mrf.mxu0  ;;  %v912_v19 = vadd.f32 %v911_v3, %v910_v1  ;;  %v865_v1 = vld [vmem:[%s1295_s3] ss:$0 sm:$0xff] }
  0xe8   :  { %v913_v5 = vpop.f32.mrf.mxu1 }
  0xe9   :  { %v886_v9 = vpop.f32.mrf.mxu0  ;;  %v611_v23 = vadd.f32 %v912_v19, %v884_v18 }
  0xea   :  { %v914_v7 = vpop.f32.mrf.mxu1  ;;  %v887_v24 = vadd.f32 %v886_v9, %v885_v6  ;;  %v769_v6 = vrot.slane %v760_v53, %v768_v60 }
  0xeb   :  { %v888_v10 = vpop.f32.mrf.mxu0  ;;  %v915_v25 = vadd.f32 %v914_v7, %v913_v5  ;;  %v780_v7 = vrot.slane %v775_v61, %v768_v60 }
  0xec   :  { %v916_v8 = vpop.f32.mrf.mxu1 }
  0xed   :  { %v889_v12 = vpop.f32.mrf.mxu0  ;;  %v614_v34 = vadd.f32 %v915_v25, %v887_v24 }
  0xee   :  { %v917_v11 = vpop.f32.mrf.mxu1  ;;  %v890_v30 = vadd.f32 %v889_v12, %v888_v10 }
  0xef   :  { %v891_v14 = vpop.f32.mrf.mxu0  ;;  %v918_v31 = vadd.f32 %v917_v11, %v916_v8 }
  0xf0   :  { %v919_v13 = vpop.f32.mrf.mxu1 }
  0xf1   :  { %v892_v17 = vpop.f32.mrf.mxu0  ;;  %v619_v42 = vadd.f32 %v918_v31, %v890_v30 }
  0xf2   :  { %v920_v15 = vpop.f32.mrf.mxu1  ;;  %v893_v45 = vadd.f32 %v892_v17, %v891_v14 }
  0xf3   :  { %v921_v46 = vadd.f32 %v920_v15, %v919_v13 }
  0xf4   :  { %v960_v16 = vpop.f32.mrf.mxu1 }
  0xf5   :  { %v622_v56 = vadd.f32 %v921_v46, %v893_v45 }
  0xf6   :  { %v708_v21 = vpop.f32.mrf.mxu1 }
  0xf8   :  { %v961_v28 = vpop.f32.mrf.mxu1 }
  0xfa   :  { %v711_v38 = vpop.f32.mrf.mxu1 }
 0x103   :  { %v938_v20 = vpop.f32.mrf.mxu0 }
 0x105   :  { %v939_v22 = vpop.f32.mrf.mxu0 }
 0x106   :  { %v940_v26 = vadd.f32 %v939_v22, %v938_v20 }
 0x107   :  { %v941_v27 = vpop.f32.mrf.mxu0 }
 0x108   :  { %v660_v29 = vadd.f32 %v940_v26, %v611_v23 }
 0x109   :  { %v942_v32 = vpop.f32.mrf.mxu0 }
 0x10a   :  { %v943_v35 = vadd.f32 %v942_v32, %v941_v27  ;;  %v709_v36 = vadd.f32 %v708_v21, %v660_v29 }
 0x10b   :  { %v944_v37 = vpop.f32.mrf.mxu0 }
 0x10c   :  { %v723_v39 = vadd.f32 %v709_v36, %v30_v33  ;;  %v663_v41 = vadd.f32 %v943_v35, %v614_v34 }
 0x10d   :  { %v945_v43 = vpop.f32.mrf.mxu0 }
 0x10e   :  { %727 = vst.msk [vmem:[#allocation2] sm:$0xff] %vm25_vm0, %v723_v39  ;;  %v946_v47 = vadd.f32 %v945_v43, %v944_v37  ;;  %v712_v48 = vadd.f32 %v711_v38, %v663_v41 }
 0x10f   :  { %v947_v49 = vpop.f32.mrf.mxu0 }
 0x110   :  { %v668_v51 = vadd.f32 %v946_v47, %v619_v42  ;;  %v724_v52 = vadd.f32 %v712_v48, %v31_v44 }
 0x111   :  { %v948_v55 = vpop.f32.mrf.mxu0 }
 0x112   :  { %v717_v57 = vadd.f32 %v960_v16, %v668_v51  ;;  %728 = vst.msk [vmem:[#allocation2 + $0x8] sm:$0xff] %vm25_vm0, %v724_v52  ;;  %v949_v58 = vadd.f32 %v948_v55, %v947_v49 }
 0x114   :  { %v725_v62 = vadd.f32 %v717_v57, %v32_v54  ;;  %v671_v63 = vadd.f32 %v949_v58, %v622_v56 }
 0x115   :  { %v734_v0 = vld [vmem:[#allocation2] sm:$0xff] }
 0x116   :  { %v745_v3 = vmul.f32 %v864_v59, %v734_v0  ;;  %729 = vst.msk [vmem:[#allocation2 + $0x10] sm:$0xff] %vm25_vm0, %v725_v62  ;;  %v720_v4 = vadd.f32 %v961_v28, %v671_v63 }
 0x118   :  { %v756_v5 = vadd.f32 %v865_v1, %v745_v3  ;;  %v726_v8 = vadd.f32 %v720_v4, %v33_v2 }
 0x119   :  { %v735_v9 = vld [vmem:[#allocation2 + $0x8] sm:$0xff] }
 0x11a   :  { %v761_v10 = vmax.f32 %v756_v5, 0.0  ;;  %v746_v11 = vmul.f32 %v864_v59, %v735_v9  ;;  %730 = vst.msk [vmem:[#allocation2 + $0x18] sm:$0xff] %vm25_vm0, %v726_v8  ;;  %v782_v13 = vmul.f32 %v780_v7, %v756_v5 }
 0x11c   :  { %v771_v12 = vmul.f32 %v769_v6, %v761_v10  ;;  %v757_v14 = vadd.f32 %v865_v1, %v746_v11 }
 0x11d   :  { %v736_v15 = vld [vmem:[#allocation2 + $0x10] sm:$0xff] }
 0x11e   :  { %v786_v16 = vadd.f32 %v782_v13, %v771_v12  ;;  %v747_v17 = vmul.f32 %v864_v59, %v736_v15  ;;  %v762_v18 = vmax.f32 %v757_v14, 0.0  ;;  %v783_v21 = vmul.f32 %v780_v7, %v757_v14 }
 0x120   :  { %790 = vst.msk [vmem:[%s1296_s5] sm:$0xff] %vm25_vm0, %v786_v16  ;;  %v758_v19 = vadd.f32 %v865_v1, %v747_v17  ;;  %v772_v20 = vmul.f32 %v769_v6, %v762_v18 }
 0x121   :  { %v737_v22 = vld [vmem:[#allocation2 + $0x18] sm:$0xff] }
 0x122   :  { %v763_v23 = vmax.f32 %v758_v19, 0.0  ;;  %v787_v24 = vadd.f32 %v783_v21, %v772_v20  ;;  %v748_v25 = vmul.f32 %v864_v59, %v737_v22  ;;  %v784_v27 = vmul.f32 %v780_v7, %v758_v19 }
 0x124   :  { %v773_v26 = vmul.f32 %v769_v6, %v763_v23  ;;  %791 = vst.msk [vmem:[%s1296_s5 + $0x8] sm:$0xff] %vm25_vm0, %v787_v24  ;;  %v759_v28 = vadd.f32 %v865_v1, %v748_v25 }
 0x126   :  { %v788_v29 = vadd.f32 %v784_v27, %v773_v26  ;;  %v764_v30 = vmax.f32 %v759_v28, 0.0  ;;  %v785_v32 = vmul.f32 %v780_v7, %v759_v28 }
 0x128   :  { %792 = vst.msk [vmem:[%s1296_s5 + $0x10] sm:$0xff] %vm25_vm0, %v788_v29  ;;  %v774_v31 = vmul.f32 %v769_v6, %v764_v30 }
 0x12a   :  { %v789_v33 = vadd.f32 %v785_v32, %v774_v31 }
 0x12c   :  { %793 = vst.msk [vmem:[%s1296_s5 + $0x18] sm:$0xff] %vm25_vm0, %v789_v33 }

// kernel: inception_forward.18
= control target key start
LH: loop header
LB: loop body
LE: loop exit
PB: predicated region body
PF: predicated region fallthrough
CT: control target
= control target key end

     0   :  { %vm378_vm0 = vcmask 516096   ;;  %s1107_s0 = inlined_call_operand.vmem [shape: f32[2,10,10,1,64], index: 0, kind: input, shape index: {}]   ;;  %s1108_s1 = inlined_call_operand.vmem [shape: f32[2,4,4,1,64], index: 1, kind: output, shape index: {}]  }
   0x1   :  { %v8_v0 = vld [vmem:[%s1107_s0] sm:$0x1]  ;;  %v9_v1 = vld [vmem:[%s1107_s0 + $0x1] sm:$0x1]  ;;  %v10_v2 = vld [vmem:[%s1107_s0 + $0x2] sm:$0x1] }
   0x2   :  { %v17_v3 = vld [vmem:[%s1107_s0 + $0xa] sm:$0x1]  ;;  %v18_v4 = vld [vmem:[%s1107_s0 + $0xb] sm:$0x1]  ;;  %v19_v5 = vld [vmem:[%s1107_s0 + $0xc] sm:$0x1]  ;;  %v170_v6 = vmax.f32 %v8_v0, %v9_v1 }
   0x3   :  { %v26_v7 = vld [vmem:[%s1107_s0 + $0x14] sm:$0x1]  ;;  %v27_v8 = vld [vmem:[%s1107_s0 + $0x15] sm:$0x1]  ;;  %v28_v9 = vld [vmem:[%s1107_s0 + $0x16] sm:$0x1]  ;;  %v174_v10 = vmax.f32 %v17_v3, %v18_v4 }
   0x4   :  { %v178_v11 = vmax.f32 %v26_v7, %v27_v8  ;;  %v242_v12 = vmax.f32 %v170_v6, %v10_v2  ;;  %v11_v13 = vld [vmem:[%s1107_s0 + $0x3] sm:$0x1]  ;;  %v12_v14 = vld [vmem:[%s1107_s0 + $0x4] sm:$0x1]  ;;  %v20_v15 = vld [vmem:[%s1107_s0 + $0xd] sm:$0x1] }
   0x5   :  { %v246_v16 = vmax.f32 %v174_v10, %v19_v5  ;;  %v21_v17 = vld [vmem:[%s1107_s0 + $0xe] sm:$0x1]  ;;  %v29_v18 = vld [vmem:[%s1107_s0 + $0x17] sm:$0x1]  ;;  %v30_v19 = vld [vmem:[%s1107_s0 + $0x18] sm:$0x1]  ;;  %v171_v20 = vmax.f32 %v10_v2, %v11_v13  ;;  %v175_v21 = vmax.f32 %v19_v5, %v20_v15 }
   0x6   :  { %v470_v22 = vmax.f32 %v178_v11, %v28_v9  ;;  %v179_v23 = vmax.f32 %v28_v9, %v29_v18  ;;  %v13_v24 = vld [vmem:[%s1107_s0 + $0x5] sm:$0x1]  ;;  %v14_v25 = vld [vmem:[%s1107_s0 + $0x6] sm:$0x1]  ;;  %v22_v26 = vld [vmem:[%s1107_s0 + $0xf] sm:$0x1] }
   0x7   :  { %v314_v27 = vmax.f32 %v242_v12, %v246_v16  ;;  %v243_v28 = vmax.f32 %v171_v20, %v12_v14  ;;  %v247_v29 = vmax.f32 %v175_v21, %v21_v17  ;;  %v23_v30 = vld [vmem:[%s1107_s0 + $0x10] sm:$0x1]  ;;  %v31_v31 = vld [vmem:[%s1107_s0 + $0x19] sm:$0x1]  ;;  %v32_v32 = vld [vmem:[%s1107_s0 + $0x1a] sm:$0x1]  ;;  %v172_v33 = vmax.f32 %v12_v14, %v13_v24 }
   0x8   :  { %v490_v34 = vmax.f32 %v179_v23, %v30_v19  ;;  %v176_v35 = vmax.f32 %v21_v17, %v22_v26  ;;  %v180_v36 = vmax.f32 %v30_v19, %v31_v31  ;;  %v15_v37 = vld [vmem:[%s1107_s0 + $0x7] sm:$0x1]  ;;  %v16_v38 = vld [vmem:[%s1107_s0 + $0x8] sm:$0x1]  ;;  %v24_v39 = vld [vmem:[%s1107_s0 + $0x11] sm:$0x1] }
   0x9   :  { %v346_v40 = vmax.f32 %v314_v27, %v470_v22  ;;  %v315_v41 = vmax.f32 %v243_v28, %v247_v29  ;;  %v244_v42 = vmax.f32 %v172_v33, %v14_v25  ;;  %v25_v43 = vld [vmem:[%s1107_s0 + $0x12] sm:$0x1]  ;;  %v33_v44 = vld [vmem:[%s1107_s0 + $0x1b] sm:$0x1]  ;;  %v34_v45 = vld [vmem:[%s1107_s0 + $0x1c] sm:$0x1]  ;;  %v173_v46 = vmax.f32 %v14_v25, %v15_v37 }
   0xa   :  { %v248_v47 = vmax.f32 %v176_v35, %v23_v30  ;;  %v177_v48 = vmax.f32 %v23_v30, %v24_v39  ;;  %v181_v49 = vmax.f32 %v32_v32, %v33_v44  ;;  %v35_v50 = vld [vmem:[%s1107_s0 + $0x1e] sm:$0x1]  ;;  %v36_v51 = vld [vmem:[%s1107_s0 + $0x1f] sm:$0x1]  ;;  %v37_v52 = vld [vmem:[%s1107_s0 + $0x20] sm:$0x1]  ;;  %v252_v59 = vmax.f32 %v180_v36, %v32_v32 }
   0xb   :  { %379 = vst.msk [vmem:[%s1108_s1] sm:$0x1] %vm378_vm0, %v346_v40  ;;  %v347_v53 = vmax.f32 %v315_v41, %v490_v34  ;;  %v245_v54 = vmax.f32 %v173_v46, %v16_v38  ;;  %v44_v55 = vld [vmem:[%s1107_s0 + $0x28] sm:$0x1]  ;;  %v45_v56 = vld [vmem:[%s1107_s0 + $0x29] sm:$0x1]  ;;  %v182_v58 = vmax.f32 %v35_v50, %v36_v51 }
   0xc   :  { %v46_v57 = vld [vmem:[%s1107_s0 + $0x2a] sm:$0x1]  ;;  %v316_v60 = vmax.f32 %v244_v42, %v248_v47  ;;  %v249_v61 = vmax.f32 %v177_v48, %v25_v43  ;;  %v186_v62 = vmax.f32 %v44_v55, %v45_v56  ;;  %v38_v63 = vld [vmem:[%s1107_s0 + $0x21] sm:$0x1]  ;;  %v39_v0 = vld [vmem:[%s1107_s0 + $0x22] sm:$0x1]  ;;  %v547_v2 = vmax.f32 %v181_v49, %v34_v45 }
   0xd   :  { %v47_v1 = vld [vmem:[%s1107_s0 + $0x2b] sm:$0x1]  ;;  %380 = vst.msk [vmem:[%s1108_s1 + $0x1] sm:$0x1] %vm378_vm0, %v347_v53  ;;  %v254_v3 = vmax.f32 %v182_v58, %v37_v52  ;;  %v48_v4 = vld [vmem:[%s1107_s0 + $0x2c] sm:$0x1]  ;;  %v183_v5 = vmax.f32 %v37_v52, %v38_v63 }
   0xe   :  { %v187_v6 = vmax.f32 %v46_v57, %v47_v1  ;;  %v40_v7 = vld [vmem:[%s1107_s0 + $0x23] sm:$0x1]  ;;  %v41_v8 = vld [vmem:[%s1107_s0 + $0x24] sm:$0x1]  ;;  %v348_v9 = vmax.f32 %v316_v60, %v252_v59  ;;  %v317_v10 = vmax.f32 %v245_v54, %v249_v61  ;;  %v558_v11 = vmax.f32 %v186_v62, %v46_v57  ;;  %v49_v12 = vld [vmem:[%s1107_s0 + $0x2d] sm:$0x1] }
   0xf   :  { %v50_v13 = vld [vmem:[%s1107_s0 + $0x2e] sm:$0x1]  ;;  %v184_v14 = vmax.f32 %v39_v0, %v40_v7  ;;  %v42_v15 = vld [vmem:[%s1107_s0 + $0x25] sm:$0x1]  ;;  %v318_v16 = vmax.f32 %v470_v22, %v254_v3  ;;  %v255_v17 = vmax.f32 %v183_v5, %v39_v0  ;;  %v188_v19 = vmax.f32 %v48_v4, %v49_v12  ;;  %v43_v20 = vld [vmem:[%s1107_s0 + $0x26] sm:$0x1] }
  0x10   :  { %v570_v18 = vmax.f32 %v187_v6, %v48_v4  ;;  %v51_v21 = vld [vmem:[%s1107_s0 + $0x2f] sm:$0x1]  ;;  %v52_v23 = vld [vmem:[%s1107_s0 + $0x30] sm:$0x1]  ;;  %381 = vst.msk [vmem:[%s1108_s1 + $0x2] sm:$0x1] %vm378_vm0, %v348_v9  ;;  %v349_v22 = vmax.f32 %v317_v10, %v547_v2  ;;  %v185_v25 = vmax.f32 %v41_v8, %v42_v15 }
  0x11   :  { %v256_v24 = vmax.f32 %v184_v14, %v41_v8  ;;  %v189_v26 = vmax.f32 %v50_v13, %v51_v21  ;;  %v53_v27 = vld [vmem:[%s1107_s0 + $0x32] sm:$0x1]  ;;  %v54_v28 = vld [vmem:[%s1107_s0 + $0x33] sm:$0x1]  ;;  %v55_v29 = vld [vmem:[%s1107_s0 + $0x34] sm:$0x1]  ;;  %v350_v30 = vmax.f32 %v318_v16, %v558_v11  ;;  %v319_v31 = vmax.f32 %v490_v34, %v255_v17 }
  0x12   :  { %v597_v32 = vmax.f32 %v188_v19, %v50_v13  ;;  %v62_v33 = vld [vmem:[%s1107_s0 + $0x3c] sm:$0x1]  ;;  %v63_v35 = vld [vmem:[%s1107_s0 + $0x3d] sm:$0x1]  ;;  %v64_v36 = vld [vmem:[%s1107_s0 + $0x3e] sm:$0x1]  ;;  %v190_v37 = vmax.f32 %v53_v27, %v54_v28  ;;  %v257_v38 = vmax.f32 %v185_v25, %v43_v20 }
  0x13   :  { %382 = vst.msk [vmem:[%s1108_s1 + $0x3] sm:$0x1] %vm378_vm0, %v349_v22  ;;  %v320_v34 = vmax.f32 %v252_v59, %v256_v24  ;;  %v612_v39 = vmax.f32 %v189_v26, %v52_v23  ;;  %v194_v40 = vmax.f32 %v62_v33, %v63_v35  ;;  %v56_v41 = vld [vmem:[%s1107_s0 + $0x35] sm:$0x1]  ;;  %v57_v42 = vld [vmem:[%s1107_s0 + $0x36] sm:$0x1]  ;;  %v351_v44 = vmax.f32 %v319_v31, %v570_v18 }
  0x14   :  { %v65_v43 = vld [vmem:[%s1107_s0 + $0x3f] sm:$0x1]  ;;  %383 = vst.msk [vmem:[%s1108_s1 + $0x4] sm:$0x1] %vm378_vm0, %v350_v30  ;;  %v262_v45 = vmax.f32 %v190_v37, %v55_v29  ;;  %v66_v46 = vld [vmem:[%s1107_s0 + $0x40] sm:$0x1]  ;;  %v191_v47 = vmax.f32 %v55_v29, %v56_v41  ;;  %v321_v52 = vmax.f32 %v547_v2, %v257_v38 }
  0x15   :  { %v195_v48 = vmax.f32 %v64_v36, %v65_v43  ;;  %v58_v49 = vld [vmem:[%s1107_s0 + $0x37] sm:$0x1]  ;;  %v59_v50 = vld [vmem:[%s1107_s0 + $0x38] sm:$0x1]  ;;  %v352_v51 = vmax.f32 %v320_v34, %v597_v32  ;;  %v639_v53 = vmax.f32 %v194_v40, %v64_v36  ;;  %v67_v54 = vld [vmem:[%s1107_s0 + $0x41] sm:$0x1] }
  0x16   :  { %v68_v55 = vld [vmem:[%s1107_s0 + $0x42] sm:$0x1]  ;;  %v192_v56 = vmax.f32 %v57_v42, %v58_v49  ;;  %v60_v57 = vld [vmem:[%s1107_s0 + $0x39] sm:$0x1]  ;;  %384 = vst.msk [vmem:[%s1108_s1 + $0x5] sm:$0x1] %vm378_vm0, %v351_v44  ;;  %v322_v58 = vmax.f32 %v558_v11, %v262_v45  ;;  %v263_v59 = vmax.f32 %v191_v47, %v57_v42  ;;  %v196_v61 = vmax.f32 %v66_v46, %v67_v54 }
  0x17   :  { %v655_v60 = vmax.f32 %v195_v48, %v66_v46  ;;  %v61_v62 = vld [vmem:[%s1107_s0 + $0x3a] sm:$0x1]  ;;  %v69_v63 = vld [vmem:[%s1107_s0 + $0x43] sm:$0x1]  ;;  %v70_v0 = vld [vmem:[%s1107_s0 + $0x44] sm:$0x1]  ;;  %v353_v1 = vmax.f32 %v321_v52, %v612_v39  ;;  %v193_v3 = vmax.f32 %v59_v50, %v60_v57 }
  0x18   :  { %385 = vst.msk [vmem:[%s1108_s1 + $0x6] sm:$0x1] %vm378_vm0, %v352_v51  ;;  %v264_v2 = vmax.f32 %v192_v56, %v59_v50  ;;  %v197_v4 = vmax.f32 %v68_v55, %v69_v63  ;;  %v71_v5 = vld [vmem:[%s1107_s0 + $0x46] sm:$0x1]  ;;  %v72_v6 = vld [vmem:[%s1107_s0 + $0x47] sm:$0x1]  ;;  %v354_v8 = vmax.f32 %v322_v58, %v639_v53  ;;  %v323_v9 = vmax.f32 %v570_v18, %v263_v59 }
  0x19   :  { %v73_v7 = vld [vmem:[%s1107_s0 + $0x48] sm:$0x1]  ;;  %v682_v10 = vmax.f32 %v196_v61, %v68_v55  ;;  %v80_v11 = vld [vmem:[%s1107_s0 + $0x50] sm:$0x1]  ;;  %v81_v12 = vld [vmem:[%s1107_s0 + $0x51] sm:$0x1]  ;;  %v198_v14 = vmax.f32 %v71_v5, %v72_v6  ;;  %v265_v16 = vmax.f32 %v193_v3, %v61_v62 }
  0x1a   :  { %v82_v13 = vld [vmem:[%s1107_s0 + $0x52] sm:$0x1]  ;;  %386 = vst.msk [vmem:[%s1108_s1 + $0x7] sm:$0x1] %vm378_vm0, %v353_v1  ;;  %v324_v15 = vmax.f32 %v597_v32, %v264_v2  ;;  %v698_v17 = vmax.f32 %v197_v4, %v70_v0  ;;  %v202_v18 = vmax.f32 %v80_v11, %v81_v12  ;;  %v74_v19 = vld [vmem:[%s1107_s0 + $0x49] sm:$0x1]  ;;  %v355_v23 = vmax.f32 %v323_v9, %v655_v60 }
  0x1b   :  { %v75_v20 = vld [vmem:[%s1107_s0 + $0x4a] sm:$0x1]  ;;  %v83_v21 = vld [vmem:[%s1107_s0 + $0x53] sm:$0x1]  ;;  %387 = vst.msk [vmem:[%s1108_s1 + $0x8] sm:$0x1] %vm378_vm0, %v354_v8  ;;  %v270_v22 = vmax.f32 %v198_v14, %v73_v7  ;;  %v199_v25 = vmax.f32 %v73_v7, %v74_v19  ;;  %v325_v30 = vmax.f32 %v612_v39, %v265_v16 }
  0x1c   :  { %v84_v24 = vld [vmem:[%s1107_s0 + $0x54] sm:$0x1]  ;;  %v203_v26 = vmax.f32 %v82_v13, %v83_v21  ;;  %v76_v27 = vld [vmem:[%s1107_s0 + $0x4b] sm:$0x1]  ;;  %v77_v28 = vld [vmem:[%s1107_s0 + $0x4c] sm:$0x1]  ;;  %v356_v29 = vmax.f32 %v324_v15, %v682_v10  ;;  %v274_v31 = vmax.f32 %v202_v18, %v82_v13 }
  0x1d   :  { %v85_v32 = vld [vmem:[%s1107_s0 + $0x55] sm:$0x1]  ;;  %v86_v33 = vld [vmem:[%s1107_s0 + $0x56] sm:$0x1]  ;;  %v200_v35 = vmax.f32 %v75_v20, %v76_v27  ;;  %v78_v36 = vld [vmem:[%s1107_s0 + $0x4d] sm:$0x1]  ;;  %v326_v37 = vmax.f32 %v639_v53, %v270_v22  ;;  %v271_v34 = vmax.f32 %v199_v25, %v75_v20  ;;  %v357_v43 = vmax.f32 %v325_v30, %v698_v17 }
  0x1e   :  { %388 = vst.msk [vmem:[%s1108_s1 + $0x9] sm:$0x1] %vm378_vm0, %v355_v23  ;;  %v275_v38 = vmax.f32 %v203_v26, %v84_v24  ;;  %v204_v39 = vmax.f32 %v84_v24, %v85_v32  ;;  %v79_v40 = vld [vmem:[%s1107_s0 + $0x4e] sm:$0x1]  ;;  %v87_v41 = vld [vmem:[%s1107_s0 + $0x57] sm:$0x1]  ;;  %v201_v45 = vmax.f32 %v77_v28, %v78_v36 }
  0x1f   :  { %v88_v42 = vld [vmem:[%s1107_s0 + $0x58] sm:$0x1]  ;;  %389 = vst.msk [vmem:[%s1108_s1 + $0xa] sm:$0x1] %vm378_vm0, %v356_v29  ;;  %v272_v44 = vmax.f32 %v200_v35, %v77_v28  ;;  %v205_v46 = vmax.f32 %v86_v33, %v87_v41  ;;  %v89_v47 = vld [vmem:[%s1107_s0 + $0x64] sm:$0x1]  ;;  %v358_v50 = vmax.f32 %v326_v37, %v274_v31  ;;  %v327_v51 = vmax.f32 %v655_v60, %v271_v34 }
  0x20   :  { %v90_v48 = vld [vmem:[%s1107_s0 + $0x65] sm:$0x1]  ;;  %v91_v49 = vld [vmem:[%s1107_s0 + $0x66] sm:$0x1]  ;;  %v276_v52 = vmax.f32 %v204_v39, %v86_v33  ;;  %v98_v53 = vld [vmem:[%s1107_s0 + $0x6e] sm:$0x1]  ;;  %v273_v58 = vmax.f32 %v201_v45, %v79_v40 }
  0x21   :  { %v99_v54 = vld [vmem:[%s1107_s0 + $0x6f] sm:$0x1]  ;;  %v100_v55 = vld [vmem:[%s1107_s0 + $0x70] sm:$0x1]  ;;  %v206_v56 = vmax.f32 %v89_v47, %v90_v48  ;;  %390 = vst.msk [vmem:[%s1108_s1 + $0xb] sm:$0x1] %vm378_vm0, %v357_v43  ;;  %v328_v57 = vmax.f32 %v682_v10, %v272_v44  ;;  %v277_v59 = vmax.f32 %v205_v46, %v88_v42  ;;  %v359_v0 = vmax.f32 %v327_v51, %v275_v38 }
  0x22   :  { %v107_v60 = vld [vmem:[%s1107_s0 + $0x78] sm:$0x1]  ;;  %v108_v61 = vld [vmem:[%s1107_s0 + $0x79] sm:$0x1]  ;;  %v109_v62 = vld [vmem:[%s1107_s0 + $0x7a] sm:$0x1]  ;;  %v210_v63 = vmax.f32 %v98_v53, %v99_v54  ;;  %v329_v7 = vmax.f32 %v698_v17, %v273_v58 }
  0x23   :  { %391 = vst.msk [vmem:[%s1108_s1 + $0xc] sm:$0x1] %vm378_vm0, %v358_v50  ;;  %v214_v1 = vmax.f32 %v107_v60, %v108_v61  ;;  %v278_v2 = vmax.f32 %v206_v56, %v91_v49  ;;  %v92_v3 = vld [vmem:[%s1107_s0 + $0x67] sm:$0x1]  ;;  %v93_v4 = vld [vmem:[%s1107_s0 + $0x68] sm:$0x1]  ;;  %v360_v6 = vmax.f32 %v328_v57, %v276_v52 }
  0x24   :  { %v101_v5 = vld [vmem:[%s1107_s0 + $0x71] sm:$0x1]  ;;  %v282_v8 = vmax.f32 %v210_v63, %v100_v55  ;;  %v102_v9 = vld [vmem:[%s1107_s0 + $0x72] sm:$0x1]  ;;  %v110_v10 = vld [vmem:[%s1107_s0 + $0x7b] sm:$0x1]  ;;  %v207_v12 = vmax.f32 %v91_v49, %v92_v3  ;;  %v361_v19 = vmax.f32 %v329_v7, %v277_v59 }
  0x25   :  { %v111_v11 = vld [vmem:[%s1107_s0 + $0x7c] sm:$0x1]  ;;  %392 = vst.msk [vmem:[%s1108_s1 + $0xd] sm:$0x1] %vm378_vm0, %v359_v0  ;;  %v813_v13 = vmax.f32 %v214_v1, %v109_v62  ;;  %v211_v14 = vmax.f32 %v100_v55, %v101_v5  ;;  %v215_v15 = vmax.f32 %v109_v62, %v110_v10  ;;  %v94_v16 = vld [vmem:[%s1107_s0 + $0x69] sm:$0x1] }
  0x26   :  { %v95_v17 = vld [vmem:[%s1107_s0 + $0x6a] sm:$0x1]  ;;  %v103_v18 = vld [vmem:[%s1107_s0 + $0x73] sm:$0x1]  ;;  %393 = vst.msk [vmem:[%s1108_s1 + $0xe] sm:$0x1] %vm378_vm0, %v360_v6  ;;  %v330_v20 = vmax.f32 %v278_v2, %v282_v8  ;;  %v279_v21 = vmax.f32 %v207_v12, %v93_v4  ;;  %v208_v25 = vmax.f32 %v93_v4, %v94_v16 }
  0x27   :  { %v104_v23 = vld [vmem:[%s1107_s0 + $0x74] sm:$0x1]  ;;  %v112_v22 = vld [vmem:[%s1107_s0 + $0x7d] sm:$0x1]  ;;  %v113_v24 = vld [vmem:[%s1107_s0 + $0x7e] sm:$0x1]  ;;  %v283_v26 = vmax.f32 %v211_v14, %v102_v9  ;;  %v212_v27 = vmax.f32 %v102_v9, %v103_v18  ;;  %v860_v39 = vmax.f32 %v215_v15, %v111_v11 }
  0x28   :  { %v216_v28 = vmax.f32 %v111_v11, %v112_v22  ;;  %v96_v29 = vld [vmem:[%s1107_s0 + $0x6b] sm:$0x1]  ;;  %v97_v30 = vld [vmem:[%s1107_s0 + $0x6c] sm:$0x1]  ;;  %v105_v31 = vld [vmem:[%s1107_s0 + $0x75] sm:$0x1]  ;;  %v362_v32 = vmax.f32 %v330_v20, %v813_v13  ;;  %v280_v33 = vmax.f32 %v208_v25, %v95_v17 }
  0x29   :  { %394 = vst.msk [vmem:[%s1108_s1 + $0xf] sm:$0x1] %vm378_vm0, %v361_v19  ;;  %v106_v35 = vld [vmem:[%s1107_s0 + $0x76] sm:$0x1]  ;;  %v114_v36 = vld [vmem:[%s1107_s0 + $0x7f] sm:$0x1]  ;;  %v209_v34 = vmax.f32 %v95_v17, %v96_v29  ;;  %v213_v38 = vmax.f32 %v104_v23, %v105_v31  ;;  %v331_v40 = vmax.f32 %v279_v21, %v283_v26  ;;  %v284_v41 = vmax.f32 %v212_v27, %v104_v23 }
  0x2a   :  { %v115_v37 = vld [vmem:[%s1107_s0 + $0x80] sm:$0x1]  ;;  %v217_v42 = vmax.f32 %v113_v24, %v114_v36  ;;  %v116_v43 = vld [vmem:[%s1107_s0 + $0x82] sm:$0x1]  ;;  %v117_v44 = vld [vmem:[%s1107_s0 + $0x83] sm:$0x1]  ;;  %v875_v46 = vmax.f32 %v216_v28, %v113_v24 }
  0x2b   :  { %v118_v45 = vld [vmem:[%s1107_s0 + $0x84] sm:$0x1]  ;;  %395 = vst.msk [vmem:[%s1108_s1 + $0x10] sm:$0x1] %vm378_vm0, %v362_v32  ;;  %v281_v47 = vmax.f32 %v209_v34, %v97_v30  ;;  %v285_v48 = vmax.f32 %v213_v38, %v106_v35  ;;  %v125_v49 = vld [vmem:[%s1107_s0 + $0x8c] sm:$0x1]  ;;  %v218_v52 = vmax.f32 %v116_v43, %v117_v44  ;;  %v363_v53 = vmax.f32 %v331_v40, %v860_v39 }
  0x2c   :  { %v126_v50 = vld [vmem:[%s1107_s0 + $0x8d] sm:$0x1]  ;;  %v127_v51 = vld [vmem:[%s1107_s0 + $0x8e] sm:$0x1]  ;;  %v332_v54 = vmax.f32 %v280_v33, %v284_v41  ;;  %v887_v55 = vmax.f32 %v217_v42, %v115_v37  ;;  %v119_v57 = vld [vmem:[%s1107_s0 + $0x85] sm:$0x1] }
  0x2d   :  { %v222_v56 = vmax.f32 %v125_v49, %v126_v50  ;;  %v120_v58 = vld [vmem:[%s1107_s0 + $0x86] sm:$0x1]  ;;  %v128_v59 = vld [vmem:[%s1107_s0 + $0x8f] sm:$0x1]  ;;  %v333_v60 = vmax.f32 %v281_v47, %v285_v48  ;;  %v290_v61 = vmax.f32 %v218_v52, %v118_v45  ;;  %v129_v62 = vld [vmem:[%s1107_s0 + $0x90] sm:$0x1]  ;;  %v219_v63 = vmax.f32 %v118_v45, %v119_v57 }
  0x2e   :  { %v223_v0 = vmax.f32 %v127_v51, %v128_v59  ;;  %v121_v1 = vld [vmem:[%s1107_s0 + $0x87] sm:$0x1]  ;;  %v122_v2 = vld [vmem:[%s1107_s0 + $0x88] sm:$0x1]  ;;  %396 = vst.msk [vmem:[%s1108_s1 + $0x11] sm:$0x1] %vm378_vm0, %v363_v53  ;;  %v364_v3 = vmax.f32 %v332_v54, %v875_v46 }
  0x2f   :  { %v130_v4 = vld [vmem:[%s1107_s0 + $0x91] sm:$0x1]  ;;  %v131_v5 = vld [vmem:[%s1107_s0 + $0x92] sm:$0x1]  ;;  %v220_v6 = vmax.f32 %v120_v58, %v121_v1  ;;  %v123_v7 = vld [vmem:[%s1107_s0 + $0x89] sm:$0x1]  ;;  %v365_v8 = vmax.f32 %v333_v60, %v887_v55  ;;  %v294_v9 = vmax.f32 %v222_v56, %v127_v51  ;;  %v334_v10 = vmax.f32 %v813_v13, %v290_v61 }
  0x30   :  { %v291_v11 = vmax.f32 %v219_v63, %v120_v58  ;;  %v124_v12 = vld [vmem:[%s1107_s0 + $0x8a] sm:$0x1]  ;;  %v132_v14 = vld [vmem:[%s1107_s0 + $0x93] sm:$0x1]  ;;  %v133_v15 = vld [vmem:[%s1107_s0 + $0x94] sm:$0x1]  ;;  %v224_v16 = vmax.f32 %v129_v62, %v130_v4  ;;  %v221_v17 = vmax.f32 %v122_v2, %v123_v7  ;;  %v295_v22 = vmax.f32 %v223_v0, %v129_v62 }
  0x31   :  { %397 = vst.msk [vmem:[%s1108_s1 + $0x12] sm:$0x1] %vm378_vm0, %v364_v3  ;;  %v292_v13 = vmax.f32 %v220_v6, %v122_v2  ;;  %v225_v18 = vmax.f32 %v131_v5, %v132_v14  ;;  %v134_v19 = vld [vmem:[%s1107_s0 + $0x96] sm:$0x1]  ;;  %v135_v20 = vld [vmem:[%s1107_s0 + $0x97] sm:$0x1]  ;;  %v366_v23 = vmax.f32 %v334_v10, %v294_v9 }
  0x32   :  { %v136_v21 = vld [vmem:[%s1107_s0 + $0x98] sm:$0x1]  ;;  %398 = vst.msk [vmem:[%s1108_s1 + $0x13] sm:$0x1] %vm378_vm0, %v365_v8  ;;  %v335_v24 = vmax.f32 %v860_v39, %v291_v11  ;;  %v143_v25 = vld [vmem:[%s1107_s0 + $0xa0] sm:$0x1]  ;;  %v226_v28 = vmax.f32 %v134_v19, %v135_v20  ;;  %v296_v29 = vmax.f32 %v224_v16, %v131_v5  ;;  %v293_v31 = vmax.f32 %v221_v17, %v124_v12 }
  0x33   :  { %v144_v26 = vld [vmem:[%s1107_s0 + $0xa1] sm:$0x1]  ;;  %v145_v27 = vld [vmem:[%s1107_s0 + $0xa2] sm:$0x1]  ;;  %v336_v30 = vmax.f32 %v875_v46, %v292_v13  ;;  %v960_v32 = vmax.f32 %v225_v18, %v133_v15  ;;  %v137_v33 = vld [vmem:[%s1107_s0 + $0x99] sm:$0x1] }
  0x34   :  { %v138_v35 = vld [vmem:[%s1107_s0 + $0x9a] sm:$0x1]  ;;  %v146_v36 = vld [vmem:[%s1107_s0 + $0xa3] sm:$0x1]  ;;  %399 = vst.msk [vmem:[%s1108_s1 + $0x14] sm:$0x1] %vm378_vm0, %v366_v23  ;;  %v367_v37 = vmax.f32 %v335_v24, %v295_v22  ;;  %v230_v34 = vmax.f32 %v143_v25, %v144_v26  ;;  %v298_v38 = vmax.f32 %v226_v28, %v136_v21  ;;  %v227_v40 = vmax.f32 %v136_v21, %v137_v33 }
  0x35   :  { %v147_v39 = vld [vmem:[%s1107_s0 + $0xa4] sm:$0x1]  ;;  %v139_v41 = vld [vmem:[%s1107_s0 + $0x9b] sm:$0x1]  ;;  %v140_v42 = vld [vmem:[%s1107_s0 + $0x9c] sm:$0x1]  ;;  %v368_v43 = vmax.f32 %v336_v30, %v296_v29  ;;  %v337_v44 = vmax.f32 %v887_v55, %v293_v31  ;;  %v231_v45 = vmax.f32 %v145_v27, %v146_v36 }
  0x36   :  { %v148_v46 = vld [vmem:[%s1107_s0 + $0xa5] sm:$0x1]  ;;  %v149_v47 = vld [vmem:[%s1107_s0 + $0xa6] sm:$0x1]  ;;  %v228_v48 = vmax.f32 %v138_v35, %v139_v41  ;;  %v141_v49 = vld [vmem:[%s1107_s0 + $0x9d] sm:$0x1]  ;;  %v998_v50 = vmax.f32 %v230_v34, %v145_v27  ;;  %v338_v51 = vmax.f32 %v294_v9, %v298_v38  ;;  %v299_v52 = vmax.f32 %v227_v40, %v138_v35 }
  0x37   :  { %400 = vst.msk [vmem:[%s1108_s1 + $0x15] sm:$0x1] %vm378_vm0, %v367_v37  ;;  %v232_v53 = vmax.f32 %v147_v39, %v148_v46  ;;  %v142_v54 = vld [vmem:[%s1107_s0 + $0x9e] sm:$0x1]  ;;  %v150_v55 = vld [vmem:[%s1107_s0 + $0xa7] sm:$0x1]  ;;  %v369_v57 = vmax.f32 %v337_v44, %v960_v32  ;;  %v303_v58 = vmax.f32 %v231_v45, %v147_v39  ;;  %v229_v60 = vmax.f32 %v140_v42, %v141_v49 }
  0x38   :  { %v151_v56 = vld [vmem:[%s1107_s0 + $0xa8] sm:$0x1]  ;;  %401 = vst.msk [vmem:[%s1108_s1 + $0x16] sm:$0x1] %vm378_vm0, %v368_v43  ;;  %v300_v59 = vmax.f32 %v228_v48, %v140_v42  ;;  %v152_v61 = vld [vmem:[%s1107_s0 + $0xaa] sm:$0x1]  ;;  %v370_v0 = vmax.f32 %v338_v51, %v998_v50  ;;  %v339_v1 = vmax.f32 %v295_v22, %v299_v52  ;;  %v233_v3 = vmax.f32 %v149_v47, %v150_v55 }
  0x39   :  { %v153_v62 = vld [vmem:[%s1107_s0 + $0xab] sm:$0x1]  ;;  %v154_v63 = vld [vmem:[%s1107_s0 + $0xac] sm:$0x1]  ;;  %v304_v2 = vmax.f32 %v232_v53, %v149_v47  ;;  %v161_v4 = vld [vmem:[%s1107_s0 + $0xb4] sm:$0x1]  ;;  %v301_v8 = vmax.f32 %v229_v60, %v142_v54 }
  0x3a   :  { %v162_v5 = vld [vmem:[%s1107_s0 + $0xb5] sm:$0x1]  ;;  %v163_v6 = vld [vmem:[%s1107_s0 + $0xb6] sm:$0x1]  ;;  %402 = vst.msk [vmem:[%s1108_s1 + $0x17] sm:$0x1] %vm378_vm0, %v369_v57  ;;  %v340_v7 = vmax.f32 %v296_v29, %v300_v59  ;;  %v234_v9 = vmax.f32 %v152_v61, %v153_v62  ;;  %v371_v15 = vmax.f32 %v339_v1, %v303_v58  ;;  %v305_v16 = vmax.f32 %v233_v3, %v151_v56 }
  0x3b   :  { %v238_v10 = vmax.f32 %v161_v4, %v162_v5  ;;  %v155_v11 = vld [vmem:[%s1107_s0 + $0xad] sm:$0x1]  ;;  %v156_v12 = vld [vmem:[%s1107_s0 + $0xae] sm:$0x1]  ;;  %v164_v14 = vld [vmem:[%s1107_s0 + $0xb7] sm:$0x1]  ;;  %v341_v23 = vmax.f32 %v960_v32, %v301_v8 }
  0x3c   :  { %403 = vst.msk [vmem:[%s1108_s1 + $0x18] sm:$0x1] %vm378_vm0, %v370_v0  ;;  %v165_v13 = vld [vmem:[%s1107_s0 + $0xb8] sm:$0x1]  ;;  %v235_v17 = vmax.f32 %v154_v63, %v155_v11  ;;  %v239_v18 = vmax.f32 %v163_v6, %v164_v14  ;;  %v157_v19 = vld [vmem:[%s1107_s0 + $0xaf] sm:$0x1]  ;;  %v372_v21 = vmax.f32 %v340_v7, %v304_v2  ;;  %v306_v22 = vmax.f32 %v234_v9, %v154_v63 }
  0x3d   :  { %v158_v20 = vld [vmem:[%s1107_s0 + $0xb0] sm:$0x1]  ;;  %v310_v24 = vmax.f32 %v238_v10, %v163_v6  ;;  %v166_v25 = vld [vmem:[%s1107_s0 + $0xb9] sm:$0x1]  ;;  %v167_v26 = vld [vmem:[%s1107_s0 + $0xba] sm:$0x1]  ;;  %v236_v30 = vmax.f32 %v156_v12, %v157_v19  ;;  %v373_v36 = vmax.f32 %v341_v23, %v305_v16 }
  0x3e   :  { %v159_v27 = vld [vmem:[%s1107_s0 + $0xb1] sm:$0x1]  ;;  %404 = vst.msk [vmem:[%s1108_s1 + $0x19] sm:$0x1] %vm378_vm0, %v371_v15  ;;  %v307_v28 = vmax.f32 %v235_v17, %v156_v12  ;;  %v311_v29 = vmax.f32 %v239_v18, %v165_v13  ;;  %v240_v31 = vmax.f32 %v165_v13, %v166_v25  ;;  %v160_v32 = vld [vmem:[%s1107_s0 + $0xb2] sm:$0x1]  ;;  %v342_v37 = vmax.f32 %v998_v50, %v306_v22 }
  0x3f   :  { %v168_v33 = vld [vmem:[%s1107_s0 + $0xbb] sm:$0x1]  ;;  %v169_v35 = vld [vmem:[%s1107_s0 + $0xbc] sm:$0x1]  ;;  %405 = vst.msk [vmem:[%s1108_s1 + $0x1a] sm:$0x1] %vm378_vm0, %v372_v21  ;;  %v237_v34 = vmax.f32 %v158_v20, %v159_v27  ;;  %v308_v40 = vmax.f32 %v236_v30, %v158_v20 }
  0x40   :  { %v241_v38 = vmax.f32 %v167_v26, %v168_v33  ;;  %v343_v39 = vmax.f32 %v303_v58, %v307_v28  ;;  %v312_v41 = vmax.f32 %v240_v31, %v167_v26  ;;  %406 = vst.msk [vmem:[%s1108_s1 + $0x1b] sm:$0x1] %vm378_vm0, %v373_v36  ;;  %v374_v42 = vmax.f32 %v342_v37, %v310_v24 }
  0x41   :  { %v309_v43 = vmax.f32 %v237_v34, %v160_v32  ;;  %v344_v46 = vmax.f32 %v304_v2, %v308_v40 }
  0x42   :  { %v313_v44 = vmax.f32 %v241_v38, %v169_v35  ;;  %v375_v45 = vmax.f32 %v343_v39, %v311_v29  ;;  %407 = vst.msk [vmem:[%s1108_s1 + $0x1c] sm:$0x1] %vm378_vm0, %v374_v42 }
  0x43   :  { %v345_v47 = vmax.f32 %v305_v16, %v309_v43  ;;  %v376_v48 = vmax.f32 %v344_v46, %v312_v41 }
  0x44   :  { %408 = vst.msk [vmem:[%s1108_s1 + $0x1d] sm:$0x1] %vm378_vm0, %v375_v45 }
  0x45   :  { %v377_v49 = vmax.f32 %v345_v47, %v313_v44  ;;  %409 = vst.msk [vmem:[%s1108_s1 + $0x1e] sm:$0x1] %vm378_vm0, %v376_v48 }
  0x47   :  { %410 = vst.msk [vmem:[%s1108_s1 + $0x1f] sm:$0x1] %vm378_vm0, %v377_v49 }

// kernel: inception_forward.19
= control target key start
LH: loop header
LB: loop body
LE: loop exit
PB: predicated region body
PF: predicated region fallthrough
CT: control target
= control target key end

     0   :  { %s1630_s18 = smov 0   ;;  %s1632_s19 = smov 0   ;;  %s1818_s0 = inlined_call_operand.vmem [shape: bf16[32,1792], index: 0, kind: input, shape index: {}]   ;;  %s1819_s1 = inlined_call_operand.vmem [shape: bf16[1792,32], index: 1, kind: input, shape index: {}]   ;;  %s1820_s2 = inlined_call_operand.vmem [shape: f32[1,32], index: 2, kind: input, shape index: {}]   ;;  %s1821_s3 = inlined_call_operand.vmem [shape: f32[1,32], index: 3, kind: input, shape index: {}]   ;;  %s1822_s4 = inlined_call_operand.vmem [shape: f32[1,32], index: 4, kind: input, shape index: {}]   ;;  %s1823_s5 = inlined_call_operand.vmem [shape: f32[32,32], index: 5, kind: output, shape index: {}]  }
   0x1   :  { %s1634_s20 = smov 0   ;;  %s1636_s21 = smov 0  }
   0x2   :  { %s1638_s22 = smov 0  }
   0x3 LB: > { %s24_s23 = sadd.s32 1, %s1593_s21  ;;  %p43_p1 = scmp.ne.s32.totalorder %s1585_s19, %s1581_s18  ;;  %s1597_s22 = sphi %s1638_s22, %s15_s22   ;;  %s1593_s21 = sphi %s1636_s21, %s1827_s21   ;;  %s1589_s20 = sphi %s1634_s20, %s1826_s20   ;;  %s1585_s19 = sphi %s1632_s19, %s1825_s19   ;;  %s1581_s18 = sphi %s1630_s18, %s1824_s18  }
   0x4   : > { %p25_p0 = scmp.ge.s32.totalorder %s24_s23, 2  ;;  %p44_p2 = scmp.eq.s32.totalorder %s1597_s22, 0 }
   0x5   : > { %s36_s25 = sadd.s32 1, %s1585_s19  ;;  %p1235_p5 = scmp.ge.s32.totalorder %s1597_s22, 2 }
   0x6   : > { %s1829_s23 = smov (%p25_p0, %s24_s23), 0  ;;  %p45_p3 = por %p44_p2, %p43_p1 }
   0x7   : > { %s32_s24 = ssub.s32 %s1593_s21, %s1829_s23  ;;  %193 = sbr.rel (%p1235_p5) target bundleno = 25 (0x19), region = 28 }
   0x8   : > { %p34_p4 = scmp.eq.s32.totalorder %s32_s24, 0 }
   0xa   : > { %s1665_s26 = scalar_select %p34_p4, %s1585_s19, %s36_s25  }
   0xc   : > { %196 = sbr.rel (!%p45_p3) target bundleno = 25 (0x19), region = 32  ;;  %s198_s27 = sand.u32 (%p45_p3), 1, %s1585_s19  }
   0xd   : > { %s1325_s28 = smul.u32 (%p45_p3), 28, %s1593_s21 }
   0xe   : > { %s1440_s29 = smul.u32 (%p45_p3), 112, %s198_s27 }
   0xf   : > { %s1673_s7 = scalar_lea.vmem (%p45_p3), %s1818_s0, %s1325_s28 }
  0x10   : > { %v221_v0 = vld [vmem:[%s1673_s7] sm:$0xff] (%p45_p3)  ;;  %v223_v1 = vld [vmem:[%s1673_s7 + $0x8] sm:$0xff] (%p45_p3)  ;;  %v225_v2 = vld [vmem:[%s1673_s7 + $0x10] sm:$0xff] (%p45_p3)  ;;  %s200_s8 = scalar_lea.vmem (%p45_p3), [#allocation3], %s1440_s29 }
  0x11   : > { %222 = vst [vmem:[%s200_s8] sm:$0xff] %v221_v0  ;;  %224 = vst [vmem:[%s200_s8 + $0x8] sm:$0xff] %v223_v1  ;;  %v227_v3 = vld [vmem:[%s1673_s7 + $0x38] sm:$0xff]  ;;  %v229_v4 = vld [vmem:[%s1673_s7 + $0x40] sm:$0xff] }
  0x12   : > { %226 = vst [vmem:[%s200_s8 + $0x10] sm:$0xff] %v225_v2  ;;  %v231_v5 = vld [vmem:[%s1673_s7 + $0x48] sm:$0xff]  ;;  %228 = vst [vmem:[%s200_s8 + $0x1c] sm:$0xff] %v227_v3  ;;  %v233_v6 = vld [vmem:[%s1673_s7 + $0x70] sm:$0xff] }
  0x13   : > { %230 = vst [vmem:[%s200_s8 + $0x24] sm:$0xff] %v229_v4  ;;  %232 = vst [vmem:[%s200_s8 + $0x2c] sm:$0xff] %v231_v5  ;;  %v235_v7 = vld [vmem:[%s1673_s7 + $0x78] sm:$0xff]  ;;  %v237_v8 = vld [vmem:[%s1673_s7 + $0x80] sm:$0xff] }
  0x14   : > { %234 = vst [vmem:[%s200_s8 + $0x38] sm:$0xff] %v233_v6  ;;  %236 = vst [vmem:[%s200_s8 + $0x40] sm:$0xff] %v235_v7  ;;  %v239_v9 = vld [vmem:[%s1673_s7 + $0xa8] sm:$0xff]  ;;  %v241_v10 = vld [vmem:[%s1673_s7 + $0xb0] sm:$0xff] }
  0x15   : > { %238 = vst [vmem:[%s200_s8 + $0x48] sm:$0xff] %v237_v8  ;;  %v243_v11 = vld [vmem:[%s1673_s7 + $0xb8] sm:$0xff]  ;;  %240 = vst [vmem:[%s200_s8 + $0x54] sm:$0xff] %v239_v9  ;;  %v1239_v13 = vld [vmem:[%s1673_s7 + $0x50] sm:$0xf] }
  0x16   : > { %242 = vst [vmem:[%s200_s8 + $0x5c] sm:$0xff] %v241_v10  ;;  %244 = vst [vmem:[%s200_s8 + $0x64] sm:$0xff] %v243_v11  ;;  %v1237_v12 = vld [vmem:[%s1673_s7 + $0x18] sm:$0xf]  ;;  %v1241_v14 = vld [vmem:[%s1673_s7 + $0x88] sm:$0xf] }
  0x17   : > { %1238 = vst [vmem:[%s200_s8 + $0x18] sm:$0xf] %v1237_v12  ;;  %1240 = vst [vmem:[%s200_s8 + $0x34] sm:$0xf] %v1239_v13  ;;  %v1243_v15 = vld [vmem:[%s1673_s7 + $0xc0] sm:$0xf] }
  0x18   : > { %1242 = vst [vmem:[%s200_s8 + $0x50] sm:$0xf] %v1241_v14  ;;  %1244 = vst [vmem:[%s200_s8 + $0x6c] sm:$0xf] %v1243_v15 }
  0x19 PF: > { %p1245_p6 = scmp.ge.s32.totalorder %s1597_s22, 1  ;;  %p274_p7 = scmp.lt.s32.totalorder %s1597_s22, 3 }
  0x1b   : > { %p275_p8 = pnand %p1245_p6, %p274_p7 }
  0x1c   : > { %s281_s9 = sand.u32 (!%p275_p8), 1, %s1581_s18   ;;  %s315_s10 = smul.u32 (!%p275_p8), 112, %s1589_s20 }
  0x1d   : > { %278 = sbr.rel (%p275_p8) target bundleno = 342 (0x156), region = 62  ;;  %p1247_p10 = scmp.ne.s32.totalorder (!%p275_p8), %s1589_s20, 0 }
  0x1e   : > { %s1441_s11 = smul.u32 (!%p275_p8), 112, %s281_s9  ;;  %p316_p9 = scmp.lt.s32.totalorder (!%p275_p8), %s315_s10, 223 }
  0x20   : > { %s1700_s16 = scalar_lea.vmem (!%p275_p8), [#allocation3], %s1441_s11 }
  0x22   : > { %s1831_s10 = smov (!%p316_p9, %s315_s10), 223  ;;  %331 = sbr.rel (%p1247_p10) target bundleno = 42 (0x2a), region = 70 }
  0x23   : > { %s1246_s12 = sshll.u32 %s1831_s10, 2 }
  0x24   : > { %s1698_s15 = scalar_lea.vmem %s1819_s1, %s1246_s12 }
  0x27   : > { %vm332_vm0 = vcmask 261120   ;;  %v1599_v16 = vmov 0.0  }
  0x28   : > { %333 = vst.msk [vmem:[#allocation2] sm:$0xff] %vm332_vm0, %v1599_v16  ;;  %334 = vst.msk [vmem:[#allocation2 + $0x8] sm:$0xff] %vm332_vm0, %v1599_v16 }
  0x29   : > { %335 = vst.msk [vmem:[#allocation2 + $0x10] sm:$0xff] %vm332_vm0, %v1599_v16  ;;  %336 = vst.msk [vmem:[#allocation2 + $0x18] sm:$0xff] %vm332_vm0, %v1599_v16 }
  0x2a PF: > { %v1483_v17 = vld [vmem:[%s1698_s15 + $0x78] sm:$0xff]   ;;  %v1487_v21 = vld [vmem:[%s1698_s15 + $0x70] sm:$0xff]   ;;  %v1491_v25 = vld [vmem:[%s1698_s15 + $0x68] sm:$0xff]   ;;  %vm1077_vm1 = vcmask 261120   ;;  %p1318_p11 = scmp.ne.s32.totalorder %s1589_s20, 1 }
  0x2b   : > { %v1484_v18 = vld [vmem:[%s1698_s15 + $0xf8] sm:$0xff]   ;;  %1326 = vmatprep.subr.bf16.mxu0 %v1483_v17  ;;  %v1488_v22 = vld [vmem:[%s1698_s15 + $0xf0] sm:$0xff]   ;;  %v1492_v26 = vld [vmem:[%s1698_s15 + $0xe8] sm:$0xff]  }
  0x2c   : > { %v1485_v19 = vld [vmem:[%s1698_s15 + $0x38] sm:$0xff]   ;;  %1354 = vmatprep.subr.bf16.mxu1 %v1484_v18  ;;  %v1489_v23 = vld [vmem:[%s1698_s15 + $0x30] sm:$0xff]   ;;  %v1493_v27 = vld [vmem:[%s1698_s15 + $0x28] sm:$0xff]  }
  0x2d   : > { %v1486_v20 = vld [vmem:[%s1698_s15 + $0xb8] sm:$0xff]   ;;  %1327 = vmatpush3.bf16.msra.mxu0 %v1485_v19  ;;  %v1490_v24 = vld [vmem:[%s1698_s15 + $0xb0] sm:$0xff]   ;;  %v1494_v28 = vld [vmem:[%s1698_s15 + $0xa8] sm:$0xff]  }
  0x2e   : > { %1355 = vmatpush3.bf16.msra.mxu1 %v1486_v20  ;;  %1328 = vmatprep.subr.bf16.mxu0 %v1487_v21  ;;  %v1495_v29 = vld [vmem:[%s1698_s15 + $0x60] sm:$0xff]   ;;  %v1499_v33 = vld [vmem:[%s1698_s15 + $0x58] sm:$0xff]   ;;  %v1503_v37 = vld [vmem:[%s1698_s15 + $0x50] sm:$0xff]  }
  0x2f   : > { %1356 = vmatprep.subr.bf16.mxu1 %v1488_v22  ;;  %v1496_v30 = vld [vmem:[%s1698_s15 + $0xe0] sm:$0xff]   ;;  %v1500_v34 = vld [vmem:[%s1698_s15 + $0xd8] sm:$0xff]   ;;  %v1504_v38 = vld [vmem:[%s1698_s15 + $0xd0] sm:$0xff]  }
  0x30   : > { %v1497_v31 = vld [vmem:[%s1698_s15 + $0x20] sm:$0xff]   ;;  %v1501_v35 = vld [vmem:[%s1698_s15 + $0x18] sm:$0xff]   ;;  %v1505_v39 = vld [vmem:[%s1698_s15 + $0x10] sm:$0xff]  }
  0x31   : > { %1329 = vmatpush3.bf16.msra.mxu0 %v1489_v23  ;;  %v1498_v32 = vld [vmem:[%s1698_s15 + $0xa0] sm:$0xff]   ;;  %v1502_v36 = vld [vmem:[%s1698_s15 + $0x98] sm:$0xff]   ;;  %v1506_v40 = vld [vmem:[%s1698_s15 + $0x90] sm:$0xff]  }
  0x32   : > { %1357 = vmatpush3.bf16.msra.mxu1 %v1490_v24  ;;  %1330 = vmatprep.subr.bf16.mxu0 %v1491_v25  ;;  %v1507_v41 = vld [vmem:[%s1698_s15 + $0x48] sm:$0xff]   ;;  %v1511_v45 = vld [vmem:[%s1698_s15 + $0x40] sm:$0xff]   ;;  %v1521_v53 = vld [vmem:[%s1698_s15 + $0x178] sm:$0xff]  }
  0x33   : > { %1358 = vmatprep.subr.bf16.mxu1 %v1492_v26  ;;  %v1508_v42 = vld [vmem:[%s1698_s15 + $0xc8] sm:$0xff]   ;;  %v1512_v46 = vld [vmem:[%s1698_s15 + $0xc0] sm:$0xff]   ;;  %v1522_v54 = vld [vmem:[%s1698_s15 + $0x138] sm:$0xff]  }
  0x34   : > { %v1509_v43 = vld [vmem:[%s1698_s15 + $0x8] sm:$0xff]   ;;  %v1513_v47 = vld [vmem:[%s1698_s15] sm:$0xff]   ;;  %v1523_v55 = vld [vmem:[%s1698_s15 + $0x170] sm:$0xff]  }
  0x35   : > { %1331 = vmatpush3.bf16.msra.mxu0 %v1493_v27  ;;  %v1510_v44 = vld [vmem:[%s1698_s15 + $0x88] sm:$0xff]   ;;  %v1514_v48 = vld [vmem:[%s1698_s15 + $0x80] sm:$0xff]   ;;  %v1524_v56 = vld [vmem:[%s1698_s15 + $0x1b8] sm:$0xff]  }
  0x36   : > { %1359 = vmatpush3.bf16.msra.mxu1 %v1494_v28  ;;  %1332 = vmatprep.subr.bf16.mxu0 %v1495_v29  ;;  %v1515_v49 = vld [vmem:[%s1700_s16] ss:$28 sps:$4 sm:$0xff]   ;;  %v1518_v51 = vld [vmem:[%s1700_s16 + $0x8] ss:$28 sps:$4 sm:$0xff]   ;;  %v1539_v5 = vld [vmem:[%s1700_s16 + $0x38] ss:$28 sps:$4 sm:$0xff]  }
  0x37   : > { %1360 = vmatprep.subr.bf16.mxu1 %v1496_v30  ;;  %v1517_v50 = vld [vmem:[%s1700_s16 + $0x4] ss:$28 sps:$4 sm:$0xff]   ;;  %v1520_v52 = vld [vmem:[%s1700_s16 + $0xc] ss:$28 sps:$4 sm:$0xff]   ;;  %v1534_v2 = vld [vmem:[%s1700_s16 + $0x3c] ss:$28 sps:$4 sm:$0xff]  }
  0x38   : > { %909 = vmatprep.mubr.bf16.mxu0 %v1517_v50  ;;  %958 = vmatprep.mubr.bf16.mxu1 %v1520_v52  ;;  %v1525_v57 = vld [vmem:[%s1698_s15 + $0x130] sm:$0xff]   ;;  %v1526_v58 = vld [vmem:[%s1698_s15 + $0x168] sm:$0xff]   ;;  %v1529_v61 = vld [vmem:[%s1698_s15 + $0x160] sm:$0xff]  }
  0x39   : > { %1333 = vmatpush3.bf16.msra.mxu0 %v1497_v31  ;;  %v1527_v59 = vld [vmem:[%s1698_s15 + $0x1b0] sm:$0xff]   ;;  %v1528_v60 = vld [vmem:[%s1698_s15 + $0x128] sm:$0xff]   ;;  %v1531_v63 = vld [vmem:[%s1698_s15 + $0x120] sm:$0xff]  }
  0x3a   : > { %1361 = vmatpush3.bf16.msra.mxu1 %v1498_v32  ;;  %1334 = vmatprep.subr.bf16.mxu0 %v1499_v33  ;;  %v1530_v62 = vld [vmem:[%s1698_s15 + $0x1a8] sm:$0xff]   ;;  %v1532_v0 = vld [vmem:[%s1698_s15 + $0x158] sm:$0xff]   ;;  %v1533_v1 = vld [vmem:[%s1698_s15 + $0x1a0] sm:$0xff]  }
  0x3b   : > { %1362 = vmatprep.subr.bf16.mxu1 %v1500_v34  ;;  %v1536_v3 = vld [vmem:[%s1700_s16 + $0x44] ss:$28 sps:$4 sm:$0xff]   ;;  %v1538_v4 = vld [vmem:[%s1698_s15 + $0x118] sm:$0xff]   ;;  %v1544_v10 = vld [vmem:[%s1698_s15 + $0x148] sm:$0xff]  }
  0x3c   : > { %v1540_v6 = vld [vmem:[%s1700_s16 + $0x40] ss:$28 sps:$4 sm:$0xff]   ;;  %v1552_v16 = vld [vmem:[%s1700_s16 + $0x14] ss:$28 sps:$4 sm:$0xff]   ;;  %v1556_v20 = vld [vmem:[%s1700_s16 + $0x4c] ss:$28 sps:$4 sm:$0xff]  }
  0x3d   : > { %1335 = vmatpush3.bf16.msra.mxu0 %v1501_v35  ;;  %v1541_v7 = vld [vmem:[%s1698_s15 + $0x150] sm:$0xff]   ;;  %v1542_v8 = vld [vmem:[%s1698_s15 + $0x198] sm:$0xff]   ;;  %v1546_v12 = vld [vmem:[%s1698_s15 + $0x108] sm:$0xff]  }
  0x3e   : > { %1363 = vmatpush3.bf16.msra.mxu1 %v1502_v36  ;;  %1336 = vmatprep.subr.bf16.mxu0 %v1503_v37  ;;  %v1543_v9 = vld [vmem:[%s1698_s15 + $0x110] sm:$0xff]   ;;  %v1547_v13 = vld [vmem:[%s1698_s15 + $0x140] sm:$0xff]   ;;  %v1548_v14 = vld [vmem:[%s1698_s15 + $0x188] sm:$0xff]  }
  0x3f   : > { %1364 = vmatprep.subr.bf16.mxu1 %v1504_v38  ;;  %v1545_v11 = vld [vmem:[%s1698_s15 + $0x190] sm:$0xff]   ;;  %v1549_v15 = vld [vmem:[%s1698_s15 + $0x100] sm:$0xff]  }
  0x40   : > { %v1553_v17 = vld [vmem:[%s1698_s15 + $0x180] sm:$0xff]  }
  0x41   : > { %1337 = vmatpush3.bf16.msra.mxu0 %v1505_v39  ;;  %v1554_v18 = vld [vmem:[%s1700_s16 + $0x18] ss:$28 sps:$4 sm:$0xff]   ;;  %v1550_v19 = vld [vmem:[%s1700_s16 + $0x10] ss:$28 sps:$4 sm:$0xff]   ;;  %v1558_v22 = vld [vmem:[%s1700_s16 + $0x48] ss:$28 sps:$4 sm:$0xff]  }
  0x42   : > { %1365 = vmatpush3.bf16.msra.mxu1 %v1506_v40  ;;  %1338 = vmatprep.subr.bf16.mxu0 %v1507_v41  ;;  %v1555_v21 = vld [vmem:[%s1700_s16 + $0x50] ss:$28 sps:$4 sm:$0xff]  }
  0x43   : > { %1366 = vmatprep.subr.bf16.mxu1 %v1508_v42 }
  0x45   : > { %1339 = vmatpush3.bf16.msra.mxu0 %v1509_v43 }
  0x46   : > { %1367 = vmatpush3.bf16.msra.mxu1 %v1510_v44  ;;  %1340 = vmatprep.subr.bf16.mxu0 %v1511_v45 }
  0x47   : > { %1368 = vmatprep.subr.bf16.mxu1 %v1512_v46 }
  0x49   : > { %1341 = vmatpush3.bf16.msra.mxu0 %v1513_v47 }
  0x4a   : > { %1369 = vmatpush3.bf16.msra.mxu1 %v1514_v48  ;;  %1382 = vmatprep.subr.bf16.mxu0 %v1521_v53 }
  0x4b   : > { %1420 = vmatprep.subr.bf16.mxu1 %v1524_v56 }
  0x4c   : > { %910 = vmatmul.mubr.bf16.vlgmr.msra.gmra.mxu0 %v1515_v49 }
  0x4d   : > { %959 = vmatmul.mubr.bf16.vlgmr.msra.gmra.mxu1 %v1518_v51  ;;  %1383 = vmatpush3.bf16.msra.mxu0 %v1522_v54  ;;  %v337_v54 = vld [vmem:[#allocation2] sm:$0xff] }
  0x4e   : > { %1384 = vmatprep.subr.bf16.mxu0 %v1523_v55  ;;  %1421 = vmatpush3.bf16.msra.mxu1 %v1524_v56 }
  0x4f   : > { %1422 = vmatprep.subr.bf16.mxu1 %v1527_v59  ;;  %917 = vmatprep.mubr.bf16.mxu0 %v1534_v2 }
  0x50   : > { %966 = vmatprep.mubr.bf16.mxu1 %v1536_v3 }
  0x51   : > { %1385 = vmatpush3.bf16.msra.mxu0 %v1525_v57 }
  0x52   : > { %1386 = vmatprep.subr.bf16.mxu0 %v1526_v58  ;;  %1423 = vmatpush3.bf16.msra.mxu1 %v1527_v59 }
  0x53   : > { %1424 = vmatprep.subr.bf16.mxu1 %v1530_v62 }
  0x54   : > { %918 = vmatmul.mubr.bf16.gmra.mxu0 %v1539_v5 }
  0x55   : > { %1387 = vmatpush3.bf16.msra.mxu0 %v1528_v60  ;;  %967 = vmatmul.mubr.bf16.gmra.mxu1 %v1540_v6 }
  0x56   : > { %1388 = vmatprep.subr.bf16.mxu0 %v1529_v61  ;;  %1425 = vmatpush3.bf16.msra.mxu1 %v1530_v62 }
  0x57   : > { %1426 = vmatprep.subr.bf16.mxu1 %v1533_v1  ;;  %1007 = vmatprep.mubr.bf16.mxu0 %v1552_v16  ;;  %v340_v16 = vld [vmem:[#allocation2 + $0x18] sm:$0xff] }
  0x58   : > { %1436 = vmatprep.mubr.bf16.mxu1 %v1554_v18 }
  0x59   : > { %1389 = vmatpush3.bf16.msra.mxu0 %v1531_v63 }
  0x5a   : > { %1390 = vmatprep.subr.bf16.mxu0 %v1532_v0  ;;  %1427 = vmatpush3.bf16.msra.mxu1 %v1533_v1  ;;  %v338_v1 = vld [vmem:[#allocation2 + $0x8] sm:$0xff] }
  0x5b   : > { %1428 = vmatprep.subr.bf16.mxu1 %v1542_v8 }
  0x5d   : > { %1391 = vmatpush3.bf16.msra.mxu0 %v1538_v4 }
  0x5e   : > { %1392 = vmatprep.subr.bf16.mxu0 %v1541_v7  ;;  %1429 = vmatpush3.bf16.msra.mxu1 %v1542_v8 }
  0x5f   : > { %1430 = vmatprep.subr.bf16.mxu1 %v1545_v11 }
  0x61   : > { %1393 = vmatpush3.bf16.msra.mxu0 %v1543_v9  ;;  %v339_v9 = vld [vmem:[#allocation2 + $0x10] sm:$0xff] }
  0x62   : > { %1394 = vmatprep.subr.bf16.mxu0 %v1544_v10  ;;  %1431 = vmatpush3.bf16.msra.mxu1 %v1545_v11 }
  0x63   : > { %1432 = vmatprep.subr.bf16.mxu1 %v1548_v14 }
  0x65   : > { %1395 = vmatpush3.bf16.msra.mxu0 %v1546_v12 }
  0x66   : > { %1396 = vmatprep.subr.bf16.mxu0 %v1547_v13  ;;  %1433 = vmatpush3.bf16.msra.mxu1 %v1548_v14 }
  0x67   : > { %1434 = vmatprep.subr.bf16.mxu1 %v1553_v17 }
  0x69   : > { %1397 = vmatpush3.bf16.msra.mxu0 %v1549_v15 }
  0x6a   : > { %1435 = vmatpush3.bf16.msra.mxu1 %v1553_v17 }
  0x6c   : > { %1008 = vmatmul.mubr.bf16.vlgmr.msra.gmra.mxu0 %v1550_v19 }
  0x6d   : > { %1015 = vmatprep.mubr.bf16.mxu0 %v1556_v20  ;;  %1437 = vmatmul.mubr.bf16.vlgmr.msra.gmra.mxu1 %v1555_v21 }
  0x74   : > { %1016 = vmatmul.mubr.bf16.gmra.mxu0 %v1558_v22 }
 0x10c   : > { %v1342_v23 = vpop.f32.mrf.mxu0 }
 0x10d   : > { %v1370_v24 = vpop.f32.mrf.mxu1 }
 0x10e   : > { %v1343_v25 = vpop.f32.mrf.mxu0 }
 0x10f   : > { %v1371_v26 = vpop.f32.mrf.mxu1  ;;  %v1344_v38 = vadd.f32 %v1343_v25, %v1342_v23 }
 0x110   : > { %v1345_v27 = vpop.f32.mrf.mxu0  ;;  %v1372_v39 = vadd.f32 %v1371_v26, %v1370_v24 }
 0x111   : > { %v1373_v28 = vpop.f32.mrf.mxu1 }
 0x112   : > { %v1346_v29 = vpop.f32.mrf.mxu0  ;;  %v961_v43 = vadd.f32 %v1372_v39, %v1344_v38 }
 0x113   : > { %v1374_v31 = vpop.f32.mrf.mxu1  ;;  %v1347_v44 = vadd.f32 %v1346_v29, %v1345_v27 }
 0x114   : > { %v1348_v30 = vpop.f32.mrf.mxu0  ;;  %v1375_v45 = vadd.f32 %v1374_v31, %v1373_v28 }
 0x115   : > { %v1376_v32 = vpop.f32.mrf.mxu1 }
 0x116   : > { %v1349_v33 = vpop.f32.mrf.mxu0  ;;  %v964_v55 = vadd.f32 %v1375_v45, %v1347_v44 }
 0x117   : > { %v1377_v34 = vpop.f32.mrf.mxu1  ;;  %v1350_v51 = vadd.f32 %v1349_v33, %v1348_v30 }
 0x118   : > { %v1351_v35 = vpop.f32.mrf.mxu0  ;;  %v1378_v52 = vadd.f32 %v1377_v34, %v1376_v32 }
 0x119   : > { %v1379_v36 = vpop.f32.mrf.mxu1 }
 0x11a   : > { %v1352_v37 = vpop.f32.mrf.mxu0  ;;  %v969_v63 = vadd.f32 %v1378_v52, %v1350_v51 }
 0x11b   : > { %v1380_v41 = vpop.f32.mrf.mxu1  ;;  %v1353_v2 = vadd.f32 %v1352_v37, %v1351_v35 }
 0x11c   : > { %v1381_v3 = vadd.f32 %v1380_v41, %v1379_v36 }
 0x11e   : > { %v972_v11 = vadd.f32 %v1381_v3, %v1353_v2 }
 0x12c   : > { %v1398_v40 = vpop.f32.mrf.mxu0 }
 0x12d   : > { %v1438_v47 = vpop.f32.mrf.mxu1 }
 0x12e   : > { %v1399_v42 = vpop.f32.mrf.mxu0 }
 0x12f   : > { %v1400_v46 = vadd.f32 %v1399_v42, %v1398_v40  ;;  %v1058_v50 = vpop.f32.mrf.mxu1 }
 0x130   : > { %v1401_v48 = vpop.f32.mrf.mxu0 }
 0x131   : > { %v1010_v49 = vadd.f32 %v1400_v46, %v961_v43  ;;  %v1439_v58 = vpop.f32.mrf.mxu1 }
 0x132   : > { %v1402_v53 = vpop.f32.mrf.mxu0 }
 0x133   : > { %v1403_v56 = vadd.f32 %v1402_v53, %v1401_v48  ;;  %v1059_v57 = vadd.f32 %v1058_v50, %v1010_v49  ;;  %v1061_v62 = vpop.f32.mrf.mxu1 }
 0x134   : > { %v1404_v59 = vpop.f32.mrf.mxu0 }
 0x135   : > { %v1073_v60 = vadd.f32 %v1059_v57, %v337_v54  ;;  %v1013_v61 = vadd.f32 %v1403_v56, %v964_v55 }
 0x136   : > { %v1405_v0 = vpop.f32.mrf.mxu0 }
 0x137   : > { %1078 = vst.msk [vmem:[#allocation2] sm:$0xff] %vm1077_vm1, %v1073_v60  ;;  %v1406_v4 = vadd.f32 %v1405_v0, %v1404_v59  ;;  %v1062_v5 = vadd.f32 %v1061_v62, %v1013_v61 }
 0x138   : > { %v1407_v6 = vpop.f32.mrf.mxu0 }
 0x139   : > { %v1018_v7 = vadd.f32 %v1406_v4, %v969_v63  ;;  %v1074_v8 = vadd.f32 %v1062_v5, %v338_v1 }
 0x13a   : > { %v1408_v10 = vpop.f32.mrf.mxu0 }
 0x13b   : > { %v1067_v12 = vadd.f32 %v1438_v47, %v1018_v7  ;;  %1079 = vst.msk [vmem:[#allocation2 + $0x8] sm:$0xff] %vm1077_vm1, %v1074_v8  ;;  %v1409_v13 = vadd.f32 %v1408_v10, %v1407_v6 }
 0x13d   : > { %v1075_v14 = vadd.f32 %v1067_v12, %v339_v9  ;;  %v1021_v15 = vadd.f32 %v1409_v13, %v972_v11 }
 0x13f   : > { %1080 = vst.msk [vmem:[#allocation2 + $0x10] sm:$0xff] %vm1077_vm1, %v1075_v14  ;;  %v1070_v17 = vadd.f32 %v1439_v58, %v1021_v15  ;;  %1085 = sbr.rel (%p1318_p11) target bundleno = 342 (0x156), region = 74 }
 0x141   : > { %v1076_v18 = vadd.f32 %v1070_v17, %v340_v16 }
 0x143   : > { %1081 = vst.msk [vmem:[#allocation2 + $0x18] sm:$0xff] %vm1077_vm1, %v1076_v18 }
 0x144   : > { %v1086_v19 = vld [vmem:[#allocation2] sm:$0xff]  ;;  %v1118_v22 = vlaneseq  ;;  %v1087_v25 = vld [vmem:[#allocation2 + $0x8] sm:$0xff] }
 0x145   : > { %v1319_v20 = vld [vmem:[%s1820_s2] ss:$0 sm:$0xff] }
 0x146   : > { %v1320_v21 = vld [vmem:[%s1821_s3] ss:$0 sm:$0xff]  ;;  %v1097_v23 = vmul.f32 %v1319_v20, %v1086_v19  ;;  %v1088_v26 = vld [vmem:[#allocation2 + $0x10] sm:$0xff]  ;;  %v1119_v27 = vshrl.u32 %v1118_v22, 7  ;;  %v1098_v29 = vmul.f32 %v1319_v20, %v1087_v25 }
 0x147   : > { %v1112_v24 = vld [vmem:[%s1822_s4] sm:$0x1]  ;;  %v1099_v30 = vmul.f32 %v1319_v20, %v1088_v26 }
 0x148   : > { %v1127_v28 = vsub.f32 1.0, %v1112_v24  ;;  %v1108_v32 = vadd.f32 %v1320_v21, %v1097_v23  ;;  %v1120_v34 = vsub.s32 0, %v1119_v27  ;;  %v1109_v35 = vadd.f32 %v1320_v21, %v1098_v29 }
 0x149   : > { %v1110_v36 = vadd.f32 %v1320_v21, %v1099_v30 }
 0x14a   : > { %v1089_v31 = vld [vmem:[#allocation2 + $0x18] sm:$0xff]  ;;  %v1113_v37 = vmax.f32 %v1108_v32, 0.0  ;;  %v1121_v39 = vrot.slane %v1112_v24, %v1120_v34  ;;  %v1132_v40 = vrot.slane %v1127_v28, %v1120_v34  ;;  %v1114_v41 = vmax.f32 %v1109_v35, 0.0 }
 0x14b   : > { %v1100_v33 = vmul.f32 %v1319_v20, %v1089_v31  ;;  %v1115_v42 = vmax.f32 %v1110_v36, 0.0 }
 0x14c   : > { %v1123_v44 = vmul.f32 %v1121_v39, %v1113_v37  ;;  %v1134_v45 = vmul.f32 %v1132_v40, %v1108_v32  ;;  %v1124_v46 = vmul.f32 %v1121_v39, %v1114_v41  ;;  %v1135_v47 = vmul.f32 %v1132_v40, %v1109_v35 }
 0x14d   : > { %v1111_v38 = vadd.f32 %v1320_v21, %v1100_v33  ;;  %v1125_v48 = vmul.f32 %v1121_v39, %v1115_v42  ;;  %v1136_v49 = vmul.f32 %v1132_v40, %v1110_v36 }
 0x14e   : > { %v1138_v52 = vadd.f32 %v1134_v45, %v1123_v44  ;;  %v1139_v53 = vadd.f32 %v1135_v47, %v1124_v46 }
 0x14f   : > { %v1116_v43 = vmax.f32 %v1111_v38, 0.0  ;;  %v1137_v51 = vmul.f32 %v1132_v40, %v1111_v38  ;;  %v1140_v54 = vadd.f32 %v1136_v49, %v1125_v48 }
 0x150   : > { %1142 = vst.msk [vmem:[%s1823_s5] sm:$0xff] %vm1077_vm1, %v1138_v52  ;;  %1143 = vst.msk [vmem:[%s1823_s5 + $0x8] sm:$0xff] %vm1077_vm1, %v1139_v53 }
 0x151   : > { %v1126_v50 = vmul.f32 %v1121_v39, %v1116_v43  ;;  %1144 = vst.msk [vmem:[%s1823_s5 + $0x10] sm:$0xff] %vm1077_vm1, %v1140_v54 }
 0x153   : > { %v1141_v55 = vadd.f32 %v1137_v51, %v1126_v50 }
 0x155   : > { %1145 = vst.msk [vmem:[%s1823_s5 + $0x18] sm:$0xff] %vm1077_vm1, %v1141_v55 }
 0x156 PF: > { %s15_s22 = sadd.s32 1, %s1597_s22   ;;  %s1824_s18 = smov %s1585_s19 }
 0x157   : > { %p12_p12 = scmp.ge.s32.totalorder %s15_s22, 4   ;;  %s1825_s19 = smov %s1665_s26 }
 0x158   : > { %s1826_s20 = smov %s1593_s21  ;;  %s1827_s21 = smov %s1829_s23 }
 0x159   :  { %14 = sbr.rel (!%p12_p12) target bundleno = 3 (0x3), region = 118 }

// kernel: inception_forward.20
= control target key start
LH: loop header
LB: loop body
LE: loop exit
PB: predicated region body
PF: predicated region fallthrough
CT: control target
= control target key end

     0   :  { %s310_s0 = inlined_call_operand.vmem [shape: f32[2,6,6,1,128], index: 0, kind: input, shape index: {}]   ;;  %s311_s1 = inlined_call_operand.vmem [shape: f32[2,2,2,1,128], index: 1, kind: output, shape index: {}]  }
   0x1   :  { %v8_v0 = vld [vmem:[%s310_s0] sm:$0x1]  ;;  %v9_v1 = vld [vmem:[%s310_s0 + $0x1] sm:$0x1]  ;;  %v10_v2 = vld [vmem:[%s310_s0 + $0x2] sm:$0x1] }
   0x2   :  { %v13_v3 = vld [vmem:[%s310_s0 + $0x6] sm:$0x1]  ;;  %v14_v4 = vld [vmem:[%s310_s0 + $0x7] sm:$0x1]  ;;  %v15_v5 = vld [vmem:[%s310_s0 + $0x8] sm:$0x1]  ;;  %v58_v6 = vmax.f32 %v8_v0, %v9_v1 }
   0x3   :  { %v18_v7 = vld [vmem:[%s310_s0 + $0xc] sm:$0x1]  ;;  %v19_v8 = vld [vmem:[%s310_s0 + $0xd] sm:$0x1]  ;;  %v20_v9 = vld [vmem:[%s310_s0 + $0xe] sm:$0x1]  ;;  %v60_v10 = vmax.f32 %v13_v3, %v14_v4 }
   0x4   :  { %v62_v11 = vmax.f32 %v18_v7, %v19_v8  ;;  %v78_v12 = vmax.f32 %v58_v6, %v10_v2  ;;  %v11_v13 = vld [vmem:[%s310_s0 + $0x3] sm:$0x1]  ;;  %v12_v14 = vld [vmem:[%s310_s0 + $0x4] sm:$0x1]  ;;  %v16_v15 = vld [vmem:[%s310_s0 + $0x9] sm:$0x1] }
   0x5   :  { %v80_v16 = vmax.f32 %v60_v10, %v15_v5  ;;  %v17_v17 = vld [vmem:[%s310_s0 + $0xa] sm:$0x1]  ;;  %v21_v18 = vld [vmem:[%s310_s0 + $0xf] sm:$0x1]  ;;  %v22_v19 = vld [vmem:[%s310_s0 + $0x10] sm:$0x1]  ;;  %v59_v20 = vmax.f32 %v10_v2, %v11_v13  ;;  %v61_v21 = vmax.f32 %v15_v5, %v16_v15 }
   0x6   :  { %v82_v22 = vmax.f32 %v62_v11, %v20_v9  ;;  %v63_v23 = vmax.f32 %v20_v9, %v21_v18  ;;  %v23_v24 = vld [vmem:[%s310_s0 + $0x12] sm:$0x1]  ;;  %v24_v25 = vld [vmem:[%s310_s0 + $0x13] sm:$0x1]  ;;  %v25_v26 = vld [vmem:[%s310_s0 + $0x14] sm:$0x1] }
   0x7   :  { %v98_v27 = vmax.f32 %v78_v12, %v80_v16  ;;  %v79_v28 = vmax.f32 %v59_v20, %v12_v14  ;;  %v81_v29 = vmax.f32 %v61_v21, %v17_v17  ;;  %v28_v30 = vld [vmem:[%s310_s0 + $0x18] sm:$0x1]  ;;  %v29_v31 = vld [vmem:[%s310_s0 + $0x19] sm:$0x1]  ;;  %v30_v32 = vld [vmem:[%s310_s0 + $0x1a] sm:$0x1]  ;;  %v64_v33 = vmax.f32 %v23_v24, %v24_v25 }
   0x8   :  { %v83_v34 = vmax.f32 %v63_v23, %v22_v19  ;;  %v66_v35 = vmax.f32 %v28_v30, %v29_v31  ;;  %v26_v36 = vld [vmem:[%s310_s0 + $0x15] sm:$0x1]  ;;  %v27_v37 = vld [vmem:[%s310_s0 + $0x16] sm:$0x1]  ;;  %v31_v38 = vld [vmem:[%s310_s0 + $0x1b] sm:$0x1] }
   0x9   :  { %v106_v39 = vmax.f32 %v98_v27, %v82_v22  ;;  %v99_v40 = vmax.f32 %v79_v28, %v81_v29  ;;  %v84_v41 = vmax.f32 %v64_v33, %v25_v26  ;;  %v32_v42 = vld [vmem:[%s310_s0 + $0x1c] sm:$0x1]  ;;  %v65_v43 = vmax.f32 %v25_v26, %v26_v36  ;;  %v33_v44 = vld [vmem:[%s310_s0 + $0x24] sm:$0x1]  ;;  %v34_v45 = vld [vmem:[%s310_s0 + $0x25] sm:$0x1] }
   0xa   :  { %v86_v46 = vmax.f32 %v66_v35, %v30_v32  ;;  %v67_v47 = vmax.f32 %v30_v32, %v31_v38  ;;  %v35_v48 = vld [vmem:[%s310_s0 + $0x26] sm:$0x1]  ;;  %v38_v49 = vld [vmem:[%s310_s0 + $0x2a] sm:$0x1]  ;;  %v39_v50 = vld [vmem:[%s310_s0 + $0x2b] sm:$0x1]  ;;  %v68_v51 = vmax.f32 %v33_v44, %v34_v45 }
   0xb   :  { %114 = vst [vmem:[%s311_s1] sm:$0x1] %v106_v39  ;;  %v107_v52 = vmax.f32 %v99_v40, %v83_v34  ;;  %v100_v53 = vmax.f32 %v82_v22, %v84_v41  ;;  %v85_v54 = vmax.f32 %v65_v43, %v27_v37  ;;  %v40_v55 = vld [vmem:[%s310_s0 + $0x2c] sm:$0x1]  ;;  %v43_v56 = vld [vmem:[%s310_s0 + $0x30] sm:$0x1]  ;;  %v70_v58 = vmax.f32 %v38_v49, %v39_v50 }
   0xc   :  { %v44_v57 = vld [vmem:[%s310_s0 + $0x31] sm:$0x1]  ;;  %v87_v59 = vmax.f32 %v67_v47, %v32_v42  ;;  %v45_v60 = vld [vmem:[%s310_s0 + $0x32] sm:$0x1]  ;;  %v88_v62 = vmax.f32 %v68_v51, %v35_v48  ;;  %v36_v63 = vld [vmem:[%s310_s0 + $0x27] sm:$0x1] }
   0xd   :  { %v72_v61 = vmax.f32 %v43_v56, %v44_v57  ;;  %v37_v0 = vld [vmem:[%s310_s0 + $0x28] sm:$0x1]  ;;  %115 = vst [vmem:[%s311_s1 + $0x1] sm:$0x1] %v107_v52  ;;  %v108_v1 = vmax.f32 %v100_v53, %v86_v46  ;;  %v101_v2 = vmax.f32 %v83_v34, %v85_v54  ;;  %v90_v3 = vmax.f32 %v70_v58, %v40_v55  ;;  %v41_v4 = vld [vmem:[%s310_s0 + $0x2d] sm:$0x1] }
   0xe   :  { %v42_v5 = vld [vmem:[%s310_s0 + $0x2e] sm:$0x1]  ;;  %v46_v6 = vld [vmem:[%s310_s0 + $0x33] sm:$0x1]  ;;  %v69_v7 = vmax.f32 %v35_v48, %v36_v63  ;;  %v47_v9 = vld [vmem:[%s310_s0 + $0x34] sm:$0x1]  ;;  %v71_v10 = vmax.f32 %v40_v55, %v41_v4 }
   0xf   :  { %v92_v8 = vmax.f32 %v72_v61, %v45_v60  ;;  %v73_v11 = vmax.f32 %v45_v60, %v46_v6  ;;  %v48_v12 = vld [vmem:[%s310_s0 + $0x36] sm:$0x1]  ;;  %v49_v13 = vld [vmem:[%s310_s0 + $0x37] sm:$0x1]  ;;  %116 = vst [vmem:[%s311_s1 + $0x2] sm:$0x1] %v108_v1  ;;  %v109_v14 = vmax.f32 %v101_v2, %v87_v59  ;;  %v102_v15 = vmax.f32 %v88_v62, %v90_v3 }
  0x10   :  { %v89_v16 = vmax.f32 %v69_v7, %v37_v0  ;;  %v50_v17 = vld [vmem:[%s310_s0 + $0x38] sm:$0x1]  ;;  %v53_v18 = vld [vmem:[%s310_s0 + $0x3c] sm:$0x1]  ;;  %v54_v19 = vld [vmem:[%s310_s0 + $0x3d] sm:$0x1]  ;;  %v74_v20 = vmax.f32 %v48_v12, %v49_v13  ;;  %v91_v21 = vmax.f32 %v71_v10, %v42_v5 }
  0x11   :  { %v55_v22 = vld [vmem:[%s310_s0 + $0x3e] sm:$0x1]  ;;  %v76_v23 = vmax.f32 %v53_v18, %v54_v19  ;;  %v51_v24 = vld [vmem:[%s310_s0 + $0x39] sm:$0x1]  ;;  %v52_v25 = vld [vmem:[%s310_s0 + $0x3a] sm:$0x1]  ;;  %v110_v26 = vmax.f32 %v102_v15, %v92_v8  ;;  %v93_v27 = vmax.f32 %v73_v11, %v47_v9 }
  0x12   :  { %117 = vst [vmem:[%s311_s1 + $0x3] sm:$0x1] %v109_v14  ;;  %v94_v28 = vmax.f32 %v74_v20, %v50_v17  ;;  %v56_v29 = vld [vmem:[%s310_s0 + $0x3f] sm:$0x1]  ;;  %v57_v30 = vld [vmem:[%s310_s0 + $0x40] sm:$0x1]  ;;  %v75_v31 = vmax.f32 %v50_v17, %v51_v24  ;;  %v103_v32 = vmax.f32 %v89_v16, %v91_v21 }
  0x13   :  { %v96_v33 = vmax.f32 %v76_v23, %v55_v22  ;;  %v77_v34 = vmax.f32 %v55_v22, %v56_v29  ;;  %118 = vst [vmem:[%s311_s1 + $0x4] sm:$0x1] %v110_v26 }
  0x14   :  { %v104_v35 = vmax.f32 %v92_v8, %v94_v28  ;;  %v95_v36 = vmax.f32 %v75_v31, %v52_v25  ;;  %v111_v37 = vmax.f32 %v103_v32, %v93_v27 }
  0x15   :  { %v97_v38 = vmax.f32 %v77_v34, %v57_v30 }
  0x16   :  { %v112_v39 = vmax.f32 %v104_v35, %v96_v33  ;;  %v105_v40 = vmax.f32 %v93_v27, %v95_v36  ;;  %119 = vst [vmem:[%s311_s1 + $0x5] sm:$0x1] %v111_v37 }
  0x18   :  { %120 = vst [vmem:[%s311_s1 + $0x6] sm:$0x1] %v112_v39  ;;  %v113_v41 = vmax.f32 %v105_v40, %v97_v38 }
  0x1a   :  { %121 = vst [vmem:[%s311_s1 + $0x7] sm:$0x1] %v113_v41 }

// kernel: inception_forward.22
= control target key start
LH: loop header
LB: loop body
LE: loop exit
PB: predicated region body
PF: predicated region fallthrough
CT: control target
= control target key end

     0   :  { %v42_v13 = vlaneseq  ;;  %s122_s0 = inlined_call_operand.vmem [shape: f32[2,4,4,1,256], index: 0, kind: input, shape index: {}]   ;;  %s123_s1 = inlined_call_operand.vmem [shape: f32[2,1,1,1,256], index: 1, kind: output, shape index: {}]  }
   0x1   :  { %v8_v0 = vld [vmem:[%s122_s0] sm:$0x3]  ;;  %v9_v1 = vld [vmem:[%s122_s0 + $0x2] sm:$0x3]  ;;  %v10_v2 = vld [vmem:[%s122_s0 + $0x4] sm:$0x3] }
   0x2   :  { %v11_v3 = vld [vmem:[%s122_s0 + $0x8] sm:$0x3]  ;;  %v12_v4 = vld [vmem:[%s122_s0 + $0xa] sm:$0x3]  ;;  %v13_v5 = vld [vmem:[%s122_s0 + $0xc] sm:$0x3]  ;;  %v26_v6 = vmax.f32 %v8_v0, %v9_v1 }
   0x3   :  { %v14_v7 = vld [vmem:[%s122_s0 + $0x10] sm:$0x3]  ;;  %v15_v8 = vld [vmem:[%s122_s0 + $0x12] sm:$0x3]  ;;  %v16_v9 = vld [vmem:[%s122_s0 + $0x14] sm:$0x3]  ;;  %v27_v10 = vmax.f32 %v11_v3, %v12_v4 }
   0x4   :  { %v28_v11 = vmax.f32 %v14_v7, %v15_v8  ;;  %v32_v12 = vmax.f32 %v26_v6, %v10_v2  ;;  %v17_v14 = vld [vmem:[%s122_s0 + $0x20] sm:$0x3]  ;;  %v18_v15 = vld [vmem:[%s122_s0 + $0x22] sm:$0x3]  ;;  %v19_v17 = vld [vmem:[%s122_s0 + $0x24] sm:$0x3] }
   0x5   :  { %v33_v16 = vmax.f32 %v27_v10, %v13_v5  ;;  %v20_v18 = vld [vmem:[%s122_s0 + $0x28] sm:$0x3]  ;;  %v21_v19 = vld [vmem:[%s122_s0 + $0x2a] sm:$0x3]  ;;  %v29_v20 = vmax.f32 %v17_v14, %v18_v15  ;;  %v22_v22 = vld [vmem:[%s122_s0 + $0x2c] sm:$0x3] }
   0x6   :  { %v34_v21 = vmax.f32 %v28_v11, %v16_v9  ;;  %v23_v23 = vld [vmem:[%s122_s0 + $0x30] sm:$0x3]  ;;  %v24_v24 = vld [vmem:[%s122_s0 + $0x32] sm:$0x3]  ;;  %v30_v25 = vmax.f32 %v20_v18, %v21_v19  ;;  %v25_v27 = vld [vmem:[%s122_s0 + $0x34] sm:$0x3] }
   0x7   :  { %v38_v26 = vmax.f32 %v32_v12, %v33_v16  ;;  %v31_v28 = vmax.f32 %v23_v23, %v24_v24  ;;  %v35_v29 = vmax.f32 %v29_v20, %v19_v17  ;;  %vm44_vm0 = vcmp.lt.s32.totalorder %v42_v13, 256 }
   0x8   :  { %v36_v30 = vmax.f32 %v30_v25, %v22_v22 }
   0x9   :  { %v40_v31 = vmax.f32 %v38_v26, %v34_v21  ;;  %v37_v32 = vmax.f32 %v31_v28, %v25_v27 }
   0xa   :  { %v39_v33 = vmax.f32 %v35_v29, %v36_v30 }
   0xb   :  { %46 = vst.msk [vmem:[%s123_s1] sm:$0x3] %vm44_vm0, %v40_v31 }
   0xc   :  { %v41_v34 = vmax.f32 %v39_v33, %v37_v32 }
   0xe   :  { %47 = vst.msk [vmem:[%s123_s1 + $0x2] sm:$0x3] %vm44_vm0, %v41_v34 }

// kernel: inception_forward.21
= control target key start
LH: loop header
LB: loop body
LE: loop exit
PB: predicated region body
PF: predicated region fallthrough
CT: control target
= control target key end

     0   :  { %s1367_s18 = smov 0   ;;  %s1369_s19 = smov 0   ;;  %s1508_s0 = inlined_call_operand.vmem [shape: bf16[8,1280], index: 0, kind: input, shape index: {}]   ;;  %s1509_s1 = inlined_call_operand.vmem [shape: bf16[1280,256], index: 1, kind: input, shape index: {}]   ;;  %s1510_s2 = inlined_call_operand.vmem [shape: f32[1,256], index: 2, kind: input, shape index: {}]   ;;  %s1511_s3 = inlined_call_operand.vmem [shape: f32[1,256], index: 3, kind: input, shape index: {}]   ;;  %s1512_s4 = inlined_call_operand.vmem [shape: f32[1,256], index: 4, kind: input, shape index: {}]   ;;  %s1513_s5 = inlined_call_operand.vmem [shape: f32[8,256], index: 5, kind: output, shape index: {}]  }
   0x1   :  { %s1371_s20 = smov 0  }
   0x2 LB: > { %s24_s21 = sadd.s32 1, %s1329_s19  ;;  %p1065_p0 = scmp.ge.s32.totalorder %s1333_s20, 1  ;;  %s1333_s20 = sphi %s1371_s20, %s15_s20   ;;  %s1329_s19 = sphi %s1369_s19, %s1515_s19   ;;  %s1325_s18 = sphi %s1367_s18, %s1514_s18  }
   0x3   : > { %p25_p1 = scmp.ge.s32.totalorder %s24_s21, 2  ;;  %p218_p2 = scmp.lt.s32.totalorder %s1333_s20, 3 }
   0x5   : > { %s1517_s21 = smov (%p25_p1, %s24_s21), 0  ;;  %p219_p3 = pnand %p1065_p0, %p218_p2 }
   0x6   : > { %s256_s22 = smul.u32 (!%p219_p3), 5, %s1325_s18  ;;  %p1069_p6 = scmp.ne.s32.totalorder (!%p219_p3), %s1325_s18, 0 }
   0x7   : > { %222 = sbr.rel (%p219_p3) target bundleno = 338 (0x152), region = 40 }
   0x8   : > { %s266_s23 = smul.u32 (!%p219_p3), 80, %s1325_s18  ;;  %p259_p4 = scmp.lt.s32.totalorder (!%p219_p3), %s256_s22, 9 }
   0xa   : > { %p267_p5 = scmp.lt.s32.totalorder (!%p219_p3), %s266_s23, 159 }
   0xc   : > { %s1519_s22 = smov (!%p259_p4, %s256_s22), 9  ;;  %s1521_s23 = smov (!%p267_p5, %s266_s23), 159 }
   0xd   : > { %s1066_s24 = sshll.u32 %s1519_s22, 2  ;;  %s1159_s28 = sshll.u32 %s1521_s23, 3 }
   0xe   : > { %s1392_s27 = scalar_lea.vmem %s1508_s0, %s1066_s24  ;;  %s1397_s6 = scalar_lea.vmem %s1509_s1, %s1159_s28 }
   0xf   : > { %282 = sbr.rel (%p1069_p6) target bundleno = 22 (0x16), region = 44 }
  0x14   : > { %v1335_v0 = vmov 0.0  }
  0x15   : > { %283 = vst [vmem:[#allocation2] sm:$0xff] %v1335_v0  ;;  %284 = vst [vmem:[#allocation2 + $0x8] sm:$0xff] %v1335_v0 }
  0x16 PF: > { %v1186_v1 = vld [vmem:[%s1397_s6 + $0x74] ss:$8 sps:$4 sm:$0xff]   ;;  %v1190_v3 = vld [vmem:[%s1397_s6 + $0x70] ss:$8 sps:$4 sm:$0xff]   ;;  %v1192_v5 = vld [vmem:[%s1397_s6 + $0x64] ss:$8 sps:$4 sm:$0xff]  }
  0x17   : > { %v1188_v2 = vld [vmem:[%s1397_s6 + $0x174] ss:$8 sps:$4 sm:$0xff]   ;;  %788 = vmatprep.subr.bf16.mxu0 %v1186_v1  ;;  %v1191_v4 = vld [vmem:[%s1397_s6 + $0x170] ss:$8 sps:$4 sm:$0xff]   ;;  %v1194_v6 = vld [vmem:[%s1397_s6 + $0x164] ss:$8 sps:$4 sm:$0xff]  }
  0x18   : > { %829 = vmatprep.subr.bf16.mxu1 %v1188_v2  ;;  %789 = vmatpush1.bf16.msra.mxu0 %v1190_v3  ;;  %v1196_v7 = vld [vmem:[%s1397_s6 + $0x60] ss:$8 sps:$4 sm:$0xff]   ;;  %v1198_v9 = vld [vmem:[%s1397_s6 + $0x54] ss:$8 sps:$4 sm:$0xff]   ;;  %v1202_v11 = vld [vmem:[%s1397_s6 + $0x50] ss:$8 sps:$4 sm:$0xff]  }
  0x19   : > { %830 = vmatpush1.bf16.msra.mxu1 %v1191_v4  ;;  %790 = vmatprep.subr.bf16.mxu0 %v1192_v5  ;;  %v1197_v8 = vld [vmem:[%s1397_s6 + $0x160] ss:$8 sps:$4 sm:$0xff]   ;;  %v1200_v10 = vld [vmem:[%s1397_s6 + $0x154] ss:$8 sps:$4 sm:$0xff]   ;;  %v1203_v12 = vld [vmem:[%s1397_s6 + $0x150] ss:$8 sps:$4 sm:$0xff]  }
  0x1a   : > { %831 = vmatprep.subr.bf16.mxu1 %v1194_v6  ;;  %v1204_v13 = vld [vmem:[%s1397_s6 + $0x44] ss:$8 sps:$4 sm:$0xff]   ;;  %v1208_v15 = vld [vmem:[%s1397_s6 + $0x40] ss:$8 sps:$4 sm:$0xff]   ;;  %v1210_v17 = vld [vmem:[%s1397_s6 + $0x34] ss:$8 sps:$4 sm:$0xff]  }
  0x1b   : > { %v1206_v14 = vld [vmem:[%s1397_s6 + $0x144] ss:$8 sps:$4 sm:$0xff]   ;;  %v1209_v16 = vld [vmem:[%s1397_s6 + $0x140] ss:$8 sps:$4 sm:$0xff]   ;;  %v1212_v18 = vld [vmem:[%s1397_s6 + $0x134] ss:$8 sps:$4 sm:$0xff]  }
  0x1c   : > { %791 = vmatpush1.bf16.msra.mxu0 %v1196_v7  ;;  %v1214_v19 = vld [vmem:[%s1397_s6 + $0x30] ss:$8 sps:$4 sm:$0xff]   ;;  %v1216_v21 = vld [vmem:[%s1397_s6 + $0x24] ss:$8 sps:$4 sm:$0xff]   ;;  %v1220_v23 = vld [vmem:[%s1397_s6 + $0x20] ss:$8 sps:$4 sm:$0xff]  }
  0x1d   : > { %832 = vmatpush1.bf16.msra.mxu1 %v1197_v8  ;;  %792 = vmatprep.subr.bf16.mxu0 %v1198_v9  ;;  %v1215_v20 = vld [vmem:[%s1397_s6 + $0x130] ss:$8 sps:$4 sm:$0xff]   ;;  %v1218_v22 = vld [vmem:[%s1397_s6 + $0x124] ss:$8 sps:$4 sm:$0xff]   ;;  %v1221_v24 = vld [vmem:[%s1397_s6 + $0x120] ss:$8 sps:$4 sm:$0xff]  }
  0x1e   : > { %833 = vmatprep.subr.bf16.mxu1 %v1200_v10  ;;  %v1222_v25 = vld [vmem:[%s1397_s6 + $0x14] ss:$8 sps:$4 sm:$0xff]   ;;  %v1226_v27 = vld [vmem:[%s1397_s6 + $0x10] ss:$8 sps:$4 sm:$0xff]   ;;  %v1228_v29 = vld [vmem:[%s1397_s6 + $0x4] ss:$8 sps:$4 sm:$0xff]  }
  0x1f   : > { %v1224_v26 = vld [vmem:[%s1397_s6 + $0x114] ss:$8 sps:$4 sm:$0xff]   ;;  %v1227_v28 = vld [vmem:[%s1397_s6 + $0x110] ss:$8 sps:$4 sm:$0xff]   ;;  %v1230_v30 = vld [vmem:[%s1397_s6 + $0x104] ss:$8 sps:$4 sm:$0xff]  }
  0x20   : > { %793 = vmatpush1.bf16.msra.mxu0 %v1202_v11  ;;  %v1232_v31 = vld [vmem:[%s1397_s6] ss:$8 sps:$4 sm:$0xff]   ;;  %v1234_v33 = vld [vmem:[%s1397_s6 + $0xf4] ss:$8 sps:$4 sm:$0xff]   ;;  %v1238_v35 = vld [vmem:[%s1397_s6 + $0xf0] ss:$8 sps:$4 sm:$0xff]  }
  0x21   : > { %834 = vmatpush1.bf16.msra.mxu1 %v1203_v12  ;;  %794 = vmatprep.subr.bf16.mxu0 %v1204_v13  ;;  %v1233_v32 = vld [vmem:[%s1397_s6 + $0x100] ss:$8 sps:$4 sm:$0xff]   ;;  %v1236_v34 = vld [vmem:[%s1397_s6 + $0x1f4] ss:$8 sps:$4 sm:$0xff]   ;;  %v1239_v36 = vld [vmem:[%s1397_s6 + $0x1f0] ss:$8 sps:$4 sm:$0xff]  }
  0x22   : > { %835 = vmatprep.subr.bf16.mxu1 %v1206_v14  ;;  %v1240_v37 = vld [vmem:[%s1397_s6 + $0xe4] ss:$8 sps:$4 sm:$0xff]   ;;  %v1244_v39 = vld [vmem:[%s1397_s6 + $0xe0] ss:$8 sps:$4 sm:$0xff]   ;;  %v1246_v41 = vld [vmem:[%s1397_s6 + $0xd4] ss:$8 sps:$4 sm:$0xff]  }
  0x23   : > { %v1242_v38 = vld [vmem:[%s1397_s6 + $0x1e4] ss:$8 sps:$4 sm:$0xff]   ;;  %v1245_v40 = vld [vmem:[%s1397_s6 + $0x1e0] ss:$8 sps:$4 sm:$0xff]   ;;  %v1248_v42 = vld [vmem:[%s1397_s6 + $0x1d4] ss:$8 sps:$4 sm:$0xff]  }
  0x24   : > { %795 = vmatpush1.bf16.msra.mxu0 %v1208_v15  ;;  %v1250_v43 = vld [vmem:[%s1397_s6 + $0xd0] ss:$8 sps:$4 sm:$0xff]   ;;  %v1252_v45 = vld [vmem:[%s1397_s6 + $0xc4] ss:$8 sps:$4 sm:$0xff]   ;;  %v1256_v50 = vld [vmem:[%s1397_s6 + $0xc0] ss:$8 sps:$4 sm:$0xff]  }
  0x25   : > { %836 = vmatpush1.bf16.msra.mxu1 %v1209_v16  ;;  %796 = vmatprep.subr.bf16.mxu0 %v1210_v17  ;;  %v1251_v44 = vld [vmem:[%s1397_s6 + $0x1d0] ss:$8 sps:$4 sm:$0xff]   ;;  %v1254_v46 = vld [vmem:[%s1397_s6 + $0x1c4] ss:$8 sps:$4 sm:$0xff]   ;;  %v1257_v51 = vld [vmem:[%s1397_s6 + $0x1c0] ss:$8 sps:$4 sm:$0xff]  }
  0x26   : > { %837 = vmatprep.subr.bf16.mxu1 %v1212_v18  ;;  %v287_v47 = vld [vmem:[%s1392_s27] sm:$0xff]  ;;  %v288_v49 = vld [vmem:[%s1392_s27 + $0x8] sm:$0xff]  ;;  %v1258_v53 = vld [vmem:[%s1397_s6 + $0xb4] ss:$8 sps:$4 sm:$0xff]   ;;  %v1336_v11 = vmov 0   ;;  %p1155_p7 = scmp.ne.s32.totalorder %s1325_s18, 1 }
  0x27   : > { %v1071_v48 = vcombine.high %v287_v47, %v287_v47  ;;  %v1073_v52 = vcombine.high %v288_v49, %v288_v49  ;;  %v1260_v54 = vld [vmem:[%s1397_s6 + $0x1b4] ss:$8 sps:$4 sm:$0xff]   ;;  %v1262_v55 = vld [vmem:[%s1397_s6 + $0xb0] ss:$8 sps:$4 sm:$0xff]   ;;  %v1264_v57 = vld [vmem:[%s1397_s6 + $0xa4] ss:$8 sps:$4 sm:$0xff]   ;;  %v1070_v6 = vcombine.low %v287_v47, %v287_v47  ;;  %v1072_v7 = vcombine.low %v288_v49, %v288_v49 }
  0x28   : > { %797 = vmatpush1.bf16.msra.mxu0 %v1214_v19  ;;  %v1263_v56 = vld [vmem:[%s1397_s6 + $0x1b0] ss:$8 sps:$4 sm:$0xff]   ;;  %v1266_v58 = vld [vmem:[%s1397_s6 + $0x1a4] ss:$8 sps:$4 sm:$0xff]   ;;  %v1268_v59 = vld [vmem:[%s1397_s6 + $0xa0] ss:$8 sps:$4 sm:$0xff]  }
  0x29   : > { %838 = vmatpush1.bf16.msra.mxu1 %v1215_v20  ;;  %798 = vmatprep.subr.bf16.mxu0 %v1216_v21  ;;  %v1269_v60 = vld [vmem:[%s1397_s6 + $0x1a0] ss:$8 sps:$4 sm:$0xff]   ;;  %v1270_v61 = vld [vmem:[%s1397_s6 + $0x94] ss:$8 sps:$4 sm:$0xff]   ;;  %v1274_v63 = vld [vmem:[%s1397_s6 + $0x90] ss:$8 sps:$4 sm:$0xff]  }
  0x2a   : > { %839 = vmatprep.subr.bf16.mxu1 %v1218_v22  ;;  %820 = vmatprep.mubr.bf16.mxu0 %v1071_v48  ;;  %v1272_v62 = vld [vmem:[%s1397_s6 + $0x194] ss:$8 sps:$4 sm:$0xff]   ;;  %v1275_v0 = vld [vmem:[%s1397_s6 + $0x190] ss:$8 sps:$4 sm:$0xff]   ;;  %v1276_v1 = vld [vmem:[%s1397_s6 + $0x84] ss:$8 sps:$4 sm:$0xff]  }
  0x2b   : > { %861 = vmatprep.mubr.bf16.mxu1 %v1073_v52  ;;  %v1278_v2 = vld [vmem:[%s1397_s6 + $0x184] ss:$8 sps:$4 sm:$0xff]   ;;  %v1280_v3 = vld [vmem:[%s1397_s6 + $0x80] ss:$8 sps:$4 sm:$0xff]   ;;  %v1288_v5 = vld [vmem:[%s1397_s6 + $0x274] ss:$8 sps:$4 sm:$0xff]  }
  0x2c   : > { %799 = vmatpush1.bf16.msra.mxu0 %v1220_v23  ;;  %v1281_v4 = vld [vmem:[%s1397_s6 + $0x180] ss:$8 sps:$4 sm:$0xff]   ;;  %v1286_v8 = vld [vmem:[%s1397_s6 + $0x270] ss:$8 sps:$4 sm:$0xff]   ;;  %v1291_v9 = vld [vmem:[%s1397_s6 + $0x264] ss:$8 sps:$4 sm:$0xff]  }
  0x2d   : > { %840 = vmatpush1.bf16.msra.mxu1 %v1221_v24  ;;  %800 = vmatprep.subr.bf16.mxu0 %v1222_v25  ;;  %v1289_v10 = vld [vmem:[%s1397_s6 + $0x260] ss:$8 sps:$4 sm:$0xff]   ;;  %v1294_v12 = vld [vmem:[%s1397_s6 + $0x254] ss:$8 sps:$4 sm:$0xff]   ;;  %v1292_v13 = vld [vmem:[%s1397_s6 + $0x250] ss:$8 sps:$4 sm:$0xff]  }
  0x2e   : > { %841 = vmatprep.subr.bf16.mxu1 %v1224_v26  ;;  %v1297_v14 = vld [vmem:[%s1397_s6 + $0x244] ss:$8 sps:$4 sm:$0xff]   ;;  %v1295_v15 = vld [vmem:[%s1397_s6 + $0x240] ss:$8 sps:$4 sm:$0xff]   ;;  %v1300_v16 = vld [vmem:[%s1397_s6 + $0x234] ss:$8 sps:$4 sm:$0xff]  }
  0x2f   : > { %v1298_v17 = vld [vmem:[%s1397_s6 + $0x230] ss:$8 sps:$4 sm:$0xff]   ;;  %v1303_v18 = vld [vmem:[%s1397_s6 + $0x224] ss:$8 sps:$4 sm:$0xff]   ;;  %v1301_v19 = vld [vmem:[%s1397_s6 + $0x220] ss:$8 sps:$4 sm:$0xff]  }
  0x30   : > { %801 = vmatpush1.bf16.msra.mxu0 %v1226_v27  ;;  %v1306_v20 = vld [vmem:[%s1397_s6 + $0x214] ss:$8 sps:$4 sm:$0xff]   ;;  %v1304_v21 = vld [vmem:[%s1397_s6 + $0x210] ss:$8 sps:$4 sm:$0xff]   ;;  %v1309_v22 = vld [vmem:[%s1397_s6 + $0x204] ss:$8 sps:$4 sm:$0xff]  }
  0x31   : > { %842 = vmatpush1.bf16.msra.mxu1 %v1227_v28  ;;  %802 = vmatprep.subr.bf16.mxu0 %v1228_v29  ;;  %v1307_v23 = vld [vmem:[%s1397_s6 + $0x200] ss:$8 sps:$4 sm:$0xff]   ;;  %v1310_v24 = vld [vmem:[%s1392_s27 + $0x10] ss:$0 sps:$4 sm:$0xff]  }
  0x32   : > { %843 = vmatprep.subr.bf16.mxu1 %v1230_v30 }
  0x34   : > { %803 = vmatpush1.bf16.msra.mxu0 %v1232_v31 }
  0x35   : > { %844 = vmatpush1.bf16.msra.mxu1 %v1233_v32  ;;  %804 = vmatprep.subr.bf16.mxu0 %v1234_v33 }
  0x36   : > { %845 = vmatprep.subr.bf16.mxu1 %v1236_v34  ;;  %v285_v34 = vld [vmem:[#allocation2] sm:$0xff] }
  0x38   : > { %805 = vmatpush2.bf16.msra.mxu0 %v1238_v35 }
  0x39   : > { %846 = vmatpush2.bf16.msra.mxu1 %v1239_v36  ;;  %806 = vmatprep.subr.bf16.mxu0 %v1240_v37 }
  0x3a   : > { %847 = vmatprep.subr.bf16.mxu1 %v1242_v38  ;;  %v286_v38 = vld [vmem:[#allocation2 + $0x8] sm:$0xff] }
  0x3c   : > { %807 = vmatpush2.bf16.msra.mxu0 %v1244_v39 }
  0x3d   : > { %848 = vmatpush2.bf16.msra.mxu1 %v1245_v40  ;;  %808 = vmatprep.subr.bf16.mxu0 %v1246_v41 }
  0x3e   : > { %849 = vmatprep.subr.bf16.mxu1 %v1248_v42 }
  0x40   : > { %809 = vmatpush2.bf16.msra.mxu0 %v1250_v43 }
  0x41   : > { %850 = vmatpush2.bf16.msra.mxu1 %v1251_v44  ;;  %810 = vmatprep.subr.bf16.mxu0 %v1252_v45 }
  0x42   : > { %851 = vmatprep.subr.bf16.mxu1 %v1254_v46 }
  0x44   : > { %811 = vmatpush2.bf16.msra.mxu0 %v1256_v50 }
  0x45   : > { %852 = vmatpush2.bf16.msra.mxu1 %v1257_v51  ;;  %812 = vmatprep.subr.bf16.mxu0 %v1258_v53 }
  0x46   : > { %853 = vmatprep.subr.bf16.mxu1 %v1260_v54 }
  0x48   : > { %813 = vmatpush2.bf16.msra.mxu0 %v1262_v55 }
  0x49   : > { %854 = vmatpush2.bf16.msra.mxu1 %v1263_v56  ;;  %814 = vmatprep.subr.bf16.mxu0 %v1264_v57 }
  0x4a   : > { %855 = vmatprep.subr.bf16.mxu1 %v1266_v58 }
  0x4c   : > { %815 = vmatpush2.bf16.msra.mxu0 %v1268_v59 }
  0x4d   : > { %856 = vmatpush2.bf16.msra.mxu1 %v1269_v60  ;;  %816 = vmatprep.subr.bf16.mxu0 %v1270_v61 }
  0x4e   : > { %857 = vmatprep.subr.bf16.mxu1 %v1272_v62 }
  0x50   : > { %817 = vmatpush2.bf16.msra.mxu0 %v1274_v63 }
  0x51   : > { %858 = vmatpush2.bf16.msra.mxu1 %v1275_v0  ;;  %818 = vmatprep.subr.bf16.mxu0 %v1276_v1 }
  0x52   : > { %859 = vmatprep.subr.bf16.mxu1 %v1278_v2 }
  0x54   : > { %819 = vmatpush2.bf16.msra.mxu0 %v1280_v3 }
  0x55   : > { %860 = vmatpush2.bf16.msra.mxu1 %v1281_v4  ;;  %870 = vmatprep.subr.bf16.mxu0 %v1288_v5 }
  0x57   : > { %821 = vmatmul.mubr.bf16.vlgmr.msra.gmra.mxu0 %v1070_v6 }
  0x58   : > { %862 = vmatmul.mubr.bf16.vlgmr.msra.gmra.mxu1 %v1072_v7  ;;  %871 = vmatpush1.bf16.msra.mxu0 %v1286_v8 }
  0x59   : > { %902 = vmatprep.mubr.bf16.mxu0 %v1336_v11  ;;  %872 = vmatprep.subr.bf16.mxu0 %v1291_v9 }
  0x5c   : > { %873 = vmatpush1.bf16.msra.mxu0 %v1289_v10 }
  0x5d   : > { %874 = vmatprep.subr.bf16.mxu0 %v1294_v12 }
  0x60   : > { %875 = vmatpush1.bf16.msra.mxu0 %v1292_v13 }
  0x61   : > { %876 = vmatprep.subr.bf16.mxu0 %v1297_v14 }
  0x64   : > { %877 = vmatpush1.bf16.msra.mxu0 %v1295_v15 }
  0x65   : > { %878 = vmatprep.subr.bf16.mxu0 %v1300_v16 }
  0x68   : > { %879 = vmatpush1.bf16.msra.mxu0 %v1298_v17 }
  0x69   : > { %880 = vmatprep.subr.bf16.mxu0 %v1303_v18 }
  0x6c   : > { %881 = vmatpush1.bf16.msra.mxu0 %v1301_v19 }
  0x6d   : > { %882 = vmatprep.subr.bf16.mxu0 %v1306_v20 }
  0x70   : > { %883 = vmatpush1.bf16.msra.mxu0 %v1304_v21 }
  0x71   : > { %884 = vmatprep.subr.bf16.mxu0 %v1309_v22 }
  0x74   : > { %885 = vmatpush1.bf16.msra.mxu0 %v1307_v23 }
  0x77   : > { %903 = vmatmul.mubr.bf16.vlgmr.msra.gmra.mxu0 %v1310_v24 }
 0x117   : > { %v822_v25 = vpop.f32.mrf.mxu0 }
 0x118   : > { %v863_v26 = vpop.f32.mrf.mxu1 }
 0x119   : > { %v824_v27 = vpop.f32.mrf.mxu0  ;;  %v864_v33 = vadd.f32 %v863_v26, %v822_v25 }
 0x11a   : > { %v865_v28 = vpop.f32.mrf.mxu1 }
 0x11b   : > { %v826_v29 = vpop.f32.mrf.mxu0  ;;  %v866_v36 = vadd.f32 %v865_v28, %v824_v27 }
 0x11c   : > { %v867_v30 = vpop.f32.mrf.mxu1 }
 0x11d   : > { %v827_v31 = vpop.f32.mrf.mxu0 }
 0x11e   : > { %v868_v32 = vpop.f32.mrf.mxu1 }
 0x137   : > { %v904_v35 = vpop.f32.mrf.mxu0 }
 0x138   : > { %v905_v37 = vadd.f32 %v904_v35, %v864_v33 }
 0x139   : > { %v906_v39 = vpop.f32.mrf.mxu0 }
 0x13a   : > { %v911_v40 = vadd.f32 %v905_v37, %v285_v34  ;;  %v907_v41 = vadd.f32 %v906_v39, %v866_v36  ;;  %918 = sbr.rel (%p1155_p7) target bundleno = 338 (0x152), region = 48 }
 0x13b   : > { %v908_v42 = vpop.f32.mrf.mxu0 }
 0x13c   : > { %913 = vst [vmem:[#allocation2] sm:$0xff] %v911_v40  ;;  %v912_v43 = vadd.f32 %v907_v41, %v286_v38 }
 0x13d   : > { %v909_v44 = vpop.f32.mrf.mxu0 }
 0x13e   : > { %914 = vst [vmem:[#allocation2 + $0x8] sm:$0xff] %v912_v43 }
 0x13f   : > { %v923_v45 = vlaneseq  ;;  %v949_v46 = vld [vmem:[%s1512_s4] sm:$0x3] }
 0x140   : > { %v921_v48 = vld [vmem:[%s1510_s2] sm:$0x3]  ;;  %v965_v51 = vsub.f32 1.0, %v949_v46 }
 0x141   : > { %v924_v47 = vshrl.u32 %v923_v45, 7  ;;  %v935_v49 = vld [vmem:[%s1511_s3] sm:$0x3] }
 0x143   : > { %v925_v50 = vsub.s32 0, %v924_v47  ;;  %v929_v52 = vsub.s32 1, %v924_v47  ;;  %v919_v53 = vld [vmem:[#allocation2] sm:$0xff] }
 0x145   : > { %v926_v54 = vrot.slane %v921_v48, %v925_v50  ;;  %v940_v55 = vrot.slane %v935_v49, %v925_v50  ;;  %v920_v56 = vld [vmem:[#allocation2 + $0x8] sm:$0xff]  ;;  %v930_v57 = vrot.slane %v921_v48, %v929_v52  ;;  %v944_v58 = vrot.slane %v935_v49, %v929_v52 }
 0x146   : > { %v970_v60 = vrot.slane %v965_v51, %v925_v50  ;;  %v974_v62 = vrot.slane %v965_v51, %v929_v52  ;;  %v956_v0 = vrot.slane %v949_v46, %v925_v50  ;;  %v960_v2 = vrot.slane %v949_v46, %v929_v52 }
 0x147   : > { %v933_v59 = vmul.f32 %v926_v54, %v919_v53  ;;  %v934_v61 = vmul.f32 %v930_v57, %v920_v56 }
 0x149   : > { %v947_v63 = vadd.f32 %v940_v55, %v933_v59  ;;  %v948_v1 = vadd.f32 %v944_v58, %v934_v61 }
 0x14b   : > { %v950_v3 = vmax.f32 %v947_v63, 0.0  ;;  %v977_v4 = vmul.f32 %v970_v60, %v947_v63  ;;  %v951_v5 = vmax.f32 %v948_v1, 0.0  ;;  %v978_v6 = vmul.f32 %v974_v62, %v948_v1 }
 0x14d   : > { %v963_v7 = vmul.f32 %v956_v0, %v950_v3  ;;  %v964_v8 = vmul.f32 %v960_v2, %v951_v5 }
 0x14f   : > { %v979_v9 = vadd.f32 %v977_v4, %v963_v7  ;;  %v980_v10 = vadd.f32 %v978_v6, %v964_v8 }
 0x151   : > { %981 = vst [vmem:[%s1513_s5] sm:$0xff] %v979_v9  ;;  %982 = vst [vmem:[%s1513_s5 + $0x8] sm:$0xff] %v980_v10 }
 0x152 PF: > { %s15_s20 = sadd.s32 1, %s1333_s20   ;;  %s1514_s18 = smov %s1329_s19 }
 0x153   : > { %p12_p8 = scmp.ge.s32.totalorder %s15_s20, 4   ;;  %s1515_s19 = smov %s1517_s21 }
 0x155   :  { %14 = sbr.rel (!%p12_p8) target bundleno = 2 (0x2), region = 81 }

// kernel: inception_forward.24
= control target key start
LH: loop header
LB: loop body
LE: loop exit
PB: predicated region body
PF: predicated region fallthrough
CT: control target
= control target key end

     0   :  { %v42_v13 = vlaneseq  ;;  %s122_s0 = inlined_call_operand.vmem [shape: f32[2,4,4,1,512], index: 0, kind: input, shape index: {}]   ;;  %s123_s1 = inlined_call_operand.vmem [shape: f32[2,1,1,1,512], index: 1, kind: output, shape index: {}]  }
   0x1   :  { %v8_v0 = vld [vmem:[%s122_s0] sm:$0xf]  ;;  %v9_v1 = vld [vmem:[%s122_s0 + $0x4] sm:$0xf]  ;;  %v10_v2 = vld [vmem:[%s122_s0 + $0x8] sm:$0xf] }
   0x2   :  { %v11_v3 = vld [vmem:[%s122_s0 + $0x10] sm:$0xf]  ;;  %v12_v4 = vld [vmem:[%s122_s0 + $0x14] sm:$0xf]  ;;  %v13_v5 = vld [vmem:[%s122_s0 + $0x18] sm:$0xf]  ;;  %v26_v6 = vmax.f32 %v8_v0, %v9_v1 }
   0x3   :  { %v14_v7 = vld [vmem:[%s122_s0 + $0x20] sm:$0xf]  ;;  %v15_v8 = vld [vmem:[%s122_s0 + $0x24] sm:$0xf]  ;;  %v16_v9 = vld [vmem:[%s122_s0 + $0x28] sm:$0xf]  ;;  %v27_v10 = vmax.f32 %v11_v3, %v12_v4 }
   0x4   :  { %v28_v11 = vmax.f32 %v14_v7, %v15_v8  ;;  %v32_v12 = vmax.f32 %v26_v6, %v10_v2  ;;  %v17_v14 = vld [vmem:[%s122_s0 + $0x40] sm:$0xf]  ;;  %v18_v15 = vld [vmem:[%s122_s0 + $0x44] sm:$0xf]  ;;  %v19_v17 = vld [vmem:[%s122_s0 + $0x48] sm:$0xf] }
   0x5   :  { %v33_v16 = vmax.f32 %v27_v10, %v13_v5  ;;  %v20_v18 = vld [vmem:[%s122_s0 + $0x50] sm:$0xf]  ;;  %v21_v19 = vld [vmem:[%s122_s0 + $0x54] sm:$0xf]  ;;  %v29_v20 = vmax.f32 %v17_v14, %v18_v15  ;;  %v22_v22 = vld [vmem:[%s122_s0 + $0x58] sm:$0xf] }
   0x6   :  { %v34_v21 = vmax.f32 %v28_v11, %v16_v9  ;;  %v23_v23 = vld [vmem:[%s122_s0 + $0x60] sm:$0xf]  ;;  %v24_v24 = vld [vmem:[%s122_s0 + $0x64] sm:$0xf]  ;;  %v30_v25 = vmax.f32 %v20_v18, %v21_v19  ;;  %v25_v27 = vld [vmem:[%s122_s0 + $0x68] sm:$0xf] }
   0x7   :  { %v38_v26 = vmax.f32 %v32_v12, %v33_v16  ;;  %v31_v28 = vmax.f32 %v23_v23, %v24_v24  ;;  %v35_v29 = vmax.f32 %v29_v20, %v19_v17  ;;  %vm44_vm0 = vcmp.lt.s32.totalorder %v42_v13, 512 }
   0x8   :  { %v36_v30 = vmax.f32 %v30_v25, %v22_v22 }
   0x9   :  { %v40_v31 = vmax.f32 %v38_v26, %v34_v21  ;;  %v37_v32 = vmax.f32 %v31_v28, %v25_v27 }
   0xa   :  { %v39_v33 = vmax.f32 %v35_v29, %v36_v30 }
   0xb   :  { %46 = vst.msk [vmem:[%s123_s1] sm:$0xf] %vm44_vm0, %v40_v31 }
   0xc   :  { %v41_v34 = vmax.f32 %v39_v33, %v37_v32 }
   0xe   :  { %47 = vst.msk [vmem:[%s123_s1 + $0x4] sm:$0xf] %vm44_vm0, %v41_v34 }

// kernel: inception_forward.23
= control target key start
LH: loop header
LB: loop body
LE: loop exit
PB: predicated region body
PF: predicated region fallthrough
CT: control target
= control target key end

     0   :  { %s2614_s18 = smov 0   ;;  %s2616_s19 = smov 0   ;;  %s2919_s0 = inlined_call_operand.vmem [shape: bf16[2,2304], index: 0, kind: input, shape index: {}]   ;;  %s2920_s1 = inlined_call_operand.vmem [shape: bf16[2304,512], index: 1, kind: input, shape index: {}]   ;;  %s2921_s2 = inlined_call_operand.vmem [shape: f32[1,512], index: 2, kind: input, shape index: {}]   ;;  %s2922_s3 = inlined_call_operand.vmem [shape: f32[1,512], index: 3, kind: input, shape index: {}]   ;;  %s2923_s4 = inlined_call_operand.vmem [shape: f32[1,512], index: 4, kind: input, shape index: {}]   ;;  %s2924_s5 = inlined_call_operand.vmem [shape: f32[2,512], index: 5, kind: output, shape index: {}]  }
   0x1   :  { %s2618_s20 = smov 0  }
   0x2 LB: > { %s24_s21 = sadd.s32 1, %s2575_s19  ;;  %p2040_p0 = scmp.ge.s32.totalorder %s2579_s20, 1  ;;  %s2579_s20 = sphi %s2618_s20, %s15_s20   ;;  %s2575_s19 = sphi %s2616_s19, %s2926_s19   ;;  %s2571_s18 = sphi %s2614_s18, %s2925_s18  }
   0x3   : > { %p25_p1 = scmp.ge.s32.totalorder %s24_s21, 3  ;;  %p217_p2 = scmp.lt.s32.totalorder %s2579_s20, 4 }
   0x5   : > { %s2928_s21 = smov (%p25_p1, %s24_s21), 0  ;;  %p218_p3 = pnand %p2040_p0, %p217_p2 }
   0x6   : > { %s254_s22 = smul.u32 (!%p218_p3), 6, %s2571_s18  ;;  %p2043_p6 = scmp.ne.s32.totalorder (!%p218_p3), %s2571_s18, 0 }
   0x7   : > { %221 = sbr.rel (%p218_p3) target bundleno = 456 (0x1c8), region = 40 }
   0x8   : > { %s263_s23 = smul.u32 (!%p218_p3), 96, %s2571_s18  ;;  %p257_p4 = scmp.lt.s32.totalorder (!%p218_p3), %s254_s22, 17 }
   0xa   : > { %p264_p5 = scmp.lt.s32.totalorder (!%p218_p3), %s263_s23, 287 }
   0xc   : > { %s2930_s22 = smov (!%p257_p4, %s254_s22), 17  ;;  %s2932_s23 = smov (!%p264_p5, %s263_s23), 287 }
   0xd   : > { %s261_s26 = scalar_lea.vmem %s2919_s0, %s2930_s22  ;;  %s2240_s27 = sshll.u32 %s2932_s23, 4 }
   0xe   : > { %s2645_s30 = scalar_lea.vmem %s2920_s1, %s2240_s27  ;;  %278 = sbr.rel (%p2043_p6) target bundleno = 21 (0x15), region = 44 }
  0x13   : > { %v2581_v0 = vmov 0.0  }
  0x14   : > { %279 = vst [vmem:[#allocation2] sm:$0xff] %v2581_v0 }
  0x15 PF: > { %v2268_v1 = vld [vmem:[%s2645_s30 + $0xe4] ss:$16 sps:$4 sm:$0xff]   ;;  %v2272_v3 = vld [vmem:[%s2645_s30 + $0xe0] ss:$16 sps:$4 sm:$0xff]   ;;  %v2582_v37 = vmov 1966171168   ;;  %v479_v39 = vlaneseq }
  0x16   : > { %v2270_v2 = vld [vmem:[%s2645_s30 + $0x2e4] ss:$16 sps:$4 sm:$0xff]   ;;  %1488 = vmatprep.subr.bf16.mxu0 %v2268_v1  ;;  %v2273_v4 = vld [vmem:[%s2645_s30 + $0x2e0] ss:$16 sps:$4 sm:$0xff]   ;;  %v477_v38 = vunpack.c.l.s4 %v2582_v37  ;;  %p2236_p7 = scmp.ne.s32.totalorder %s2571_s18, 2 }
  0x17   : > { %1529 = vmatprep.subr.bf16.mxu1 %v2270_v2  ;;  %v2274_v5 = vld [vmem:[%s2645_s30 + $0xc4] ss:$16 sps:$4 sm:$0xff]   ;;  %1489 = vmatpush1.bf16.msra.mxu0 %v2272_v3  ;;  %v2278_v7 = vld [vmem:[%s2645_s30 + $0xc0] ss:$16 sps:$4 sm:$0xff]   ;;  %v2687_v44 = vshrl.u32 %v479_v39, 7 }
  0x18   : > { %1530 = vmatpush1.bf16.msra.mxu1 %v2273_v4  ;;  %v2276_v6 = vld [vmem:[%s2645_s30 + $0x2c4] ss:$16 sps:$4 sm:$0xff]   ;;  %1490 = vmatprep.subr.bf16.mxu0 %v2274_v5  ;;  %v2279_v8 = vld [vmem:[%s2645_s30 + $0x2c0] ss:$16 sps:$4 sm:$0xff]   ;;  %v478_v43 = vunpack.c.0.s8 %v477_v38  ;;  %v2391_v38 = vld [vmem:[%s2645_s30 + $0x68] ss:$16 sps:$4 sm:$0xff]  }
  0x19   : > { %1531 = vmatprep.subr.bf16.mxu1 %v2276_v6  ;;  %v2280_v9 = vld [vmem:[%s2645_s30 + $0xa4] ss:$16 sps:$4 sm:$0xff]   ;;  %v2284_v11 = vld [vmem:[%s2645_s30 + $0xa0] ss:$16 sps:$4 sm:$0xff]  }
  0x1a   : > { %v2282_v10 = vld [vmem:[%s2645_s30 + $0x2a4] ss:$16 sps:$4 sm:$0xff]   ;;  %v2285_v12 = vld [vmem:[%s2645_s30 + $0x2a0] ss:$16 sps:$4 sm:$0xff]   ;;  %v2695_v50 = vsub.s32 %v478_v43, %v2687_v44 }
  0x1b   : > { %1491 = vmatpush1.bf16.msra.mxu0 %v2278_v7  ;;  %v2286_v13 = vld [vmem:[%s2645_s30 + $0x84] ss:$16 sps:$4 sm:$0xff]   ;;  %v2290_v15 = vld [vmem:[%s2645_s30 + $0x80] ss:$16 sps:$4 sm:$0xff]  }
  0x1c   : > { %1532 = vmatpush1.bf16.msra.mxu1 %v2279_v8  ;;  %1492 = vmatprep.subr.bf16.mxu0 %v2280_v9  ;;  %v2288_v14 = vld [vmem:[%s2645_s30 + $0x284] ss:$16 sps:$4 sm:$0xff]   ;;  %v2291_v16 = vld [vmem:[%s2645_s30 + $0x280] ss:$16 sps:$4 sm:$0xff]  }
  0x1d   : > { %1533 = vmatprep.subr.bf16.mxu1 %v2282_v10  ;;  %v2292_v17 = vld [vmem:[%s2645_s30 + $0x64] ss:$16 sps:$4 sm:$0xff]   ;;  %v2296_v19 = vld [vmem:[%s2645_s30 + $0x60] ss:$16 sps:$4 sm:$0xff]  }
  0x1e   : > { %v2294_v18 = vld [vmem:[%s2645_s30 + $0x264] ss:$16 sps:$4 sm:$0xff]   ;;  %v2297_v20 = vld [vmem:[%s2645_s30 + $0x260] ss:$16 sps:$4 sm:$0xff]  }
  0x1f   : > { %1493 = vmatpush1.bf16.msra.mxu0 %v2284_v11  ;;  %v2298_v21 = vld [vmem:[%s2645_s30 + $0x44] ss:$16 sps:$4 sm:$0xff]   ;;  %v2302_v23 = vld [vmem:[%s2645_s30 + $0x40] ss:$16 sps:$4 sm:$0xff]  }
  0x20   : > { %1534 = vmatpush1.bf16.msra.mxu1 %v2285_v12  ;;  %1494 = vmatprep.subr.bf16.mxu0 %v2286_v13  ;;  %v2300_v22 = vld [vmem:[%s2645_s30 + $0x244] ss:$16 sps:$4 sm:$0xff]   ;;  %v2303_v24 = vld [vmem:[%s2645_s30 + $0x240] ss:$16 sps:$4 sm:$0xff]  }
  0x21   : > { %1535 = vmatprep.subr.bf16.mxu1 %v2288_v14  ;;  %v2304_v25 = vld [vmem:[%s2645_s30 + $0x24] ss:$16 sps:$4 sm:$0xff]   ;;  %v2308_v27 = vld [vmem:[%s2645_s30 + $0x20] ss:$16 sps:$4 sm:$0xff]  }
  0x22   : > { %v2306_v26 = vld [vmem:[%s2645_s30 + $0x224] ss:$16 sps:$4 sm:$0xff]   ;;  %v2309_v28 = vld [vmem:[%s2645_s30 + $0x220] ss:$16 sps:$4 sm:$0xff]  }
  0x23   : > { %1495 = vmatpush1.bf16.msra.mxu0 %v2290_v15  ;;  %v2310_v29 = vld [vmem:[%s2645_s30 + $0x4] ss:$16 sps:$4 sm:$0xff]   ;;  %v2314_v31 = vld [vmem:[%s2645_s30] ss:$16 sps:$4 sm:$0xff]  }
  0x24   : > { %1536 = vmatpush1.bf16.msra.mxu1 %v2291_v16  ;;  %1496 = vmatprep.subr.bf16.mxu0 %v2292_v17  ;;  %v2312_v30 = vld [vmem:[%s2645_s30 + $0x204] ss:$16 sps:$4 sm:$0xff]   ;;  %v2315_v32 = vld [vmem:[%s2645_s30 + $0x200] ss:$16 sps:$4 sm:$0xff]   ;;  %v2369_v17 = vld [vmem:[%s2645_s30 + $0xec] ss:$16 sps:$4 sm:$0xff]  }
  0x25   : > { %1537 = vmatprep.subr.bf16.mxu1 %v2294_v18  ;;  %v2316_v33 = vld [vmem:[%s2645_s30 + $0x1e4] ss:$16 sps:$4 sm:$0xff]   ;;  %v2320_v35 = vld [vmem:[%s2645_s30 + $0x1e0] ss:$16 sps:$4 sm:$0xff]  }
  0x26   : > { %v2318_v34 = vld [vmem:[%s2645_s30 + $0x3e4] ss:$16 sps:$4 sm:$0xff]   ;;  %v2321_v36 = vld [vmem:[%s2645_s30 + $0x3e0] ss:$16 sps:$4 sm:$0xff]  }
  0x27   : > { %1497 = vmatpush1.bf16.msra.mxu0 %v2296_v19  ;;  %v2322_v40 = vld [vmem:[%s2645_s30 + $0x1c4] ss:$16 sps:$4 sm:$0xff]   ;;  %v2326_v42 = vld [vmem:[%s2645_s30 + $0x1c0] ss:$16 sps:$4 sm:$0xff]  }
  0x28   : > { %1538 = vmatpush1.bf16.msra.mxu1 %v2297_v20  ;;  %1498 = vmatprep.subr.bf16.mxu0 %v2298_v21  ;;  %v2324_v41 = vld [vmem:[%s2645_s30 + $0x3c4] ss:$16 sps:$4 sm:$0xff]   ;;  %v2327_v45 = vld [vmem:[%s2645_s30 + $0x3c0] ss:$16 sps:$4 sm:$0xff]   ;;  %v2367_v21 = vld [vmem:[%s2645_s30 + $0xe8] ss:$16 sps:$4 sm:$0xff]  }
  0x29   : > { %1539 = vmatprep.subr.bf16.mxu1 %v2300_v22  ;;  %v2328_v46 = vld [vmem:[%s2645_s30 + $0x1a4] ss:$16 sps:$4 sm:$0xff]   ;;  %v2332_v48 = vld [vmem:[%s2645_s30 + $0x1a0] ss:$16 sps:$4 sm:$0xff]  }
  0x2a   : > { %v2330_v47 = vld [vmem:[%s2645_s30 + $0x3a4] ss:$16 sps:$4 sm:$0xff]   ;;  %v2333_v49 = vld [vmem:[%s2645_s30 + $0x3a0] ss:$16 sps:$4 sm:$0xff]  }
  0x2b   : > { %1499 = vmatpush1.bf16.msra.mxu0 %v2302_v23  ;;  %v2334_v51 = vld [vmem:[%s2645_s30 + $0x184] ss:$16 sps:$4 sm:$0xff]   ;;  %v2338_v54 = vld [vmem:[%s2645_s30 + $0x180] ss:$16 sps:$4 sm:$0xff]   ;;  %v2375_v23 = vld [vmem:[%s2645_s30 + $0xcc] ss:$16 sps:$4 sm:$0xff]  }
  0x2c   : > { %1540 = vmatpush1.bf16.msra.mxu1 %v2303_v24  ;;  %1500 = vmatprep.subr.bf16.mxu0 %v2304_v25  ;;  %v2336_v52 = vld [vmem:[%s2645_s30 + $0x384] ss:$16 sps:$4 sm:$0xff]   ;;  %v2339_v57 = vld [vmem:[%s2645_s30 + $0x380] ss:$16 sps:$4 sm:$0xff]  }
  0x2d   : > { %1541 = vmatprep.subr.bf16.mxu1 %v2306_v26  ;;  %v281_v53 = vld [vmem:[%s261_s26] sm:$0x3f]  ;;  %v2373_v26 = vld [vmem:[%s2645_s30 + $0xc8] ss:$16 sps:$4 sm:$0xff]  }
  0x2e   : > { %v482_v55 = vrot.slane %v281_v53, %v2695_v50  ;;  %v475_v56 = vcombine.high %v281_v53, %v281_v53  ;;  %v2340_v58 = vld [vmem:[%s2645_s30 + $0x164] ss:$16 sps:$4 sm:$0xff]   ;;  %v2344_v62 = vld [vmem:[%s2645_s30 + $0x160] ss:$16 sps:$4 sm:$0xff]   ;;  %v2417_v53 = vld [vmem:[%s2645_s30 + $0x1ec] ss:$16 sps:$4 sm:$0xff]  }
  0x2f   : > { %1501 = vmatpush1.bf16.msra.mxu0 %v2308_v27  ;;  %v2342_v59 = vld [vmem:[%s2645_s30 + $0x364] ss:$16 sps:$4 sm:$0xff]   ;;  %v2345_v1 = vld [vmem:[%s2645_s30 + $0x360] ss:$16 sps:$4 sm:$0xff]  }
  0x30   : > { %1542 = vmatpush1.bf16.msra.mxu1 %v2309_v28  ;;  %1502 = vmatprep.subr.bf16.mxu0 %v2310_v29  ;;  %v490_v60 = vcombine.high %v482_v55, %v482_v55  ;;  %v489_v61 = vrot.slane %v475_v56, %v2695_v50  ;;  %v2346_v2 = vld [vmem:[%s2645_s30 + $0x144] ss:$16 sps:$4 sm:$0xff]   ;;  %v2350_v5 = vld [vmem:[%s2645_s30 + $0x140] ss:$16 sps:$4 sm:$0xff]   ;;  %v2731_v14 = vrot.slane %v482_v55, %v2695_v50  ;;  %v2381_v28 = vld [vmem:[%s2645_s30 + $0xac] ss:$16 sps:$4 sm:$0xff]  }
  0x31   : > { %1543 = vmatprep.subr.bf16.mxu1 %v2312_v30  ;;  %v2348_v3 = vld [vmem:[%s2645_s30 + $0x344] ss:$16 sps:$4 sm:$0xff]   ;;  %v2351_v6 = vld [vmem:[%s2645_s30 + $0x340] ss:$16 sps:$4 sm:$0xff]   ;;  %v2379_v30 = vld [vmem:[%s2645_s30 + $0xa8] ss:$16 sps:$4 sm:$0xff]  }
  0x32   : > { %v512_v63 = vrot.slane %v490_v60, %v2695_v50  ;;  %v2713_v0 = vrot.slane %v489_v61, %v2695_v50  ;;  %v2352_v7 = vld [vmem:[%s2645_s30 + $0x124] ss:$16 sps:$4 sm:$0xff]   ;;  %v2356_v9 = vld [vmem:[%s2645_s30 + $0x120] ss:$16 sps:$4 sm:$0xff]   ;;  %v491_v18 = vcombine.high %v489_v61, %v489_v61  ;;  %v2738_v19 = vcombine.high %v2731_v14, %v2731_v14  ;;  %v2415_v55 = vld [vmem:[%s2645_s30 + $0x1e8] ss:$16 sps:$4 sm:$0xff]  }
  0x33   : > { %1503 = vmatpush1.bf16.msra.mxu0 %v2314_v31  ;;  %v2354_v8 = vld [vmem:[%s2645_s30 + $0x324] ss:$16 sps:$4 sm:$0xff]   ;;  %v2357_v10 = vld [vmem:[%s2645_s30 + $0x320] ss:$16 sps:$4 sm:$0xff]   ;;  %v2429_v61 = vld [vmem:[%s2645_s30 + $0x1ac] ss:$16 sps:$4 sm:$0xff]  }
  0x34   : > { %1544 = vmatpush1.bf16.msra.mxu1 %v2315_v32  ;;  %1504 = vmatprep.subr.bf16.mxu0 %v2316_v33  ;;  %v2718_v4 = vcombine.high %v512_v63, %v512_v63  ;;  %v2358_v11 = vld [vmem:[%s2645_s30 + $0x104] ss:$16 sps:$4 sm:$0xff]   ;;  %v2362_v13 = vld [vmem:[%s2645_s30 + $0x100] ss:$16 sps:$4 sm:$0xff]   ;;  %v2745_v24 = vrot.slane %v491_v18, %v2695_v50  ;;  %v2387_v32 = vld [vmem:[%s2645_s30 + $0x8c] ss:$16 sps:$4 sm:$0xff]  }
  0x35   : > { %1545 = vmatprep.subr.bf16.mxu1 %v2318_v34  ;;  %1520 = vmatprep.mubr.bf16.mxu0 %v512_v63  ;;  %v2360_v12 = vld [vmem:[%s2645_s30 + $0x304] ss:$16 sps:$4 sm:$0xff]   ;;  %v2363_v15 = vld [vmem:[%s2645_s30 + $0x300] ss:$16 sps:$4 sm:$0xff]   ;;  %v2385_v34 = vld [vmem:[%s2645_s30 + $0x88] ss:$16 sps:$4 sm:$0xff]  }
  0x36   : > { %1561 = vmatprep.mubr.bf16.mxu1 %v2718_v4  ;;  %v2366_v16 = vld [vmem:[%s2645_s30 + $0x4e4] ss:$16 sps:$4 sm:$0xff]   ;;  %v2364_v20 = vld [vmem:[%s2645_s30 + $0x4e0] ss:$16 sps:$4 sm:$0xff]   ;;  %v2451_v18 = vld [vmem:[%s2645_s30 + $0x128] ss:$16 sps:$4 sm:$0xff]  }
  0x37   : > { %1505 = vmatpush2.bf16.msra.mxu0 %v2320_v35  ;;  %v2372_v22 = vld [vmem:[%s2645_s30 + $0x4c4] ss:$16 sps:$4 sm:$0xff]   ;;  %v2370_v25 = vld [vmem:[%s2645_s30 + $0x4c0] ss:$16 sps:$4 sm:$0xff]  }
  0x38   : > { %1546 = vmatpush2.bf16.msra.mxu1 %v2321_v36  ;;  %1506 = vmatprep.subr.bf16.mxu0 %v2322_v40  ;;  %v2378_v27 = vld [vmem:[%s2645_s30 + $0x4a4] ss:$16 sps:$4 sm:$0xff]   ;;  %v2376_v29 = vld [vmem:[%s2645_s30 + $0x4a0] ss:$16 sps:$4 sm:$0xff]   ;;  %v2393_v36 = vld [vmem:[%s2645_s30 + $0x6c] ss:$16 sps:$4 sm:$0xff]  }
  0x39   : > { %1547 = vmatprep.subr.bf16.mxu1 %v2324_v41  ;;  %v2384_v31 = vld [vmem:[%s2645_s30 + $0x484] ss:$16 sps:$4 sm:$0xff]   ;;  %v2382_v33 = vld [vmem:[%s2645_s30 + $0x480] ss:$16 sps:$4 sm:$0xff]   ;;  %v2399_v40 = vld [vmem:[%s2645_s30 + $0x4c] ss:$16 sps:$4 sm:$0xff]  }
  0x3a   : > { %v2390_v35 = vld [vmem:[%s2645_s30 + $0x464] ss:$16 sps:$4 sm:$0xff]   ;;  %v2388_v37 = vld [vmem:[%s2645_s30 + $0x460] ss:$16 sps:$4 sm:$0xff]  }
  0x3b   : > { %1507 = vmatpush2.bf16.msra.mxu0 %v2326_v42  ;;  %v2396_v39 = vld [vmem:[%s2645_s30 + $0x444] ss:$16 sps:$4 sm:$0xff]   ;;  %v2394_v41 = vld [vmem:[%s2645_s30 + $0x440] ss:$16 sps:$4 sm:$0xff]   ;;  %v2397_v42 = vld [vmem:[%s2645_s30 + $0x48] ss:$16 sps:$4 sm:$0xff]  }
  0x3c   : > { %1548 = vmatpush2.bf16.msra.mxu1 %v2327_v45  ;;  %1508 = vmatprep.subr.bf16.mxu0 %v2328_v46  ;;  %v2402_v43 = vld [vmem:[%s2645_s30 + $0x424] ss:$16 sps:$4 sm:$0xff]   ;;  %v2405_v45 = vld [vmem:[%s2645_s30 + $0x2c] ss:$16 sps:$4 sm:$0xff]   ;;  %v2400_v46 = vld [vmem:[%s2645_s30 + $0x420] ss:$16 sps:$4 sm:$0xff]  }
  0x3d   : > { %1549 = vmatprep.subr.bf16.mxu1 %v2330_v47  ;;  %v2403_v47 = vld [vmem:[%s2645_s30 + $0x28] ss:$16 sps:$4 sm:$0xff]   ;;  %v2406_v50 = vld [vmem:[%s2645_s30 + $0x400] ss:$16 sps:$4 sm:$0xff]   ;;  %v2420_v56 = vld [vmem:[%s2645_s30 + $0x5c4] ss:$16 sps:$4 sm:$0xff]  }
  0x3e   : > { %v2426_v60 = vld [vmem:[%s2645_s30 + $0x5a4] ss:$16 sps:$4 sm:$0xff]  }
  0x3f   : > { %1509 = vmatpush2.bf16.msra.mxu0 %v2332_v48  ;;  %v2408_v48 = vld [vmem:[%s2645_s30 + $0x404] ss:$16 sps:$4 sm:$0xff]  }
  0x40   : > { %1550 = vmatpush2.bf16.msra.mxu1 %v2333_v49  ;;  %1510 = vmatprep.subr.bf16.mxu0 %v2334_v51  ;;  %v2411_v49 = vld [vmem:[%s2645_s30 + $0xc] ss:$16 sps:$4 sm:$0xff]   ;;  %v2409_v51 = vld [vmem:[%s2645_s30 + $0x8] ss:$16 sps:$4 sm:$0xff]  }
  0x41   : > { %1551 = vmatprep.subr.bf16.mxu1 %v2336_v52  ;;  %v2414_v52 = vld [vmem:[%s2645_s30 + $0x5e4] ss:$16 sps:$4 sm:$0xff]  }
  0x43   : > { %1511 = vmatpush2.bf16.msra.mxu0 %v2338_v54  ;;  %v2412_v54 = vld [vmem:[%s2645_s30 + $0x5e0] ss:$16 sps:$4 sm:$0xff]  }
  0x44   : > { %1552 = vmatpush2.bf16.msra.mxu1 %v2339_v57  ;;  %1512 = vmatprep.subr.bf16.mxu0 %v2340_v58  ;;  %v2423_v57 = vld [vmem:[%s2645_s30 + $0x1cc] ss:$16 sps:$4 sm:$0xff]   ;;  %v2418_v58 = vld [vmem:[%s2645_s30 + $0x5c0] ss:$16 sps:$4 sm:$0xff]  }
  0x45   : > { %1553 = vmatprep.subr.bf16.mxu1 %v2342_v59  ;;  %v2421_v59 = vld [vmem:[%s2645_s30 + $0x1c8] ss:$16 sps:$4 sm:$0xff]  }
  0x47   : > { %1513 = vmatpush2.bf16.msra.mxu0 %v2344_v62  ;;  %v2424_v62 = vld [vmem:[%s2645_s30 + $0x5a0] ss:$16 sps:$4 sm:$0xff]  }
  0x48   : > { %1554 = vmatpush2.bf16.msra.mxu1 %v2345_v1  ;;  %1514 = vmatprep.subr.bf16.mxu0 %v2346_v2  ;;  %v2432_v1 = vld [vmem:[%s2645_s30 + $0x584] ss:$16 sps:$4 sm:$0xff]   ;;  %v2435_v2 = vld [vmem:[%s2645_s30 + $0x18c] ss:$16 sps:$4 sm:$0xff]  }
  0x49   : > { %1555 = vmatprep.subr.bf16.mxu1 %v2348_v3  ;;  %v2430_v3 = vld [vmem:[%s2645_s30 + $0x580] ss:$16 sps:$4 sm:$0xff]  }
  0x4b   : > { %1515 = vmatpush2.bf16.msra.mxu0 %v2350_v5  ;;  %v2433_v5 = vld [vmem:[%s2645_s30 + $0x188] ss:$16 sps:$4 sm:$0xff]  }
  0x4c   : > { %1556 = vmatpush2.bf16.msra.mxu1 %v2351_v6  ;;  %1516 = vmatprep.subr.bf16.mxu0 %v2352_v7  ;;  %v2438_v6 = vld [vmem:[%s2645_s30 + $0x564] ss:$16 sps:$4 sm:$0xff]   ;;  %v2441_v7 = vld [vmem:[%s2645_s30 + $0x16c] ss:$16 sps:$4 sm:$0xff]  }
  0x4d   : > { %1557 = vmatprep.subr.bf16.mxu1 %v2354_v8  ;;  %v2436_v8 = vld [vmem:[%s2645_s30 + $0x560] ss:$16 sps:$4 sm:$0xff]  }
  0x4f   : > { %1517 = vmatpush2.bf16.msra.mxu0 %v2356_v9  ;;  %v2439_v9 = vld [vmem:[%s2645_s30 + $0x168] ss:$16 sps:$4 sm:$0xff]  }
  0x50   : > { %1558 = vmatpush2.bf16.msra.mxu1 %v2357_v10  ;;  %1518 = vmatprep.subr.bf16.mxu0 %v2358_v11  ;;  %v2444_v10 = vld [vmem:[%s2645_s30 + $0x544] ss:$16 sps:$4 sm:$0xff]   ;;  %v2447_v11 = vld [vmem:[%s2645_s30 + $0x14c] ss:$16 sps:$4 sm:$0xff]  }
  0x51   : > { %1559 = vmatprep.subr.bf16.mxu1 %v2360_v12  ;;  %v2442_v12 = vld [vmem:[%s2645_s30 + $0x540] ss:$16 sps:$4 sm:$0xff]  }
  0x53   : > { %1519 = vmatpush2.bf16.msra.mxu0 %v2362_v13  ;;  %v2445_v13 = vld [vmem:[%s2645_s30 + $0x148] ss:$16 sps:$4 sm:$0xff]  }
  0x54   : > { %1560 = vmatpush2.bf16.msra.mxu1 %v2363_v15  ;;  %1570 = vmatprep.subr.bf16.mxu0 %v2366_v16  ;;  %v2450_v15 = vld [vmem:[%s2645_s30 + $0x524] ss:$16 sps:$4 sm:$0xff]   ;;  %v2453_v16 = vld [vmem:[%s2645_s30 + $0x12c] ss:$16 sps:$4 sm:$0xff]  }
  0x55   : > { %1611 = vmatprep.subr.bf16.mxu1 %v2369_v17  ;;  %v2448_v17 = vld [vmem:[%s2645_s30 + $0x520] ss:$16 sps:$4 sm:$0xff]  }
  0x56   : > { %1521 = vmatmul.mubr.bf16.vlgmr.msra.gmra.mxu0 %v2731_v14 }
  0x57   : > { %1562 = vmatmul.mubr.bf16.vlgmr.msra.gmra.mxu1 %v2738_v19  ;;  %1571 = vmatpush1.bf16.msra.mxu0 %v2364_v20  ;;  %v2456_v20 = vld [vmem:[%s2645_s30 + $0x504] ss:$16 sps:$4 sm:$0xff]  }
  0x58   : > { %1612 = vmatpush1.bf16.msra.mxu1 %v2367_v21  ;;  %1572 = vmatprep.subr.bf16.mxu0 %v2372_v22  ;;  %v2459_v21 = vld [vmem:[%s2645_s30 + $0x10c] ss:$16 sps:$4 sm:$0xff]   ;;  %v2454_v22 = vld [vmem:[%s2645_s30 + $0x500] ss:$16 sps:$4 sm:$0xff]  }
  0x59   : > { %1613 = vmatprep.subr.bf16.mxu1 %v2375_v23  ;;  %1602 = vmatprep.mubr.bf16.mxu0 %v2745_v24  ;;  %v2457_v23 = vld [vmem:[%s2645_s30 + $0x108] ss:$16 sps:$4 sm:$0xff]  }
  0x5a   : > { %1643 = vmatprep.mubr.bf16.mxu1 %v512_v63  ;;  %v2427_v63 = vld [vmem:[%s2645_s30 + $0x1a8] ss:$16 sps:$4 sm:$0xff]  }
  0x5b   : > { %1573 = vmatpush1.bf16.msra.mxu0 %v2370_v25  ;;  %v2463_v25 = vld [vmem:[%s2645_s30 + $0x2ec] ss:$16 sps:$4 sm:$0xff]  }
  0x5c   : > { %1614 = vmatpush1.bf16.msra.mxu1 %v2373_v26  ;;  %1574 = vmatprep.subr.bf16.mxu0 %v2378_v27  ;;  %v2466_v26 = vld [vmem:[%s2645_s30 + $0x4ec] ss:$16 sps:$4 sm:$0xff]   ;;  %v2461_v27 = vld [vmem:[%s2645_s30 + $0x2e8] ss:$16 sps:$4 sm:$0xff]  }
  0x5d   : > { %1615 = vmatprep.subr.bf16.mxu1 %v2381_v28  ;;  %v2464_v28 = vld [vmem:[%s2645_s30 + $0x4e8] ss:$16 sps:$4 sm:$0xff]  }
  0x5f   : > { %1575 = vmatpush1.bf16.msra.mxu0 %v2376_v29  ;;  %v2469_v29 = vld [vmem:[%s2645_s30 + $0x2cc] ss:$16 sps:$4 sm:$0xff]  }
  0x60   : > { %1616 = vmatpush1.bf16.msra.mxu1 %v2379_v30  ;;  %1576 = vmatprep.subr.bf16.mxu0 %v2384_v31  ;;  %v2472_v30 = vld [vmem:[%s2645_s30 + $0x4cc] ss:$16 sps:$4 sm:$0xff]   ;;  %v2467_v31 = vld [vmem:[%s2645_s30 + $0x2c8] ss:$16 sps:$4 sm:$0xff]  }
  0x61   : > { %1617 = vmatprep.subr.bf16.mxu1 %v2387_v32  ;;  %v2470_v32 = vld [vmem:[%s2645_s30 + $0x4c8] ss:$16 sps:$4 sm:$0xff]  }
  0x63   : > { %1577 = vmatpush1.bf16.msra.mxu0 %v2382_v33  ;;  %v2475_v33 = vld [vmem:[%s2645_s30 + $0x2ac] ss:$16 sps:$4 sm:$0xff]  }
  0x64   : > { %1618 = vmatpush1.bf16.msra.mxu1 %v2385_v34  ;;  %1578 = vmatprep.subr.bf16.mxu0 %v2390_v35  ;;  %v2478_v34 = vld [vmem:[%s2645_s30 + $0x4ac] ss:$16 sps:$4 sm:$0xff]   ;;  %v2476_v35 = vld [vmem:[%s2645_s30 + $0x4a8] ss:$16 sps:$4 sm:$0xff]  }
  0x65   : > { %1619 = vmatprep.subr.bf16.mxu1 %v2393_v36  ;;  %v2481_v36 = vld [vmem:[%s2645_s30 + $0x28c] ss:$16 sps:$4 sm:$0xff]  }
  0x67   : > { %1579 = vmatpush1.bf16.msra.mxu0 %v2388_v37  ;;  %v2484_v37 = vld [vmem:[%s2645_s30 + $0x48c] ss:$16 sps:$4 sm:$0xff]  }
  0x68   : > { %1620 = vmatpush1.bf16.msra.mxu1 %v2391_v38  ;;  %1580 = vmatprep.subr.bf16.mxu0 %v2396_v39  ;;  %v2479_v38 = vld [vmem:[%s2645_s30 + $0x288] ss:$16 sps:$4 sm:$0xff]   ;;  %v2490_v39 = vld [vmem:[%s2645_s30 + $0x46c] ss:$16 sps:$4 sm:$0xff]  }
  0x69   : > { %1621 = vmatprep.subr.bf16.mxu1 %v2399_v40  ;;  %v2485_v40 = vld [vmem:[%s2645_s30 + $0x268] ss:$16 sps:$4 sm:$0xff]  }
  0x6b   : > { %1581 = vmatpush1.bf16.msra.mxu0 %v2394_v41  ;;  %v2488_v41 = vld [vmem:[%s2645_s30 + $0x468] ss:$16 sps:$4 sm:$0xff]  }
  0x6c   : > { %1622 = vmatpush1.bf16.msra.mxu1 %v2397_v42  ;;  %1582 = vmatprep.subr.bf16.mxu0 %v2402_v43  ;;  %v2493_v42 = vld [vmem:[%s2645_s30 + $0x24c] ss:$16 sps:$4 sm:$0xff]  }
  0x6d   : > { %1623 = vmatprep.subr.bf16.mxu1 %v2405_v45  ;;  %v2496_v43 = vld [vmem:[%s2645_s30 + $0x44c] ss:$16 sps:$4 sm:$0xff]   ;;  %v2491_v45 = vld [vmem:[%s2645_s30 + $0x248] ss:$16 sps:$4 sm:$0xff]  }
  0x6f   : > { %1583 = vmatpush1.bf16.msra.mxu0 %v2400_v46  ;;  %v2494_v46 = vld [vmem:[%s2645_s30 + $0x448] ss:$16 sps:$4 sm:$0xff]  }
  0x70   : > { %1624 = vmatpush1.bf16.msra.mxu1 %v2403_v47  ;;  %1584 = vmatprep.subr.bf16.mxu0 %v2408_v48  ;;  %v2499_v47 = vld [vmem:[%s2645_s30 + $0x22c] ss:$16 sps:$4 sm:$0xff]  }
  0x71   : > { %1625 = vmatprep.subr.bf16.mxu1 %v2411_v49  ;;  %v2502_v48 = vld [vmem:[%s2645_s30 + $0x42c] ss:$16 sps:$4 sm:$0xff]   ;;  %v2497_v49 = vld [vmem:[%s2645_s30 + $0x228] ss:$16 sps:$4 sm:$0xff]  }
  0x73   : > { %1585 = vmatpush1.bf16.msra.mxu0 %v2406_v50  ;;  %v2500_v50 = vld [vmem:[%s2645_s30 + $0x428] ss:$16 sps:$4 sm:$0xff]  }
  0x74   : > { %1626 = vmatpush1.bf16.msra.mxu1 %v2409_v51  ;;  %1586 = vmatprep.subr.bf16.mxu0 %v2414_v52  ;;  %v2505_v51 = vld [vmem:[%s2645_s30 + $0x20c] ss:$16 sps:$4 sm:$0xff]  }
  0x75   : > { %1627 = vmatprep.subr.bf16.mxu1 %v2417_v53  ;;  %v2508_v52 = vld [vmem:[%s2645_s30 + $0x40c] ss:$16 sps:$4 sm:$0xff]   ;;  %v2503_v53 = vld [vmem:[%s2645_s30 + $0x208] ss:$16 sps:$4 sm:$0xff]  }
  0x77   : > { %1587 = vmatpush2.bf16.msra.mxu0 %v2412_v54  ;;  %v2506_v54 = vld [vmem:[%s2645_s30 + $0x408] ss:$16 sps:$4 sm:$0xff]  }
  0x78   : > { %1628 = vmatpush2.bf16.msra.mxu1 %v2415_v55  ;;  %1588 = vmatprep.subr.bf16.mxu0 %v2420_v56  ;;  %v2511_v55 = vld [vmem:[%s2645_s30 + $0x3ec] ss:$16 sps:$4 sm:$0xff]  }
  0x79   : > { %1629 = vmatprep.subr.bf16.mxu1 %v2423_v57  ;;  %v2514_v56 = vld [vmem:[%s2645_s30 + $0x5ec] ss:$16 sps:$4 sm:$0xff]   ;;  %v2509_v57 = vld [vmem:[%s2645_s30 + $0x3e8] ss:$16 sps:$4 sm:$0xff]  }
  0x7b   : > { %1589 = vmatpush2.bf16.msra.mxu0 %v2418_v58  ;;  %v2512_v58 = vld [vmem:[%s2645_s30 + $0x5e8] ss:$16 sps:$4 sm:$0xff]  }
  0x7c   : > { %1630 = vmatpush2.bf16.msra.mxu1 %v2421_v59  ;;  %1590 = vmatprep.subr.bf16.mxu0 %v2426_v60  ;;  %v2517_v59 = vld [vmem:[%s2645_s30 + $0x3cc] ss:$16 sps:$4 sm:$0xff]  }
  0x7d   : > { %1631 = vmatprep.subr.bf16.mxu1 %v2429_v61  ;;  %v2520_v60 = vld [vmem:[%s2645_s30 + $0x5cc] ss:$16 sps:$4 sm:$0xff]   ;;  %v2515_v61 = vld [vmem:[%s2645_s30 + $0x3c8] ss:$16 sps:$4 sm:$0xff]  }
  0x7f   : > { %1591 = vmatpush2.bf16.msra.mxu0 %v2424_v62  ;;  %v2518_v62 = vld [vmem:[%s2645_s30 + $0x5c8] ss:$16 sps:$4 sm:$0xff]  }
  0x80   : > { %1632 = vmatpush2.bf16.msra.mxu1 %v2427_v63  ;;  %1592 = vmatprep.subr.bf16.mxu0 %v2432_v1  ;;  %v2523_v63 = vld [vmem:[%s2645_s30 + $0x3ac] ss:$16 sps:$4 sm:$0xff]  }
  0x81   : > { %1633 = vmatprep.subr.bf16.mxu1 %v2435_v2  ;;  %v2526_v1 = vld [vmem:[%s2645_s30 + $0x5ac] ss:$16 sps:$4 sm:$0xff]   ;;  %v2521_v2 = vld [vmem:[%s2645_s30 + $0x3a8] ss:$16 sps:$4 sm:$0xff]  }
  0x83   : > { %1593 = vmatpush2.bf16.msra.mxu0 %v2430_v3  ;;  %v2524_v3 = vld [vmem:[%s2645_s30 + $0x5a8] ss:$16 sps:$4 sm:$0xff]  }
  0x84   : > { %1634 = vmatpush2.bf16.msra.mxu1 %v2433_v5  ;;  %1594 = vmatprep.subr.bf16.mxu0 %v2438_v6  ;;  %v2529_v5 = vld [vmem:[%s2645_s30 + $0x38c] ss:$16 sps:$4 sm:$0xff]  }
  0x85   : > { %1635 = vmatprep.subr.bf16.mxu1 %v2441_v7  ;;  %v2532_v6 = vld [vmem:[%s2645_s30 + $0x58c] ss:$16 sps:$4 sm:$0xff]   ;;  %v2527_v7 = vld [vmem:[%s2645_s30 + $0x388] ss:$16 sps:$4 sm:$0xff]  }
  0x87   : > { %1595 = vmatpush2.bf16.msra.mxu0 %v2436_v8  ;;  %v2530_v8 = vld [vmem:[%s2645_s30 + $0x588] ss:$16 sps:$4 sm:$0xff]  }
  0x88   : > { %1636 = vmatpush2.bf16.msra.mxu1 %v2439_v9  ;;  %1596 = vmatprep.subr.bf16.mxu0 %v2444_v10  ;;  %v2535_v9 = vld [vmem:[%s2645_s30 + $0x36c] ss:$16 sps:$4 sm:$0xff]  }
  0x89   : > { %1637 = vmatprep.subr.bf16.mxu1 %v2447_v11  ;;  %v2538_v10 = vld [vmem:[%s2645_s30 + $0x56c] ss:$16 sps:$4 sm:$0xff]   ;;  %v2533_v11 = vld [vmem:[%s2645_s30 + $0x368] ss:$16 sps:$4 sm:$0xff]  }
  0x8b   : > { %1597 = vmatpush2.bf16.msra.mxu0 %v2442_v12  ;;  %v2536_v12 = vld [vmem:[%s2645_s30 + $0x568] ss:$16 sps:$4 sm:$0xff]  }
  0x8c   : > { %1638 = vmatpush2.bf16.msra.mxu1 %v2445_v13  ;;  %1598 = vmatprep.subr.bf16.mxu0 %v2450_v15  ;;  %v2541_v13 = vld [vmem:[%s2645_s30 + $0x34c] ss:$16 sps:$4 sm:$0xff]  }
  0x8d   : > { %1639 = vmatprep.subr.bf16.mxu1 %v2453_v16  ;;  %v2544_v15 = vld [vmem:[%s2645_s30 + $0x54c] ss:$16 sps:$4 sm:$0xff]   ;;  %v2539_v16 = vld [vmem:[%s2645_s30 + $0x348] ss:$16 sps:$4 sm:$0xff]  }
  0x8f   : > { %1599 = vmatpush2.bf16.msra.mxu0 %v2448_v17  ;;  %v2542_v17 = vld [vmem:[%s2645_s30 + $0x548] ss:$16 sps:$4 sm:$0xff]  }
  0x90   : > { %1640 = vmatpush2.bf16.msra.mxu1 %v2451_v18  ;;  %1600 = vmatprep.subr.bf16.mxu0 %v2456_v20  ;;  %v2547_v18 = vld [vmem:[%s2645_s30 + $0x32c] ss:$16 sps:$4 sm:$0xff]  }
  0x91   : > { %1641 = vmatprep.subr.bf16.mxu1 %v2459_v21  ;;  %v2550_v20 = vld [vmem:[%s2645_s30 + $0x52c] ss:$16 sps:$4 sm:$0xff]   ;;  %v2545_v21 = vld [vmem:[%s2645_s30 + $0x328] ss:$16 sps:$4 sm:$0xff]  }
  0x93   : > { %1601 = vmatpush2.bf16.msra.mxu0 %v2454_v22  ;;  %v2548_v22 = vld [vmem:[%s2645_s30 + $0x528] ss:$16 sps:$4 sm:$0xff]  }
  0x94   : > { %1642 = vmatpush2.bf16.msra.mxu1 %v2457_v23  ;;  %1652 = vmatprep.subr.bf16.mxu0 %v2463_v25  ;;  %v2553_v23 = vld [vmem:[%s2645_s30 + $0x30c] ss:$16 sps:$4 sm:$0xff]  }
  0x95   : > { %1693 = vmatprep.subr.bf16.mxu1 %v2466_v26  ;;  %v2556_v25 = vld [vmem:[%s2645_s30 + $0x50c] ss:$16 sps:$4 sm:$0xff]   ;;  %v2551_v26 = vld [vmem:[%s2645_s30 + $0x308] ss:$16 sps:$4 sm:$0xff]  }
  0x96   : > { %1603 = vmatmul.mubr.bf16.vlgmr.msra.gmra.mxu0 %v2713_v0 }
  0x97   : > { %1644 = vmatmul.mubr.bf16.vlgmr.msra.gmra.mxu1 %v2731_v14  ;;  %1653 = vmatpush1.bf16.msra.mxu0 %v2461_v27  ;;  %v2473_v14 = vld [vmem:[%s2645_s30 + $0x2a8] ss:$16 sps:$4 sm:$0xff]  }
  0x98   : > { %1694 = vmatpush1.bf16.msra.mxu1 %v2464_v28  ;;  %1654 = vmatprep.subr.bf16.mxu0 %v2469_v29  ;;  %v2554_v27 = vld [vmem:[%s2645_s30 + $0x508] ss:$16 sps:$4 sm:$0xff]  }
  0x99   : > { %1695 = vmatprep.subr.bf16.mxu1 %v2472_v30  ;;  %1684 = vmatprep.mubr.bf16.mxu0 %v2718_v4  ;;  %v2482_v4 = vld [vmem:[%s2645_s30 + $0x488] ss:$16 sps:$4 sm:$0xff]  }
  0x9a   : > { %1725 = vmatprep.mubr.bf16.mxu1 %v2745_v24  ;;  %v2487_v24 = vld [vmem:[%s2645_s30 + $0x26c] ss:$16 sps:$4 sm:$0xff]  }
  0x9b   : > { %1655 = vmatpush1.bf16.msra.mxu0 %v2467_v31 }
  0x9c   : > { %1696 = vmatpush1.bf16.msra.mxu1 %v2470_v32  ;;  %1656 = vmatprep.subr.bf16.mxu0 %v2475_v33 }
  0x9d   : > { %1697 = vmatprep.subr.bf16.mxu1 %v2478_v34 }
  0x9f   : > { %1657 = vmatpush1.bf16.msra.mxu0 %v2473_v14 }
  0xa0   : > { %1698 = vmatpush1.bf16.msra.mxu1 %v2476_v35  ;;  %1658 = vmatprep.subr.bf16.mxu0 %v2481_v36 }
  0xa1   : > { %1699 = vmatprep.subr.bf16.mxu1 %v2484_v37 }
  0xa3   : > { %1659 = vmatpush1.bf16.msra.mxu0 %v2479_v38 }
  0xa4   : > { %1700 = vmatpush1.bf16.msra.mxu1 %v2482_v4  ;;  %1660 = vmatprep.subr.bf16.mxu0 %v2487_v24 }
  0xa5   : > { %1701 = vmatprep.subr.bf16.mxu1 %v2490_v39 }
  0xa7   : > { %1661 = vmatpush1.bf16.msra.mxu0 %v2485_v40 }
  0xa8   : > { %1702 = vmatpush1.bf16.msra.mxu1 %v2488_v41  ;;  %1662 = vmatprep.subr.bf16.mxu0 %v2493_v42 }
  0xa9   : > { %1703 = vmatprep.subr.bf16.mxu1 %v2496_v43 }
  0xab   : > { %1663 = vmatpush1.bf16.msra.mxu0 %v2491_v45  ;;  %v2583_v45 = vmov 1983009808  }
  0xac   : > { %1704 = vmatpush1.bf16.msra.mxu1 %v2494_v46  ;;  %1664 = vmatprep.subr.bf16.mxu0 %v2499_v47  ;;  %v1741_v46 = vunpack.c.l.s4 %v2583_v45 }
  0xad   : > { %1705 = vmatprep.subr.bf16.mxu1 %v2502_v48 }
  0xaf   : > { %1665 = vmatpush1.bf16.msra.mxu0 %v2497_v49  ;;  %v1742_v49 = vunpack.c.0.s8 %v1741_v46 }
  0xb0   : > { %1706 = vmatpush1.bf16.msra.mxu1 %v2500_v50  ;;  %1666 = vmatprep.subr.bf16.mxu0 %v2505_v51 }
  0xb1   : > { %1707 = vmatprep.subr.bf16.mxu1 %v2508_v52 }
  0xb3   : > { %1667 = vmatpush1.bf16.msra.mxu0 %v2503_v53 }
  0xb4   : > { %1708 = vmatpush1.bf16.msra.mxu1 %v2506_v54  ;;  %1668 = vmatprep.subr.bf16.mxu0 %v2511_v55 }
  0xb5   : > { %1709 = vmatprep.subr.bf16.mxu1 %v2514_v56  ;;  %v2879_v56 = vsub.s32 %v1742_v49, %v2687_v44 }
  0xb7   : > { %1669 = vmatpush2.bf16.msra.mxu0 %v2509_v57 }
  0xb8   : > { %1710 = vmatpush2.bf16.msra.mxu1 %v2512_v58  ;;  %1670 = vmatprep.subr.bf16.mxu0 %v2517_v59 }
  0xb9   : > { %1711 = vmatprep.subr.bf16.mxu1 %v2520_v60 }
  0xbb   : > { %1671 = vmatpush2.bf16.msra.mxu0 %v2515_v61 }
  0xbc   : > { %1712 = vmatpush2.bf16.msra.mxu1 %v2518_v62  ;;  %1672 = vmatprep.subr.bf16.mxu0 %v2523_v63 }
  0xbd   : > { %1713 = vmatprep.subr.bf16.mxu1 %v2526_v1  ;;  %v280_v1 = vld [vmem:[#allocation2] sm:$0xff] }
  0xbf   : > { %1673 = vmatpush2.bf16.msra.mxu0 %v2521_v2 }
  0xc0   : > { %1714 = vmatpush2.bf16.msra.mxu1 %v2524_v3  ;;  %1674 = vmatprep.subr.bf16.mxu0 %v2529_v5 }
  0xc1   : > { %1715 = vmatprep.subr.bf16.mxu1 %v2532_v6 }
  0xc3   : > { %1675 = vmatpush2.bf16.msra.mxu0 %v2527_v7 }
  0xc4   : > { %1716 = vmatpush2.bf16.msra.mxu1 %v2530_v8  ;;  %1676 = vmatprep.subr.bf16.mxu0 %v2535_v9 }
  0xc5   : > { %1717 = vmatprep.subr.bf16.mxu1 %v2538_v10 }
  0xc7   : > { %1677 = vmatpush2.bf16.msra.mxu0 %v2533_v11 }
  0xc8   : > { %1718 = vmatpush2.bf16.msra.mxu1 %v2536_v12  ;;  %1678 = vmatprep.subr.bf16.mxu0 %v2541_v13 }
  0xc9   : > { %1719 = vmatprep.subr.bf16.mxu1 %v2544_v15 }
  0xcb   : > { %1679 = vmatpush2.bf16.msra.mxu0 %v2539_v16 }
  0xcc   : > { %1720 = vmatpush2.bf16.msra.mxu1 %v2542_v17  ;;  %1680 = vmatprep.subr.bf16.mxu0 %v2547_v18 }
  0xcd   : > { %1721 = vmatprep.subr.bf16.mxu1 %v2550_v20 }
  0xcf   : > { %1681 = vmatpush2.bf16.msra.mxu0 %v2545_v21 }
  0xd0   : > { %1722 = vmatpush2.bf16.msra.mxu1 %v2548_v22  ;;  %1682 = vmatprep.subr.bf16.mxu0 %v2553_v23 }
  0xd1   : > { %1723 = vmatprep.subr.bf16.mxu1 %v2556_v25 }
  0xd3   : > { %1683 = vmatpush2.bf16.msra.mxu0 %v2551_v26 }
  0xd4   : > { %1724 = vmatpush2.bf16.msra.mxu1 %v2554_v27 }
  0xd6   : > { %1685 = vmatmul.mubr.bf16.vlgmr.msra.gmra.mxu0 %v2738_v19 }
  0xd7   : > { %1726 = vmatmul.mubr.bf16.vlgmr.msra.gmra.mxu1 %v2713_v0 }
 0x116   : > { %v1522_v28 = vpop.f32.mrf.mxu0 }
 0x117   : > { %v1563_v29 = vpop.f32.mrf.mxu1 }
 0x118   : > { %v1564_v30 = vadd.f32 %v1563_v29, %v1522_v28  ;;  %v1524_v31 = vpop.f32.mrf.mxu0 }
 0x119   : > { %v1565_v32 = vpop.f32.mrf.mxu1 }
 0x11a   : > { %v1566_v33 = vadd.f32 %v1565_v32, %v1524_v31  ;;  %v1526_v34 = vpop.f32.mrf.mxu0 }
 0x11b   : > { %v1567_v14 = vpop.f32.mrf.mxu1 }
 0x11c   : > { %v1527_v35 = vpop.f32.mrf.mxu0 }
 0x11d   : > { %v1568_v36 = vpop.f32.mrf.mxu1 }
 0x156   : > { %v1604_v37 = vpop.f32.mrf.mxu0 }
 0x157   : > { %v1645_v38 = vpop.f32.mrf.mxu1  ;;  %v1605_v4 = vadd.f32 %v1604_v37, %v1564_v30 }
 0x158   : > { %v1606_v24 = vpop.f32.mrf.mxu0 }
 0x159   : > { %v1647_v39 = vpop.f32.mrf.mxu1  ;;  %v1607_v40 = vadd.f32 %v1606_v24, %v1566_v33 }
 0x15a   : > { %v1608_v41 = vpop.f32.mrf.mxu0 }
 0x15b   : > { %v1649_v19 = vpop.f32.mrf.mxu1  ;;  %v1738_v42 = vcombine.low %v1605_v4, %v1607_v40 }
 0x15c   : > { %v1609_v0 = vpop.f32.mrf.mxu0 }
 0x15d   : > { %v1650_v43 = vpop.f32.mrf.mxu1  ;;  %v1746_v62 = vrot.slane %v1738_v42, %v2879_v56 }
 0x196   : > { %v1686_v47 = vpop.f32.mrf.mxu0 }
 0x197   : > { %v1727_v48 = vpop.f32.mrf.mxu1  ;;  %v1687_v50 = vadd.f32 %v1686_v47, %v1645_v38 }
 0x198   : > { %v1688_v51 = vpop.f32.mrf.mxu0 }
 0x199   : > { %v1729_v52 = vpop.f32.mrf.mxu1  ;;  %v1689_v53 = vadd.f32 %v1688_v51, %v1647_v39  ;;  %v1728_v57 = vadd.f32 %v1727_v48, %v1687_v50 }
 0x19a   : > { %v1690_v54 = vpop.f32.mrf.mxu0 }
 0x19b   : > { %v1731_v55 = vpop.f32.mrf.mxu1  ;;  %v1730_v58 = vadd.f32 %v1729_v52, %v1689_v53 }
 0x19c   : > { %v1691_v59 = vpop.f32.mrf.mxu0 }
 0x19d   : > { %v1732_v60 = vpop.f32.mrf.mxu1  ;;  %v1739_v61 = vcombine.low %v1728_v57, %v1730_v58 }
 0x19f   : > { %v1753_v63 = vrot.slane %v1739_v61, %v2879_v56 }
 0x1a1   : > { %v1754_v2 = vcombine.low %v1746_v62, %v1753_v63  ;;  %1761 = sbr.rel (%p2236_p7) target bundleno = 456 (0x1c8), region = 48 }
 0x1a3   : > { %v1756_v3 = vadd.f32 %v1754_v2, %v280_v1 }
 0x1a5   : > { %1757 = vst [vmem:[#allocation2] sm:$0xff] %v1756_v3 }
 0x1a6   : > { %v1763_v5 = vld [vmem:[%s2921_s2] sm:$0xf]  ;;  %v1767_v6 = vsub.s32 0, %v2687_v44  ;;  %v1771_v7 = vsub.s32 1, %v2687_v44  ;;  %v1775_v8 = vsub.s32 2, %v2687_v44  ;;  %v1779_v9 = vsub.s32 3, %v2687_v44 }
 0x1a7   : > { %v1800_v10 = vld [vmem:[%s2922_s3] sm:$0xf] }
 0x1a8   : > { %v1768_v11 = vrot.slane %v1763_v5, %v1767_v6  ;;  %v1772_v12 = vrot.slane %v1763_v5, %v1771_v7  ;;  %v1776_v13 = vrot.slane %v1763_v5, %v1775_v8  ;;  %v1805_v15 = vrot.slane %v1800_v10, %v1767_v6  ;;  %v1837_v29 = vld [vmem:[%s2923_s4] sm:$0xf] }
 0x1a9   : > { %v1780_v16 = vrot.slane %v1763_v5, %v1779_v9  ;;  %v1809_v17 = vrot.slane %v1800_v10, %v1771_v7  ;;  %v1813_v18 = vrot.slane %v1800_v10, %v1775_v8  ;;  %v1817_v20 = vrot.slane %v1800_v10, %v1779_v9 }
 0x1aa   : > { %v1781_v21 = vcombine.low %v1768_v11, %v1772_v12  ;;  %v1886_v33 = vsub.f32 1.0, %v1837_v29  ;;  %v1843_v35 = vrot.slane %v1837_v29, %v1767_v6  ;;  %v1847_v38 = vrot.slane %v1837_v29, %v1771_v7 }
 0x1ab   : > { %v1782_v22 = vcombine.low %v1776_v13, %v1780_v16  ;;  %v1818_v23 = vcombine.low %v1805_v15, %v1809_v17  ;;  %v1819_v25 = vcombine.low %v1813_v18, %v1817_v20  ;;  %v1851_v39 = vrot.slane %v1837_v29, %v1775_v8 }
 0x1ac   : > { %v1789_v26 = vrot.slane %v1781_v21, %v2879_v56  ;;  %v1762_v30 = vld [vmem:[#allocation2] sm:$0xff]  ;;  %v1891_v36 = vrot.slane %v1886_v33, %v1767_v6  ;;  %v1895_v40 = vrot.slane %v1886_v33, %v1771_v7  ;;  %v1899_v41 = vrot.slane %v1886_v33, %v1775_v8 }
 0x1ad   : > { %v1796_v44 = vrot.slane %v1782_v22, %v2879_v56  ;;  %v1826_v27 = vrot.slane %v1818_v23, %v2879_v56  ;;  %v1833_v28 = vrot.slane %v1819_v25, %v2879_v56  ;;  %v1903_v19 = vrot.slane %v1886_v33, %v1779_v9 }
 0x1ae   : > { %v1855_v46 = vrot.slane %v1837_v29, %v1779_v9 }
 0x1af   : > { %v1797_v31 = vcombine.low %v1789_v26, %v1796_v44  ;;  %v1834_v32 = vcombine.low %v1826_v27, %v1833_v28 }
 0x1b1   : > { %v1799_v34 = vmul.f32 %v1797_v31, %v1762_v30 }
 0x1b3   : > { %v1836_v14 = vadd.f32 %v1834_v32, %v1799_v34 }
 0x1b5   : > { %v1838_v37 = vmax.f32 %v1836_v14, 0.0  ;;  %v1909_v4 = vcombine.high %v1836_v14, %v1836_v14  ;;  %v1916_v24 = vrot.slane %v1836_v14, %v2879_v56 }
 0x1b7   : > { %v1861_v42 = vcombine.high %v1838_v37, %v1838_v37  ;;  %v1868_v0 = vrot.slane %v1838_v37, %v2879_v56  ;;  %v1923_v43 = vrot.slane %v1909_v4, %v2879_v56  ;;  %v1924_v45 = vcombine.high %v1916_v24, %v1916_v24 }
 0x1b8   : > { %v1930_v47 = vmul.f32 %v1916_v24, %v1891_v36 }
 0x1b9   : > { %v1875_v48 = vrot.slane %v1861_v42, %v2879_v56  ;;  %v1876_v49 = vcombine.high %v1868_v0, %v1868_v0  ;;  %v1882_v50 = vmul.f32 %v1868_v0, %v1843_v35  ;;  %v1925_v51 = vcombine.high %v1923_v43, %v1923_v43 }
 0x1ba   : > { %v1931_v52 = vmul.f32 %v1924_v45, %v1895_v40  ;;  %v1932_v53 = vmul.f32 %v1923_v43, %v1899_v41 }
 0x1bb   : > { %v1877_v54 = vcombine.high %v1875_v48, %v1875_v48  ;;  %v1883_v55 = vmul.f32 %v1876_v49, %v1847_v38  ;;  %v1884_v57 = vmul.f32 %v1875_v48, %v1851_v39  ;;  %v1933_v58 = vmul.f32 %v1925_v51, %v1903_v19 }
 0x1bc   : > { %v1934_v59 = vadd.f32 %v1930_v47, %v1882_v50 }
 0x1bd   : > { %v1885_v60 = vmul.f32 %v1877_v54, %v1855_v46  ;;  %v1935_v61 = vadd.f32 %v1931_v52, %v1883_v55  ;;  %v1936_v62 = vadd.f32 %v1932_v53, %v1884_v57 }
 0x1bf   : > { %v1937_v63 = vadd.f32 %v1933_v58, %v1885_v60  ;;  %v1942_v1 = vcombine.low %v1934_v59, %v1935_v61 }
 0x1c1   : > { %v1943_v2 = vcombine.low %v1936_v62, %v1937_v63  ;;  %v1950_v3 = vrot.slane %v1942_v1, %v2879_v56 }
 0x1c3   : > { %v1957_v5 = vrot.slane %v1943_v2, %v2879_v56 }
 0x1c5   : > { %v1958_v6 = vcombine.low %v1950_v3, %v1957_v5 }
 0x1c7   : > { %1960 = vst [vmem:[%s2924_s5] sm:$0xff] %v1958_v6 }
 0x1c8 PF: > { %s15_s20 = sadd.s32 1, %s2579_s20   ;;  %s2925_s18 = smov %s2575_s19 }
 0x1c9   : > { %p12_p8 = scmp.ge.s32.totalorder %s15_s20, 5   ;;  %s2926_s19 = smov %s2928_s21 }
 0x1cb   :  { %14 = sbr.rel (!%p12_p8) target bundleno = 2 (0x2), region = 81 }

// kernel: inception_forward.25
= control target key start
LH: loop header
LB: loop body
LE: loop exit
PB: predicated region body
PF: predicated region fallthrough
CT: control target
= control target key end

     0   :  { %v34_v36 = vlaneseq  ;;  %vm163_vm0 = vcmask 1041409   ;;  %s1370_s0 = inlined_call_operand.vmem [shape: f32[2,1,512], index: 0, kind: input, shape index: {}]   ;;  %s1371_s1 = inlined_call_operand.vmem [shape: bf16[512,256], index: 1, kind: input, shape index: {}]   ;;  %s1372_s2 = inlined_call_operand.vmem [shape: f32[1,256], index: 2, kind: input, shape index: {}]   ;;  %s1373_s3 = inlined_call_operand.vmem [shape: f32[1,256], index: 3, kind: input, shape index: {}]   ;;  %s1374_s4 = inlined_call_operand.vmem [shape: bf16[256,128], index: 4, kind: input, shape index: {}]   ;;  %s1375_s5 = inlined_call_operand.vmem [shape: f32[1,128], index: 5, kind: input, shape index: {}]   ;;  %s1376_s6 = inlined_call_operand.vmem [shape: f32[1,128], index: 6, kind: input, shape index: {}]   ;;  %s1377_s7 = inlined_call_operand.hbm [shape: f32[2,128], index: 7, kind: output, shape index: {}]  }
   0x1   :  { %v918_v0 = vld [vmem:[%s1371_s1 + $0x74] ss:$8 sps:$4 sm:$0xff]   ;;  %v922_v2 = vld [vmem:[%s1371_s1 + $0x70] ss:$8 sps:$4 sm:$0xff]   ;;  %v924_v4 = vld [vmem:[%s1371_s1 + $0x64] ss:$8 sps:$4 sm:$0xff]  }
   0x2   :  { %v920_v1 = vld [vmem:[%s1371_s1 + $0x174] ss:$8 sps:$4 sm:$0xff]   ;;  %499 = vmatprep.subr.bf16.mxu0 %v918_v0  ;;  %v923_v3 = vld [vmem:[%s1371_s1 + $0x170] ss:$8 sps:$4 sm:$0xff]   ;;  %v926_v5 = vld [vmem:[%s1371_s1 + $0x164] ss:$8 sps:$4 sm:$0xff]  }
   0x3   :  { %540 = vmatprep.subr.bf16.mxu1 %v920_v1  ;;  %500 = vmatpush1.bf16.msra.mxu0 %v922_v2  ;;  %v928_v6 = vld [vmem:[%s1371_s1 + $0x60] ss:$8 sps:$4 sm:$0xff]   ;;  %v930_v8 = vld [vmem:[%s1371_s1 + $0x54] ss:$8 sps:$4 sm:$0xff]   ;;  %v934_v10 = vld [vmem:[%s1371_s1 + $0x50] ss:$8 sps:$4 sm:$0xff]  }
   0x4   :  { %541 = vmatpush1.bf16.msra.mxu1 %v923_v3  ;;  %501 = vmatprep.subr.bf16.mxu0 %v924_v4  ;;  %v929_v7 = vld [vmem:[%s1371_s1 + $0x160] ss:$8 sps:$4 sm:$0xff]   ;;  %v932_v9 = vld [vmem:[%s1371_s1 + $0x154] ss:$8 sps:$4 sm:$0xff]   ;;  %v935_v11 = vld [vmem:[%s1371_s1 + $0x150] ss:$8 sps:$4 sm:$0xff]  }
   0x5   :  { %542 = vmatprep.subr.bf16.mxu1 %v926_v5  ;;  %v936_v12 = vld [vmem:[%s1371_s1 + $0x44] ss:$8 sps:$4 sm:$0xff]   ;;  %v940_v14 = vld [vmem:[%s1371_s1 + $0x40] ss:$8 sps:$4 sm:$0xff]   ;;  %v942_v16 = vld [vmem:[%s1371_s1 + $0x34] ss:$8 sps:$4 sm:$0xff]  }
   0x6   :  { %v938_v13 = vld [vmem:[%s1371_s1 + $0x144] ss:$8 sps:$4 sm:$0xff]   ;;  %v941_v15 = vld [vmem:[%s1371_s1 + $0x140] ss:$8 sps:$4 sm:$0xff]   ;;  %v944_v17 = vld [vmem:[%s1371_s1 + $0x134] ss:$8 sps:$4 sm:$0xff]  }
   0x7   :  { %502 = vmatpush1.bf16.msra.mxu0 %v928_v6  ;;  %v946_v18 = vld [vmem:[%s1371_s1 + $0x30] ss:$8 sps:$4 sm:$0xff]   ;;  %v948_v20 = vld [vmem:[%s1371_s1 + $0x24] ss:$8 sps:$4 sm:$0xff]   ;;  %v952_v22 = vld [vmem:[%s1371_s1 + $0x20] ss:$8 sps:$4 sm:$0xff]  }
   0x8   :  { %543 = vmatpush1.bf16.msra.mxu1 %v929_v7  ;;  %503 = vmatprep.subr.bf16.mxu0 %v930_v8  ;;  %v947_v19 = vld [vmem:[%s1371_s1 + $0x130] ss:$8 sps:$4 sm:$0xff]   ;;  %v950_v21 = vld [vmem:[%s1371_s1 + $0x124] ss:$8 sps:$4 sm:$0xff]   ;;  %v953_v23 = vld [vmem:[%s1371_s1 + $0x120] ss:$8 sps:$4 sm:$0xff]  }
   0x9   :  { %544 = vmatprep.subr.bf16.mxu1 %v932_v9  ;;  %v954_v24 = vld [vmem:[%s1371_s1 + $0x14] ss:$8 sps:$4 sm:$0xff]   ;;  %v958_v26 = vld [vmem:[%s1371_s1 + $0x10] ss:$8 sps:$4 sm:$0xff]   ;;  %v960_v28 = vld [vmem:[%s1371_s1 + $0x4] ss:$8 sps:$4 sm:$0xff]  }
   0xa   :  { %v956_v25 = vld [vmem:[%s1371_s1 + $0x114] ss:$8 sps:$4 sm:$0xff]   ;;  %v959_v27 = vld [vmem:[%s1371_s1 + $0x110] ss:$8 sps:$4 sm:$0xff]   ;;  %v962_v29 = vld [vmem:[%s1371_s1 + $0x104] ss:$8 sps:$4 sm:$0xff]  }
   0xb   :  { %504 = vmatpush1.bf16.msra.mxu0 %v934_v10  ;;  %v964_v30 = vld [vmem:[%s1371_s1] ss:$8 sps:$4 sm:$0xff]   ;;  %v966_v32 = vld [vmem:[%s1371_s1 + $0xf4] ss:$8 sps:$4 sm:$0xff]   ;;  %v970_v34 = vld [vmem:[%s1371_s1 + $0xf0] ss:$8 sps:$4 sm:$0xff]  }
   0xc   :  { %545 = vmatpush1.bf16.msra.mxu1 %v935_v11  ;;  %505 = vmatprep.subr.bf16.mxu0 %v936_v12  ;;  %v965_v31 = vld [vmem:[%s1371_s1 + $0x100] ss:$8 sps:$4 sm:$0xff]   ;;  %v968_v33 = vld [vmem:[%s1371_s1 + $0x1f4] ss:$8 sps:$4 sm:$0xff]   ;;  %v971_v35 = vld [vmem:[%s1371_s1 + $0x1f0] ss:$8 sps:$4 sm:$0xff]  }
   0xd   :  { %546 = vmatprep.subr.bf16.mxu1 %v938_v13  ;;  %v972_v37 = vld [vmem:[%s1371_s1 + $0xe4] ss:$8 sps:$4 sm:$0xff]   ;;  %v976_v39 = vld [vmem:[%s1371_s1 + $0xe0] ss:$8 sps:$4 sm:$0xff]   ;;  %v35_v40 = vshrl.u32 %v34_v36, 7 }
   0xe   :  { %v974_v38 = vld [vmem:[%s1371_s1 + $0x1e4] ss:$8 sps:$4 sm:$0xff]   ;;  %v977_v41 = vld [vmem:[%s1371_s1 + $0x1e0] ss:$8 sps:$4 sm:$0xff]   ;;  %v978_v42 = vld [vmem:[%s1371_s1 + $0xd4] ss:$8 sps:$4 sm:$0xff]  }
   0xf   :  { %506 = vmatpush1.bf16.msra.mxu0 %v940_v14  ;;  %v980_v43 = vld [vmem:[%s1371_s1 + $0x1d4] ss:$8 sps:$4 sm:$0xff]   ;;  %v982_v44 = vld [vmem:[%s1371_s1 + $0xd0] ss:$8 sps:$4 sm:$0xff]   ;;  %v1225_v46 = vsub.s32 1, %v35_v40  ;;  %v48_v48 = vsub.s32 3, %v35_v40 }
  0x10   :  { %547 = vmatpush1.bf16.msra.mxu1 %v941_v15  ;;  %507 = vmatprep.subr.bf16.mxu0 %v942_v16  ;;  %v983_v45 = vld [vmem:[%s1371_s1 + $0x1d0] ss:$8 sps:$4 sm:$0xff]   ;;  %v984_v47 = vld [vmem:[%s1371_s1 + $0xc4] ss:$8 sps:$4 sm:$0xff]   ;;  %v1230_v49 = vsub.s32 0, %v35_v40  ;;  %v44_v51 = vsub.s32 2, %v35_v40 }
  0x11   :  { %548 = vmatprep.subr.bf16.mxu1 %v944_v17  ;;  %v986_v50 = vld [vmem:[%s1371_s1 + $0x1c4] ss:$8 sps:$4 sm:$0xff]   ;;  %v988_v52 = vld [vmem:[%s1371_s1 + $0xc0] ss:$8 sps:$4 sm:$0xff]   ;;  %v990_v58 = vld [vmem:[%s1371_s1 + $0xb4] ss:$8 sps:$4 sm:$0xff]  }
  0x12   :  { %v989_v53 = vld [vmem:[%s1371_s1 + $0x1c0] ss:$8 sps:$4 sm:$0xff]   ;;  %v29_v55 = vld [vmem:[%s1370_s0 + $0x4] sm:$0xf]  ;;  %v992_v62 = vld [vmem:[%s1371_s1 + $0x1b4] ss:$8 sps:$4 sm:$0xff]  }
  0x13   :  { %508 = vmatpush1.bf16.msra.mxu0 %v946_v18  ;;  %v28_v54 = vld [vmem:[%s1370_s0] sm:$0xf]  ;;  %v57_v59 = vrot.slane %v29_v55, %v1225_v46  ;;  %v65_v60 = vrot.slane %v29_v55, %v48_v48  ;;  %v53_v61 = vrot.slane %v29_v55, %v1230_v49  ;;  %v994_v1 = vld [vmem:[%s1371_s1 + $0xb0] ss:$8 sps:$4 sm:$0xff]   ;;  %v61_v5 = vrot.slane %v29_v55, %v44_v51  ;;  %v996_v10 = vld [vmem:[%s1371_s1 + $0xa4] ss:$8 sps:$4 sm:$0xff]  }
  0x14   :  { %549 = vmatpush1.bf16.msra.mxu1 %v947_v19  ;;  %509 = vmatprep.subr.bf16.mxu0 %v948_v20  ;;  %v41_v56 = vrot.slane %v28_v54, %v1225_v46  ;;  %v49_v57 = vrot.slane %v28_v54, %v48_v48  ;;  %v995_v6 = vld [vmem:[%s1371_s1 + $0x1b0] ss:$8 sps:$4 sm:$0xff]   ;;  %v37_v8 = vrot.slane %v28_v54, %v1230_v49  ;;  %v998_v15 = vld [vmem:[%s1371_s1 + $0x1a4] ss:$8 sps:$4 sm:$0xff]   ;;  %v1000_v17 = vld [vmem:[%s1371_s1 + $0xa0] ss:$8 sps:$4 sm:$0xff]  }
  0x15   :  { %550 = vmatprep.subr.bf16.mxu1 %v950_v21  ;;  %v79_v2 = vpack.c.bf16 %v57_v59, %v57_v59  ;;  %v81_v3 = vpack.c.bf16 %v65_v60, %v65_v60  ;;  %v78_v4 = vpack.c.bf16 %v53_v61, %v53_v61  ;;  %v45_v9 = vrot.slane %v28_v54, %v44_v51  ;;  %v1001_v18 = vld [vmem:[%s1371_s1 + $0x1a0] ss:$8 sps:$4 sm:$0xff]  }
  0x16   :  { %v75_v63 = vpack.c.bf16 %v41_v56, %v41_v56  ;;  %v77_v0 = vpack.c.bf16 %v49_v57, %v49_v57  ;;  %v80_v14 = vpack.c.bf16 %v61_v5, %v61_v5 }
  0x17   :  { %510 = vmatpush1.bf16.msra.mxu0 %v952_v22  ;;  %v159_v11 = vunpack.c.l.b16 %v79_v2  ;;  %v161_v13 = vunpack.c.l.b16 %v81_v3  ;;  %v158_v16 = vunpack.c.l.b16 %v78_v4  ;;  %v1002_v22 = vld [vmem:[%s1371_s1 + $0x94] ss:$8 sps:$4 sm:$0xff]  }
  0x18   :  { %551 = vmatpush1.bf16.msra.mxu1 %v953_v23  ;;  %511 = vmatprep.subr.bf16.mxu0 %v954_v24  ;;  %v155_v7 = vunpack.c.l.b16 %v75_v63  ;;  %v157_v12 = vunpack.c.l.b16 %v77_v0  ;;  %v160_v21 = vunpack.c.l.b16 %v80_v14  ;;  %v74_v23 = vpack.c.bf16 %v37_v8, %v37_v8  ;;  %v1004_v24 = vld [vmem:[%s1371_s1 + $0x194] ss:$8 sps:$4 sm:$0xff]  }
  0x19   :  { %552 = vmatprep.subr.bf16.mxu1 %v956_v25  ;;  %v165_v19 = vrot.slane %v159_v11, 7  ;;  %v169_v20 = vrot.slane %v161_v13, 7 }
  0x1a   :  { %v154_v36 = vunpack.c.l.b16 %v74_v23 }
  0x1b   :  { %512 = vmatpush1.bf16.msra.mxu0 %v958_v26  ;;  %v166_v25 = vsel %vm163_vm0, %v165_v19, %v155_v7  ;;  %v170_v26 = vsel %vm163_vm0, %v169_v20, %v157_v12 }
  0x1c   :  { %553 = vmatpush1.bf16.msra.mxu1 %v959_v27  ;;  %513 = vmatprep.subr.bf16.mxu0 %v960_v28  ;;  %v76_v27 = vpack.c.bf16 %v45_v9, %v45_v9  ;;  %v172_v28 = vpack.c.b16 %v166_v25, %v166_v25 }
  0x1d   :  { %554 = vmatprep.subr.bf16.mxu1 %v962_v29  ;;  %v174_v29 = vpack.c.b16 %v170_v26, %v170_v26 }
  0x1e   :  { %531 = vmatprep.mubr.bf16.mxu0 %v172_v28 }
  0x1f   :  { %514 = vmatpush1.bf16.msra.mxu0 %v964_v30  ;;  %v162_v30 = vrot.slane %v158_v16, 7  ;;  %572 = vmatprep.mubr.bf16.mxu1 %v174_v29 }
  0x20   :  { %555 = vmatpush1.bf16.msra.mxu1 %v965_v31  ;;  %515 = vmatprep.subr.bf16.mxu0 %v966_v32  ;;  %v167_v31 = vrot.slane %v160_v21, 7  ;;  %v1006_v32 = vld [vmem:[%s1371_s1 + $0x90] ss:$8 sps:$4 sm:$0xff]  }
  0x21   :  { %556 = vmatprep.subr.bf16.mxu1 %v968_v33  ;;  %v1007_v33 = vld [vmem:[%s1371_s1 + $0x190] ss:$8 sps:$4 sm:$0xff]  }
  0x23   :  { %516 = vmatpush2.bf16.msra.mxu0 %v970_v34  ;;  %v1008_v34 = vld [vmem:[%s1371_s1 + $0x84] ss:$8 sps:$4 sm:$0xff]  }
  0x24   :  { %557 = vmatpush2.bf16.msra.mxu1 %v971_v35  ;;  %517 = vmatprep.subr.bf16.mxu0 %v972_v37  ;;  %v1010_v35 = vld [vmem:[%s1371_s1 + $0x184] ss:$8 sps:$4 sm:$0xff]   ;;  %v156_v37 = vunpack.c.l.b16 %v76_v27 }
  0x25   :  { %558 = vmatprep.subr.bf16.mxu1 %v974_v38 }
  0x27   :  { %518 = vmatpush2.bf16.msra.mxu0 %v976_v39 }
  0x28   :  { %559 = vmatpush2.bf16.msra.mxu1 %v977_v41  ;;  %519 = vmatprep.subr.bf16.mxu0 %v978_v42 }
  0x29   :  { %560 = vmatprep.subr.bf16.mxu1 %v980_v43 }
  0x2b   :  { %520 = vmatpush2.bf16.msra.mxu0 %v982_v44 }
  0x2c   :  { %561 = vmatpush2.bf16.msra.mxu1 %v983_v45  ;;  %521 = vmatprep.subr.bf16.mxu0 %v984_v47 }
  0x2d   :  { %562 = vmatprep.subr.bf16.mxu1 %v986_v50 }
  0x2f   :  { %522 = vmatpush2.bf16.msra.mxu0 %v988_v52 }
  0x30   :  { %563 = vmatpush2.bf16.msra.mxu1 %v989_v53  ;;  %523 = vmatprep.subr.bf16.mxu0 %v990_v58 }
  0x31   :  { %564 = vmatprep.subr.bf16.mxu1 %v992_v62 }
  0x33   :  { %524 = vmatpush2.bf16.msra.mxu0 %v994_v1 }
  0x34   :  { %565 = vmatpush2.bf16.msra.mxu1 %v995_v6  ;;  %525 = vmatprep.subr.bf16.mxu0 %v996_v10 }
  0x35   :  { %566 = vmatprep.subr.bf16.mxu1 %v998_v15 }
  0x37   :  { %526 = vmatpush2.bf16.msra.mxu0 %v1000_v17 }
  0x38   :  { %567 = vmatpush2.bf16.msra.mxu1 %v1001_v18  ;;  %527 = vmatprep.subr.bf16.mxu0 %v1002_v22 }
  0x39   :  { %568 = vmatprep.subr.bf16.mxu1 %v1004_v24 }
  0x3a   :  { %12 = vsyncpa [#allocation3], 0  ;;  %v1012_v38 = vld [vmem:[%s1371_s1 + $0x80] ss:$8 sps:$4 sm:$0xff]   ;;  %v164_v40 = vsel %vm163_vm0, %v162_v30, %v154_v36  ;;  %v168_v41 = vsel %vm163_vm0, %v167_v31, %v156_v37  ;;  %v1014_v42 = vld [vmem:[%s1374_s4 + $0x78] sm:$0xff]   ;;  %s1052_s27 = smov [#allocation2]  }
  0x3b   :  { %528 = vmatpush2.bf16.msra.mxu0 %v1006_v32  ;;  %v1013_v39 = vld [vmem:[%s1371_s1 + $0x180] ss:$8 sps:$4 sm:$0xff]   ;;  %v171_v43 = vpack.c.b16 %v164_v40, %v164_v40  ;;  %v173_v44 = vpack.c.b16 %v168_v41, %v168_v41  ;;  %v1015_v45 = vld [vmem:[%s1374_s4 + $0x38] sm:$0xff]   ;;  %v1016_v47 = vld [vmem:[%s1374_s4 + $0x70] sm:$0xff]   ;;  %s805_s28 = sshll.u32 %s1052_s27, 4  ;;  %s806_s28 = int_to_ptr.vmem [resolvable:$true] %s805_s28 }
  0x3c   :  { %569 = vmatpush2.bf16.msra.mxu1 %v1007_v33  ;;  %529 = vmatprep.subr.bf16.mxu0 %v1008_v34  ;;  %v1017_v48 = vld [vmem:[%s1374_s4 + $0x30] sm:$0xff]   ;;  %v1018_v50 = vld [vmem:[%s1374_s4 + $0x68] sm:$0xff]   ;;  %v1020_v52 = vld [vmem:[%s1374_s4 + $0x60] sm:$0xff]   ;;  %s1030_s29 = scalar_lea.vmem %s806_s28, 32  ;;  %p1035_p1 = scmp.lt.s32.totalorder %s806_s28, %s806_s28 }
  0x3d   :  { %570 = vmatprep.subr.bf16.mxu1 %v1010_v35  ;;  %v1019_v51 = vld [vmem:[%s1374_s4 + $0x28] sm:$0xff]   ;;  %v1021_v53 = vld [vmem:[%s1374_s4 + $0x20] sm:$0xff]   ;;  %v1022_v54 = vld [vmem:[%s1374_s4 + $0x58] sm:$0xff]   ;;  %p1031_p0 = scmp.ne.s32.totalorder %s806_s28, %s1030_s29  ;;  %p1036_p2 = scmp.lt.s32.totalorder %s1030_s29, %s1030_s29 }
  0x3e   :  { %v1023_v55 = vld [vmem:[%s1374_s4 + $0x18] sm:$0xff]   ;;  %v1024_v56 = vld [vmem:[%s1374_s4 + $0x50] sm:$0xff]   ;;  %v1026_v58 = vld [vmem:[%s1374_s4 + $0x48] sm:$0xff]  }
  0x3f   :  { %530 = vmatpush2.bf16.msra.mxu0 %v1012_v38  ;;  %v1025_v57 = vld [vmem:[%s1374_s4 + $0x10] sm:$0xff]   ;;  %v1027_v59 = vld [vmem:[%s1374_s4 + $0x8] sm:$0xff]   ;;  %v1028_v60 = vld [vmem:[%s1374_s4 + $0x40] sm:$0xff]   ;;  %p1037_p3 = por %p1036_p2, %p1035_p1 }
  0x40   :  { %571 = vmatpush2.bf16.msra.mxu1 %v1013_v39  ;;  %895 = vmatprep.subr.bf16.mxu0 %v1014_v42  ;;  %v1029_v61 = vld [vmem:[%s1374_s4] sm:$0xff]  }
  0x41   :  { %v581_v62 = vld [vmem:[%s1372_s2] sm:$0x3]  ;;  %p1038_p4 = pnand %p1037_p3, %p1031_p0 }
  0x42   :  { %532 = vmatmul.mubr.bf16.vlgmr.msra.gmra.mxu0 %v171_v43  ;;  %v595_v63 = vld [vmem:[%s1373_s3] sm:$0x3]  ;;  %v586_v0 = vrot.slane %v581_v62, %v1230_v49  ;;  %v590_v5 = vrot.slane %v581_v62, %v1225_v46 }
  0x43   :  { %573 = vmatmul.mubr.bf16.vlgmr.msra.gmra.mxu1 %v173_v44  ;;  %896 = vmatpush3.bf16.msra.mxu0 %v1015_v45  ;;  %v600_v4 = vrot.slane %v595_v63, %v1230_v49  ;;  %v604_v10 = vrot.slane %v595_v63, %v1225_v46  ;;  %v893_v23 = vld [vmem:[%s1375_s5] ss:$0 sm:$0xff] }
  0x44   :  { %897 = vmatprep.subr.bf16.mxu0 %v1016_v47  ;;  %v894_v25 = vld [vmem:[%s1376_s6] ss:$0 sm:$0xff] }
  0x47   :  { %898 = vmatpush3.bf16.msra.mxu0 %v1017_v48 }
  0x48   :  { %899 = vmatprep.subr.bf16.mxu0 %v1018_v50 }
  0x4b   :  { %900 = vmatpush3.bf16.msra.mxu0 %v1019_v51 }
  0x4c   :  { %901 = vmatprep.subr.bf16.mxu0 %v1020_v52 }
  0x4f   :  { %902 = vmatpush3.bf16.msra.mxu0 %v1021_v53 }
  0x50   :  { %903 = vmatprep.subr.bf16.mxu0 %v1022_v54 }
  0x53   :  { %904 = vmatpush3.bf16.msra.mxu0 %v1023_v55 }
  0x54   :  { %905 = vmatprep.subr.bf16.mxu0 %v1024_v56 }
  0x57   :  { %906 = vmatpush3.bf16.msra.mxu0 %v1025_v57 }
  0x58   :  { %907 = vmatprep.subr.bf16.mxu0 %v1026_v58 }
  0x5b   :  { %908 = vmatpush3.bf16.msra.mxu0 %v1027_v59 }
  0x5c   :  { %909 = vmatprep.subr.bf16.mxu0 %v1028_v60 }
  0x5f   :  { %910 = vmatpush3.bf16.msra.mxu0 %v1029_v61 }
 0x102   :  { %v533_v1 = vpop.f32.mrf.mxu0 }
 0x103   :  { %v574_v2 = vpop.f32.mrf.mxu1 }
 0x104   :  { %v575_v3 = vadd.f32 %v574_v2, %v533_v1  ;;  %v535_v6 = vpop.f32.mrf.mxu0 }
 0x105   :  { %v576_v7 = vpop.f32.mrf.mxu1 }
 0x106   :  { %v593_v8 = vmul.f32 %v586_v0, %v575_v3  ;;  %v577_v9 = vadd.f32 %v576_v7, %v535_v6  ;;  %v537_v11 = vpop.f32.mrf.mxu0 }
 0x107   :  { %v578_v12 = vpop.f32.mrf.mxu1 }
 0x108   :  { %v607_v13 = vadd.f32 %v600_v4, %v593_v8  ;;  %v594_v14 = vmul.f32 %v590_v5, %v577_v9  ;;  %v538_v15 = vpop.f32.mrf.mxu0 }
 0x109   :  { %v579_v16 = vpop.f32.mrf.mxu1 }
 0x10a   :  { %v608_v17 = vadd.f32 %v604_v10, %v594_v14  ;;  %v609_v18 = vmax.f32 %v607_v13, 0.0 }
 0x10c   :  { %v610_v19 = vmax.f32 %v608_v17, 0.0  ;;  %v611_v21 = vpack.c.bf16 %v609_v18, %v609_v18 }
 0x10e   :  { %v612_v20 = vpack.c.bf16 %v610_v19, %v610_v19 }
 0x110   :  { %773 = vmatprep.mubr.bf16.mxu0 %v612_v20 }
 0x111   :  { %774 = vmatmul.mubr.bf16.vlgmr.msra.gmra.mxu0 %v611_v21 }
 0x1d1   :  { %v911_v49 = vpop.f32.mrf.mxu0 }
 0x1d3   :  { %v912_v22 = vpop.f32.mrf.mxu0 }
 0x1d4   :  { %v913_v46 = vadd.f32 %v912_v22, %v911_v49 }
 0x1d5   :  { %v914_v24 = vpop.f32.mrf.mxu0 }
 0x1d6   :  { %v788_v26 = vmul.f32 %v913_v46, %v893_v23 }
 0x1d7   :  { %v915_v27 = vpop.f32.mrf.mxu0 }
 0x1d8   :  { %v796_v28 = vadd.f32 %v894_v25, %v788_v26 }
 0x1da   :  { %v797_v29 = vmax.f32 %v796_v28, 0.0 }
 0x1dc   :  { %798 = vst [vmem:[#allocation2] sm:$0x3] %v797_v29 }
 0x1dd   :  { %1041 = shalt.err (!%p1038_p4)
}
 0x1de   :  { %808 = dma.vmem_to_hbm [thread:$0]  %s806_s28, 32, %s1377_s7, [#allocation3]  }
 0x1df   :  { %1050 = dma.done.wait [#allocation3], 32  }
 0x1e0   :  { %1051 = vsyncadd [#allocation3], 4294967264 }
 0x1e1   :  { %812 = vsyncpa [#allocation3], 1 }

</bundles_post_ra>
